<compile_context>
chip_gen: v6e
topology: v6e:2x2x1
jax: 0.10.0
libtpu: 0.0.40
codegen_flags: <defaults>
</compile_context>

<pallas_src>
import functools
import math

import jax
import jax.numpy as jnp
from jax.experimental import pallas as pl
from jax.experimental.pallas import tpu as pltpu


# ----------------------------- in-kernel helpers ----------------------------

def _erf_approx(x):
    # Abramowitz & Stegun 7.1.26 (max abs error ~1.5e-7) -- exp/mul only, lowers on Mosaic.
    a1, a2, a3, a4, a5 = 0.254829592, -0.284496736, 1.421413741, -1.453152027, 1.061405429
    pc = 0.3275911
    sgn = jnp.where(x >= 0.0, 1.0, -1.0)
    z = jnp.abs(x)
    t = 1.0 / (1.0 + pc * z)
    poly = ((((a5 * t + a4) * t + a3) * t + a2) * t + a1) * t
    return sgn * (1.0 - poly * jnp.exp(-z * z))


def _gelu_exact(x):
    # matches torch.nn.functional.gelu (erf form) to ~1e-7
    return 0.5 * x * (1.0 + _erf_approx(x * 0.7071067811865476))


# ------------------------- fused RoFormer stack kernel ----------------------

def _roformer_stack_kernel(*refs, n_layers, n_heads, masked, has_proj, out_mode, eps):
    """One grid step = one batch block through the WHOLE RoFormer stack (+ optional fc)."""
    idx = 0
    if masked:
        len_ref = refs[0]                       # (B,) int32 in SMEM (scalar prefetch)
        idx = 1
    x_ref, tt_ref, eg_ref, eb_ref = refs[idx:idx + 4]
    idx += 4
    if has_proj:
        pw_ref, pb_ref = refs[idx:idx + 2]
        idx += 2
    (qkv_w, qkv_b, ao_w, ao_b, aln_g, aln_b,
     i_w, i_b, o_w, o_b, oln_g, oln_b,
     rot_ref, sin_ref, cos_ref) = refs[idx:idx + 15]
    idx += 15
    if out_mode == "logits":
        fc_w_ref, fc_b_ref = refs[idx:idx + 2]
        idx += 2
    o_ref = refs[idx]

    f32 = jnp.float32
    Bb, S, E = x_ref.shape
    H = qkv_w.shape[1]
    dh = H // n_heads
    scale = 1.0 / math.sqrt(dh)

    def ln(x, g, b):
        mu = jnp.mean(x, axis=-1, keepdims=True)
        xc = x - mu
        var = jnp.mean(xc * xc, axis=-1, keepdims=True)
        return xc * jax.lax.rsqrt(var + eps) * g + b

    # ---- embeddings: inputs_embeds + token_type_emb[0], LayerNorm, optional projection ----
    h = x_ref[...].reshape(Bb * S, E) + tt_ref[...]
    h = ln(h, eg_ref[...], eb_ref[...])
    if has_proj:
        h = jnp.dot(h, pw_ref[...], preferred_element_type=f32) + pb_ref[...]

    sin = sin_ref[...][None]                    # (1, S, H) -- per-head tiled sinusoids
    cos = cos_ref[...][None]
    R = rot_ref[...]                            # (H, H)  rotate_half as a matmul

    # ---- key-length mask (additive bias), built once per grid step from SMEM scalars ----
    if masked:
        base = pl.program_id(0) * Bb
        rows = []
        for j in range(Bb):
            lj = len_ref[base + j]
            colj = jax.lax.broadcasted_iota(jnp.int32, (1, 1, S), 2)
            rows.append(jnp.where(colj < lj, 0.0, -1e30).astype(f32))
        bias = rows[0] if Bb == 1 else jnp.concatenate(rows, axis=0)     # (Bb, 1, S)

    # ---- transformer layers (unrolled; weights already resident in VMEM) ----
    for l in range(n_layers):
        qkv = jnp.dot(h, qkv_w[l], preferred_element_type=f32) + qkv_b[l]    # (Bb*S, 3H)
        q = qkv[:, 0:H]
        k = qkv[:, H:2 * H]
        v = qkv[:, 2 * H:3 * H]

        # interleaved RoPE: x*cos + rotate_half(x)*sin  (rotate_half == x @ R, one MXU op)
        q_rot = jnp.dot(q, R, preferred_element_type=f32)
        k_rot = jnp.dot(k, R, preferred_element_type=f32)
        q3 = q.reshape(Bb, S, H) * cos + q_rot.reshape(Bb, S, H) * sin
        k3 = k.reshape(Bb, S, H) * cos + k_rot.reshape(Bb, S, H) * sin
        v3 = v.reshape(Bb, S, H)

        ctx_heads = []
        for hh in range(n_heads):
            lo = hh * dh
            qh = q3[:, :, lo:lo + dh]
            kh = k3[:, :, lo:lo + dh]
            vh = v3[:, :, lo:lo + dh]
            s = jnp.einsum("bqd,bkd->bqk", qh, kh, preferred_element_type=f32) * scale
            if masked:
                s = s + bias
            m = jnp.max(s, axis=-1, keepdims=True)
            p = jnp.exp(s - m)
            p = p / jnp.sum(p, axis=-1, keepdims=True)          # exact division (parity)
            ctx_heads.append(jnp.einsum("bqk,bkd->bqd", p, vh, preferred_element_type=f32))
        ctx = jnp.concatenate(ctx_heads, axis=-1).reshape(Bb * S, H)

        attn_out = jnp.dot(ctx, ao_w[l], preferred_element_type=f32) + ao_b[l]
        h = ln(attn_out + h, aln_g[l], aln_b[l])

        inter = _gelu_exact(jnp.dot(h, i_w[l], preferred_element_type=f32) + i_b[l])
        ffn = jnp.dot(inter, o_w[l], preferred_element_type=f32) + o_b[l]
        h = ln(ffn + h, oln_g[l], oln_b[l])

    # ---- output ----
    if out_mode == "logits":
        logits = jnp.dot(h, fc_w_ref[...], preferred_element_type=f32) + fc_b_ref[...]
        o_ref[...] = logits.reshape(Bb, S, -1).astype(o_ref.dtype)       # lane-dense (128)
    elif out_mode == "cls":
        o_ref[...] = h.reshape(Bb, S, H)[:, 0:1, :].astype(o_ref.dtype)  # CLS row only
    else:
        o_ref[...] = h.reshape(Bb, S, H).astype(o_ref.dtype)


# ------------------------------ wrapper / glue ------------------------------

def rotary_tables(seq_len, head_dim, n_heads):
    """HF RoFormerSinusoidalPositionalEmbedding: angle = pos / 10000**(2*(j//2)/head_dim),
    interleaved [s0,s0,s1,s1,...]; tiled per head so it applies on the full (S,H) slab."""
    half = head_dim // 2
    inv = jnp.exp(-jnp.arange(half, dtype=jnp.float32) * (math.log(10000.0) / max(half, 1)))
    ang = jnp.arange(seq_len, dtype=jnp.float32)[:, None] * inv[None, :]     # (S, half)
    sin, cos = jnp.sin(ang), jnp.cos(ang)
    sin_pos = jnp.stack([sin, sin], axis=-1).reshape(seq_len, head_dim)
    cos_pos = jnp.stack([cos, cos], axis=-1).reshape(seq_len, head_dim)
    return jnp.tile(sin_pos, (1, n_heads)), jnp.tile(cos_pos, (1, n_heads))


def rotate_half_matrix(H):
    """R so that (x @ R)[2i] = -x[2i+1], (x @ R)[2i+1] = x[2i] (HF rotate_half)."""
    d = jnp.arange(H)[:, None]
    e = jnp.arange(H)[None, :]
    return jnp.where((e == d + 1) & (d % 2 == 0), 1.0,
                     jnp.where((e == d - 1) & (d % 2 == 1), -1.0, 0.0)).astype(jnp.float32)


def _pick_block_b(B, max_b=8):
    """Largest divisor of B <= max_b that still gives a >=2-step grid (v7x megacore)."""
    divs = [d for d in range(1, B + 1) if B % d == 0 and d <= max_b]
    multi = [d for d in divs if B // d >= 2]
    return max(multi) if multi else max(divs)


def roformer_stack(x, lengths, params, n_heads, *, masked, out_mode,
                   fc_w=None, fc_b=None, eps=1e-12):
    """Fused RoFormerModel forward (one pallas_call).
    x:(B,S,E) f32 with CLS already prepended; lengths:(B,) int32 (valid keys incl. CLS) if
    masked; out_mode: 'cls' -> (B,1,H), 'logits' -> (B,S,fc_w.shape[1]), 'hidden' -> (B,S,H)."""
    B, S, E = x.shape
    L, H = params['qkv_w'].shape[0], params['qkv_w'].shape[1]
    has_proj = 'proj_w' in params
    assert E == (params['proj_w'].shape[0] if has_proj else H)

    block_b = _pick_block_b(B)
    grid = (B // block_b,)

    dh = H // n_heads
    sin_full, cos_full = rotary_tables(S, dh, n_heads)          # (S, H)
    R = rotate_half_matrix(H)                                   # (H, H)

    def im3(i, *_):  # batch-blocked 3-D operand / output
        return (i, 0, 0)

    def c2(i, *_):   # constant-resident 2-D operand
        return (0, 0)

    def c3(i, *_):   # constant-resident 3-D operand (stacked per-layer weights)
        return (0, 0, 0)

    in_specs = [pl.BlockSpec((block_b, S, E), im3),
                pl.BlockSpec((1, E), c2),
                pl.BlockSpec((1, E), c2),
                pl.BlockSpec((1, E), c2)]
    ops = [x, params['token_type_emb'][0:1, :], params['emb_ln_g'], params['emb_ln_b']]
    if has_proj:
        in_specs += [pl.BlockSpec((E, H), c2), pl.BlockSpec((1, H), c2)]
        ops += [params['proj_w'], params['proj_b']]
    for name in ('qkv_w', 'qkv_b', 'ao_w', 'ao_b', 'aln_g', 'aln_b',
                 'i_w', 'i_b', 'o_w', 'o_b', 'oln_g', 'oln_b'):
        a = params[name]
        in_specs.append(pl.BlockSpec(a.shape, c3))
        ops.append(a)
    in_specs += [pl.BlockSpec((H, H), c2), pl.BlockSpec((S, H), c2), pl.BlockSpec((S, H), c2)]
    ops += [R, sin_full, cos_full]

    if out_mode == "logits":
        Cp = fc_w.shape[1]
        in_specs += [pl.BlockSpec(fc_w.shape, c2), pl.BlockSpec((1, Cp), c2)]
        ops += [fc_w, fc_b]
        out_shape = jax.ShapeDtypeStruct((B, S, Cp), jnp.float32)
        out_spec = pl.BlockSpec((block_b, S, Cp), im3)
    elif out_mode == "cls":
        out_shape = jax.ShapeDtypeStruct((B, 1, H), jnp.float32)
        out_spec = pl.BlockSpec((block_b, 1, H), im3)
    else:
        out_shape = jax.ShapeDtypeStruct((B, S, H), jnp.float32)
        out_spec = pl.BlockSpec((block_b, S, H), im3)

    kern = functools.partial(_roformer_stack_kernel, n_layers=L, n_heads=n_heads,
                             masked=masked, has_proj=has_proj, out_mode=out_mode, eps=eps)
    grid_spec = pltpu.PrefetchScalarGridSpec(
        num_scalar_prefetch=1 if masked else 0,
        grid=grid, in_specs=in_specs, out_specs=out_spec)
    call = pl.pallas_call(
        kern, out_shape=out_shape, grid_spec=grid_spec,
        compiler_params=pltpu.CompilerParams(dimension_semantics=("parallel",)))
    if masked:
        return call(lengths.astype(jnp.int32), *ops)
    return call(*ops)


# ------------------------------ parameter init ------------------------------

def init_roformer(key, emb, hidden, heads, inter, layers, std=0.02):
    ks = jax.random.split(key, 8)
    params = {
        'cls': jax.random.normal(ks[0], (1, 1, emb), dtype=jnp.float32),      # nn.init.normal_
        'token_type_emb': std * jax.random.normal(ks[1], (2, emb), dtype=jnp.float32),
        'emb_ln_g': jnp.ones((1, emb), jnp.float32),
        'emb_ln_b': jnp.zeros((1, emb), jnp.float32),
    }
    if emb != hidden:
        params['proj_w'] = std * jax.random.normal(ks[2], (emb, hidden), dtype=jnp.float32)
        params['proj_b'] = jnp.zeros((1, hidden), jnp.float32)
    kw = jax.random.split(ks[3], 4)
    params.update({
        'qkv_w': std * jax.random.normal(kw[0], (layers, hidden, 3 * hidden), dtype=jnp.float32),
        'qkv_b': jnp.zeros((layers, 1, 3 * hidden), jnp.float32),
        'ao_w': std * jax.random.normal(kw[1], (layers, hidden, hidden), dtype=jnp.float32),
        'ao_b': jnp.zeros((layers, 1, hidden), jnp.float32),
        'aln_g': jnp.ones((layers, 1, hidden), jnp.float32),
        'aln_b': jnp.zeros((layers, 1, hidden), jnp.float32),
        'i_w': std * jax.random.normal(kw[2], (layers, hidden, inter), dtype=jnp.float32),
        'i_b': jnp.zeros((layers, 1, inter), jnp.float32),
        'o_w': std * jax.random.normal(kw[3], (layers, inter, hidden), dtype=jnp.float32),
        'o_b': jnp.zeros((layers, 1, hidden), jnp.float32),
        'oln_g': jnp.ones((layers, 1, hidden), jnp.float32),
        'oln_b': jnp.zeros((layers, 1, hidden), jnp.float32),
    })
    return params


# -------------------------------- full model --------------------------------

def eeg_sleep_transformer_forward(eeg, length, params, cfg):
    """eeg: (n, T, E) with E == head embedding_size; length: (n,) valid #patches per sample."""
    n, T, E = eeg.shape
    P = cfg['patch_size']
    npatch = T // P

    if cfg['log_transform']:
        eeg = jnp.log(eeg + 1e-9)            # tiny elementwise op, left to XLA fusion

    # eeg.unflatten(1, (-1, P)).flatten(0, 1)
    x = eeg.reshape(n * npatch, P, E)

    # ----- head RoFormer over each patch (CLS prepended, no mask), fused stack, CLS out -----
    cls_h = jnp.broadcast_to(params['head']['cls'], (n * npatch, 1, E))
    xh = jnp.concatenate([cls_h, x], axis=1)                              # (n*npatch, P+1, E)
    cls_out = roformer_stack(xh, None, params['head'], cfg['head_heads'],
                             masked=False, out_mode="cls")                # (n*npatch, 1, Hh)
    Hh = cls_out.shape[-1]

    # ----- backbone RoFormer over patch embeddings (length mask + CLS) + fused classifier ---
    cls_b = jnp.broadcast_to(params['backbone']['cls'], (n, 1, Hh))
    xb = jnp.concatenate([cls_b, cls_out.reshape(n, npatch, Hh)], axis=1)  # (n, npatch+1, Hh)
    len_b = length.astype(jnp.int32) + 1                                   # valid keys incl. CLS
    logits = roformer_stack(xb, len_b, params['backbone'], cfg['backbone_heads'],
                            masked=True, out_mode="logits",
                            fc_w=params['fc_w'], fc_b=params['fc_b'])      # (n, npatch+1, 128)
    return logits[:, 1:, :cfg['num_classes']]                              # drop CLS, real cols


# ----------------------------------- main ------------------------------------

if __name__ == "__main__":
    # Small deterministic configuration.
    patch_size = 8
    head_hidden, head_heads, head_inter, head_layers = 32, 2, 64, 2
    bb_hidden, bb_heads, bb_inter, bb_layers = 32, 2, 64, 2
    num_classes = 5
    n, num_patches = 2, 4
    T = num_patches * patch_size
    E = head_hidden                     # eeg feature dim == head embedding_size

    root = jax.random.PRNGKey(0)
    k_head, k_bb, k_fc, k_eeg = jax.random.split(root, 4)

    params = {
        'head': init_roformer(k_head, E, head_hidden, head_heads, head_inter, head_layers),
        # backbone embedding_size == head.hidden_size (as in the PyTorch __init__)
        'backbone': init_roformer(k_bb, head_hidden, bb_hidden, bb_heads, bb_inter, bb_layers),
    }
    C_PAD = 128                          # lane-dense classifier output, sliced afterwards
    fc_w = 0.02 * jax.random.normal(k_fc, (bb_hidden, num_classes), dtype=jnp.float32)
    params['fc_w'] = jnp.pad(fc_w, ((0, 0), (0, C_PAD - num_classes)))
    params['fc_b'] = jnp.zeros((1, C_PAD), jnp.float32)

    eeg = jax.random.uniform(k_eeg, (n, T, E), jnp.float32, minval=0.1, maxval=2.0)
    length = jnp.array([4, 2], dtype=jnp.int32)   # valid patch counts per sample

    cfg = dict(patch_size=patch_size, log_transform=True,
               head_heads=head_heads, backbone_heads=bb_heads, num_classes=num_classes)

    fwd = jax.jit(lambda e, l, p: eeg_sleep_transformer_forward(e, l, p, cfg))
    out = jax.block_until_ready(fwd(eeg, length, params))
    assert out.shape == (n, num_patches, num_classes), out.shape
    assert bool(jnp.all(jnp.isfinite(out)))
    print("KERNEL_OK")
</pallas_src>

<mosaic_0001>
module attributes {stable_mosaic.version = 11 : i64} {
  func.func @_roformer_stack_kernel(%arg0: i32, %arg1: memref<4x9x32xf32, #tpu.memory_space<vmem>>, %arg2: memref<1x32xf32, #tpu.memory_space<vmem>>, %arg3: memref<1x32xf32, #tpu.memory_space<vmem>>, %arg4: memref<1x32xf32, #tpu.memory_space<vmem>>, %arg5: memref<2x32x96xf32, #tpu.memory_space<vmem>>, %arg6: memref<2x1x96xf32, #tpu.memory_space<vmem>>, %arg7: memref<2x32x32xf32, #tpu.memory_space<vmem>>, %arg8: memref<2x1x32xf32, #tpu.memory_space<vmem>>, %arg9: memref<2x1x32xf32, #tpu.memory_space<vmem>>, %arg10: memref<2x1x32xf32, #tpu.memory_space<vmem>>, %arg11: memref<2x32x64xf32, #tpu.memory_space<vmem>>, %arg12: memref<2x1x64xf32, #tpu.memory_space<vmem>>, %arg13: memref<2x64x32xf32, #tpu.memory_space<vmem>>, %arg14: memref<2x1x32xf32, #tpu.memory_space<vmem>>, %arg15: memref<2x1x32xf32, #tpu.memory_space<vmem>>, %arg16: memref<2x1x32xf32, #tpu.memory_space<vmem>>, %arg17: memref<32x32xf32, #tpu.memory_space<vmem>>, %arg18: memref<9x32xf32, #tpu.memory_space<vmem>>, %arg19: memref<9x32xf32, #tpu.memory_space<vmem>>, %arg20: memref<4x1x32xf32, #tpu.memory_space<vmem>>) attributes {dimension_semantics = [#tpu.dimension_semantics<parallel>], iteration_bounds = array<i64: 2>, scalar_prefetch = 0 : i64, scratch_operands = 0 : i64, tpu.core_type = #tpu.core_type<tc>, window_params = [{transform_indices = @transform_0, window_bounds = array<i64: 4, 9, 32>}, {pipeline_mode = #tpu.pipeline_mode<synchronous>, transform_indices = @transform_1, window_bounds = array<i64: 1, 32>}, {pipeline_mode = #tpu.pipeline_mode<synchronous>, transform_indices = @transform_2, window_bounds = array<i64: 1, 32>}, {pipeline_mode = #tpu.pipeline_mode<synchronous>, transform_indices = @transform_3, window_bounds = array<i64: 1, 32>}, {pipeline_mode = #tpu.pipeline_mode<synchronous>, transform_indices = @transform_4, window_bounds = array<i64: 2, 32, 96>}, {pipeline_mode = #tpu.pipeline_mode<synchronous>, transform_indices = @transform_5, window_bounds = array<i64: 2, 1, 96>}, {pipeline_mode = #tpu.pipeline_mode<synchronous>, transform_indices = @transform_6, window_bounds = array<i64: 2, 32, 32>}, {pipeline_mode = #tpu.pipeline_mode<synchronous>, transform_indices = @transform_7, window_bounds = array<i64: 2, 1, 32>}, {pipeline_mode = #tpu.pipeline_mode<synchronous>, transform_indices = @transform_8, window_bounds = array<i64: 2, 1, 32>}, {pipeline_mode = #tpu.pipeline_mode<synchronous>, transform_indices = @transform_9, window_bounds = array<i64: 2, 1, 32>}, {pipeline_mode = #tpu.pipeline_mode<synchronous>, transform_indices = @transform_10, window_bounds = array<i64: 2, 32, 64>}, {pipeline_mode = #tpu.pipeline_mode<synchronous>, transform_indices = @transform_11, window_bounds = array<i64: 2, 1, 64>}, {pipeline_mode = #tpu.pipeline_mode<synchronous>, transform_indices = @transform_12, window_bounds = array<i64: 2, 64, 32>}, {pipeline_mode = #tpu.pipeline_mode<synchronous>, transform_indices = @transform_13, window_bounds = array<i64: 2, 1, 32>}, {pipeline_mode = #tpu.pipeline_mode<synchronous>, transform_indices = @transform_14, window_bounds = array<i64: 2, 1, 32>}, {pipeline_mode = #tpu.pipeline_mode<synchronous>, transform_indices = @transform_15, window_bounds = array<i64: 2, 1, 32>}, {pipeline_mode = #tpu.pipeline_mode<synchronous>, transform_indices = @transform_16, window_bounds = array<i64: 32, 32>}, {pipeline_mode = #tpu.pipeline_mode<synchronous>, transform_indices = @transform_17, window_bounds = array<i64: 9, 32>}, {pipeline_mode = #tpu.pipeline_mode<synchronous>, transform_indices = @transform_18, window_bounds = array<i64: 9, 32>}, {transform_indices = @transform_19, window_bounds = array<i64: 4, 1, 32>}]} {
    %c0 = arith.constant 0 : index
    %c0_0 = arith.constant 0 : index
    %c0_1 = arith.constant 0 : index
    %0 = vector.load %arg1[%c0, %c0_0, %c0_1] : memref<4x9x32xf32, #tpu.memory_space<vmem>>, vector<4x9x32xf32>
    %1 = vector.shape_cast %0 : vector<4x9x32xf32> to vector<36x32xf32>
    %c0_2 = arith.constant 0 : index
    %c0_3 = arith.constant 0 : index
    %2 = vector.load %arg2[%c0_2, %c0_3] : memref<1x32xf32, #tpu.memory_space<vmem>>, vector<1x32xf32>
    %3 = vector.broadcast %2 : vector<1x32xf32> to vector<36x32xf32>
    %4 = arith.addf %1, %3 : vector<36x32xf32>
    %c0_4 = arith.constant 0 : index
    %c0_5 = arith.constant 0 : index
    %5 = vector.load %arg3[%c0_4, %c0_5] : memref<1x32xf32, #tpu.memory_space<vmem>>, vector<1x32xf32>
    %c0_6 = arith.constant 0 : index
    %c0_7 = arith.constant 0 : index
    %6 = vector.load %arg4[%c0_6, %c0_7] : memref<1x32xf32, #tpu.memory_space<vmem>>, vector<1x32xf32>
    %cst = arith.constant dense<0.000000e+00> : vector<36xf32>
    %7 = vector.multi_reduction <add>, %4, %cst [1] : vector<36x32xf32> to vector<36xf32>
    %8 = vector.shape_cast %7 : vector<36xf32> to vector<36x1xf32>
    %cst_8 = arith.constant 3.200000e+01 : f32
    %9 = vector.broadcast %cst_8 : f32 to vector<36x1xf32>
    %10 = arith.divf %8, %9 : vector<36x1xf32>
    %11 = vector.broadcast %10 : vector<36x1xf32> to vector<36x32xf32>
    %12 = arith.subf %4, %11 : vector<36x32xf32>
    %13 = arith.mulf %12, %12 : vector<36x32xf32>
    %cst_9 = arith.constant dense<0.000000e+00> : vector<36xf32>
    %14 = vector.multi_reduction <add>, %13, %cst_9 [1] : vector<36x32xf32> to vector<36xf32>
    %15 = vector.shape_cast %14 : vector<36xf32> to vector<36x1xf32>
    %cst_10 = arith.constant 3.200000e+01 : f32
    %16 = vector.broadcast %cst_10 : f32 to vector<36x1xf32>
    %17 = arith.divf %15, %16 : vector<36x1xf32>
    %cst_11 = arith.constant 9.99999996E-13 : f32
    %18 = vector.broadcast %cst_11 : f32 to vector<36x1xf32>
    %19 = arith.addf %17, %18 : vector<36x1xf32>
    %20 = math.rsqrt %19 : vector<36x1xf32>
    %21 = vector.broadcast %20 : vector<36x1xf32> to vector<36x32xf32>
    %22 = arith.mulf %12, %21 : vector<36x32xf32>
    %23 = vector.broadcast %5 : vector<1x32xf32> to vector<36x32xf32>
    %24 = arith.mulf %22, %23 : vector<36x32xf32>
    %25 = vector.broadcast %6 : vector<1x32xf32> to vector<36x32xf32>
    %26 = arith.addf %24, %25 : vector<36x32xf32>
    %c0_12 = arith.constant 0 : index
    %c0_13 = arith.constant 0 : index
    %27 = vector.load %arg18[%c0_12, %c0_13] : memref<9x32xf32, #tpu.memory_space<vmem>>, vector<9x32xf32>
    %28 = vector.shape_cast %27 : vector<9x32xf32> to vector<1x9x32xf32>
    %c0_14 = arith.constant 0 : index
    %c0_15 = arith.constant 0 : index
    %29 = vector.load %arg19[%c0_14, %c0_15] : memref<9x32xf32, #tpu.memory_space<vmem>>, vector<9x32xf32>
    %30 = vector.shape_cast %29 : vector<9x32xf32> to vector<1x9x32xf32>
    %c0_16 = arith.constant 0 : index
    %c0_17 = arith.constant 0 : index
    %31 = vector.load %arg17[%c0_16, %c0_17] : memref<32x32xf32, #tpu.memory_space<vmem>>, vector<32x32xf32>
    %c0_18 = arith.constant 0 : index
    %c0_19 = arith.constant 0 : index
    %c0_20 = arith.constant 0 : index
    %32 = vector.load %arg5[%c0_18, %c0_19, %c0_20] : memref<2x32x96xf32, #tpu.memory_space<vmem>>, vector<1x32x96xf32>
    %33 = vector.shape_cast %32 : vector<1x32x96xf32> to vector<32x96xf32>
    %cst_21 = arith.constant dense<0.000000e+00> : vector<36x96xf32>
    %34 = tpu.matmul %26, %33, %cst_21 {dimension_numbers = #tpu.dot_dimension_numbers<[1], [0], [0], [1], [0, 0, 1, 1], [], []>} : vector<36x32xf32>, vector<32x96xf32>, vector<36x96xf32> -> vector<36x96xf32>
    %c0_22 = arith.constant 0 : index
    %c0_23 = arith.constant 0 : index
    %c0_24 = arith.constant 0 : index
    %35 = vector.load %arg6[%c0_22, %c0_23, %c0_24] : memref<2x1x96xf32, #tpu.memory_space<vmem>>, vector<1x1x96xf32>
    %36 = vector.shape_cast %35 : vector<1x1x96xf32> to vector<1x96xf32>
    %37 = vector.broadcast %36 : vector<1x96xf32> to vector<36x96xf32>
    %38 = arith.addf %34, %37 : vector<36x96xf32>
    %39 = vector.extract_strided_slice %38 {offsets = [0, 0], sizes = [36, 32], strides = [1, 1]} : vector<36x96xf32> to vector<36x32xf32>
    %40 = vector.extract_strided_slice %38 {offsets = [0, 32], sizes = [36, 32], strides = [1, 1]} : vector<36x96xf32> to vector<36x32xf32>
    %41 = vector.extract_strided_slice %38 {offsets = [0, 64], sizes = [36, 32], strides = [1, 1]} : vector<36x96xf32> to vector<36x32xf32>
    %cst_25 = arith.constant dense<0.000000e+00> : vector<36x32xf32>
    %42 = tpu.matmul %39, %31, %cst_25 {dimension_numbers = #tpu.dot_dimension_numbers<[1], [0], [0], [1], [0, 0, 1, 1], [], []>} : vector<36x32xf32>, vector<32x32xf32>, vector<36x32xf32> -> vector<36x32xf32>
    %cst_26 = arith.constant dense<0.000000e+00> : vector<36x32xf32>
    %43 = tpu.matmul %40, %31, %cst_26 {dimension_numbers = #tpu.dot_dimension_numbers<[1], [0], [0], [1], [0, 0, 1, 1], [], []>} : vector<36x32xf32>, vector<32x32xf32>, vector<36x32xf32> -> vector<36x32xf32>
    %44 = vector.shape_cast %39 : vector<36x32xf32> to vector<4x9x32xf32>
    %45 = vector.broadcast %30 : vector<1x9x32xf32> to vector<4x9x32xf32>
    %46 = arith.mulf %44, %45 : vector<4x9x32xf32>
    %47 = vector.shape_cast %42 : vector<36x32xf32> to vector<4x9x32xf32>
    %48 = vector.broadcast %28 : vector<1x9x32xf32> to vector<4x9x32xf32>
    %49 = arith.mulf %47, %48 : vector<4x9x32xf32>
    %50 = arith.addf %46, %49 : vector<4x9x32xf32>
    %51 = vector.shape_cast %40 : vector<36x32xf32> to vector<4x9x32xf32>
    %52 = vector.broadcast %30 : vector<1x9x32xf32> to vector<4x9x32xf32>
    %53 = arith.mulf %51, %52 : vector<4x9x32xf32>
    %54 = vector.shape_cast %43 : vector<36x32xf32> to vector<4x9x32xf32>
    %55 = vector.broadcast %28 : vector<1x9x32xf32> to vector<4x9x32xf32>
    %56 = arith.mulf %54, %55 : vector<4x9x32xf32>
    %57 = arith.addf %53, %56 : vector<4x9x32xf32>
    %58 = vector.shape_cast %41 : vector<36x32xf32> to vector<4x9x32xf32>
    %59 = vector.extract_strided_slice %50 {offsets = [0, 0, 0], sizes = [4, 9, 16], strides = [1, 1, 1]} : vector<4x9x32xf32> to vector<4x9x16xf32>
    %60 = vector.extract_strided_slice %57 {offsets = [0, 0, 0], sizes = [4, 9, 16], strides = [1, 1, 1]} : vector<4x9x32xf32> to vector<4x9x16xf32>
    %61 = vector.extract_strided_slice %58 {offsets = [0, 0, 0], sizes = [4, 9, 16], strides = [1, 1, 1]} : vector<4x9x32xf32> to vector<4x9x16xf32>
    "tpu.trace_start"() <{level = 10 : i32, message = "bqd,bkd->bqk"}> : () -> ()
    %cst_27 = arith.constant dense<0.000000e+00> : vector<4x9x9xf32>
    %62 = tpu.matmul %59, %60, %cst_27 {dimension_numbers = #tpu.dot_dimension_numbers<[2], [2], [1], [1], [0, 0, 0, 1, 1, 1], [0], [0]>} : vector<4x9x16xf32>, vector<4x9x16xf32>, vector<4x9x9xf32> -> vector<4x9x9xf32>
    "tpu.trace_stop"() : () -> ()
    %cst_28 = arith.constant 2.500000e-01 : f32
    %63 = vector.broadcast %cst_28 : f32 to vector<4x9x9xf32>
    %64 = arith.mulf %62, %63 : vector<4x9x9xf32>
    %cst_29 = arith.constant dense<0xFF800000> : vector<4x9xf32>
    %65 = vector.multi_reduction <maximumf>, %64, %cst_29 [2] : vector<4x9x9xf32> to vector<4x9xf32>
    %66 = vector.shape_cast %65 : vector<4x9xf32> to vector<4x9x1xf32>
    %67 = vector.broadcast %66 : vector<4x9x1xf32> to vector<4x9x9xf32>
    %68 = arith.subf %64, %67 : vector<4x9x9xf32>
    %69 = math.exp %68 : vector<4x9x9xf32>
    %cst_30 = arith.constant dense<0.000000e+00> : vector<4x9xf32>
    %70 = vector.multi_reduction <add>, %69, %cst_30 [2] : vector<4x9x9xf32> to vector<4x9xf32>
    %71 = vector.shape_cast %70 : vector<4x9xf32> to vector<4x9x1xf32>
    %72 = vector.broadcast %71 : vector<4x9x1xf32> to vector<4x9x9xf32>
    %73 = arith.divf %69, %72 : vector<4x9x9xf32>
    "tpu.trace_start"() <{level = 10 : i32, message = "bqk,bkd->bqd"}> : () -> ()
    %cst_31 = arith.constant dense<0.000000e+00> : vector<4x9x16xf32>
    %74 = tpu.matmul %73, %61, %cst_31 {dimension_numbers = #tpu.dot_dimension_numbers<[2], [1], [1], [2], [0, 0, 0, 1, 1, 2], [0], [0]>} : vector<4x9x9xf32>, vector<4x9x16xf32>, vector<4x9x16xf32> -> vector<4x9x16xf32>
    "tpu.trace_stop"() : () -> ()
    %75 = vector.extract_strided_slice %50 {offsets = [0, 0, 16], sizes = [4, 9, 16], strides = [1, 1, 1]} : vector<4x9x32xf32> to vector<4x9x16xf32>
    %76 = vector.extract_strided_slice %57 {offsets = [0, 0, 16], sizes = [4, 9, 16], strides = [1, 1, 1]} : vector<4x9x32xf32> to vector<4x9x16xf32>
    %77 = vector.extract_strided_slice %58 {offsets = [0, 0, 16], sizes = [4, 9, 16], strides = [1, 1, 1]} : vector<4x9x32xf32> to vector<4x9x16xf32>
    "tpu.trace_start"() <{level = 10 : i32, message = "bqd,bkd->bqk"}> : () -> ()
    %cst_32 = arith.constant dense<0.000000e+00> : vector<4x9x9xf32>
    %78 = tpu.matmul %75, %76, %cst_32 {dimension_numbers = #tpu.dot_dimension_numbers<[2], [2], [1], [1], [0, 0, 0, 1, 1, 1], [0], [0]>} : vector<4x9x16xf32>, vector<4x9x16xf32>, vector<4x9x9xf32> -> vector<4x9x9xf32>
    "tpu.trace_stop"() : () -> ()
    %cst_33 = arith.constant 2.500000e-01 : f32
    %79 = vector.broadcast %cst_33 : f32 to vector<4x9x9xf32>
    %80 = arith.mulf %78, %79 : vector<4x9x9xf32>
    %cst_34 = arith.constant dense<0xFF800000> : vector<4x9xf32>
    %81 = vector.multi_reduction <maximumf>, %80, %cst_34 [2] : vector<4x9x9xf32> to vector<4x9xf32>
    %82 = vector.shape_cast %81 : vector<4x9xf32> to vector<4x9x1xf32>
    %83 = vector.broadcast %82 : vector<4x9x1xf32> to vector<4x9x9xf32>
    %84 = arith.subf %80, %83 : vector<4x9x9xf32>
    %85 = math.exp %84 : vector<4x9x9xf32>
    %cst_35 = arith.constant dense<0.000000e+00> : vector<4x9xf32>
    %86 = vector.multi_reduction <add>, %85, %cst_35 [2] : vector<4x9x9xf32> to vector<4x9xf32>
    %87 = vector.shape_cast %86 : vector<4x9xf32> to vector<4x9x1xf32>
    %88 = vector.broadcast %87 : vector<4x9x1xf32> to vector<4x9x9xf32>
    %89 = arith.divf %85, %88 : vector<4x9x9xf32>
    "tpu.trace_start"() <{level = 10 : i32, message = "bqk,bkd->bqd"}> : () -> ()
    %cst_36 = arith.constant dense<0.000000e+00> : vector<4x9x16xf32>
    %90 = tpu.matmul %89, %77, %cst_36 {dimension_numbers = #tpu.dot_dimension_numbers<[2], [1], [1], [2], [0, 0, 0, 1, 1, 2], [0], [0]>} : vector<4x9x9xf32>, vector<4x9x16xf32>, vector<4x9x16xf32> -> vector<4x9x16xf32>
    "tpu.trace_stop"() : () -> ()
    %91 = tpu.concatenate %74, %90 in 2 : vector<4x9x16xf32>, vector<4x9x16xf32> -> vector<4x9x32xf32>
    %92 = vector.shape_cast %91 : vector<4x9x32xf32> to vector<36x32xf32>
    %c0_37 = arith.constant 0 : index
    %c0_38 = arith.constant 0 : index
    %c0_39 = arith.constant 0 : index
    %93 = vector.load %arg7[%c0_37, %c0_38, %c0_39] : memref<2x32x32xf32, #tpu.memory_space<vmem>>, vector<1x32x32xf32>
    %94 = vector.shape_cast %93 : vector<1x32x32xf32> to vector<32x32xf32>
    %cst_40 = arith.constant dense<0.000000e+00> : vector<36x32xf32>
    %95 = tpu.matmul %92, %94, %cst_40 {dimension_numbers = #tpu.dot_dimension_numbers<[1], [0], [0], [1], [0, 0, 1, 1], [], []>} : vector<36x32xf32>, vector<32x32xf32>, vector<36x32xf32> -> vector<36x32xf32>
    %c0_41 = arith.constant 0 : index
    %c0_42 = arith.constant 0 : index
    %c0_43 = arith.constant 0 : index
    %96 = vector.load %arg8[%c0_41, %c0_42, %c0_43] : memref<2x1x32xf32, #tpu.memory_space<vmem>>, vector<1x1x32xf32>
    %97 = vector.shape_cast %96 : vector<1x1x32xf32> to vector<1x32xf32>
    %98 = vector.broadcast %97 : vector<1x32xf32> to vector<36x32xf32>
    %99 = arith.addf %95, %98 : vector<36x32xf32>
    %100 = arith.addf %99, %26 : vector<36x32xf32>
    %c0_44 = arith.constant 0 : index
    %c0_45 = arith.constant 0 : index
    %c0_46 = arith.constant 0 : index
    %101 = vector.load %arg9[%c0_44, %c0_45, %c0_46] : memref<2x1x32xf32, #tpu.memory_space<vmem>>, vector<1x1x32xf32>
    %102 = vector.shape_cast %101 : vector<1x1x32xf32> to vector<1x32xf32>
    %c0_47 = arith.constant 0 : index
    %c0_48 = arith.constant 0 : index
    %c0_49 = arith.constant 0 : index
    %103 = vector.load %arg10[%c0_47, %c0_48, %c0_49] : memref<2x1x32xf32, #tpu.memory_space<vmem>>, vector<1x1x32xf32>
    %104 = vector.shape_cast %103 : vector<1x1x32xf32> to vector<1x32xf32>
    %cst_50 = arith.constant dense<0.000000e+00> : vector<36xf32>
    %105 = vector.multi_reduction <add>, %100, %cst_50 [1] : vector<36x32xf32> to vector<36xf32>
    %106 = vector.shape_cast %105 : vector<36xf32> to vector<36x1xf32>
    %cst_51 = arith.constant 3.200000e+01 : f32
    %107 = vector.broadcast %cst_51 : f32 to vector<36x1xf32>
    %108 = arith.divf %106, %107 : vector<36x1xf32>
    %109 = vector.broadcast %108 : vector<36x1xf32> to vector<36x32xf32>
    %110 = arith.subf %100, %109 : vector<36x32xf32>
    %111 = arith.mulf %110, %110 : vector<36x32xf32>
    %cst_52 = arith.constant dense<0.000000e+00> : vector<36xf32>
    %112 = vector.multi_reduction <add>, %111, %cst_52 [1] : vector<36x32xf32> to vector<36xf32>
    %113 = vector.shape_cast %112 : vector<36xf32> to vector<36x1xf32>
    %cst_53 = arith.constant 3.200000e+01 : f32
    %114 = vector.broadcast %cst_53 : f32 to vector<36x1xf32>
    %115 = arith.divf %113, %114 : vector<36x1xf32>
    %cst_54 = arith.constant 9.99999996E-13 : f32
    %116 = vector.broadcast %cst_54 : f32 to vector<36x1xf32>
    %117 = arith.addf %115, %116 : vector<36x1xf32>
    %118 = math.rsqrt %117 : vector<36x1xf32>
    %119 = vector.broadcast %118 : vector<36x1xf32> to vector<36x32xf32>
    %120 = arith.mulf %110, %119 : vector<36x32xf32>
    %121 = vector.broadcast %102 : vector<1x32xf32> to vector<36x32xf32>
    %122 = arith.mulf %120, %121 : vector<36x32xf32>
    %123 = vector.broadcast %104 : vector<1x32xf32> to vector<36x32xf32>
    %124 = arith.addf %122, %123 : vector<36x32xf32>
    %c0_55 = arith.constant 0 : index
    %c0_56 = arith.constant 0 : index
    %c0_57 = arith.constant 0 : index
    %125 = vector.load %arg11[%c0_55, %c0_56, %c0_57] : memref<2x32x64xf32, #tpu.memory_space<vmem>>, vector<1x32x64xf32>
    %126 = vector.shape_cast %125 : vector<1x32x64xf32> to vector<32x64xf32>
    %cst_58 = arith.constant dense<0.000000e+00> : vector<36x64xf32>
    %127 = tpu.matmul %124, %126, %cst_58 {dimension_numbers = #tpu.dot_dimension_numbers<[1], [0], [0], [1], [0, 0, 1, 1], [], []>} : vector<36x32xf32>, vector<32x64xf32>, vector<36x64xf32> -> vector<36x64xf32>
    %c0_59 = arith.constant 0 : index
    %c0_60 = arith.constant 0 : index
    %c0_61 = arith.constant 0 : index
    %128 = vector.load %arg12[%c0_59, %c0_60, %c0_61] : memref<2x1x64xf32, #tpu.memory_space<vmem>>, vector<1x1x64xf32>
    %129 = vector.shape_cast %128 : vector<1x1x64xf32> to vector<1x64xf32>
    %130 = vector.broadcast %129 : vector<1x64xf32> to vector<36x64xf32>
    %131 = arith.addf %127, %130 : vector<36x64xf32>
    %cst_62 = arith.constant 5.000000e-01 : f32
    %132 = vector.broadcast %cst_62 : f32 to vector<36x64xf32>
    %133 = arith.mulf %132, %131 : vector<36x64xf32>
    %cst_63 = arith.constant 0.707106769 : f32
    %134 = vector.broadcast %cst_63 : f32 to vector<36x64xf32>
    %135 = arith.mulf %131, %134 : vector<36x64xf32>
    %cst_64 = arith.constant 0.000000e+00 : f32
    %136 = vector.broadcast %cst_64 : f32 to vector<36x64xf32>
    %137 = arith.cmpf oge, %135, %136 : vector<36x64xf32>
    %cst_65 = arith.constant 1.000000e+00 : f32
    %cst_66 = arith.constant -1.000000e+00 : f32
    %138 = vector.broadcast %cst_65 : f32 to vector<36x64xf32>
    %139 = vector.broadcast %cst_66 : f32 to vector<36x64xf32>
    %140 = arith.select %137, %138, %139 : vector<36x64xi1>, vector<36x64xf32>
    %141 = math.absf %135 : vector<36x64xf32>
    %cst_67 = arith.constant 0.327591091 : f32
    %142 = vector.broadcast %cst_67 : f32 to vector<36x64xf32>
    %143 = arith.mulf %142, %141 : vector<36x64xf32>
    %cst_68 = arith.constant 1.000000e+00 : f32
    %144 = vector.broadcast %cst_68 : f32 to vector<36x64xf32>
    %145 = arith.addf %144, %143 : vector<36x64xf32>
    %cst_69 = arith.constant 1.000000e+00 : f32
    %146 = vector.broadcast %cst_69 : f32 to vector<36x64xf32>
    %147 = arith.divf %146, %145 : vector<36x64xf32>
    %cst_70 = arith.constant 1.06140542 : f32
    %148 = vector.broadcast %cst_70 : f32 to vector<36x64xf32>
    %149 = arith.mulf %148, %147 : vector<36x64xf32>
    %cst_71 = arith.constant -1.45315206 : f32
    %150 = vector.broadcast %cst_71 : f32 to vector<36x64xf32>
    %151 = arith.addf %149, %150 : vector<36x64xf32>
    %152 = arith.mulf %151, %147 : vector<36x64xf32>
    %cst_72 = arith.constant 1.42141378 : f32
    %153 = vector.broadcast %cst_72 : f32 to vector<36x64xf32>
    %154 = arith.addf %152, %153 : vector<36x64xf32>
    %155 = arith.mulf %154, %147 : vector<36x64xf32>
    %cst_73 = arith.constant -0.284496725 : f32
    %156 = vector.broadcast %cst_73 : f32 to vector<36x64xf32>
    %157 = arith.addf %155, %156 : vector<36x64xf32>
    %158 = arith.mulf %157, %147 : vector<36x64xf32>
    %cst_74 = arith.constant 0.254829586 : f32
    %159 = vector.broadcast %cst_74 : f32 to vector<36x64xf32>
    %160 = arith.addf %158, %159 : vector<36x64xf32>
    %161 = arith.mulf %160, %147 : vector<36x64xf32>
    %cst_75 = arith.constant 0.000000e+00 : f32
    %162 = vector.broadcast %cst_75 : f32 to vector<36x64xf32>
    %163 = arith.subf %162, %141 : vector<36x64xf32>
    %164 = arith.mulf %163, %141 : vector<36x64xf32>
    %165 = math.exp %164 : vector<36x64xf32>
    %166 = arith.mulf %161, %165 : vector<36x64xf32>
    %cst_76 = arith.constant 1.000000e+00 : f32
    %167 = vector.broadcast %cst_76 : f32 to vector<36x64xf32>
    %168 = arith.subf %167, %166 : vector<36x64xf32>
    %169 = arith.mulf %140, %168 : vector<36x64xf32>
    %cst_77 = arith.constant 1.000000e+00 : f32
    %170 = vector.broadcast %cst_77 : f32 to vector<36x64xf32>
    %171 = arith.addf %170, %169 : vector<36x64xf32>
    %172 = arith.mulf %133, %171 : vector<36x64xf32>
    %c0_78 = arith.constant 0 : index
    %c0_79 = arith.constant 0 : index
    %c0_80 = arith.constant 0 : index
    %173 = vector.load %arg13[%c0_78, %c0_79, %c0_80] : memref<2x64x32xf32, #tpu.memory_space<vmem>>, vector<1x64x32xf32>
    %174 = vector.shape_cast %173 : vector<1x64x32xf32> to vector<64x32xf32>
    %cst_81 = arith.constant dense<0.000000e+00> : vector<36x32xf32>
    %175 = tpu.matmul %172, %174, %cst_81 {dimension_numbers = #tpu.dot_dimension_numbers<[1], [0], [0], [1], [0, 0, 1, 1], [], []>} : vector<36x64xf32>, vector<64x32xf32>, vector<36x32xf32> -> vector<36x32xf32>
    %c0_82 = arith.constant 0 : index
    %c0_83 = arith.constant 0 : index
    %c0_84 = arith.constant 0 : index
    %176 = vector.load %arg14[%c0_82, %c0_83, %c0_84] : memref<2x1x32xf32, #tpu.memory_space<vmem>>, vector<1x1x32xf32>
    %177 = vector.shape_cast %176 : vector<1x1x32xf32> to vector<1x32xf32>
    %178 = vector.broadcast %177 : vector<1x32xf32> to vector<36x32xf32>
    %179 = arith.addf %175, %178 : vector<36x32xf32>
    %180 = arith.addf %179, %124 : vector<36x32xf32>
    %c0_85 = arith.constant 0 : index
    %c0_86 = arith.constant 0 : index
    %c0_87 = arith.constant 0 : index
    %181 = vector.load %arg15[%c0_85, %c0_86, %c0_87] : memref<2x1x32xf32, #tpu.memory_space<vmem>>, vector<1x1x32xf32>
    %182 = vector.shape_cast %181 : vector<1x1x32xf32> to vector<1x32xf32>
    %c0_88 = arith.constant 0 : index
    %c0_89 = arith.constant 0 : index
    %c0_90 = arith.constant 0 : index
    %183 = vector.load %arg16[%c0_88, %c0_89, %c0_90] : memref<2x1x32xf32, #tpu.memory_space<vmem>>, vector<1x1x32xf32>
    %184 = vector.shape_cast %183 : vector<1x1x32xf32> to vector<1x32xf32>
    %cst_91 = arith.constant dense<0.000000e+00> : vector<36xf32>
    %185 = vector.multi_reduction <add>, %180, %cst_91 [1] : vector<36x32xf32> to vector<36xf32>
    %186 = vector.shape_cast %185 : vector<36xf32> to vector<36x1xf32>
    %cst_92 = arith.constant 3.200000e+01 : f32
    %187 = vector.broadcast %cst_92 : f32 to vector<36x1xf32>
    %188 = arith.divf %186, %187 : vector<36x1xf32>
    %189 = vector.broadcast %188 : vector<36x1xf32> to vector<36x32xf32>
    %190 = arith.subf %180, %189 : vector<36x32xf32>
    %191 = arith.mulf %190, %190 : vector<36x32xf32>
    %cst_93 = arith.constant dense<0.000000e+00> : vector<36xf32>
    %192 = vector.multi_reduction <add>, %191, %cst_93 [1] : vector<36x32xf32> to vector<36xf32>
    %193 = vector.shape_cast %192 : vector<36xf32> to vector<36x1xf32>
    %cst_94 = arith.constant 3.200000e+01 : f32
    %194 = vector.broadcast %cst_94 : f32 to vector<36x1xf32>
    %195 = arith.divf %193, %194 : vector<36x1xf32>
    %cst_95 = arith.constant 9.99999996E-13 : f32
    %196 = vector.broadcast %cst_95 : f32 to vector<36x1xf32>
    %197 = arith.addf %195, %196 : vector<36x1xf32>
    %198 = math.rsqrt %197 : vector<36x1xf32>
    %199 = vector.broadcast %198 : vector<36x1xf32> to vector<36x32xf32>
    %200 = arith.mulf %190, %199 : vector<36x32xf32>
    %201 = vector.broadcast %182 : vector<1x32xf32> to vector<36x32xf32>
    %202 = arith.mulf %200, %201 : vector<36x32xf32>
    %203 = vector.broadcast %184 : vector<1x32xf32> to vector<36x32xf32>
    %204 = arith.addf %202, %203 : vector<36x32xf32>
    %c1 = arith.constant 1 : index
    %c0_96 = arith.constant 0 : index
    %c0_97 = arith.constant 0 : index
    %205 = vector.load %arg5[%c1, %c0_96, %c0_97] : memref<2x32x96xf32, #tpu.memory_space<vmem>>, vector<1x32x96xf32>
    %206 = vector.shape_cast %205 : vector<1x32x96xf32> to vector<32x96xf32>
    %cst_98 = arith.constant dense<0.000000e+00> : vector<36x96xf32>
    %207 = tpu.matmul %204, %206, %cst_98 {dimension_numbers = #tpu.dot_dimension_numbers<[1], [0], [0], [1], [0, 0, 1, 1], [], []>} : vector<36x32xf32>, vector<32x96xf32>, vector<36x96xf32> -> vector<36x96xf32>
    %c1_99 = arith.constant 1 : index
    %c0_100 = arith.constant 0 : index
    %c0_101 = arith.constant 0 : index
    %208 = vector.load %arg6[%c1_99, %c0_100, %c0_101] : memref<2x1x96xf32, #tpu.memory_space<vmem>>, vector<1x1x96xf32>
    %209 = vector.shape_cast %208 : vector<1x1x96xf32> to vector<1x96xf32>
    %210 = vector.broadcast %209 : vector<1x96xf32> to vector<36x96xf32>
    %211 = arith.addf %207, %210 : vector<36x96xf32>
    %212 = vector.extract_strided_slice %211 {offsets = [0, 0], sizes = [36, 32], strides = [1, 1]} : vector<36x96xf32> to vector<36x32xf32>
    %213 = vector.extract_strided_slice %211 {offsets = [0, 32], sizes = [36, 32], strides = [1, 1]} : vector<36x96xf32> to vector<36x32xf32>
    %214 = vector.extract_strided_slice %211 {offsets = [0, 64], sizes = [36, 32], strides = [1, 1]} : vector<36x96xf32> to vector<36x32xf32>
    %cst_102 = arith.constant dense<0.000000e+00> : vector<36x32xf32>
    %215 = tpu.matmul %212, %31, %cst_102 {dimension_numbers = #tpu.dot_dimension_numbers<[1], [0], [0], [1], [0, 0, 1, 1], [], []>} : vector<36x32xf32>, vector<32x32xf32>, vector<36x32xf32> -> vector<36x32xf32>
    %cst_103 = arith.constant dense<0.000000e+00> : vector<36x32xf32>
    %216 = tpu.matmul %213, %31, %cst_103 {dimension_numbers = #tpu.dot_dimension_numbers<[1], [0], [0], [1], [0, 0, 1, 1], [], []>} : vector<36x32xf32>, vector<32x32xf32>, vector<36x32xf32> -> vector<36x32xf32>
    %217 = vector.shape_cast %212 : vector<36x32xf32> to vector<4x9x32xf32>
    %218 = vector.broadcast %30 : vector<1x9x32xf32> to vector<4x9x32xf32>
    %219 = arith.mulf %217, %218 : vector<4x9x32xf32>
    %220 = vector.shape_cast %215 : vector<36x32xf32> to vector<4x9x32xf32>
    %221 = vector.broadcast %28 : vector<1x9x32xf32> to vector<4x9x32xf32>
    %222 = arith.mulf %220, %221 : vector<4x9x32xf32>
    %223 = arith.addf %219, %222 : vector<4x9x32xf32>
    %224 = vector.shape_cast %213 : vector<36x32xf32> to vector<4x9x32xf32>
    %225 = vector.broadcast %30 : vector<1x9x32xf32> to vector<4x9x32xf32>
    %226 = arith.mulf %224, %225 : vector<4x9x32xf32>
    %227 = vector.shape_cast %216 : vector<36x32xf32> to vector<4x9x32xf32>
    %228 = vector.broadcast %28 : vector<1x9x32xf32> to vector<4x9x32xf32>
    %229 = arith.mulf %227, %228 : vector<4x9x32xf32>
    %230 = arith.addf %226, %229 : vector<4x9x32xf32>
    %231 = vector.shape_cast %214 : vector<36x32xf32> to vector<4x9x32xf32>
    %232 = vector.extract_strided_slice %223 {offsets = [0, 0, 0], sizes = [4, 9, 16], strides = [1, 1, 1]} : vector<4x9x32xf32> to vector<4x9x16xf32>
    %233 = vector.extract_strided_slice %230 {offsets = [0, 0, 0], sizes = [4, 9, 16], strides = [1, 1, 1]} : vector<4x9x32xf32> to vector<4x9x16xf32>
    %234 = vector.extract_strided_slice %231 {offsets = [0, 0, 0], sizes = [4, 9, 16], strides = [1, 1, 1]} : vector<4x9x32xf32> to vector<4x9x16xf32>
    "tpu.trace_start"() <{level = 10 : i32, message = "bqd,bkd->bqk"}> : () -> ()
    %cst_104 = arith.constant dense<0.000000e+00> : vector<4x9x9xf32>
    %235 = tpu.matmul %232, %233, %cst_104 {dimension_numbers = #tpu.dot_dimension_numbers<[2], [2], [1], [1], [0, 0, 0, 1, 1, 1], [0], [0]>} : vector<4x9x16xf32>, vector<4x9x16xf32>, vector<4x9x9xf32> -> vector<4x9x9xf32>
    "tpu.trace_stop"() : () -> ()
    %cst_105 = arith.constant 2.500000e-01 : f32
    %236 = vector.broadcast %cst_105 : f32 to vector<4x9x9xf32>
    %237 = arith.mulf %235, %236 : vector<4x9x9xf32>
    %cst_106 = arith.constant dense<0xFF800000> : vector<4x9xf32>
    %238 = vector.multi_reduction <maximumf>, %237, %cst_106 [2] : vector<4x9x9xf32> to vector<4x9xf32>
    %239 = vector.shape_cast %238 : vector<4x9xf32> to vector<4x9x1xf32>
    %240 = vector.broadcast %239 : vector<4x9x1xf32> to vector<4x9x9xf32>
    %241 = arith.subf %237, %240 : vector<4x9x9xf32>
    %242 = math.exp %241 : vector<4x9x9xf32>
    %cst_107 = arith.constant dense<0.000000e+00> : vector<4x9xf32>
    %243 = vector.multi_reduction <add>, %242, %cst_107 [2] : vector<4x9x9xf32> to vector<4x9xf32>
    %244 = vector.shape_cast %243 : vector<4x9xf32> to vector<4x9x1xf32>
    %245 = vector.broadcast %244 : vector<4x9x1xf32> to vector<4x9x9xf32>
    %246 = arith.divf %242, %245 : vector<4x9x9xf32>
    "tpu.trace_start"() <{level = 10 : i32, message = "bqk,bkd->bqd"}> : () -> ()
    %cst_108 = arith.constant dense<0.000000e+00> : vector<4x9x16xf32>
    %247 = tpu.matmul %246, %234, %cst_108 {dimension_numbers = #tpu.dot_dimension_numbers<[2], [1], [1], [2], [0, 0, 0, 1, 1, 2], [0], [0]>} : vector<4x9x9xf32>, vector<4x9x16xf32>, vector<4x9x16xf32> -> vector<4x9x16xf32>
    "tpu.trace_stop"() : () -> ()
    %248 = vector.extract_strided_slice %223 {offsets = [0, 0, 16], sizes = [4, 9, 16], strides = [1, 1, 1]} : vector<4x9x32xf32> to vector<4x9x16xf32>
    %249 = vector.extract_strided_slice %230 {offsets = [0, 0, 16], sizes = [4, 9, 16], strides = [1, 1, 1]} : vector<4x9x32xf32> to vector<4x9x16xf32>
    %250 = vector.extract_strided_slice %231 {offsets = [0, 0, 16], sizes = [4, 9, 16], strides = [1, 1, 1]} : vector<4x9x32xf32> to vector<4x9x16xf32>
    "tpu.trace_start"() <{level = 10 : i32, message = "bqd,bkd->bqk"}> : () -> ()
    %cst_109 = arith.constant dense<0.000000e+00> : vector<4x9x9xf32>
    %251 = tpu.matmul %248, %249, %cst_109 {dimension_numbers = #tpu.dot_dimension_numbers<[2], [2], [1], [1], [0, 0, 0, 1, 1, 1], [0], [0]>} : vector<4x9x16xf32>, vector<4x9x16xf32>, vector<4x9x9xf32> -> vector<4x9x9xf32>
    "tpu.trace_stop"() : () -> ()
    %cst_110 = arith.constant 2.500000e-01 : f32
    %252 = vector.broadcast %cst_110 : f32 to vector<4x9x9xf32>
    %253 = arith.mulf %251, %252 : vector<4x9x9xf32>
    %cst_111 = arith.constant dense<0xFF800000> : vector<4x9xf32>
    %254 = vector.multi_reduction <maximumf>, %253, %cst_111 [2] : vector<4x9x9xf32> to vector<4x9xf32>
    %255 = vector.shape_cast %254 : vector<4x9xf32> to vector<4x9x1xf32>
    %256 = vector.broadcast %255 : vector<4x9x1xf32> to vector<4x9x9xf32>
    %257 = arith.subf %253, %256 : vector<4x9x9xf32>
    %258 = math.exp %257 : vector<4x9x9xf32>
    %cst_112 = arith.constant dense<0.000000e+00> : vector<4x9xf32>
    %259 = vector.multi_reduction <add>, %258, %cst_112 [2] : vector<4x9x9xf32> to vector<4x9xf32>
    %260 = vector.shape_cast %259 : vector<4x9xf32> to vector<4x9x1xf32>
    %261 = vector.broadcast %260 : vector<4x9x1xf32> to vector<4x9x9xf32>
    %262 = arith.divf %258, %261 : vector<4x9x9xf32>
    "tpu.trace_start"() <{level = 10 : i32, message = "bqk,bkd->bqd"}> : () -> ()
    %cst_113 = arith.constant dense<0.000000e+00> : vector<4x9x16xf32>
    %263 = tpu.matmul %262, %250, %cst_113 {dimension_numbers = #tpu.dot_dimension_numbers<[2], [1], [1], [2], [0, 0, 0, 1, 1, 2], [0], [0]>} : vector<4x9x9xf32>, vector<4x9x16xf32>, vector<4x9x16xf32> -> vector<4x9x16xf32>
    "tpu.trace_stop"() : () -> ()
    %264 = tpu.concatenate %247, %263 in 2 : vector<4x9x16xf32>, vector<4x9x16xf32> -> vector<4x9x32xf32>
    %265 = vector.shape_cast %264 : vector<4x9x32xf32> to vector<36x32xf32>
    %c1_114 = arith.constant 1 : index
    %c0_115 = arith.constant 0 : index
    %c0_116 = arith.constant 0 : index
    %266 = vector.load %arg7[%c1_114, %c0_115, %c0_116] : memref<2x32x32xf32, #tpu.memory_space<vmem>>, vector<1x32x32xf32>
    %267 = vector.shape_cast %266 : vector<1x32x32xf32> to vector<32x32xf32>
    %cst_117 = arith.constant dense<0.000000e+00> : vector<36x32xf32>
    %268 = tpu.matmul %265, %267, %cst_117 {dimension_numbers = #tpu.dot_dimension_numbers<[1], [0], [0], [1], [0, 0, 1, 1], [], []>} : vector<36x32xf32>, vector<32x32xf32>, vector<36x32xf32> -> vector<36x32xf32>
    %c1_118 = arith.constant 1 : index
    %c0_119 = arith.constant 0 : index
    %c0_120 = arith.constant 0 : index
    %269 = vector.load %arg8[%c1_118, %c0_119, %c0_120] : memref<2x1x32xf32, #tpu.memory_space<vmem>>, vector<1x1x32xf32>
    %270 = vector.shape_cast %269 : vector<1x1x32xf32> to vector<1x32xf32>
    %271 = vector.broadcast %270 : vector<1x32xf32> to vector<36x32xf32>
    %272 = arith.addf %268, %271 : vector<36x32xf32>
    %273 = arith.addf %272, %204 : vector<36x32xf32>
    %c1_121 = arith.constant 1 : index
    %c0_122 = arith.constant 0 : index
    %c0_123 = arith.constant 0 : index
    %274 = vector.load %arg9[%c1_121, %c0_122, %c0_123] : memref<2x1x32xf32, #tpu.memory_space<vmem>>, vector<1x1x32xf32>
    %275 = vector.shape_cast %274 : vector<1x1x32xf32> to vector<1x32xf32>
    %c1_124 = arith.constant 1 : index
    %c0_125 = arith.constant 0 : index
    %c0_126 = arith.constant 0 : index
    %276 = vector.load %arg10[%c1_124, %c0_125, %c0_126] : memref<2x1x32xf32, #tpu.memory_space<vmem>>, vector<1x1x32xf32>
    %277 = vector.shape_cast %276 : vector<1x1x32xf32> to vector<1x32xf32>
    %cst_127 = arith.constant dense<0.000000e+00> : vector<36xf32>
    %278 = vector.multi_reduction <add>, %273, %cst_127 [1] : vector<36x32xf32> to vector<36xf32>
    %279 = vector.shape_cast %278 : vector<36xf32> to vector<36x1xf32>
    %cst_128 = arith.constant 3.200000e+01 : f32
    %280 = vector.broadcast %cst_128 : f32 to vector<36x1xf32>
    %281 = arith.divf %279, %280 : vector<36x1xf32>
    %282 = vector.broadcast %281 : vector<36x1xf32> to vector<36x32xf32>
    %283 = arith.subf %273, %282 : vector<36x32xf32>
    %284 = arith.mulf %283, %283 : vector<36x32xf32>
    %cst_129 = arith.constant dense<0.000000e+00> : vector<36xf32>
    %285 = vector.multi_reduction <add>, %284, %cst_129 [1] : vector<36x32xf32> to vector<36xf32>
    %286 = vector.shape_cast %285 : vector<36xf32> to vector<36x1xf32>
    %cst_130 = arith.constant 3.200000e+01 : f32
    %287 = vector.broadcast %cst_130 : f32 to vector<36x1xf32>
    %288 = arith.divf %286, %287 : vector<36x1xf32>
    %cst_131 = arith.constant 9.99999996E-13 : f32
    %289 = vector.broadcast %cst_131 : f32 to vector<36x1xf32>
    %290 = arith.addf %288, %289 : vector<36x1xf32>
    %291 = math.rsqrt %290 : vector<36x1xf32>
    %292 = vector.broadcast %291 : vector<36x1xf32> to vector<36x32xf32>
    %293 = arith.mulf %283, %292 : vector<36x32xf32>
    %294 = vector.broadcast %275 : vector<1x32xf32> to vector<36x32xf32>
    %295 = arith.mulf %293, %294 : vector<36x32xf32>
    %296 = vector.broadcast %277 : vector<1x32xf32> to vector<36x32xf32>
    %297 = arith.addf %295, %296 : vector<36x32xf32>
    %c1_132 = arith.constant 1 : index
    %c0_133 = arith.constant 0 : index
    %c0_134 = arith.constant 0 : index
    %298 = vector.load %arg11[%c1_132, %c0_133, %c0_134] : memref<2x32x64xf32, #tpu.memory_space<vmem>>, vector<1x32x64xf32>
    %299 = vector.shape_cast %298 : vector<1x32x64xf32> to vector<32x64xf32>
    %cst_135 = arith.constant dense<0.000000e+00> : vector<36x64xf32>
    %300 = tpu.matmul %297, %299, %cst_135 {dimension_numbers = #tpu.dot_dimension_numbers<[1], [0], [0], [1], [0, 0, 1, 1], [], []>} : vector<36x32xf32>, vector<32x64xf32>, vector<36x64xf32> -> vector<36x64xf32>
    %c1_136 = arith.constant 1 : index
    %c0_137 = arith.constant 0 : index
    %c0_138 = arith.constant 0 : index
    %301 = vector.load %arg12[%c1_136, %c0_137, %c0_138] : memref<2x1x64xf32, #tpu.memory_space<vmem>>, vector<1x1x64xf32>
    %302 = vector.shape_cast %301 : vector<1x1x64xf32> to vector<1x64xf32>
    %303 = vector.broadcast %302 : vector<1x64xf32> to vector<36x64xf32>
    %304 = arith.addf %300, %303 : vector<36x64xf32>
    %cst_139 = arith.constant 5.000000e-01 : f32
    %305 = vector.broadcast %cst_139 : f32 to vector<36x64xf32>
    %306 = arith.mulf %305, %304 : vector<36x64xf32>
    %cst_140 = arith.constant 0.707106769 : f32
    %307 = vector.broadcast %cst_140 : f32 to vector<36x64xf32>
    %308 = arith.mulf %304, %307 : vector<36x64xf32>
    %cst_141 = arith.constant 0.000000e+00 : f32
    %309 = vector.broadcast %cst_141 : f32 to vector<36x64xf32>
    %310 = arith.cmpf oge, %308, %309 : vector<36x64xf32>
    %cst_142 = arith.constant 1.000000e+00 : f32
    %cst_143 = arith.constant -1.000000e+00 : f32
    %311 = vector.broadcast %cst_142 : f32 to vector<36x64xf32>
    %312 = vector.broadcast %cst_143 : f32 to vector<36x64xf32>
    %313 = arith.select %310, %311, %312 : vector<36x64xi1>, vector<36x64xf32>
    %314 = math.absf %308 : vector<36x64xf32>
    %cst_144 = arith.constant 0.327591091 : f32
    %315 = vector.broadcast %cst_144 : f32 to vector<36x64xf32>
    %316 = arith.mulf %315, %314 : vector<36x64xf32>
    %cst_145 = arith.constant 1.000000e+00 : f32
    %317 = vector.broadcast %cst_145 : f32 to vector<36x64xf32>
    %318 = arith.addf %317, %316 : vector<36x64xf32>
    %cst_146 = arith.constant 1.000000e+00 : f32
    %319 = vector.broadcast %cst_146 : f32 to vector<36x64xf32>
    %320 = arith.divf %319, %318 : vector<36x64xf32>
    %cst_147 = arith.constant 1.06140542 : f32
    %321 = vector.broadcast %cst_147 : f32 to vector<36x64xf32>
    %322 = arith.mulf %321, %320 : vector<36x64xf32>
    %cst_148 = arith.constant -1.45315206 : f32
    %323 = vector.broadcast %cst_148 : f32 to vector<36x64xf32>
    %324 = arith.addf %322, %323 : vector<36x64xf32>
    %325 = arith.mulf %324, %320 : vector<36x64xf32>
    %cst_149 = arith.constant 1.42141378 : f32
    %326 = vector.broadcast %cst_149 : f32 to vector<36x64xf32>
    %327 = arith.addf %325, %326 : vector<36x64xf32>
    %328 = arith.mulf %327, %320 : vector<36x64xf32>
    %cst_150 = arith.constant -0.284496725 : f32
    %329 = vector.broadcast %cst_150 : f32 to vector<36x64xf32>
    %330 = arith.addf %328, %329 : vector<36x64xf32>
    %331 = arith.mulf %330, %320 : vector<36x64xf32>
    %cst_151 = arith.constant 0.254829586 : f32
    %332 = vector.broadcast %cst_151 : f32 to vector<36x64xf32>
    %333 = arith.addf %331, %332 : vector<36x64xf32>
    %334 = arith.mulf %333, %320 : vector<36x64xf32>
    %cst_152 = arith.constant 0.000000e+00 : f32
    %335 = vector.broadcast %cst_152 : f32 to vector<36x64xf32>
    %336 = arith.subf %335, %314 : vector<36x64xf32>
    %337 = arith.mulf %336, %314 : vector<36x64xf32>
    %338 = math.exp %337 : vector<36x64xf32>
    %339 = arith.mulf %334, %338 : vector<36x64xf32>
    %cst_153 = arith.constant 1.000000e+00 : f32
    %340 = vector.broadcast %cst_153 : f32 to vector<36x64xf32>
    %341 = arith.subf %340, %339 : vector<36x64xf32>
    %342 = arith.mulf %313, %341 : vector<36x64xf32>
    %cst_154 = arith.constant 1.000000e+00 : f32
    %343 = vector.broadcast %cst_154 : f32 to vector<36x64xf32>
    %344 = arith.addf %343, %342 : vector<36x64xf32>
    %345 = arith.mulf %306, %344 : vector<36x64xf32>
    %c1_155 = arith.constant 1 : index
    %c0_156 = arith.constant 0 : index
    %c0_157 = arith.constant 0 : index
    %346 = vector.load %arg13[%c1_155, %c0_156, %c0_157] : memref<2x64x32xf32, #tpu.memory_space<vmem>>, vector<1x64x32xf32>
    %347 = vector.shape_cast %346 : vector<1x64x32xf32> to vector<64x32xf32>
    %cst_158 = arith.constant dense<0.000000e+00> : vector<36x32xf32>
    %348 = tpu.matmul %345, %347, %cst_158 {dimension_numbers = #tpu.dot_dimension_numbers<[1], [0], [0], [1], [0, 0, 1, 1], [], []>} : vector<36x64xf32>, vector<64x32xf32>, vector<36x32xf32> -> vector<36x32xf32>
    %c1_159 = arith.constant 1 : index
    %c0_160 = arith.constant 0 : index
    %c0_161 = arith.constant 0 : index
    %349 = vector.load %arg14[%c1_159, %c0_160, %c0_161] : memref<2x1x32xf32, #tpu.memory_space<vmem>>, vector<1x1x32xf32>
    %350 = vector.shape_cast %349 : vector<1x1x32xf32> to vector<1x32xf32>
    %351 = vector.broadcast %350 : vector<1x32xf32> to vector<36x32xf32>
    %352 = arith.addf %348, %351 : vector<36x32xf32>
    %353 = arith.addf %352, %297 : vector<36x32xf32>
    %c1_162 = arith.constant 1 : index
    %c0_163 = arith.constant 0 : index
    %c0_164 = arith.constant 0 : index
    %354 = vector.load %arg15[%c1_162, %c0_163, %c0_164] : memref<2x1x32xf32, #tpu.memory_space<vmem>>, vector<1x1x32xf32>
    %355 = vector.shape_cast %354 : vector<1x1x32xf32> to vector<1x32xf32>
    %c1_165 = arith.constant 1 : index
    %c0_166 = arith.constant 0 : index
    %c0_167 = arith.constant 0 : index
    %356 = vector.load %arg16[%c1_165, %c0_166, %c0_167] : memref<2x1x32xf32, #tpu.memory_space<vmem>>, vector<1x1x32xf32>
    %357 = vector.shape_cast %356 : vector<1x1x32xf32> to vector<1x32xf32>
    %cst_168 = arith.constant dense<0.000000e+00> : vector<36xf32>
    %358 = vector.multi_reduction <add>, %353, %cst_168 [1] : vector<36x32xf32> to vector<36xf32>
    %359 = vector.shape_cast %358 : vector<36xf32> to vector<36x1xf32>
    %cst_169 = arith.constant 3.200000e+01 : f32
    %360 = vector.broadcast %cst_169 : f32 to vector<36x1xf32>
    %361 = arith.divf %359, %360 : vector<36x1xf32>
    %362 = vector.broadcast %361 : vector<36x1xf32> to vector<36x32xf32>
    %363 = arith.subf %353, %362 : vector<36x32xf32>
    %364 = arith.mulf %363, %363 : vector<36x32xf32>
    %cst_170 = arith.constant dense<0.000000e+00> : vector<36xf32>
    %365 = vector.multi_reduction <add>, %364, %cst_170 [1] : vector<36x32xf32> to vector<36xf32>
    %366 = vector.shape_cast %365 : vector<36xf32> to vector<36x1xf32>
    %cst_171 = arith.constant 3.200000e+01 : f32
    %367 = vector.broadcast %cst_171 : f32 to vector<36x1xf32>
    %368 = arith.divf %366, %367 : vector<36x1xf32>
    %cst_172 = arith.constant 9.99999996E-13 : f32
    %369 = vector.broadcast %cst_172 : f32 to vector<36x1xf32>
    %370 = arith.addf %368, %369 : vector<36x1xf32>
    %371 = math.rsqrt %370 : vector<36x1xf32>
    %372 = vector.broadcast %371 : vector<36x1xf32> to vector<36x32xf32>
    %373 = arith.mulf %363, %372 : vector<36x32xf32>
    %374 = vector.broadcast %355 : vector<1x32xf32> to vector<36x32xf32>
    %375 = arith.mulf %373, %374 : vector<36x32xf32>
    %376 = vector.broadcast %357 : vector<1x32xf32> to vector<36x32xf32>
    %377 = arith.addf %375, %376 : vector<36x32xf32>
    %378 = vector.shape_cast %377 : vector<36x32xf32> to vector<4x9x32xf32>
    %379 = vector.extract_strided_slice %378 {offsets = [0, 0, 0], sizes = [4, 1, 32], strides = [1, 1, 1]} : vector<4x9x32xf32> to vector<4x1x32xf32>
    %c0_173 = arith.constant 0 : index
    %c0_174 = arith.constant 0 : index
    %c0_175 = arith.constant 0 : index
    %380 = vector.load %arg20[%c0_173, %c0_174, %c0_175] : memref<4x1x32xf32, #tpu.memory_space<vmem>>, vector<4x1x32xf32>
    tpu.vector_store %arg20[%c0_173, %c0_174, %c0_175], %379 {strides = array<i32>} : memref<4x1x32xf32, #tpu.memory_space<vmem>>, vector<4x1x32xf32>,
    return
  }
  func.func @transform_0(%arg0: i32) -> (i32, i32, i32) {
    %c0_i32 = arith.constant 0 : i32
    %c0_i32_0 = arith.constant 0 : i32
    %c0_i32_1 = arith.constant 0 : i32
    return %arg0, %c0_i32, %c0_i32_0 : i32, i32, i32
  }
  func.func @transform_1(%arg0: i32) -> (i32, i32) {
    %c0_i32 = arith.constant 0 : i32
    %c0_i32_0 = arith.constant 0 : i32
    %c0_i32_1 = arith.constant 0 : i32
    return %c0_i32, %c0_i32_0 : i32, i32
  }
  func.func @transform_2(%arg0: i32) -> (i32, i32) {
    %c0_i32 = arith.constant 0 : i32
    %c0_i32_0 = arith.constant 0 : i32
    %c0_i32_1 = arith.constant 0 : i32
    return %c0_i32, %c0_i32_0 : i32, i32
  }
  func.func @transform_3(%arg0: i32) -> (i32, i32) {
    %c0_i32 = arith.constant 0 : i32
    %c0_i32_0 = arith.constant 0 : i32
    %c0_i32_1 = arith.constant 0 : i32
    return %c0_i32, %c0_i32_0 : i32, i32
  }
  func.func @transform_4(%arg0: i32) -> (i32, i32, i32) {
    %c0_i32 = arith.constant 0 : i32
    %c0_i32_0 = arith.constant 0 : i32
    %c0_i32_1 = arith.constant 0 : i32
    %c0_i32_2 = arith.constant 0 : i32
    return %c0_i32, %c0_i32_0, %c0_i32_1 : i32, i32, i32
  }
  func.func @transform_5(%arg0: i32) -> (i32, i32, i32) {
    %c0_i32 = arith.constant 0 : i32
    %c0_i32_0 = arith.constant 0 : i32
    %c0_i32_1 = arith.constant 0 : i32
    %c0_i32_2 = arith.constant 0 : i32
    return %c0_i32, %c0_i32_0, %c0_i32_1 : i32, i32, i32
  }
  func.func @transform_6(%arg0: i32) -> (i32, i32, i32) {
    %c0_i32 = arith.constant 0 : i32
    %c0_i32_0 = arith.constant 0 : i32
    %c0_i32_1 = arith.constant 0 : i32
    %c0_i32_2 = arith.constant 0 : i32
    return %c0_i32, %c0_i32_0, %c0_i32_1 : i32, i32, i32
  }
  func.func @transform_7(%arg0: i32) -> (i32, i32, i32) {
    %c0_i32 = arith.constant 0 : i32
    %c0_i32_0 = arith.constant 0 : i32
    %c0_i32_1 = arith.constant 0 : i32
    %c0_i32_2 = arith.constant 0 : i32
    return %c0_i32, %c0_i32_0, %c0_i32_1 : i32, i32, i32
  }
  func.func @transform_8(%arg0: i32) -> (i32, i32, i32) {
    %c0_i32 = arith.constant 0 : i32
    %c0_i32_0 = arith.constant 0 : i32
    %c0_i32_1 = arith.constant 0 : i32
    %c0_i32_2 = arith.constant 0 : i32
    return %c0_i32, %c0_i32_0, %c0_i32_1 : i32, i32, i32
  }
  func.func @transform_9(%arg0: i32) -> (i32, i32, i32) {
    %c0_i32 = arith.constant 0 : i32
    %c0_i32_0 = arith.constant 0 : i32
    %c0_i32_1 = arith.constant 0 : i32
    %c0_i32_2 = arith.constant 0 : i32
    return %c0_i32, %c0_i32_0, %c0_i32_1 : i32, i32, i32
  }
  func.func @transform_10(%arg0: i32) -> (i32, i32, i32) {
    %c0_i32 = arith.constant 0 : i32
    %c0_i32_0 = arith.constant 0 : i32
    %c0_i32_1 = arith.constant 0 : i32
    %c0_i32_2 = arith.constant 0 : i32
    return %c0_i32, %c0_i32_0, %c0_i32_1 : i32, i32, i32
  }
  func.func @transform_11(%arg0: i32) -> (i32, i32, i32) {
    %c0_i32 = arith.constant 0 : i32
    %c0_i32_0 = arith.constant 0 : i32
    %c0_i32_1 = arith.constant 0 : i32
    %c0_i32_2 = arith.constant 0 : i32
    return %c0_i32, %c0_i32_0, %c0_i32_1 : i32, i32, i32
  }
  func.func @transform_12(%arg0: i32) -> (i32, i32, i32) {
    %c0_i32 = arith.constant 0 : i32
    %c0_i32_0 = arith.constant 0 : i32
    %c0_i32_1 = arith.constant 0 : i32
    %c0_i32_2 = arith.constant 0 : i32
    return %c0_i32, %c0_i32_0, %c0_i32_1 : i32, i32, i32
  }
  func.func @transform_13(%arg0: i32) -> (i32, i32, i32) {
    %c0_i32 = arith.constant 0 : i32
    %c0_i32_0 = arith.constant 0 : i32
    %c0_i32_1 = arith.constant 0 : i32
    %c0_i32_2 = arith.constant 0 : i32
    return %c0_i32, %c0_i32_0, %c0_i32_1 : i32, i32, i32
  }
  func.func @transform_14(%arg0: i32) -> (i32, i32, i32) {
    %c0_i32 = arith.constant 0 : i32
    %c0_i32_0 = arith.constant 0 : i32
    %c0_i32_1 = arith.constant 0 : i32
    %c0_i32_2 = arith.constant 0 : i32
    return %c0_i32, %c0_i32_0, %c0_i32_1 : i32, i32, i32
  }
  func.func @transform_15(%arg0: i32) -> (i32, i32, i32) {
    %c0_i32 = arith.constant 0 : i32
    %c0_i32_0 = arith.constant 0 : i32
    %c0_i32_1 = arith.constant 0 : i32
    %c0_i32_2 = arith.constant 0 : i32
    return %c0_i32, %c0_i32_0, %c0_i32_1 : i32, i32, i32
  }
  func.func @transform_16(%arg0: i32) -> (i32, i32) {
    %c0_i32 = arith.constant 0 : i32
    %c0_i32_0 = arith.constant 0 : i32
    %c0_i32_1 = arith.constant 0 : i32
    return %c0_i32, %c0_i32_0 : i32, i32
  }
  func.func @transform_17(%arg0: i32) -> (i32, i32) {
    %c0_i32 = arith.constant 0 : i32
    %c0_i32_0 = arith.constant 0 : i32
    %c0_i32_1 = arith.constant 0 : i32
    return %c0_i32, %c0_i32_0 : i32, i32
  }
  func.func @transform_18(%arg0: i32) -> (i32, i32) {
    %c0_i32 = arith.constant 0 : i32
    %c0_i32_0 = arith.constant 0 : i32
    %c0_i32_1 = arith.constant 0 : i32
    return %c0_i32, %c0_i32_0 : i32, i32
  }
  func.func @transform_19(%arg0: i32) -> (i32, i32, i32) {
    %c0_i32 = arith.constant 0 : i32
    %c0_i32_0 = arith.constant 0 : i32
    %c0_i32_1 = arith.constant 0 : i32
    return %arg0, %c0_i32, %c0_i32_0 : i32, i32, i32
  }
}

module attributes {stable_mosaic.version = 11 : i64} {
  func.func @_roformer_stack_kernel(%arg0: i32, %arg1: memref<2xi32, #tpu.memory_space<smem>>, %arg2: memref<1x5x32xf32, #tpu.memory_space<vmem>>, %arg3: memref<1x32xf32, #tpu.memory_space<vmem>>, %arg4: memref<1x32xf32, #tpu.memory_space<vmem>>, %arg5: memref<1x32xf32, #tpu.memory_space<vmem>>, %arg6: memref<2x32x96xf32, #tpu.memory_space<vmem>>, %arg7: memref<2x1x96xf32, #tpu.memory_space<vmem>>, %arg8: memref<2x32x32xf32, #tpu.memory_space<vmem>>, %arg9: memref<2x1x32xf32, #tpu.memory_space<vmem>>, %arg10: memref<2x1x32xf32, #tpu.memory_space<vmem>>, %arg11: memref<2x1x32xf32, #tpu.memory_space<vmem>>, %arg12: memref<2x32x64xf32, #tpu.memory_space<vmem>>, %arg13: memref<2x1x64xf32, #tpu.memory_space<vmem>>, %arg14: memref<2x64x32xf32, #tpu.memory_space<vmem>>, %arg15: memref<2x1x32xf32, #tpu.memory_space<vmem>>, %arg16: memref<2x1x32xf32, #tpu.memory_space<vmem>>, %arg17: memref<2x1x32xf32, #tpu.memory_space<vmem>>, %arg18: memref<32x32xf32, #tpu.memory_space<vmem>>, %arg19: memref<5x32xf32, #tpu.memory_space<vmem>>, %arg20: memref<5x32xf32, #tpu.memory_space<vmem>>, %arg21: memref<32x128xf32, #tpu.memory_space<vmem>>, %arg22: memref<1x128xf32, #tpu.memory_space<vmem>>, %arg23: memref<1x5x128xf32, #tpu.memory_space<vmem>>) attributes {dimension_semantics = [#tpu.dimension_semantics<parallel>], iteration_bounds = array<i64: 2>, scalar_prefetch = 1 : i64, scratch_operands = 0 : i64, tpu.core_type = #tpu.core_type<tc>, window_params = [{transform_indices = @transform_0, window_bounds = array<i64: 1, 5, 32>}, {pipeline_mode = #tpu.pipeline_mode<synchronous>, transform_indices = @transform_1, window_bounds = array<i64: 1, 32>}, {pipeline_mode = #tpu.pipeline_mode<synchronous>, transform_indices = @transform_2, window_bounds = array<i64: 1, 32>}, {pipeline_mode = #tpu.pipeline_mode<synchronous>, transform_indices = @transform_3, window_bounds = array<i64: 1, 32>}, {pipeline_mode = #tpu.pipeline_mode<synchronous>, transform_indices = @transform_4, window_bounds = array<i64: 2, 32, 96>}, {pipeline_mode = #tpu.pipeline_mode<synchronous>, transform_indices = @transform_5, window_bounds = array<i64: 2, 1, 96>}, {pipeline_mode = #tpu.pipeline_mode<synchronous>, transform_indices = @transform_6, window_bounds = array<i64: 2, 32, 32>}, {pipeline_mode = #tpu.pipeline_mode<synchronous>, transform_indices = @transform_7, window_bounds = array<i64: 2, 1, 32>}, {pipeline_mode = #tpu.pipeline_mode<synchronous>, transform_indices = @transform_8, window_bounds = array<i64: 2, 1, 32>}, {pipeline_mode = #tpu.pipeline_mode<synchronous>, transform_indices = @transform_9, window_bounds = array<i64: 2, 1, 32>}, {pipeline_mode = #tpu.pipeline_mode<synchronous>, transform_indices = @transform_10, window_bounds = array<i64: 2, 32, 64>}, {pipeline_mode = #tpu.pipeline_mode<synchronous>, transform_indices = @transform_11, window_bounds = array<i64: 2, 1, 64>}, {pipeline_mode = #tpu.pipeline_mode<synchronous>, transform_indices = @transform_12, window_bounds = array<i64: 2, 64, 32>}, {pipeline_mode = #tpu.pipeline_mode<synchronous>, transform_indices = @transform_13, window_bounds = array<i64: 2, 1, 32>}, {pipeline_mode = #tpu.pipeline_mode<synchronous>, transform_indices = @transform_14, window_bounds = array<i64: 2, 1, 32>}, {pipeline_mode = #tpu.pipeline_mode<synchronous>, transform_indices = @transform_15, window_bounds = array<i64: 2, 1, 32>}, {pipeline_mode = #tpu.pipeline_mode<synchronous>, transform_indices = @transform_16, window_bounds = array<i64: 32, 32>}, {pipeline_mode = #tpu.pipeline_mode<synchronous>, transform_indices = @transform_17, window_bounds = array<i64: 5, 32>}, {pipeline_mode = #tpu.pipeline_mode<synchronous>, transform_indices = @transform_18, window_bounds = array<i64: 5, 32>}, {pipeline_mode = #tpu.pipeline_mode<synchronous>, transform_indices = @transform_19, window_bounds = array<i64: 32, 128>}, {pipeline_mode = #tpu.pipeline_mode<synchronous>, transform_indices = @transform_20, window_bounds = array<i64: 1, 128>}, {transform_indices = @transform_21, window_bounds = array<i64: 1, 5, 128>}]} {
    %c0 = arith.constant 0 : index
    %c0_0 = arith.constant 0 : index
    %c0_1 = arith.constant 0 : index
    %0 = vector.load %arg2[%c0, %c0_0, %c0_1] : memref<1x5x32xf32, #tpu.memory_space<vmem>>, vector<1x5x32xf32>
    %1 = vector.shape_cast %0 : vector<1x5x32xf32> to vector<5x32xf32>
    %c0_2 = arith.constant 0 : index
    %c0_3 = arith.constant 0 : index
    %2 = vector.load %arg3[%c0_2, %c0_3] : memref<1x32xf32, #tpu.memory_space<vmem>>, vector<1x32xf32>
    %3 = vector.broadcast %2 : vector<1x32xf32> to vector<5x32xf32>
    %4 = arith.addf %1, %3 : vector<5x32xf32>
    %c0_4 = arith.constant 0 : index
    %c0_5 = arith.constant 0 : index
    %5 = vector.load %arg4[%c0_4, %c0_5] : memref<1x32xf32, #tpu.memory_space<vmem>>, vector<1x32xf32>
    %c0_6 = arith.constant 0 : index
    %c0_7 = arith.constant 0 : index
    %6 = vector.load %arg5[%c0_6, %c0_7] : memref<1x32xf32, #tpu.memory_space<vmem>>, vector<1x32xf32>
    %cst = arith.constant dense<0.000000e+00> : vector<5xf32>
    %7 = vector.multi_reduction <add>, %4, %cst [1] : vector<5x32xf32> to vector<5xf32>
    %8 = vector.shape_cast %7 : vector<5xf32> to vector<5x1xf32>
    %cst_8 = arith.constant 3.200000e+01 : f32
    %9 = vector.broadcast %cst_8 : f32 to vector<5x1xf32>
    %10 = arith.divf %8, %9 : vector<5x1xf32>
    %11 = vector.broadcast %10 : vector<5x1xf32> to vector<5x32xf32>
    %12 = arith.subf %4, %11 : vector<5x32xf32>
    %13 = arith.mulf %12, %12 : vector<5x32xf32>
    %cst_9 = arith.constant dense<0.000000e+00> : vector<5xf32>
    %14 = vector.multi_reduction <add>, %13, %cst_9 [1] : vector<5x32xf32> to vector<5xf32>
    %15 = vector.shape_cast %14 : vector<5xf32> to vector<5x1xf32>
    %cst_10 = arith.constant 3.200000e+01 : f32
    %16 = vector.broadcast %cst_10 : f32 to vector<5x1xf32>
    %17 = arith.divf %15, %16 : vector<5x1xf32>
    %cst_11 = arith.constant 9.99999996E-13 : f32
    %18 = vector.broadcast %cst_11 : f32 to vector<5x1xf32>
    %19 = arith.addf %17, %18 : vector<5x1xf32>
    %20 = math.rsqrt %19 : vector<5x1xf32>
    %21 = vector.broadcast %20 : vector<5x1xf32> to vector<5x32xf32>
    %22 = arith.mulf %12, %21 : vector<5x32xf32>
    %23 = vector.broadcast %5 : vector<1x32xf32> to vector<5x32xf32>
    %24 = arith.mulf %22, %23 : vector<5x32xf32>
    %25 = vector.broadcast %6 : vector<1x32xf32> to vector<5x32xf32>
    %26 = arith.addf %24, %25 : vector<5x32xf32>
    %c0_12 = arith.constant 0 : index
    %c0_13 = arith.constant 0 : index
    %27 = vector.load %arg19[%c0_12, %c0_13] : memref<5x32xf32, #tpu.memory_space<vmem>>, vector<5x32xf32>
    %28 = vector.shape_cast %27 : vector<5x32xf32> to vector<1x5x32xf32>
    %c0_14 = arith.constant 0 : index
    %c0_15 = arith.constant 0 : index
    %29 = vector.load %arg20[%c0_14, %c0_15] : memref<5x32xf32, #tpu.memory_space<vmem>>, vector<5x32xf32>
    %30 = vector.shape_cast %29 : vector<5x32xf32> to vector<1x5x32xf32>
    %c0_16 = arith.constant 0 : index
    %c0_17 = arith.constant 0 : index
    %31 = vector.load %arg18[%c0_16, %c0_17] : memref<32x32xf32, #tpu.memory_space<vmem>>, vector<32x32xf32>
    %c1_i32 = arith.constant 1 : i32
    %32 = arith.muli %arg0, %c1_i32 : i32
    %c0_i32 = arith.constant 0 : i32
    %33 = arith.addi %32, %c0_i32 : i32
    %34 = arith.index_cast %33 : i32 to index
    %35 = memref.load %arg1[%34] : memref<2xi32, #tpu.memory_space<smem>>
    %36 = tpu.iota {dimensions = array<i32: 2>} : vector<1x1x5xi32>
    %37 = vector.broadcast %35 : i32 to vector<1x1x5xi32>
    %38 = arith.cmpi slt, %36, %37 : vector<1x1x5xi32>
    %cst_18 = arith.constant 0.000000e+00 : f32
    %cst_19 = arith.constant -1.000000e+30 : f32
    %39 = vector.broadcast %cst_18 : f32 to vector<1x1x5xf32>
    %40 = vector.broadcast %cst_19 : f32 to vector<1x1x5xf32>
    %41 = arith.select %38, %39, %40 : vector<1x1x5xi1>, vector<1x1x5xf32>
    %c0_20 = arith.constant 0 : index
    %c0_21 = arith.constant 0 : index
    %c0_22 = arith.constant 0 : index
    %42 = vector.load %arg6[%c0_20, %c0_21, %c0_22] : memref<2x32x96xf32, #tpu.memory_space<vmem>>, vector<1x32x96xf32>
    %43 = vector.shape_cast %42 : vector<1x32x96xf32> to vector<32x96xf32>
    %cst_23 = arith.constant dense<0.000000e+00> : vector<5x96xf32>
    %44 = tpu.matmul %26, %43, %cst_23 {dimension_numbers = #tpu.dot_dimension_numbers<[1], [0], [0], [1], [0, 0, 1, 1], [], []>} : vector<5x32xf32>, vector<32x96xf32>, vector<5x96xf32> -> vector<5x96xf32>
    %c0_24 = arith.constant 0 : index
    %c0_25 = arith.constant 0 : index
    %c0_26 = arith.constant 0 : index
    %45 = vector.load %arg7[%c0_24, %c0_25, %c0_26] : memref<2x1x96xf32, #tpu.memory_space<vmem>>, vector<1x1x96xf32>
    %46 = vector.shape_cast %45 : vector<1x1x96xf32> to vector<1x96xf32>
    %47 = vector.broadcast %46 : vector<1x96xf32> to vector<5x96xf32>
    %48 = arith.addf %44, %47 : vector<5x96xf32>
    %49 = vector.extract_strided_slice %48 {offsets = [0, 0], sizes = [5, 32], strides = [1, 1]} : vector<5x96xf32> to vector<5x32xf32>
    %50 = vector.extract_strided_slice %48 {offsets = [0, 32], sizes = [5, 32], strides = [1, 1]} : vector<5x96xf32> to vector<5x32xf32>
    %51 = vector.extract_strided_slice %48 {offsets = [0, 64], sizes = [5, 32], strides = [1, 1]} : vector<5x96xf32> to vector<5x32xf32>
    %cst_27 = arith.constant dense<0.000000e+00> : vector<5x32xf32>
    %52 = tpu.matmul %49, %31, %cst_27 {dimension_numbers = #tpu.dot_dimension_numbers<[1], [0], [0], [1], [0, 0, 1, 1], [], []>} : vector<5x32xf32>, vector<32x32xf32>, vector<5x32xf32> -> vector<5x32xf32>
    %cst_28 = arith.constant dense<0.000000e+00> : vector<5x32xf32>
    %53 = tpu.matmul %50, %31, %cst_28 {dimension_numbers = #tpu.dot_dimension_numbers<[1], [0], [0], [1], [0, 0, 1, 1], [], []>} : vector<5x32xf32>, vector<32x32xf32>, vector<5x32xf32> -> vector<5x32xf32>
    %54 = vector.shape_cast %49 : vector<5x32xf32> to vector<1x5x32xf32>
    %55 = arith.mulf %54, %30 : vector<1x5x32xf32>
    %56 = vector.shape_cast %52 : vector<5x32xf32> to vector<1x5x32xf32>
    %57 = arith.mulf %56, %28 : vector<1x5x32xf32>
    %58 = arith.addf %55, %57 : vector<1x5x32xf32>
    %59 = vector.shape_cast %50 : vector<5x32xf32> to vector<1x5x32xf32>
    %60 = arith.mulf %59, %30 : vector<1x5x32xf32>
    %61 = vector.shape_cast %53 : vector<5x32xf32> to vector<1x5x32xf32>
    %62 = arith.mulf %61, %28 : vector<1x5x32xf32>
    %63 = arith.addf %60, %62 : vector<1x5x32xf32>
    %64 = vector.shape_cast %51 : vector<5x32xf32> to vector<1x5x32xf32>
    %65 = vector.extract_strided_slice %58 {offsets = [0, 0, 0], sizes = [1, 5, 16], strides = [1, 1, 1]} : vector<1x5x32xf32> to vector<1x5x16xf32>
    %66 = vector.extract_strided_slice %63 {offsets = [0, 0, 0], sizes = [1, 5, 16], strides = [1, 1, 1]} : vector<1x5x32xf32> to vector<1x5x16xf32>
    %67 = vector.extract_strided_slice %64 {offsets = [0, 0, 0], sizes = [1, 5, 16], strides = [1, 1, 1]} : vector<1x5x32xf32> to vector<1x5x16xf32>
    "tpu.trace_start"() <{level = 10 : i32, message = "bqd,bkd->bqk"}> : () -> ()
    %cst_29 = arith.constant dense<0.000000e+00> : vector<1x5x5xf32>
    %68 = tpu.matmul %65, %66, %cst_29 {dimension_numbers = #tpu.dot_dimension_numbers<[2], [2], [1], [1], [0, 0, 0, 1, 1, 1], [0], [0]>} : vector<1x5x16xf32>, vector<1x5x16xf32>, vector<1x5x5xf32> -> vector<1x5x5xf32>
    "tpu.trace_stop"() : () -> ()
    %cst_30 = arith.constant 2.500000e-01 : f32
    %69 = vector.broadcast %cst_30 : f32 to vector<1x5x5xf32>
    %70 = arith.mulf %68, %69 : vector<1x5x5xf32>
    %71 = vector.broadcast %41 : vector<1x1x5xf32> to vector<1x5x5xf32>
    %72 = arith.addf %70, %71 : vector<1x5x5xf32>
    %cst_31 = arith.constant dense<0xFF800000> : vector<1x5xf32>
    %73 = vector.multi_reduction <maximumf>, %72, %cst_31 [2] : vector<1x5x5xf32> to vector<1x5xf32>
    %74 = vector.shape_cast %73 : vector<1x5xf32> to vector<1x5x1xf32>
    %75 = vector.broadcast %74 : vector<1x5x1xf32> to vector<1x5x5xf32>
    %76 = arith.subf %72, %75 : vector<1x5x5xf32>
    %77 = math.exp %76 : vector<1x5x5xf32>
    %cst_32 = arith.constant dense<0.000000e+00> : vector<1x5xf32>
    %78 = vector.multi_reduction <add>, %77, %cst_32 [2] : vector<1x5x5xf32> to vector<1x5xf32>
    %79 = vector.shape_cast %78 : vector<1x5xf32> to vector<1x5x1xf32>
    %80 = vector.broadcast %79 : vector<1x5x1xf32> to vector<1x5x5xf32>
    %81 = arith.divf %77, %80 : vector<1x5x5xf32>
    "tpu.trace_start"() <{level = 10 : i32, message = "bqk,bkd->bqd"}> : () -> ()
    %cst_33 = arith.constant dense<0.000000e+00> : vector<1x5x16xf32>
    %82 = tpu.matmul %81, %67, %cst_33 {dimension_numbers = #tpu.dot_dimension_numbers<[2], [1], [1], [2], [0, 0, 0, 1, 1, 2], [0], [0]>} : vector<1x5x5xf32>, vector<1x5x16xf32>, vector<1x5x16xf32> -> vector<1x5x16xf32>
    "tpu.trace_stop"() : () -> ()
    %83 = vector.extract_strided_slice %58 {offsets = [0, 0, 16], sizes = [1, 5, 16], strides = [1, 1, 1]} : vector<1x5x32xf32> to vector<1x5x16xf32>
    %84 = vector.extract_strided_slice %63 {offsets = [0, 0, 16], sizes = [1, 5, 16], strides = [1, 1, 1]} : vector<1x5x32xf32> to vector<1x5x16xf32>
    %85 = vector.extract_strided_slice %64 {offsets = [0, 0, 16], sizes = [1, 5, 16], strides = [1, 1, 1]} : vector<1x5x32xf32> to vector<1x5x16xf32>
    "tpu.trace_start"() <{level = 10 : i32, message = "bqd,bkd->bqk"}> : () -> ()
    %cst_34 = arith.constant dense<0.000000e+00> : vector<1x5x5xf32>
    %86 = tpu.matmul %83, %84, %cst_34 {dimension_numbers = #tpu.dot_dimension_numbers<[2], [2], [1], [1], [0, 0, 0, 1, 1, 1], [0], [0]>} : vector<1x5x16xf32>, vector<1x5x16xf32>, vector<1x5x5xf32> -> vector<1x5x5xf32>
    "tpu.trace_stop"() : () -> ()
    %cst_35 = arith.constant 2.500000e-01 : f32
    %87 = vector.broadcast %cst_35 : f32 to vector<1x5x5xf32>
    %88 = arith.mulf %86, %87 : vector<1x5x5xf32>
    %89 = vector.broadcast %41 : vector<1x1x5xf32> to vector<1x5x5xf32>
    %90 = arith.addf %88, %89 : vector<1x5x5xf32>
    %cst_36 = arith.constant dense<0xFF800000> : vector<1x5xf32>
    %91 = vector.multi_reduction <maximumf>, %90, %cst_36 [2] : vector<1x5x5xf32> to vector<1x5xf32>
    %92 = vector.shape_cast %91 : vector<1x5xf32> to vector<1x5x1xf32>
    %93 = vector.broadcast %92 : vector<1x5x1xf32> to vector<1x5x5xf32>
    %94 = arith.subf %90, %93 : vector<1x5x5xf32>
    %95 = math.exp %94 : vector<1x5x5xf32>
    %cst_37 = arith.constant dense<0.000000e+00> : vector<1x5xf32>
    %96 = vector.multi_reduction <add>, %95, %cst_37 [2] : vector<1x5x5xf32> to vector<1x5xf32>
    %97 = vector.shape_cast %96 : vector<1x5xf32> to vector<1x5x1xf32>
    %98 = vector.broadcast %97 : vector<1x5x1xf32> to vector<1x5x5xf32>
    %99 = arith.divf %95, %98 : vector<1x5x5xf32>
    "tpu.trace_start"() <{level = 10 : i32, message = "bqk,bkd->bqd"}> : () -> ()
    %cst_38 = arith.constant dense<0.000000e+00> : vector<1x5x16xf32>
    %100 = tpu.matmul %99, %85, %cst_38 {dimension_numbers = #tpu.dot_dimension_numbers<[2], [1], [1], [2], [0, 0, 0, 1, 1, 2], [0], [0]>} : vector<1x5x5xf32>, vector<1x5x16xf32>, vector<1x5x16xf32> -> vector<1x5x16xf32>
    "tpu.trace_stop"() : () -> ()
    %101 = tpu.concatenate %82, %100 in 2 : vector<1x5x16xf32>, vector<1x5x16xf32> -> vector<1x5x32xf32>
    %102 = vector.shape_cast %101 : vector<1x5x32xf32> to vector<5x32xf32>
    %c0_39 = arith.constant 0 : index
    %c0_40 = arith.constant 0 : index
    %c0_41 = arith.constant 0 : index
    %103 = vector.load %arg8[%c0_39, %c0_40, %c0_41] : memref<2x32x32xf32, #tpu.memory_space<vmem>>, vector<1x32x32xf32>
    %104 = vector.shape_cast %103 : vector<1x32x32xf32> to vector<32x32xf32>
    %cst_42 = arith.constant dense<0.000000e+00> : vector<5x32xf32>
    %105 = tpu.matmul %102, %104, %cst_42 {dimension_numbers = #tpu.dot_dimension_numbers<[1], [0], [0], [1], [0, 0, 1, 1], [], []>} : vector<5x32xf32>, vector<32x32xf32>, vector<5x32xf32> -> vector<5x32xf32>
    %c0_43 = arith.constant 0 : index
    %c0_44 = arith.constant 0 : index
    %c0_45 = arith.constant 0 : index
    %106 = vector.load %arg9[%c0_43, %c0_44, %c0_45] : memref<2x1x32xf32, #tpu.memory_space<vmem>>, vector<1x1x32xf32>
    %107 = vector.shape_cast %106 : vector<1x1x32xf32> to vector<1x32xf32>
    %108 = vector.broadcast %107 : vector<1x32xf32> to vector<5x32xf32>
    %109 = arith.addf %105, %108 : vector<5x32xf32>
    %110 = arith.addf %109, %26 : vector<5x32xf32>
    %c0_46 = arith.constant 0 : index
    %c0_47 = arith.constant 0 : index
    %c0_48 = arith.constant 0 : index
    %111 = vector.load %arg10[%c0_46, %c0_47, %c0_48] : memref<2x1x32xf32, #tpu.memory_space<vmem>>, vector<1x1x32xf32>
    %112 = vector.shape_cast %111 : vector<1x1x32xf32> to vector<1x32xf32>
    %c0_49 = arith.constant 0 : index
    %c0_50 = arith.constant 0 : index
    %c0_51 = arith.constant 0 : index
    %113 = vector.load %arg11[%c0_49, %c0_50, %c0_51] : memref<2x1x32xf32, #tpu.memory_space<vmem>>, vector<1x1x32xf32>
    %114 = vector.shape_cast %113 : vector<1x1x32xf32> to vector<1x32xf32>
    %cst_52 = arith.constant dense<0.000000e+00> : vector<5xf32>
    %115 = vector.multi_reduction <add>, %110, %cst_52 [1] : vector<5x32xf32> to vector<5xf32>
    %116 = vector.shape_cast %115 : vector<5xf32> to vector<5x1xf32>
    %cst_53 = arith.constant 3.200000e+01 : f32
    %117 = vector.broadcast %cst_53 : f32 to vector<5x1xf32>
    %118 = arith.divf %116, %117 : vector<5x1xf32>
    %119 = vector.broadcast %118 : vector<5x1xf32> to vector<5x32xf32>
    %120 = arith.subf %110, %119 : vector<5x32xf32>
    %121 = arith.mulf %120, %120 : vector<5x32xf32>
    %cst_54 = arith.constant dense<0.000000e+00> : vector<5xf32>
    %122 = vector.multi_reduction <add>, %121, %cst_54 [1] : vector<5x32xf32> to vector<5xf32>
    %123 = vector.shape_cast %122 : vector<5xf32> to vector<5x1xf32>
    %cst_55 = arith.constant 3.200000e+01 : f32
    %124 = vector.broadcast %cst_55 : f32 to vector<5x1xf32>
    %125 = arith.divf %123, %124 : vector<5x1xf32>
    %cst_56 = arith.constant 9.99999996E-13 : f32
    %126 = vector.broadcast %cst_56 : f32 to vector<5x1xf32>
    %127 = arith.addf %125, %126 : vector<5x1xf32>
    %128 = math.rsqrt %127 : vector<5x1xf32>
    %129 = vector.broadcast %128 : vector<5x1xf32> to vector<5x32xf32>
    %130 = arith.mulf %120, %129 : vector<5x32xf32>
    %131 = vector.broadcast %112 : vector<1x32xf32> to vector<5x32xf32>
    %132 = arith.mulf %130, %131 : vector<5x32xf32>
    %133 = vector.broadcast %114 : vector<1x32xf32> to vector<5x32xf32>
    %134 = arith.addf %132, %133 : vector<5x32xf32>
    %c0_57 = arith.constant 0 : index
    %c0_58 = arith.constant 0 : index
    %c0_59 = arith.constant 0 : index
    %135 = vector.load %arg12[%c0_57, %c0_58, %c0_59] : memref<2x32x64xf32, #tpu.memory_space<vmem>>, vector<1x32x64xf32>
    %136 = vector.shape_cast %135 : vector<1x32x64xf32> to vector<32x64xf32>
    %cst_60 = arith.constant dense<0.000000e+00> : vector<5x64xf32>
    %137 = tpu.matmul %134, %136, %cst_60 {dimension_numbers = #tpu.dot_dimension_numbers<[1], [0], [0], [1], [0, 0, 1, 1], [], []>} : vector<5x32xf32>, vector<32x64xf32>, vector<5x64xf32> -> vector<5x64xf32>
    %c0_61 = arith.constant 0 : index
    %c0_62 = arith.constant 0 : index
    %c0_63 = arith.constant 0 : index
    %138 = vector.load %arg13[%c0_61, %c0_62, %c0_63] : memref<2x1x64xf32, #tpu.memory_space<vmem>>, vector<1x1x64xf32>
    %139 = vector.shape_cast %138 : vector<1x1x64xf32> to vector<1x64xf32>
    %140 = vector.broadcast %139 : vector<1x64xf32> to vector<5x64xf32>
    %141 = arith.addf %137, %140 : vector<5x64xf32>
    %cst_64 = arith.constant 5.000000e-01 : f32
    %142 = vector.broadcast %cst_64 : f32 to vector<5x64xf32>
    %143 = arith.mulf %142, %141 : vector<5x64xf32>
    %cst_65 = arith.constant 0.707106769 : f32
    %144 = vector.broadcast %cst_65 : f32 to vector<5x64xf32>
    %145 = arith.mulf %141, %144 : vector<5x64xf32>
    %cst_66 = arith.constant 0.000000e+00 : f32
    %146 = vector.broadcast %cst_66 : f32 to vector<5x64xf32>
    %147 = arith.cmpf oge, %145, %146 : vector<5x64xf32>
    %cst_67 = arith.constant 1.000000e+00 : f32
    %cst_68 = arith.constant -1.000000e+00 : f32
    %148 = vector.broadcast %cst_67 : f32 to vector<5x64xf32>
    %149 = vector.broadcast %cst_68 : f32 to vector<5x64xf32>
    %150 = arith.select %147, %148, %149 : vector<5x64xi1>, vector<5x64xf32>
    %151 = math.absf %145 : vector<5x64xf32>
    %cst_69 = arith.constant 0.327591091 : f32
    %152 = vector.broadcast %cst_69 : f32 to vector<5x64xf32>
    %153 = arith.mulf %152, %151 : vector<5x64xf32>
    %cst_70 = arith.constant 1.000000e+00 : f32
    %154 = vector.broadcast %cst_70 : f32 to vector<5x64xf32>
    %155 = arith.addf %154, %153 : vector<5x64xf32>
    %cst_71 = arith.constant 1.000000e+00 : f32
    %156 = vector.broadcast %cst_71 : f32 to vector<5x64xf32>
    %157 = arith.divf %156, %155 : vector<5x64xf32>
    %cst_72 = arith.constant 1.06140542 : f32
    %158 = vector.broadcast %cst_72 : f32 to vector<5x64xf32>
    %159 = arith.mulf %158, %157 : vector<5x64xf32>
    %cst_73 = arith.constant -1.45315206 : f32
    %160 = vector.broadcast %cst_73 : f32 to vector<5x64xf32>
    %161 = arith.addf %159, %160 : vector<5x64xf32>
    %162 = arith.mulf %161, %157 : vector<5x64xf32>
    %cst_74 = arith.constant 1.42141378 : f32
    %163 = vector.broadcast %cst_74 : f32 to vector<5x64xf32>
    %164 = arith.addf %162, %163 : vector<5x64xf32>
    %165 = arith.mulf %164, %157 : vector<5x64xf32>
    %cst_75 = arith.constant -0.284496725 : f32
    %166 = vector.broadcast %cst_75 : f32 to vector<5x64xf32>
    %167 = arith.addf %165, %166 : vector<5x64xf32>
    %168 = arith.mulf %167, %157 : vector<5x64xf32>
    %cst_76 = arith.constant 0.254829586 : f32
    %169 = vector.broadcast %cst_76 : f32 to vector<5x64xf32>
    %170 = arith.addf %168, %169 : vector<5x64xf32>
    %171 = arith.mulf %170, %157 : vector<5x64xf32>
    %cst_77 = arith.constant 0.000000e+00 : f32
    %172 = vector.broadcast %cst_77 : f32 to vector<5x64xf32>
    %173 = arith.subf %172, %151 : vector<5x64xf32>
    %174 = arith.mulf %173, %151 : vector<5x64xf32>
    %175 = math.exp %174 : vector<5x64xf32>
    %176 = arith.mulf %171, %175 : vector<5x64xf32>
    %cst_78 = arith.constant 1.000000e+00 : f32
    %177 = vector.broadcast %cst_78 : f32 to vector<5x64xf32>
    %178 = arith.subf %177, %176 : vector<5x64xf32>
    %179 = arith.mulf %150, %178 : vector<5x64xf32>
    %cst_79 = arith.constant 1.000000e+00 : f32
    %180 = vector.broadcast %cst_79 : f32 to vector<5x64xf32>
    %181 = arith.addf %180, %179 : vector<5x64xf32>
    %182 = arith.mulf %143, %181 : vector<5x64xf32>
    %c0_80 = arith.constant 0 : index
    %c0_81 = arith.constant 0 : index
    %c0_82 = arith.constant 0 : index
    %183 = vector.load %arg14[%c0_80, %c0_81, %c0_82] : memref<2x64x32xf32, #tpu.memory_space<vmem>>, vector<1x64x32xf32>
    %184 = vector.shape_cast %183 : vector<1x64x32xf32> to vector<64x32xf32>
    %cst_83 = arith.constant dense<0.000000e+00> : vector<5x32xf32>
    %185 = tpu.matmul %182, %184, %cst_83 {dimension_numbers = #tpu.dot_dimension_numbers<[1], [0], [0], [1], [0, 0, 1, 1], [], []>} : vector<5x64xf32>, vector<64x32xf32>, vector<5x32xf32> -> vector<5x32xf32>
    %c0_84 = arith.constant 0 : index
    %c0_85 = arith.constant 0 : index
    %c0_86 = arith.constant 0 : index
    %186 = vector.load %arg15[%c0_84, %c0_85, %c0_86] : memref<2x1x32xf32, #tpu.memory_space<vmem>>, vector<1x1x32xf32>
    %187 = vector.shape_cast %186 : vector<1x1x32xf32> to vector<1x32xf32>
    %188 = vector.broadcast %187 : vector<1x32xf32> to vector<5x32xf32>
    %189 = arith.addf %185, %188 : vector<5x32xf32>
    %190 = arith.addf %189, %134 : vector<5x32xf32>
    %c0_87 = arith.constant 0 : index
    %c0_88 = arith.constant 0 : index
    %c0_89 = arith.constant 0 : index
    %191 = vector.load %arg16[%c0_87, %c0_88, %c0_89] : memref<2x1x32xf32, #tpu.memory_space<vmem>>, vector<1x1x32xf32>
    %192 = vector.shape_cast %191 : vector<1x1x32xf32> to vector<1x32xf32>
    %c0_90 = arith.constant 0 : index
    %c0_91 = arith.constant 0 : index
    %c0_92 = arith.constant 0 : index
    %193 = vector.load %arg17[%c0_90, %c0_91, %c0_92] : memref<2x1x32xf32, #tpu.memory_space<vmem>>, vector<1x1x32xf32>
    %194 = vector.shape_cast %193 : vector<1x1x32xf32> to vector<1x32xf32>
    %cst_93 = arith.constant dense<0.000000e+00> : vector<5xf32>
    %195 = vector.multi_reduction <add>, %190, %cst_93 [1] : vector<5x32xf32> to vector<5xf32>
    %196 = vector.shape_cast %195 : vector<5xf32> to vector<5x1xf32>
    %cst_94 = arith.constant 3.200000e+01 : f32
    %197 = vector.broadcast %cst_94 : f32 to vector<5x1xf32>
    %198 = arith.divf %196, %197 : vector<5x1xf32>
    %199 = vector.broadcast %198 : vector<5x1xf32> to vector<5x32xf32>
    %200 = arith.subf %190, %199 : vector<5x32xf32>
    %201 = arith.mulf %200, %200 : vector<5x32xf32>
    %cst_95 = arith.constant dense<0.000000e+00> : vector<5xf32>
    %202 = vector.multi_reduction <add>, %201, %cst_95 [1] : vector<5x32xf32> to vector<5xf32>
    %203 = vector.shape_cast %202 : vector<5xf32> to vector<5x1xf32>
    %cst_96 = arith.constant 3.200000e+01 : f32
    %204 = vector.broadcast %cst_96 : f32 to vector<5x1xf32>
    %205 = arith.divf %203, %204 : vector<5x1xf32>
    %cst_97 = arith.constant 9.99999996E-13 : f32
    %206 = vector.broadcast %cst_97 : f32 to vector<5x1xf32>
    %207 = arith.addf %205, %206 : vector<5x1xf32>
    %208 = math.rsqrt %207 : vector<5x1xf32>
    %209 = vector.broadcast %208 : vector<5x1xf32> to vector<5x32xf32>
    %210 = arith.mulf %200, %209 : vector<5x32xf32>
    %211 = vector.broadcast %192 : vector<1x32xf32> to vector<5x32xf32>
    %212 = arith.mulf %210, %211 : vector<5x32xf32>
    %213 = vector.broadcast %194 : vector<1x32xf32> to vector<5x32xf32>
    %214 = arith.addf %212, %213 : vector<5x32xf32>
    %c1 = arith.constant 1 : index
    %c0_98 = arith.constant 0 : index
    %c0_99 = arith.constant 0 : index
    %215 = vector.load %arg6[%c1, %c0_98, %c0_99] : memref<2x32x96xf32, #tpu.memory_space<vmem>>, vector<1x32x96xf32>
    %216 = vector.shape_cast %215 : vector<1x32x96xf32> to vector<32x96xf32>
    %cst_100 = arith.constant dense<0.000000e+00> : vector<5x96xf32>
    %217 = tpu.matmul %214, %216, %cst_100 {dimension_numbers = #tpu.dot_dimension_numbers<[1], [0], [0], [1], [0, 0, 1, 1], [], []>} : vector<5x32xf32>, vector<32x96xf32>, vector<5x96xf32> -> vector<5x96xf32>
    %c1_101 = arith.constant 1 : index
    %c0_102 = arith.constant 0 : index
    %c0_103 = arith.constant 0 : index
    %218 = vector.load %arg7[%c1_101, %c0_102, %c0_103] : memref<2x1x96xf32, #tpu.memory_space<vmem>>, vector<1x1x96xf32>
    %219 = vector.shape_cast %218 : vector<1x1x96xf32> to vector<1x96xf32>
    %220 = vector.broadcast %219 : vector<1x96xf32> to vector<5x96xf32>
    %221 = arith.addf %217, %220 : vector<5x96xf32>
    %222 = vector.extract_strided_slice %221 {offsets = [0, 0], sizes = [5, 32], strides = [1, 1]} : vector<5x96xf32> to vector<5x32xf32>
    %223 = vector.extract_strided_slice %221 {offsets = [0, 32], sizes = [5, 32], strides = [1, 1]} : vector<5x96xf32> to vector<5x32xf32>
    %224 = vector.extract_strided_slice %221 {offsets = [0, 64], sizes = [5, 32], strides = [1, 1]} : vector<5x96xf32> to vector<5x32xf32>
    %cst_104 = arith.constant dense<0.000000e+00> : vector<5x32xf32>
    %225 = tpu.matmul %222, %31, %cst_104 {dimension_numbers = #tpu.dot_dimension_numbers<[1], [0], [0], [1], [0, 0, 1, 1], [], []>} : vector<5x32xf32>, vector<32x32xf32>, vector<5x32xf32> -> vector<5x32xf32>
    %cst_105 = arith.constant dense<0.000000e+00> : vector<5x32xf32>
    %226 = tpu.matmul %223, %31, %cst_105 {dimension_numbers = #tpu.dot_dimension_numbers<[1], [0], [0], [1], [0, 0, 1, 1], [], []>} : vector<5x32xf32>, vector<32x32xf32>, vector<5x32xf32> -> vector<5x32xf32>
    %227 = vector.shape_cast %222 : vector<5x32xf32> to vector<1x5x32xf32>
    %228 = arith.mulf %227, %30 : vector<1x5x32xf32>
    %229 = vector.shape_cast %225 : vector<5x32xf32> to vector<1x5x32xf32>
    %230 = arith.mulf %229, %28 : vector<1x5x32xf32>
    %231 = arith.addf %228, %230 : vector<1x5x32xf32>
    %232 = vector.shape_cast %223 : vector<5x32xf32> to vector<1x5x32xf32>
    %233 = arith.mulf %232, %30 : vector<1x5x32xf32>
    %234 = vector.shape_cast %226 : vector<5x32xf32> to vector<1x5x32xf32>
    %235 = arith.mulf %234, %28 : vector<1x5x32xf32>
    %236 = arith.addf %233, %235 : vector<1x5x32xf32>
    %237 = vector.shape_cast %224 : vector<5x32xf32> to vector<1x5x32xf32>
    %238 = vector.extract_strided_slice %231 {offsets = [0, 0, 0], sizes = [1, 5, 16], strides = [1, 1, 1]} : vector<1x5x32xf32> to vector<1x5x16xf32>
    %239 = vector.extract_strided_slice %236 {offsets = [0, 0, 0], sizes = [1, 5, 16], strides = [1, 1, 1]} : vector<1x5x32xf32> to vector<1x5x16xf32>
    %240 = vector.extract_strided_slice %237 {offsets = [0, 0, 0], sizes = [1, 5, 16], strides = [1, 1, 1]} : vector<1x5x32xf32> to vector<1x5x16xf32>
    "tpu.trace_start"() <{level = 10 : i32, message = "bqd,bkd->bqk"}> : () -> ()
    %cst_106 = arith.constant dense<0.000000e+00> : vector<1x5x5xf32>
    %241 = tpu.matmul %238, %239, %cst_106 {dimension_numbers = #tpu.dot_dimension_numbers<[2], [2], [1], [1], [0, 0, 0, 1, 1, 1], [0], [0]>} : vector<1x5x16xf32>, vector<1x5x16xf32>, vector<1x5x5xf32> -> vector<1x5x5xf32>
    "tpu.trace_stop"() : () -> ()
    %cst_107 = arith.constant 2.500000e-01 : f32
    %242 = vector.broadcast %cst_107 : f32 to vector<1x5x5xf32>
    %243 = arith.mulf %241, %242 : vector<1x5x5xf32>
    %244 = vector.broadcast %41 : vector<1x1x5xf32> to vector<1x5x5xf32>
    %245 = arith.addf %243, %244 : vector<1x5x5xf32>
    %cst_108 = arith.constant dense<0xFF800000> : vector<1x5xf32>
    %246 = vector.multi_reduction <maximumf>, %245, %cst_108 [2] : vector<1x5x5xf32> to vector<1x5xf32>
    %247 = vector.shape_cast %246 : vector<1x5xf32> to vector<1x5x1xf32>
    %248 = vector.broadcast %247 : vector<1x5x1xf32> to vector<1x5x5xf32>
    %249 = arith.subf %245, %248 : vector<1x5x5xf32>
    %250 = math.exp %249 : vector<1x5x5xf32>
    %cst_109 = arith.constant dense<0.000000e+00> : vector<1x5xf32>
    %251 = vector.multi_reduction <add>, %250, %cst_109 [2] : vector<1x5x5xf32> to vector<1x5xf32>
    %252 = vector.shape_cast %251 : vector<1x5xf32> to vector<1x5x1xf32>
    %253 = vector.broadcast %252 : vector<1x5x1xf32> to vector<1x5x5xf32>
    %254 = arith.divf %250, %253 : vector<1x5x5xf32>
    "tpu.trace_start"() <{level = 10 : i32, message = "bqk,bkd->bqd"}> : () -> ()
    %cst_110 = arith.constant dense<0.000000e+00> : vector<1x5x16xf32>
    %255 = tpu.matmul %254, %240, %cst_110 {dimension_numbers = #tpu.dot_dimension_numbers<[2], [1], [1], [2], [0, 0, 0, 1, 1, 2], [0], [0]>} : vector<1x5x5xf32>, vector<1x5x16xf32>, vector<1x5x16xf32> -> vector<1x5x16xf32>
    "tpu.trace_stop"() : () -> ()
    %256 = vector.extract_strided_slice %231 {offsets = [0, 0, 16], sizes = [1, 5, 16], strides = [1, 1, 1]} : vector<1x5x32xf32> to vector<1x5x16xf32>
    %257 = vector.extract_strided_slice %236 {offsets = [0, 0, 16], sizes = [1, 5, 16], strides = [1, 1, 1]} : vector<1x5x32xf32> to vector<1x5x16xf32>
    %258 = vector.extract_strided_slice %237 {offsets = [0, 0, 16], sizes = [1, 5, 16], strides = [1, 1, 1]} : vector<1x5x32xf32> to vector<1x5x16xf32>
    "tpu.trace_start"() <{level = 10 : i32, message = "bqd,bkd->bqk"}> : () -> ()
    %cst_111 = arith.constant dense<0.000000e+00> : vector<1x5x5xf32>
    %259 = tpu.matmul %256, %257, %cst_111 {dimension_numbers = #tpu.dot_dimension_numbers<[2], [2], [1], [1], [0, 0, 0, 1, 1, 1], [0], [0]>} : vector<1x5x16xf32>, vector<1x5x16xf32>, vector<1x5x5xf32> -> vector<1x5x5xf32>
    "tpu.trace_stop"() : () -> ()
    %cst_112 = arith.constant 2.500000e-01 : f32
    %260 = vector.broadcast %cst_112 : f32 to vector<1x5x5xf32>
    %261 = arith.mulf %259, %260 : vector<1x5x5xf32>
    %262 = vector.broadcast %41 : vector<1x1x5xf32> to vector<1x5x5xf32>
    %263 = arith.addf %261, %262 : vector<1x5x5xf32>
    %cst_113 = arith.constant dense<0xFF800000> : vector<1x5xf32>
    %264 = vector.multi_reduction <maximumf>, %263, %cst_113 [2] : vector<1x5x5xf32> to vector<1x5xf32>
    %265 = vector.shape_cast %264 : vector<1x5xf32> to vector<1x5x1xf32>
    %266 = vector.broadcast %265 : vector<1x5x1xf32> to vector<1x5x5xf32>
    %267 = arith.subf %263, %266 : vector<1x5x5xf32>
    %268 = math.exp %267 : vector<1x5x5xf32>
    %cst_114 = arith.constant dense<0.000000e+00> : vector<1x5xf32>
    %269 = vector.multi_reduction <add>, %268, %cst_114 [2] : vector<1x5x5xf32> to vector<1x5xf32>
    %270 = vector.shape_cast %269 : vector<1x5xf32> to vector<1x5x1xf32>
    %271 = vector.broadcast %270 : vector<1x5x1xf32> to vector<1x5x5xf32>
    %272 = arith.divf %268, %271 : vector<1x5x5xf32>
    "tpu.trace_start"() <{level = 10 : i32, message = "bqk,bkd->bqd"}> : () -> ()
    %cst_115 = arith.constant dense<0.000000e+00> : vector<1x5x16xf32>
    %273 = tpu.matmul %272, %258, %cst_115 {dimension_numbers = #tpu.dot_dimension_numbers<[2], [1], [1], [2], [0, 0, 0, 1, 1, 2], [0], [0]>} : vector<1x5x5xf32>, vector<1x5x16xf32>, vector<1x5x16xf32> -> vector<1x5x16xf32>
    "tpu.trace_stop"() : () -> ()
    %274 = tpu.concatenate %255, %273 in 2 : vector<1x5x16xf32>, vector<1x5x16xf32> -> vector<1x5x32xf32>
    %275 = vector.shape_cast %274 : vector<1x5x32xf32> to vector<5x32xf32>
    %c1_116 = arith.constant 1 : index
    %c0_117 = arith.constant 0 : index
    %c0_118 = arith.constant 0 : index
    %276 = vector.load %arg8[%c1_116, %c0_117, %c0_118] : memref<2x32x32xf32, #tpu.memory_space<vmem>>, vector<1x32x32xf32>
    %277 = vector.shape_cast %276 : vector<1x32x32xf32> to vector<32x32xf32>
    %cst_119 = arith.constant dense<0.000000e+00> : vector<5x32xf32>
    %278 = tpu.matmul %275, %277, %cst_119 {dimension_numbers = #tpu.dot_dimension_numbers<[1], [0], [0], [1], [0, 0, 1, 1], [], []>} : vector<5x32xf32>, vector<32x32xf32>, vector<5x32xf32> -> vector<5x32xf32>
    %c1_120 = arith.constant 1 : index
    %c0_121 = arith.constant 0 : index
    %c0_122 = arith.constant 0 : index
    %279 = vector.load %arg9[%c1_120, %c0_121, %c0_122] : memref<2x1x32xf32, #tpu.memory_space<vmem>>, vector<1x1x32xf32>
    %280 = vector.shape_cast %279 : vector<1x1x32xf32> to vector<1x32xf32>
    %281 = vector.broadcast %280 : vector<1x32xf32> to vector<5x32xf32>
    %282 = arith.addf %278, %281 : vector<5x32xf32>
    %283 = arith.addf %282, %214 : vector<5x32xf32>
    %c1_123 = arith.constant 1 : index
    %c0_124 = arith.constant 0 : index
    %c0_125 = arith.constant 0 : index
    %284 = vector.load %arg10[%c1_123, %c0_124, %c0_125] : memref<2x1x32xf32, #tpu.memory_space<vmem>>, vector<1x1x32xf32>
    %285 = vector.shape_cast %284 : vector<1x1x32xf32> to vector<1x32xf32>
    %c1_126 = arith.constant 1 : index
    %c0_127 = arith.constant 0 : index
    %c0_128 = arith.constant 0 : index
    %286 = vector.load %arg11[%c1_126, %c0_127, %c0_128] : memref<2x1x32xf32, #tpu.memory_space<vmem>>, vector<1x1x32xf32>
    %287 = vector.shape_cast %286 : vector<1x1x32xf32> to vector<1x32xf32>
    %cst_129 = arith.constant dense<0.000000e+00> : vector<5xf32>
    %288 = vector.multi_reduction <add>, %283, %cst_129 [1] : vector<5x32xf32> to vector<5xf32>
    %289 = vector.shape_cast %288 : vector<5xf32> to vector<5x1xf32>
    %cst_130 = arith.constant 3.200000e+01 : f32
    %290 = vector.broadcast %cst_130 : f32 to vector<5x1xf32>
    %291 = arith.divf %289, %290 : vector<5x1xf32>
    %292 = vector.broadcast %291 : vector<5x1xf32> to vector<5x32xf32>
    %293 = arith.subf %283, %292 : vector<5x32xf32>
    %294 = arith.mulf %293, %293 : vector<5x32xf32>
    %cst_131 = arith.constant dense<0.000000e+00> : vector<5xf32>
    %295 = vector.multi_reduction <add>, %294, %cst_131 [1] : vector<5x32xf32> to vector<5xf32>
    %296 = vector.shape_cast %295 : vector<5xf32> to vector<5x1xf32>
    %cst_132 = arith.constant 3.200000e+01 : f32
    %297 = vector.broadcast %cst_132 : f32 to vector<5x1xf32>
    %298 = arith.divf %296, %297 : vector<5x1xf32>
    %cst_133 = arith.constant 9.99999996E-13 : f32
    %299 = vector.broadcast %cst_133 : f32 to vector<5x1xf32>
    %300 = arith.addf %298, %299 : vector<5x1xf32>
    %301 = math.rsqrt %300 : vector<5x1xf32>
    %302 = vector.broadcast %301 : vector<5x1xf32> to vector<5x32xf32>
    %303 = arith.mulf %293, %302 : vector<5x32xf32>
    %304 = vector.broadcast %285 : vector<1x32xf32> to vector<5x32xf32>
    %305 = arith.mulf %303, %304 : vector<5x32xf32>
    %306 = vector.broadcast %287 : vector<1x32xf32> to vector<5x32xf32>
    %307 = arith.addf %305, %306 : vector<5x32xf32>
    %c1_134 = arith.constant 1 : index
    %c0_135 = arith.constant 0 : index
    %c0_136 = arith.constant 0 : index
    %308 = vector.load %arg12[%c1_134, %c0_135, %c0_136] : memref<2x32x64xf32, #tpu.memory_space<vmem>>, vector<1x32x64xf32>
    %309 = vector.shape_cast %308 : vector<1x32x64xf32> to vector<32x64xf32>
    %cst_137 = arith.constant dense<0.000000e+00> : vector<5x64xf32>
    %310 = tpu.matmul %307, %309, %cst_137 {dimension_numbers = #tpu.dot_dimension_numbers<[1], [0], [0], [1], [0, 0, 1, 1], [], []>} : vector<5x32xf32>, vector<32x64xf32>, vector<5x64xf32> -> vector<5x64xf32>
    %c1_138 = arith.constant 1 : index
    %c0_139 = arith.constant 0 : index
    %c0_140 = arith.constant 0 : index
    %311 = vector.load %arg13[%c1_138, %c0_139, %c0_140] : memref<2x1x64xf32, #tpu.memory_space<vmem>>, vector<1x1x64xf32>
    %312 = vector.shape_cast %311 : vector<1x1x64xf32> to vector<1x64xf32>
    %313 = vector.broadcast %312 : vector<1x64xf32> to vector<5x64xf32>
    %314 = arith.addf %310, %313 : vector<5x64xf32>
    %cst_141 = arith.constant 5.000000e-01 : f32
    %315 = vector.broadcast %cst_141 : f32 to vector<5x64xf32>
    %316 = arith.mulf %315, %314 : vector<5x64xf32>
    %cst_142 = arith.constant 0.707106769 : f32
    %317 = vector.broadcast %cst_142 : f32 to vector<5x64xf32>
    %318 = arith.mulf %314, %317 : vector<5x64xf32>
    %cst_143 = arith.constant 0.000000e+00 : f32
    %319 = vector.broadcast %cst_143 : f32 to vector<5x64xf32>
    %320 = arith.cmpf oge, %318, %319 : vector<5x64xf32>
    %cst_144 = arith.constant 1.000000e+00 : f32
    %cst_145 = arith.constant -1.000000e+00 : f32
    %321 = vector.broadcast %cst_144 : f32 to vector<5x64xf32>
    %322 = vector.broadcast %cst_145 : f32 to vector<5x64xf32>
    %323 = arith.select %320, %321, %322 : vector<5x64xi1>, vector<5x64xf32>
    %324 = math.absf %318 : vector<5x64xf32>
    %cst_146 = arith.constant 0.327591091 : f32
    %325 = vector.broadcast %cst_146 : f32 to vector<5x64xf32>
    %326 = arith.mulf %325, %324 : vector<5x64xf32>
    %cst_147 = arith.constant 1.000000e+00 : f32
    %327 = vector.broadcast %cst_147 : f32 to vector<5x64xf32>
    %328 = arith.addf %327, %326 : vector<5x64xf32>
    %cst_148 = arith.constant 1.000000e+00 : f32
    %329 = vector.broadcast %cst_148 : f32 to vector<5x64xf32>
    %330 = arith.divf %329, %328 : vector<5x64xf32>
    %cst_149 = arith.constant 1.06140542 : f32
    %331 = vector.broadcast %cst_149 : f32 to vector<5x64xf32>
    %332 = arith.mulf %331, %330 : vector<5x64xf32>
    %cst_150 = arith.constant -1.45315206 : f32
    %333 = vector.broadcast %cst_150 : f32 to vector<5x64xf32>
    %334 = arith.addf %332, %333 : vector<5x64xf32>
    %335 = arith.mulf %334, %330 : vector<5x64xf32>
    %cst_151 = arith.constant 1.42141378 : f32
    %336 = vector.broadcast %cst_151 : f32 to vector<5x64xf32>
    %337 = arith.addf %335, %336 : vector<5x64xf32>
    %338 = arith.mulf %337, %330 : vector<5x64xf32>
    %cst_152 = arith.constant -0.284496725 : f32
    %339 = vector.broadcast %cst_152 : f32 to vector<5x64xf32>
    %340 = arith.addf %338, %339 : vector<5x64xf32>
    %341 = arith.mulf %340, %330 : vector<5x64xf32>
    %cst_153 = arith.constant 0.254829586 : f32
    %342 = vector.broadcast %cst_153 : f32 to vector<5x64xf32>
    %343 = arith.addf %341, %342 : vector<5x64xf32>
    %344 = arith.mulf %343, %330 : vector<5x64xf32>
    %cst_154 = arith.constant 0.000000e+00 : f32
    %345 = vector.broadcast %cst_154 : f32 to vector<5x64xf32>
    %346 = arith.subf %345, %324 : vector<5x64xf32>
    %347 = arith.mulf %346, %324 : vector<5x64xf32>
    %348 = math.exp %347 : vector<5x64xf32>
    %349 = arith.mulf %344, %348 : vector<5x64xf32>
    %cst_155 = arith.constant 1.000000e+00 : f32
    %350 = vector.broadcast %cst_155 : f32 to vector<5x64xf32>
    %351 = arith.subf %350, %349 : vector<5x64xf32>
    %352 = arith.mulf %323, %351 : vector<5x64xf32>
    %cst_156 = arith.constant 1.000000e+00 : f32
    %353 = vector.broadcast %cst_156 : f32 to vector<5x64xf32>
    %354 = arith.addf %353, %352 : vector<5x64xf32>
    %355 = arith.mulf %316, %354 : vector<5x64xf32>
    %c1_157 = arith.constant 1 : index
    %c0_158 = arith.constant 0 : index
    %c0_159 = arith.constant 0 : index
    %356 = vector.load %arg14[%c1_157, %c0_158, %c0_159] : memref<2x64x32xf32, #tpu.memory_space<vmem>>, vector<1x64x32xf32>
    %357 = vector.shape_cast %356 : vector<1x64x32xf32> to vector<64x32xf32>
    %cst_160 = arith.constant dense<0.000000e+00> : vector<5x32xf32>
    %358 = tpu.matmul %355, %357, %cst_160 {dimension_numbers = #tpu.dot_dimension_numbers<[1], [0], [0], [1], [0, 0, 1, 1], [], []>} : vector<5x64xf32>, vector<64x32xf32>, vector<5x32xf32> -> vector<5x32xf32>
    %c1_161 = arith.constant 1 : index
    %c0_162 = arith.constant 0 : index
    %c0_163 = arith.constant 0 : index
    %359 = vector.load %arg15[%c1_161, %c0_162, %c0_163] : memref<2x1x32xf32, #tpu.memory_space<vmem>>, vector<1x1x32xf32>
    %360 = vector.shape_cast %359 : vector<1x1x32xf32> to vector<1x32xf32>
    %361 = vector.broadcast %360 : vector<1x32xf32> to vector<5x32xf32>
    %362 = arith.addf %358, %361 : vector<5x32xf32>
    %363 = arith.addf %362, %307 : vector<5x32xf32>
    %c1_164 = arith.constant 1 : index
    %c0_165 = arith.constant 0 : index
    %c0_166 = arith.constant 0 : index
    %364 = vector.load %arg16[%c1_164, %c0_165, %c0_166] : memref<2x1x32xf32, #tpu.memory_space<vmem>>, vector<1x1x32xf32>
    %365 = vector.shape_cast %364 : vector<1x1x32xf32> to vector<1x32xf32>
    %c1_167 = arith.constant 1 : index
    %c0_168 = arith.constant 0 : index
    %c0_169 = arith.constant 0 : index
    %366 = vector.load %arg17[%c1_167, %c0_168, %c0_169] : memref<2x1x32xf32, #tpu.memory_space<vmem>>, vector<1x1x32xf32>
    %367 = vector.shape_cast %366 : vector<1x1x32xf32> to vector<1x32xf32>
    %cst_170 = arith.constant dense<0.000000e+00> : vector<5xf32>
    %368 = vector.multi_reduction <add>, %363, %cst_170 [1] : vector<5x32xf32> to vector<5xf32>
    %369 = vector.shape_cast %368 : vector<5xf32> to vector<5x1xf32>
    %cst_171 = arith.constant 3.200000e+01 : f32
    %370 = vector.broadcast %cst_171 : f32 to vector<5x1xf32>
    %371 = arith.divf %369, %370 : vector<5x1xf32>
    %372 = vector.broadcast %371 : vector<5x1xf32> to vector<5x32xf32>
    %373 = arith.subf %363, %372 : vector<5x32xf32>
    %374 = arith.mulf %373, %373 : vector<5x32xf32>
    %cst_172 = arith.constant dense<0.000000e+00> : vector<5xf32>
    %375 = vector.multi_reduction <add>, %374, %cst_172 [1] : vector<5x32xf32> to vector<5xf32>
    %376 = vector.shape_cast %375 : vector<5xf32> to vector<5x1xf32>
    %cst_173 = arith.constant 3.200000e+01 : f32
    %377 = vector.broadcast %cst_173 : f32 to vector<5x1xf32>
    %378 = arith.divf %376, %377 : vector<5x1xf32>
    %cst_174 = arith.constant 9.99999996E-13 : f32
    %379 = vector.broadcast %cst_174 : f32 to vector<5x1xf32>
    %380 = arith.addf %378, %379 : vector<5x1xf32>
    %381 = math.rsqrt %380 : vector<5x1xf32>
    %382 = vector.broadcast %381 : vector<5x1xf32> to vector<5x32xf32>
    %383 = arith.mulf %373, %382 : vector<5x32xf32>
    %384 = vector.broadcast %365 : vector<1x32xf32> to vector<5x32xf32>
    %385 = arith.mulf %383, %384 : vector<5x32xf32>
    %386 = vector.broadcast %367 : vector<1x32xf32> to vector<5x32xf32>
    %387 = arith.addf %385, %386 : vector<5x32xf32>
    %c0_175 = arith.constant 0 : index
    %c0_176 = arith.constant 0 : index
    %388 = vector.load %arg21[%c0_175, %c0_176] : memref<32x128xf32, #tpu.memory_space<vmem>>, vector<32x128xf32>
    %cst_177 = arith.constant dense<0.000000e+00> : vector<5x128xf32>
    %389 = tpu.matmul %387, %388, %cst_177 {dimension_numbers = #tpu.dot_dimension_numbers<[1], [0], [0], [1], [0, 0, 1, 1], [], []>} : vector<5x32xf32>, vector<32x128xf32>, vector<5x128xf32> -> vector<5x128xf32>
    %c0_178 = arith.constant 0 : index
    %c0_179 = arith.constant 0 : index
    %390 = vector.load %arg22[%c0_178, %c0_179] : memref<1x128xf32, #tpu.memory_space<vmem>>, vector<1x128xf32>
    %391 = vector.broadcast %390 : vector<1x128xf32> to vector<5x128xf32>
    %392 = arith.addf %389, %391 : vector<5x128xf32>
    %393 = vector.shape_cast %392 : vector<5x128xf32> to vector<1x5x128xf32>
    %c0_180 = arith.constant 0 : index
    %c0_181 = arith.constant 0 : index
    %c0_182 = arith.constant 0 : index
    %394 = vector.load %arg23[%c0_180, %c0_181, %c0_182] : memref<1x5x128xf32, #tpu.memory_space<vmem>>, vector<1x5x128xf32>
    tpu.vector_store %arg23[%c0_180, %c0_181, %c0_182], %393 {strides = array<i32>} : memref<1x5x128xf32, #tpu.memory_space<vmem>>, vector<1x5x128xf32>,
    return
  }
  func.func @transform_0(%arg0: i32, %arg1: memref<2xi32, #tpu.memory_space<smem>>) -> (i32, i32, i32) {
    %c0_i32 = arith.constant 0 : i32
    %c0_i32_0 = arith.constant 0 : i32
    %c0_i32_1 = arith.constant 0 : i32
    return %arg0, %c0_i32, %c0_i32_0 : i32, i32, i32
  }
  func.func @transform_1(%arg0: i32, %arg1: memref<2xi32, #tpu.memory_space<smem>>) -> (i32, i32) {
    %c0_i32 = arith.constant 0 : i32
    %c0_i32_0 = arith.constant 0 : i32
    %c0_i32_1 = arith.constant 0 : i32
    return %c0_i32, %c0_i32_0 : i32, i32
  }
  func.func @transform_2(%arg0: i32, %arg1: memref<2xi32, #tpu.memory_space<smem>>) -> (i32, i32) {
    %c0_i32 = arith.constant 0 : i32
    %c0_i32_0 = arith.constant 0 : i32
    %c0_i32_1 = arith.constant 0 : i32
    return %c0_i32, %c0_i32_0 : i32, i32
  }
  func.func @transform_3(%arg0: i32, %arg1: memref<2xi32, #tpu.memory_space<smem>>) -> (i32, i32) {
    %c0_i32 = arith.constant 0 : i32
    %c0_i32_0 = arith.constant 0 : i32
    %c0_i32_1 = arith.constant 0 : i32
    return %c0_i32, %c0_i32_0 : i32, i32
  }
  func.func @transform_4(%arg0: i32, %arg1: memref<2xi32, #tpu.memory_space<smem>>) -> (i32, i32, i32) {
    %c0_i32 = arith.constant 0 : i32
    %c0_i32_0 = arith.constant 0 : i32
    %c0_i32_1 = arith.constant 0 : i32
    %c0_i32_2 = arith.constant 0 : i32
    return %c0_i32, %c0_i32_0, %c0_i32_1 : i32, i32, i32
  }
  func.func @transform_5(%arg0: i32, %arg1: memref<2xi32, #tpu.memory_space<smem>>) -> (i32, i32, i32) {
    %c0_i32 = arith.constant 0 : i32
    %c0_i32_0 = arith.constant 0 : i32
    %c0_i32_1 = arith.constant 0 : i32
    %c0_i32_2 = arith.constant 0 : i32
    return %c0_i32, %c0_i32_0, %c0_i32_1 : i32, i32, i32
  }
  func.func @transform_6(%arg0: i32, %arg1: memref<2xi32, #tpu.memory_space<smem>>) -> (i32, i32, i32) {
    %c0_i32 = arith.constant 0 : i32
    %c0_i32_0 = arith.constant 0 : i32
    %c0_i32_1 = arith.constant 0 : i32
    %c0_i32_2 = arith.constant 0 : i32
    return %c0_i32, %c0_i32_0, %c0_i32_1 : i32, i32, i32
  }
  func.func @transform_7(%arg0: i32, %arg1: memref<2xi32, #tpu.memory_space<smem>>) -> (i32, i32, i32) {
    %c0_i32 = arith.constant 0 : i32
    %c0_i32_0 = arith.constant 0 : i32
    %c0_i32_1 = arith.constant 0 : i32
    %c0_i32_2 = arith.constant 0 : i32
    return %c0_i32, %c0_i32_0, %c0_i32_1 : i32, i32, i32
  }
  func.func @transform_8(%arg0: i32, %arg1: memref<2xi32, #tpu.memory_space<smem>>) -> (i32, i32, i32) {
    %c0_i32 = arith.constant 0 : i32
    %c0_i32_0 = arith.constant 0 : i32
    %c0_i32_1 = arith.constant 0 : i32
    %c0_i32_2 = arith.constant 0 : i32
    return %c0_i32, %c0_i32_0, %c0_i32_1 : i32, i32, i32
  }
  func.func @transform_9(%arg0: i32, %arg1: memref<2xi32, #tpu.memory_space<smem>>) -> (i32, i32, i32) {
    %c0_i32 = arith.constant 0 : i32
    %c0_i32_0 = arith.constant 0 : i32
    %c0_i32_1 = arith.constant 0 : i32
    %c0_i32_2 = arith.constant 0 : i32
    return %c0_i32, %c0_i32_0, %c0_i32_1 : i32, i32, i32
  }
  func.func @transform_10(%arg0: i32, %arg1: memref<2xi32, #tpu.memory_space<smem>>) -> (i32, i32, i32) {
    %c0_i32 = arith.constant 0 : i32
    %c0_i32_0 = arith.constant 0 : i32
    %c0_i32_1 = arith.constant 0 : i32
    %c0_i32_2 = arith.constant 0 : i32
    return %c0_i32, %c0_i32_0, %c0_i32_1 : i32, i32, i32
  }
  func.func @transform_11(%arg0: i32, %arg1: memref<2xi32, #tpu.memory_space<smem>>) -> (i32, i32, i32) {
    %c0_i32 = arith.constant 0 : i32
    %c0_i32_0 = arith.constant 0 : i32
    %c0_i32_1 = arith.constant 0 : i32
    %c0_i32_2 = arith.constant 0 : i32
    return %c0_i32, %c0_i32_0, %c0_i32_1 : i32, i32, i32
  }
  func.func @transform_12(%arg0: i32, %arg1: memref<2xi32, #tpu.memory_space<smem>>) -> (i32, i32, i32) {
    %c0_i32 = arith.constant 0 : i32
    %c0_i32_0 = arith.constant 0 : i32
    %c0_i32_1 = arith.constant 0 : i32
    %c0_i32_2 = arith.constant 0 : i32
    return %c0_i32, %c0_i32_0, %c0_i32_1 : i32, i32, i32
  }
  func.func @transform_13(%arg0: i32, %arg1: memref<2xi32, #tpu.memory_space<smem>>) -> (i32, i32, i32) {
    %c0_i32 = arith.constant 0 : i32
    %c0_i32_0 = arith.constant 0 : i32
    %c0_i32_1 = arith.constant 0 : i32
    %c0_i32_2 = arith.constant 0 : i32
    return %c0_i32, %c0_i32_0, %c0_i32_1 : i32, i32, i32
  }
  func.func @transform_14(%arg0: i32, %arg1: memref<2xi32, #tpu.memory_space<smem>>) -> (i32, i32, i32) {
    %c0_i32 = arith.constant 0 : i32
    %c0_i32_0 = arith.constant 0 : i32
    %c0_i32_1 = arith.constant 0 : i32
    %c0_i32_2 = arith.constant 0 : i32
    return %c0_i32, %c0_i32_0, %c0_i32_1 : i32, i32, i32
  }
  func.func @transform_15(%arg0: i32, %arg1: memref<2xi32, #tpu.memory_space<smem>>) -> (i32, i32, i32) {
    %c0_i32 = arith.constant 0 : i32
    %c0_i32_0 = arith.constant 0 : i32
    %c0_i32_1 = arith.constant 0 : i32
    %c0_i32_2 = arith.constant 0 : i32
    return %c0_i32, %c0_i32_0, %c0_i32_1 : i32, i32, i32
  }
  func.func @transform_16(%arg0: i32, %arg1: memref<2xi32, #tpu.memory_space<smem>>) -> (i32, i32) {
    %c0_i32 = arith.constant 0 : i32
    %c0_i32_0 = arith.constant 0 : i32
    %c0_i32_1 = arith.constant 0 : i32
    return %c0_i32, %c0_i32_0 : i32, i32
  }
  func.func @transform_17(%arg0: i32, %arg1: memref<2xi32, #tpu.memory_space<smem>>) -> (i32, i32) {
    %c0_i32 = arith.constant 0 : i32
    %c0_i32_0 = arith.constant 0 : i32
    %c0_i32_1 = arith.constant 0 : i32
    return %c0_i32, %c0_i32_0 : i32, i32
  }
  func.func @transform_18(%arg0: i32, %arg1: memref<2xi32, #tpu.memory_space<smem>>) -> (i32, i32) {
    %c0_i32 = arith.constant 0 : i32
    %c0_i32_0 = arith.constant 0 : i32
    %c0_i32_1 = arith.constant 0 : i32
    return %c0_i32, %c0_i32_0 : i32, i32
  }
  func.func @transform_19(%arg0: i32, %arg1: memref<2xi32, #tpu.memory_space<smem>>) -> (i32, i32) {
    %c0_i32 = arith.constant 0 : i32
    %c0_i32_0 = arith.constant 0 : i32
    %c0_i32_1 = arith.constant 0 : i32
    return %c0_i32, %c0_i32_0 : i32, i32
  }
  func.func @transform_20(%arg0: i32, %arg1: memref<2xi32, #tpu.memory_space<smem>>) -> (i32, i32) {
    %c0_i32 = arith.constant 0 : i32
    %c0_i32_0 = arith.constant 0 : i32
    %c0_i32_1 = arith.constant 0 : i32
    return %c0_i32, %c0_i32_0 : i32, i32
  }
  func.func @transform_21(%arg0: i32, %arg1: memref<2xi32, #tpu.memory_space<smem>>) -> (i32, i32, i32) {
    %c0_i32 = arith.constant 0 : i32
    %c0_i32_0 = arith.constant 0 : i32
    %c0_i32_1 = arith.constant 0 : i32
    return %arg0, %c0_i32, %c0_i32_0 : i32, i32, i32
  }
}

</mosaic_0001>

<bundles_post_ra>
// kernel: tile.19
= control target key start
LH: loop header
LB: loop body
LE: loop exit
PB: predicated region body
PF: predicated region fallthrough
CT: control target
= control target key end

     0   :  { %vm48_vm0 = vcmask 1047556   ;;  %vm50_vm1 = vcmask 130048   ;;  %vm65_vm2 = vcmask 261248   ;;  %s142_s0 = inlined_call_operand.vmem [shape: f32[9,2,16], index: 0, kind: input, shape index: {}]   ;;  %s143_s1 = inlined_call_operand.vmem [shape: f32[9,32], index: 1, kind: output, shape index: {}]  }
   0x1   :  { %v82_v0 = vld [vmem:[%s142_s0 + $0xe] sm:$0x3]  ;;  %v83_v1 = vld [vmem:[%s142_s0 + $0xc] sm:$0x3]  ;;  %v84_v2 = vld [vmem:[%s142_s0 + $0xa] sm:$0x3] }
   0x2   :  { %14 = vst [vmem:[#allocation0 + $0x38] sm:$0x3] %v82_v0  ;;  %19 = vst [vmem:[#allocation0 + $0x30] sm:$0x3] %v83_v1  ;;  %v85_v3 = vld [vmem:[%s142_s0 + $0x8] sm:$0x3] }
   0x3   :  { %24 = vst [vmem:[#allocation0 + $0x28] sm:$0x3] %v84_v2  ;;  %v86_v4 = vld [vmem:[%s142_s0 + $0x6] sm:$0x3]  ;;  %v87_v5 = vld [vmem:[%s142_s0 + $0x4] sm:$0x3] }
   0x4   :  { %29 = vst [vmem:[#allocation0 + $0x20] sm:$0x3] %v85_v3  ;;  %34 = vst [vmem:[#allocation0 + $0x18] sm:$0x3] %v86_v4  ;;  %v88_v6 = vld [vmem:[%s142_s0 + $0x2] sm:$0x3] }
   0x5   :  { %39 = vst [vmem:[#allocation0 + $0x10] sm:$0x3] %v87_v5  ;;  %v44_v7 = vld [vmem:[%s142_s0] sm:$0x3]  ;;  %43 = vst [vmem:[#allocation0 + $0x8] sm:$0x3] %v88_v6 }
   0x6   :  { %45 = vst [vmem:[#allocation0] sm:$0x3] %v44_v7  ;;  %v81_v8 = vld [vmem:[%s142_s0 + $0x10] sm:$0x3]  ;;  %s92_s0 = smov 16  }
   0x7   :  { %9 = vst [vmem:[#allocation0 + $0x40] sm:$0x3] %v81_v8 }
   0xb   :  { %v60_v9 = vld [vmem:[#allocation0 + $0x1] ss:$8 sm:$0xf0]   ;;  %v47_v10 = vld [vmem:[#allocation0] ss:$8 sm:$0xf0]  }
   0xd   :  { %v46_v11 = vld [vmem:[#allocation0] ss:$8 sm:$0xf]   ;;  %v58_v12 = vld [vmem:[#allocation0 + $0x1] ss:$8 sm:$0xf]  }
   0xe   :  { %v62_v13 = vsel %vm48_vm0, %v60_v9, %v58_v12  ;;  %v49_v14 = vsel %vm48_vm0, %v47_v10, %v46_v11  ;;  %v53_v15 = vld [vmem:[#allocation0 + $0x40] sm:$0x1]   ;;  %v68_v16 = vld [vmem:[#allocation0 + $0x41] sm:$0x1]  }
   0xf   :  { %63 = vrot.lane.b32.xlu0 %v62_v13, %s92_s0  ;;  %51 = vst.msk [vmem:[%s143_s1] sm:$0xff] %vm50_vm1, %v49_v14   ;;  %89 = vst.msk [vmem:[%s143_s1 + $0x8] sm:$0x1] %vm50_vm1, %v53_v15  }
  0x13   :  { %69 = vrot.lane.b32.xlu0 %v68_v16, %s92_s0 }
  0x81   :  { %v64_v17 = vpop.permute.xlu0 %63  }
  0x82   :  { %66 = vst.msk [vmem:[%s143_s1] sm:$0xff] %vm65_vm2, %v64_v17  }
  0x85   :  { %v70_v18 = vpop.permute.xlu0 %69  }
  0x86   :  { %90 = vst.msk [vmem:[%s143_s1 + $0x8] sm:$0x1] %vm65_vm2, %v70_v18  }

// kernel: tile.27
= control target key start
LH: loop header
LB: loop body
LE: loop exit
PB: predicated region body
PF: predicated region fallthrough
CT: control target
= control target key end

     0   :  { %vm29_vm0 = vcmask 1044484   ;;  %vm31_vm1 = vcmask 130048   ;;  %vm41_vm2 = vcmask 261248   ;;  %s83_s0 = inlined_call_operand.vmem [shape: f32[5,2,16], index: 0, kind: input, shape index: {}]   ;;  %s84_s1 = inlined_call_operand.vmem [shape: f32[5,32], index: 1, kind: output, shape index: {}]  }
   0x1   :  { %v46_v0 = vld [vmem:[%s83_s0 + $0x8] sm:$0x3]  ;;  %v47_v1 = vld [vmem:[%s83_s0 + $0x6] sm:$0x3]  ;;  %v48_v2 = vld [vmem:[%s83_s0 + $0x4] sm:$0x3] }
   0x2   :  { %9 = vst [vmem:[#allocation0 + $0x20] sm:$0x3] %v46_v0  ;;  %14 = vst [vmem:[#allocation0 + $0x18] sm:$0x3] %v47_v1  ;;  %v49_v3 = vld [vmem:[%s83_s0 + $0x2] sm:$0x3] }
   0x3   :  { %19 = vst [vmem:[#allocation0 + $0x10] sm:$0x3] %v48_v2  ;;  %v24_v4 = vld [vmem:[%s83_s0] sm:$0x3]  ;;  %23 = vst [vmem:[#allocation0 + $0x8] sm:$0x3] %v49_v3 }
   0x4   :  { %25 = vst [vmem:[#allocation0] sm:$0x3] %v24_v4  ;;  %s51_s0 = smov 16  }
   0x9   :  { %v28_v5 = vld [vmem:[#allocation0 + $0x1c] sm:$0x10]   ;;  %v36_v6 = vld [vmem:[#allocation0 + $0x1d] sm:$0x10]  }
   0xb   :  { %v26_v7 = vld [vmem:[#allocation0] ss:$8 sm:$0xf]   ;;  %v34_v8 = vld [vmem:[#allocation0 + $0x1] ss:$8 sm:$0xf]  }
   0xc   :  { %v30_v9 = vsel %vm29_vm0, %v28_v5, %v26_v7  ;;  %v38_v10 = vsel %vm29_vm0, %v36_v6, %v34_v8 }
   0xd   :  { %39 = vrot.lane.b32.xlu0 %v38_v10, %s51_s0  ;;  %32 = vst.msk [vmem:[%s84_s1] sm:$0x1f] %vm31_vm1, %v30_v9  }
  0x7f   :  { %v40_v11 = vpop.permute.xlu0 %39  }
  0x80   :  { %42 = vst.msk [vmem:[%s84_s1] sm:$0x1f] %vm41_vm2, %v40_v11  }

// kernel: _lambda_.3
= control target key start
LH: loop header
LB: loop body
LE: loop exit
PB: predicated region body
PF: predicated region fallthrough
CT: control target
= control target key end

     0   :  { %s3787_s0 = inlined_call_operand.vmem [shape: s32[2], index: 0, kind: input, shape index: {}]   ;;  %s3788_s1 = inlined_call_operand.vmem [shape: f32[2,5,32], index: 1, kind: input, shape index: {}]   ;;  %s3789_s2 = inlined_call_operand.vmem [shape: f32[1,32], index: 2, kind: input, shape index: {}]   ;;  %s3790_s3 = inlined_call_operand.vmem [shape: f32[1,32], index: 3, kind: input, shape index: {}]   ;;  %s3791_s4 = inlined_call_operand.vmem [shape: f32[1,32], index: 4, kind: input, shape index: {}]   ;;  %s3792_s5 = inlined_call_operand.vmem [shape: f32[2,32,96], index: 5, kind: input, shape index: {}]   ;;  %s3793_s6 = inlined_call_operand.vmem [shape: f32[2,1,96], index: 6, kind: input, shape index: {}]   ;;  %s3794_s7 = inlined_call_operand.vmem [shape: f32[2,32,32], index: 7, kind: input, shape index: {}]   ;;  %s3795_s8 = inlined_call_operand.vmem [shape: f32[2,1,32], index: 8, kind: input, shape index: {}]   ;;  %s3796_s9 = inlined_call_operand.vmem [shape: f32[2,1,32], index: 9, kind: input, shape index: {}]   ;;  %s3797_s10 = inlined_call_operand.vmem [shape: f32[2,1,32], index: 10, kind: input, shape index: {}]   ;;  %s3798_s11 = inlined_call_operand.vmem [shape: f32[2,32,64], index: 11, kind: input, shape index: {}]   ;;  %s3799_s12 = inlined_call_operand.vmem [shape: f32[2,1,64], index: 12, kind: input, shape index: {}]   ;;  %s3800_s13 = inlined_call_operand.vmem [shape: f32[2,64,32], index: 13, kind: input, shape index: {}]   ;;  %s3801_s14 = inlined_call_operand.vmem [shape: f32[2,1,32], index: 14, kind: input, shape index: {}]   ;;  %s3802_s15 = inlined_call_operand.vmem [shape: f32[2,1,32], index: 15, kind: input, shape index: {}]   ;;  %s3803_s16 = inlined_call_operand.vmem [shape: f32[2,1,32], index: 16, kind: input, shape index: {}]   ;;  %s3804_s17 = inlined_call_operand.vmem [shape: f32[32,32], index: 17, kind: input, shape index: {}]   ;;  %s3805_s18 = inlined_call_operand.vmem [shape: f32[5,32], index: 18, kind: input, shape index: {}]   ;;  %s3806_s19 = inlined_call_operand.vmem [shape: f32[5,32], index: 19, kind: input, shape index: {}]   ;;  %s3807_s20 = inlined_call_operand.vmem [shape: f32[32,128], index: 20, kind: input, shape index: {}]   ;;  %s3808_s21 = inlined_call_operand.vmem [shape: f32[1,128], index: 21, kind: input, shape index: {}]   ;;  %s3809_s22 = inlined_call_operand.vmem [shape: f32[2,5,128], index: 22, kind: output, shape index: {}]  }
   0x1   :  { %3817 = sst [smem:[#allocation5_spill]] %s3787_s0 }
   0x2   :  { %3818 = sst [smem:[#allocation6_spill]] %s3788_s1 }
   0x3   :  { %3819 = sst [smem:[#allocation7_spill]] %s3789_s2 }
   0x4   :  { %3820 = sst [smem:[#allocation8_spill]] %s3790_s3 }
   0x5   :  { %3821 = sst [smem:[#allocation9_spill]] %s3791_s4 }
   0x6   :  { %3822 = sst [smem:[#allocation10_spill]] %s3792_s5 }
   0x7   :  { %3823 = sst [smem:[#allocation11_spill]] %s3793_s6 }
   0x8   :  { %3824 = sst [smem:[#allocation12_spill]] %s3803_s16 }
   0x9   :  { %s3825_s29 = sld [smem:[#allocation5_spill]] }
   0xf   :  { %s27_s16 = sshll.u32 %s3825_s29, 4  ;;  %s28_s16 = int_to_ptr.vmem [resolvable:$true] %s27_s16 }
  0x10   :  { %s3149_s30 = scalar_lea.vmem %s28_s16, 16  ;;  %p3154_p1 = scmp.lt.s32.totalorder %s28_s16, %s28_s16 }
  0x11   :  { %p3150_p0 = scmp.ne.s32.totalorder %s28_s16, %s3149_s30  ;;  %p3155_p2 = scmp.lt.s32.totalorder %s3149_s30, %s3149_s30 }
  0x13   :  { %p3156_p3 = por %p3155_p2, %p3154_p1 }
  0x15   :  { %p3157_p4 = pnand %p3156_p3, %p3150_p0 }
  0x17   :  { %3160 = shalt.err (!%p3157_p4)  }
  0x18   :  { %s3171_s4 = smov [#allocation3]  }
  0x19   :  { %30 = dma.vmem_to_smem %s28_s16, 16, %s3171_s4, [#allocation2] }
  0x1a   :  { %3165 = dma.done.wait [#allocation2], 16 }
  0x1b   :  { %3166 = vsyncadd [#allocation2], 4294967280 }
  0x1c   :  { %32 = sfence }
  0x1d   :  { %s3301_s0 = smov 0  }
  0x1e LB: > { %s3307_s23 = sadd.s32 4294967295, %s3169_s0   ;;  %p2725_p5 = scmp.ge.s32.totalorder %s3169_s0, 1  ;;  %s3169_s0 = sphi %s3301_s0, %s38_s0  }
  0x1f   : > { %p593_p6 = scmp.lt.s32.totalorder %s3169_s0, 3 }
  0x21   : > { %p594_p7 = pnand %p2725_p5, %p593_p6 }
  0x22   : > { %p651_p8 = scmp.lt.s32.totalorder (!%p594_p7), %s3307_s23, 1  ;;  %s3826_s6 = sld [smem:[#allocation7_spill]] (!%p594_p7) }
  0x23   : > { %597 = sbr.rel (%p594_p7) target bundleno = 6694 (0x1a26), region = 104  ;;  %s3827_s2 = sld [smem:[#allocation6_spill]] (!%p594_p7) }
  0x24   : > { %s3828_s29 = sld [smem:[#allocation10_spill]] (!%p594_p7)  ;;  %s3179_s3 = smov (!%p594_p7), 80  }
  0x25   : > { %s3829_s4 = sld [smem:[#allocation8_spill]] (!%p594_p7)  ;;  %s3816_s28 = smov (!%p594_p7), 48  }
  0x26   : > { %s3831_s30 = sld [smem:[#allocation11_spill]] (!%p594_p7)  ;;  %s3815_s24 = smov (!%p594_p7), 16  }
  0x28   : > { %s3313_s16 = scalar_select %p651_p8, %s3307_s23, 1  ;;  %v2728_v0 = vld [vmem:[%s3826_s6] ss:$0 sm:$0xff]  ;;  %vm670_vm0 = vcmask 258048   ;;  %v3172_v10 = vmov 0.0   ;;  %vm3173_vm1 = vmmov 0   ;;  %v706_v47 = vlaneseq }
  0x29   : > { %2896 = vmatprep.subr.mxu0 %v3172_v10  ;;  %2904 = vmatprep.mubr.msk.f32.mxu0 %vm3173_vm1, %v3172_v10  ;;  %v3351_v14 = vld [vmem:[%s3804_s17 + $0x18] sm:$0xff]  ;;  %v3356_v15 = vld [vmem:[%s3804_s17 + $0x10] sm:$0xff]  ;;  %s3830_s6 = sld [smem:[#allocation9_spill]]  ;;  %vm722_vm2 = vcmask 261120   ;;  %v3381_v25 = vld [vmem:[%s3804_s17 + $0x8] sm:$0xff]  ;;  %vm960_vm3 = vcmask 130048  }
  0x2a   : > { %s3813_s1 = sshll.u32 %s3313_s16, 3  ;;  %v714_v9 = vld [vmem:[%s3828_s29 + $0x18] sm:$0xff]  ;;  %v713_v11 = vld [vmem:[%s3828_s29 + $0x10] sm:$0xff]  ;;  %2907 = vmatprep.subr.mxu1 %v3172_v10  ;;  %v712_v12 = vld [vmem:[%s3828_s29 + $0x8] sm:$0xff]  ;;  %2915 = vmatprep.mubr.msk.f32.mxu1 %vm3173_vm1, %v3172_v10  ;;  %v707_v48 = vand.u32 127, %v706_v47  ;;  %vm1038_vm5 = vcmask 36864  }
  0x2b   : > { %s654_s27 = scalar_lea.vmem %s3827_s2, %s3813_s1  ;;  %2897 = vmatpush3.msra.mxu0 %v714_v9  ;;  %v711_v13 = vld [vmem:[%s3828_s29] sm:$0xff]  ;;  %2908 = vmatpush3.msra.mxu1 %v3351_v14  ;;  %s705_s2 = sld [smem:[#allocation3 + %s3307_s23]]  ;;  %v3176_v51 = vmov -1e+30   ;;  %vm1056_vm6 = vcmask 1044480   ;;  %vm1052_vm7 = vcmask 39936  }
  0x2c   : > { %v659_v1 = vld [vmem:[%s654_s27] sm:$0x1f]  ;;  %2898 = vmatprep.subr.mxu0 %v3172_v10  ;;  %2909 = vmatprep.subr.mxu1 %v3172_v10  ;;  %s3814_s27 = smov 64   ;;  %s3178_s23 = smov 112   ;;  %vm1542_vm9 = vcmask 523264  }
  0x2d   : > { %v667_v2 = vadd.f32 %v2728_v0, %v659_v1  ;;  %2899 = vmatpush3.msra.mxu0 %v713_v11  ;;  %2910 = vmatpush3.msra.mxu1 %v3356_v15  ;;  %v2729_v20 = vld [vmem:[%s3829_s4] ss:$0 sm:$0xff]  ;;  %s3174_s4 = smov 96   ;;  %s3835_s1 = smov 16  }
  0x2e   : > { %2900 = vmatprep.subr.mxu0 %v3172_v10  ;;  %2911 = vmatprep.subr.mxu1 %v3172_v10  ;;  %v3389_v26 = vld [vmem:[%s3804_s17] sm:$0xff]  ;;  %s3836_s25 = sshll.u32 %s3313_s16, 3 }
  0x2f   : > { %v671_v3 = vsel %vm670_vm0, %v667_v2, 0.0  ;;  %2901 = vmatpush3.msra.mxu0 %v712_v12  ;;  %v2730_v22 = vld [vmem:[%s3830_s6] ss:$0 sm:$0xff]  ;;  %2912 = vmatpush3.msra.mxu1 %v3381_v25  ;;  %s3175_s6 = smov 32  }
  0x30   : > { %672 = vadd.xlane.f32.xlu0 %v671_v3  ;;  %2902 = vmatprep.subr.mxu0 %v3172_v10  ;;  %v2731_v27 = vld [vmem:[%s3831_s30] ss:$0 sm:$0xff] }
  0x31   : > { %2903 = vmatpush3.msra.mxu0 %v711_v13  ;;  %2913 = vmatprep.subr.mxu1 %v3172_v10  ;;  %v3410_v31 = vld [vmem:[%s3806_s19] sm:$0x1f]  ;;  %v708_v49 = vstv %s705_s2  ;;  %s658_s2 = scalar_lea.vmem %s3809_s22, %s3836_s25 }
  0x32   : > { %2918 = vmatprep.subr.mxu0 %v3172_v10  ;;  %2914 = vmatpush3.msra.mxu1 %v3389_v26  ;;  %v3420_v35 = vld [vmem:[%s3805_s18] sm:$0x1f]  ;;  %vm709_vm4 = vcmp.lt.s32.totalorder %v707_v48, %v708_v49  ;;  %v1419_v48 = vld [vmem:[%s3798_s11 + $0x18] sm:$0xff]  ;;  %v1418_v49 = vld [vmem:[%s3798_s11 + $0x10] sm:$0xff] }
  0x33   : > { %2929 = vmatprep.subr.mxu1 %v3172_v10  ;;  %v3438_v52 = vsel %vm709_vm4, 0.0, %v3176_v51 }
  0xb9   : > { %v673_v4 = vpop.xlane.xlu0 %672 }
  0xba   : > { %v675_v5 = vmul.f32 0.03125, %v673_v4 }
  0xbc   : > { %v676_v6 = vsub.f32 %v667_v2, %v675_v5 }
  0xbe   : > { %v677_v7 = vmul.f32 %v676_v6, %v676_v6 }
  0xc0   : > { %v678_v8 = vsel %vm670_vm0, %v677_v7, 0.0 }
  0xc1   : > { %679 = vadd.xlane.f32.xlu0 %v678_v8 }
 0x14a   : > { %v680_v16 = vpop.xlane.xlu0 %679 }
 0x14b   : > { %v681_v17 = vmul.f32 0.03125, %v680_v16 }
 0x14d   : > { %v682_v18 = vadd.f32 1e-12, %v681_v17 }
 0x14f   : > { %3115 = vrsqrt.f32 %v682_v18 }
 0x15c   : > { %v3116_v19 = vpop.eup %3115 }
 0x15d   : > { %v684_v21 = vmul.f32 %v3116_v19, %v676_v6 }
 0x15f   : > { %v691_v23 = vmul.f32 %v2729_v20, %v684_v21 }
 0x161   : > { %v3368_v24 = vadd.f32 %v2730_v22, %v691_v23  ;;  %v1305_v23 = vld [vmem:[%s3794_s7 + $0x18] sm:$0xff] }
 0x163   : > { %2905 = vmatmul.mubr.msk.f32.vlgmr.msra.gmra.mxu0 %vm722_vm2, %v3368_v24 }
 0x164   : > { %2919 = vmatpush3.msra.mxu0 %v3351_v14  ;;  %2926 = vmatprep.mubr.msk.f32.mxu0 %vm3173_vm1, %v3172_v10 }
 0x165   : > { %2920 = vmatprep.subr.mxu0 %v3172_v10 }
 0x166   : > { %2921 = vmatpush3.msra.mxu0 %v3356_v15 }
 0x167   : > { %2922 = vmatprep.subr.mxu0 %v3172_v10 }
 0x168   : > { %2923 = vmatpush3.msra.mxu0 %v3381_v25 }
 0x169   : > { %2924 = vmatprep.subr.mxu0 %v3172_v10 }
 0x16a   : > { %2925 = vmatpush3.msra.mxu0 %v3389_v26 }
 0x16b   : > { %2949 = vmatprep.subr.mxu0 %v3172_v10 }
 0x223   : > { %v792_v28 = vpop.f32.mrf.mxu0 }
 0x224   : > { %v3399_v29 = vadd.f32 %v2731_v27, %v792_v28  ;;  %v1304_v27 = vld [vmem:[%s3794_s7 + $0x10] sm:$0xff]  ;;  %v1303_v28 = vld [vmem:[%s3794_s7 + $0x8] sm:$0xff] }
 0x225   : > { %v2906_v30 = vpop.f32.mrf.mxu0 }
 0x226   : > { %869 = vrot.lane.b32.xlu1 %v3399_v29, %s3174_s4  ;;  %2916 = vmatmul.mubr.msk.f32.vlgmr.msra.gmra.mxu1 %vm722_vm2, %v3399_v29  ;;  %v943_v44 = vmul.f32 %v3399_v29, %v3410_v31 }
 0x227   : > { %2931 = vmatprep.mubr.msk.f32.mxu1 %vm3173_vm1, %v3172_v10 }
 0x22a   : > { %947 = vrot.lane.b32.xlu1 %v3410_v31, %s3175_s6 }
 0x298   : > { %v870_v32 = vpop.permute.xlu1 %869 }
 0x299   : > { %2927 = vmatmul.mubr.msk.f32.vlgmr.msra.gmra.mxu0 %vm722_vm2, %v870_v32 }
 0x29a   : > { %2957 = vmatprep.mubr.msk.f32.mxu0 %vm3173_vm1, %v3172_v10  ;;  %2950 = vmatpush3.msra.mxu0 %v1305_v23 }
 0x29b   : > { %2951 = vmatprep.subr.mxu0 %v3172_v10 }
 0x29c   : > { %v3424_v39 = vpop.permute.xlu1 %947  ;;  %2952 = vmatpush3.msra.mxu0 %v1304_v27 }
 0x29d   : > { %v950_v40 = vmul.f32 %v3424_v39, %v3399_v29  ;;  %2953 = vmatprep.subr.mxu0 %v3172_v10 }
 0x29e   : > { %2954 = vmatpush3.msra.mxu0 %v1303_v28 }
 0x29f   : > { %2955 = vmatprep.subr.mxu0 %v3172_v10 }
 0x2e6   : > { %v865_v33 = vpop.f32.mrf.mxu1 }
 0x2e7   : > { %v944_v43 = vmul.f32 %v865_v33, %v3420_v35 }
 0x2e8   : > { %v2917_v34 = vpop.f32.mrf.mxu1 }
 0x2e9   : > { %v945_v46 = vadd.f32 %v944_v43, %v943_v44 }
 0x359   : > { %v939_v36 = vpop.f32.mrf.mxu0 }
 0x35a   : > { %v951_v37 = vmul.f32 %v939_v36, %v3420_v35  ;;  %v2743_v36 = vld [vmem:[%s3795_s8] ss:$0 sm:$0xff] }
 0x35b   : > { %v2928_v38 = vpop.f32.mrf.mxu0 }
 0x35c   : > { %953 = vrot.lane.b32.xlu0 %v951_v37, %s3175_s6 }
 0x3ce   : > { %v954_v41 = vpop.permute.xlu0 %953 }
 0x3cf   : > { %v956_v42 = vadd.f32 %v954_v41, %v950_v40 }
 0x3d1   : > { %958 = vrot.lane.b32.xlu1 %v956_v42, %s3174_s4 }
 0x443   : > { %v959_v45 = vpop.permute.xlu1 %958 }
 0x444   : > { %2930 = vmatpush3.xpose.msk.msra.mxu1 %vm960_vm3, %v959_v45 }
 0x445   : > { %2934 = vmatprep.subr.mxu1 %v3172_v10 }
 0x447   : > { %2932 = vmatmul.mubr.msk.f32.vlgmr.msra.gmra.mxu1 %vm960_vm3, %v945_v46 }
 0x448   : > { %2936 = vmatprep.mubr.msk.f32.mxu1 %vm3173_vm1, %v3172_v10 }
 0x507   : > { %v1032_v50 = vpop.f32.mrf.mxu1 }
 0x508   : > { %v1036_v53 = vmul.f32 0.25, %v1032_v50  ;;  %v1416_v50 = vld [vmem:[%s3798_s11] sm:$0xff] }
 0x509   : > { %v2933_v54 = vpop.f32.mrf.mxu1 }
 0x50a   : > { %v1037_v55 = vadd.f32 %v1036_v53, %v3438_v52 }
 0x50c   : > { %v1039_v56 = vsel %vm1038_vm5, %v1037_v55, -inf }
 0x50d   : > { %1040 = vmax.xlane.f32.xlu1 %v1039_v56  ;;  %v2745_v56 = vld [vmem:[%s3796_s9] ss:$0 sm:$0xff] }
 0x51e   : > { %1050 = vrot.lane.b32.xlu1 %v3399_v29, %s3814_s27 }
 0x522   : > { %1129 = vrot.lane.b32.xlu1 %v945_v46, %s3178_s23 }
 0x596   : > { %v1041_v57 = vpop.xlane.xlu1 %1040 }
 0x597   : > { %v1042_v58 = vsub.f32 %v1037_v55, %v1041_v57 }
 0x599   : > { %v1043_v59 = vmul.f32 1.442695, %v1042_v58  ;;  %v2746_v58 = vld [vmem:[%s3797_s10] ss:$0 sm:$0xff] }
 0x59a   : > { %v1051_v60 = vpop.permute.xlu1 %1050 }
 0x59b   : > { %3117 = vpow2.f32 %v1043_v59  ;;  %2935 = vmatpush3.msk.msra.mxu1 %vm1056_vm6, %v1051_v60 }
 0x59c   : > { %2939 = vmatprep.subr.mxu1 %v3172_v10 }
 0x59e   : > { %v1130_v3 = vpop.permute.xlu1 %1129 }
 0x5a8   : > { %v3118_v61 = vpop.eup %3117 }
 0x5a9   : > { %v1045_v62 = vsel %vm1038_vm5, %v3118_v61, 0.0 }
 0x5aa   : > { %1046 = vadd.xlane.f32.xlu0 %v1045_v62  ;;  %v1533_v62 = vld [vmem:[%s3800_s13 + $0x30] sm:$0xff] }
 0x5c0   : > { %1131 = vrot.lane.b32.xlu0 %v956_v42, %s3179_s3 }
 0x633   : > { %v1047_v63 = vpop.xlane.xlu0 %1046 }
 0x634   : > { %3119 = vrcp.f32 %v1047_v63  ;;  %v1532_v63 = vld [vmem:[%s3800_s13 + $0x28] sm:$0xff] }
 0x637   : > { %v1132_v2 = vpop.permute.xlu0 %1131 }
 0x641   : > { %v3120_v0 = vpop.eup %3119 }
 0x642   : > { %v1049_v1 = vmul.f32 %v3120_v0, %v3118_v61  ;;  %v1534_v61 = vld [vmem:[%s3800_s13 + $0x38] sm:$0xff]  ;;  %v1531_v0 = vld [vmem:[%s3800_s13 + $0x20] sm:$0xff] }
 0x644   : > { %2937 = vmatmul.mubr.msk.f32.vlgmr.msra.gmra.mxu1 %vm1052_vm7, %v1049_v1  ;;  %v1530_v1 = vld [vmem:[%s3800_s13 + $0x18] sm:$0xff] }
 0x645   : > { %2940 = vmatpush3.xpose.msk.msra.mxu1 %vm960_vm3, %v1132_v2  ;;  %2941 = vmatprep.mubr.msk.f32.mxu1 %vm3173_vm1, %v3172_v10  ;;  %v1529_v2 = vld [vmem:[%s3800_s13 + $0x10] sm:$0xff] }
 0x646   : > { %2944 = vmatprep.subr.mxu1 %v3172_v10 }
 0x648   : > { %2942 = vmatmul.mubr.msk.f32.vlgmr.msra.gmra.mxu1 %vm960_vm3, %v1130_v3  ;;  %v1528_v3 = vld [vmem:[%s3800_s13 + $0x8] sm:$0xff] }
 0x649   : > { %2946 = vmatprep.mubr.msk.f32.mxu1 %vm3173_vm1, %v3172_v10 }
 0x704   : > { %v1125_v4 = vpop.f32.mrf.mxu1 }
 0x706   : > { %v2938_v5 = vpop.f32.mrf.mxu1 }
 0x707   : > { %v2747_v5 = vld [vmem:[%s3799_s12] ss:$0 sm:$0xff] }
 0x708   : > { %v1203_v6 = vpop.f32.mrf.mxu1 }
 0x709   : > { %v1207_v7 = vmul.f32 0.25, %v1203_v6 }
 0x70a   : > { %v2943_v8 = vpop.f32.mrf.mxu1 }
 0x70b   : > { %v1208_v9 = vadd.f32 %v1207_v7, %v3438_v52 }
 0x70d   : > { %v1209_v11 = vsel %vm1038_vm5, %v1208_v9, -inf }
 0x70e   : > { %1210 = vmax.xlane.f32.xlu1 %v1209_v11 }
 0x71f   : > { %1220 = vrot.lane.b32.xlu1 %v3399_v29, %s3816_s28  ;;  %v1302_v29 = vld [vmem:[%s3794_s7] sm:$0xff]  ;;  %s3832_s28 = sld [smem:[#allocation12_spill]] }
 0x720   : > { %2956 = vmatpush3.msra.mxu0 %v1302_v29 }
 0x721   : > { %2971 = vmatprep.subr.mxu0 %v3172_v10 }
 0x797   : > { %v1211_v12 = vpop.xlane.xlu1 %1210 }
 0x798   : > { %v1212_v13 = vsub.f32 %v1208_v9, %v1211_v12 }
 0x79a   : > { %v1213_v16 = vmul.f32 1.442695, %v1212_v13 }
 0x79b   : > { %v1221_v17 = vpop.permute.xlu1 %1220 }
 0x79c   : > { %3121 = vpow2.f32 %v1213_v16  ;;  %2945 = vmatpush3.msk.msra.mxu1 %vm1056_vm6, %v1221_v17 }
 0x79d   : > { %2960 = vmatprep.subr.mxu1 %v3172_v10 }
 0x7a9   : > { %v3122_v18 = vpop.eup %3121 }
 0x7aa   : > { %v1215_v19 = vsel %vm1038_vm5, %v3122_v18, 0.0 }
 0x7ab   : > { %1216 = vadd.xlane.f32.xlu0 %v1215_v19 }
 0x834   : > { %v1217_v20 = vpop.xlane.xlu0 %1216 }
 0x835   : > { %3123 = vrcp.f32 %v1217_v20 }
 0x842   : > { %v3124_v21 = vpop.eup %3123 }
 0x843   : > { %v1219_v22 = vmul.f32 %v3124_v21, %v3122_v18 }
 0x845   : > { %2947 = vmatmul.mubr.msk.f32.vlgmr.msra.gmra.mxu1 %vm1052_vm7, %v1219_v22 }
 0x846   : > { %2968 = vmatprep.mubr.msk.f32.mxu1 %vm3173_vm1, %v3172_v10  ;;  %2961 = vmatpush3.msra.mxu1 %v1419_v48 }
 0x847   : > { %2962 = vmatprep.subr.mxu1 %v3172_v10 }
 0x848   : > { %2963 = vmatpush3.msra.mxu1 %v1418_v49 }
 0x849   : > { %2964 = vmatprep.subr.mxu1 %v3172_v10 }
 0x905   : > { %v1293_v30 = vpop.f32.mrf.mxu1 }
 0x906   : > { %1298 = vrot.lane.b32.xlu0 %v1293_v30, %s3815_s24 }
 0x907   : > { %v2948_v32 = vpop.f32.mrf.mxu1 }
 0x978   : > { %v1299_v33 = vpop.permute.xlu0 %1298 }
 0x979   : > { %v1301_v34 = vsel %vm960_vm3, %v1125_v4, %v1299_v33  ;;  %v1527_v4 = vld [vmem:[%s3800_s13] sm:$0xff] }
 0x97a   : > { %2958 = vmatmul.mubr.msk.f32.vlgmr.msra.gmra.mxu0 %vm722_vm2, %v1301_v34 }
 0x97b   : > { %2987 = vmatprep.mubr.msk.f32.mxu0 %vm3173_vm1, %v3172_v10  ;;  %2972 = vmatpush3.msra.mxu0 %v1534_v61 }
 0x97c   : > { %2973 = vmatprep.subr.mxu0 %v3172_v10 }
 0x97d   : > { %2974 = vmatpush3.msra.mxu0 %v1533_v62 }
 0x97e   : > { %2975 = vmatprep.subr.mxu0 %v3172_v10 }
 0x97f   : > { %2976 = vmatpush3.msra.mxu0 %v1532_v63  ;;  %v2751_v63 = vld [vmem:[%s3802_s15] ss:$0 sm:$0xff] }
 0x980   : > { %2977 = vmatprep.subr.mxu0 %v3172_v10 }
 0x981   : > { %2978 = vmatpush3.msra.mxu0 %v1531_v0 }
 0x982   : > { %2979 = vmatprep.subr.mxu0 %v3172_v10 }
 0x983   : > { %2980 = vmatpush3.msra.mxu0 %v1530_v1  ;;  %v2752_v1 = vld [vmem:[%s3832_s28] ss:$0 sm:$0xff] }
 0x984   : > { %2981 = vmatprep.subr.mxu0 %v3172_v10 }
 0x985   : > { %2982 = vmatpush3.msra.mxu0 %v1529_v2 }
 0x986   : > { %2983 = vmatprep.subr.mxu0 %v3172_v10 }
 0x987   : > { %2984 = vmatpush3.msra.mxu0 %v1528_v3 }
 0x988   : > { %2985 = vmatprep.subr.mxu0 %v3172_v10 }
 0x989   : > { %2986 = vmatpush3.msra.mxu0 %v1527_v4 }
 0x98a   : > { %3012 = vmatprep.subr.mxu0 %v3172_v10 }
 0xa3a   : > { %v1382_v37 = vpop.f32.mrf.mxu0 }
 0xa3b   : > { %v1383_v38 = vadd.f32 %v2743_v36, %v1382_v37  ;;  %v3182_v37 = vmov -1.0  }
 0xa3c   : > { %v2959_v40 = vpop.f32.mrf.mxu0 }
 0xa3d   : > { %v1386_v41 = vadd.f32 %v1383_v38, %v3368_v24  ;;  %v1417_v24 = vld [vmem:[%s3798_s11 + $0x8] sm:$0xff] }
 0xa3e   : > { %2965 = vmatpush3.msra.mxu1 %v1417_v24 }
 0xa3f   : > { %v1389_v42 = vsel %vm670_vm0, %v1386_v41, 0.0  ;;  %2966 = vmatprep.subr.mxu1 %v3172_v10 }
 0xa40   : > { %1390 = vadd.xlane.f32.xlu1 %v1389_v42  ;;  %2967 = vmatpush3.msra.mxu1 %v1416_v50 }
 0xa41   : > { %2990 = vmatprep.subr.mxu1 %v3172_v10 }
 0xac9   : > { %v1391_v43 = vpop.xlane.xlu1 %1390 }
 0xaca   : > { %v1392_v44 = vmul.f32 0.03125, %v1391_v43 }
 0xacc   : > { %v1393_v45 = vsub.f32 %v1386_v41, %v1392_v44  ;;  %v2749_v44 = vld [vmem:[%s3801_s14] ss:$0 sm:$0xff] }
 0xace   : > { %v1394_v46 = vmul.f32 %v1393_v45, %v1393_v45 }
 0xad0   : > { %v1395_v47 = vsel %vm670_vm0, %v1394_v46, 0.0 }
 0xad1   : > { %1396 = vadd.xlane.f32.xlu0 %v1395_v47 }
 0xb5a   : > { %v1397_v51 = vpop.xlane.xlu0 %1396 }
 0xb5b   : > { %v1398_v53 = vmul.f32 0.03125, %v1397_v51 }
 0xb5d   : > { %v1399_v54 = vadd.f32 1e-12, %v1398_v53 }
 0xb5f   : > { %3125 = vrsqrt.f32 %v1399_v54 }
 0xb6c   : > { %v3126_v55 = vpop.eup %3125 }
 0xb6d   : > { %v1401_v57 = vmul.f32 %v3126_v55, %v1393_v45  ;;  %v2756_v55 = vld [vmem:[%s3828_s29 + $0x38] sm:$0xff] }
 0xb6f   : > { %v1408_v59 = vmul.f32 %v2745_v56, %v1401_v57  ;;  %v2755_v56 = vld [vmem:[%s3828_s29 + $0x30] sm:$0xff]  ;;  %v2754_v57 = vld [vmem:[%s3828_s29 + $0x28] sm:$0xff] }
 0xb71   : > { %v3516_v60 = vadd.f32 %v2746_v58, %v1408_v59  ;;  %v2753_v58 = vld [vmem:[%s3828_s29 + $0x20] sm:$0xff] }
 0xb73   : > { %2969 = vmatmul.mubr.msk.f32.vlgmr.msra.gmra.mxu1 %vm722_vm2, %v3516_v60 }
 0xb74   : > { %2998 = vmatprep.mubr.msk.f32.mxu1 %vm3173_vm1, %v3172_v10  ;;  %2991 = vmatpush3.msra.mxu1 %v2756_v55  ;;  %v2771_v55 = vld [vmem:[%s3794_s7 + $0x28] sm:$0xff] }
 0xb75   : > { %2992 = vmatprep.subr.mxu1 %v3172_v10 }
 0xb76   : > { %2993 = vmatpush3.msra.mxu1 %v2755_v56  ;;  %v2770_v56 = vld [vmem:[%s3794_s7 + $0x20] sm:$0xff] }
 0xb77   : > { %2994 = vmatprep.subr.mxu1 %v3172_v10 }
 0xb78   : > { %2995 = vmatpush3.msra.mxu1 %v2754_v57 }
 0xb79   : > { %2996 = vmatprep.subr.mxu1 %v3172_v10 }
 0xb7a   : > { %2997 = vmatpush3.msra.mxu1 %v2753_v58 }
 0xb7b   : > { %3001 = vmatprep.subr.mxu1 %v3172_v10 }
 0xc33   : > { %v1496_v6 = vpop.f32.mrf.mxu1 }
 0xc34   : > { %v1497_v7 = vadd.f32 %v2747_v5, %v1496_v6 }
 0xc35   : > { %v2970_v8 = vpop.f32.mrf.mxu1 }
 0xc36   : > { %v1501_v9 = vmul.f32 0.70710677, %v1497_v7  ;;  %v1500_v41 = vmul.f32 0.5, %v1497_v7 }
 0xc38   : > { %v1504_v11 = vand.u32 2147483647, %v1501_v9  ;;  %vm1502_vm8 = vcmp.ge.f32.partialorder %v1501_v9, 0.0 }
 0xc39   : > { %v1503_v38 = vsel %vm1502_vm8, 1.0, %v3182_v37 }
 0xc3a   : > { %v1505_v12 = vmul.f32 0.3275911, %v1504_v11  ;;  %v1518_v16 = vsub.f32 0.0, %v1504_v11 }
 0xc3c   : > { %v1506_v13 = vadd.f32 1.0, %v1505_v12  ;;  %v1519_v17 = vmul.f32 %v1518_v16, %v1504_v11 }
 0xc3e   : > { %3127 = vrcp.f32 %v1506_v13  ;;  %v1520_v20 = vmul.f32 1.442695, %v1519_v17 }
 0xc40   : > { %3129 = vpow2.f32 %v1520_v20 }
 0xc4b   : > { %v3128_v18 = vpop.eup %3127 }
 0xc4c   : > { %v1509_v19 = vmul.f32 1.0614054, %v3128_v18 }
 0xc4d   : > { %v3130_v33 = vpop.eup %3129 }
 0xc4e   : > { %v1510_v21 = vadd.f32 -1.4531521, %v1509_v19 }
 0xc50   : > { %v1511_v22 = vmul.f32 %v3128_v18, %v1510_v21 }
 0xc52   : > { %v1512_v23 = vadd.f32 1.4214138, %v1511_v22 }
 0xc54   : > { %v1513_v27 = vmul.f32 %v3128_v18, %v1512_v23 }
 0xc56   : > { %v1514_v28 = vadd.f32 -0.28449672, %v1513_v27 }
 0xc58   : > { %v1515_v29 = vmul.f32 %v3128_v18, %v1514_v28 }
 0xc5a   : > { %v1516_v30 = vadd.f32 0.2548296, %v1515_v29 }
 0xc5c   : > { %v1517_v32 = vmul.f32 %v3128_v18, %v1516_v30 }
 0xc5e   : > { %v1522_v34 = vmul.f32 %v3130_v33, %v1517_v32 }
 0xc60   : > { %v1523_v36 = vsub.f32 1.0, %v1522_v34 }
 0xc62   : > { %v1524_v40 = vmul.f32 %v1523_v36, %v1503_v38 }
 0xc64   : > { %v1525_v42 = vadd.f32 1.0, %v1524_v40 }
 0xc66   : > { %v1526_v43 = vmul.f32 %v1525_v42, %v1500_v41 }
 0xc68   : > { %2988 = vmatmul.mubr.msk.f32.vlgmr.msra.gmra.mxu0 %vm1542_vm9, %v1526_v43 }
 0xc69   : > { %3013 = vmatpush3.msra.mxu0 %v3351_v14  ;;  %3020 = vmatprep.mubr.msk.f32.mxu0 %vm3173_vm1, %v3172_v10 }
 0xc6a   : > { %3014 = vmatprep.subr.mxu0 %v3172_v10 }
 0xc6b   : > { %3015 = vmatpush3.msra.mxu0 %v3356_v15 }
 0xc6c   : > { %3016 = vmatprep.subr.mxu0 %v3172_v10 }
 0xc6d   : > { %3017 = vmatpush3.msra.mxu0 %v3381_v25 }
 0xc6e   : > { %3018 = vmatprep.subr.mxu0 %v3172_v10 }
 0xc6f   : > { %3019 = vmatpush3.msra.mxu0 %v3389_v26 }
 0xc70   : > { %3033 = vmatprep.subr.mxu0 %v3172_v10 }
 0xd28   : > { %v1612_v45 = vpop.f32.mrf.mxu0 }
 0xd29   : > { %v1613_v46 = vadd.f32 %v2749_v44, %v1612_v45 }
 0xd2a   : > { %v2989_v47 = vpop.f32.mrf.mxu0 }
 0xd2b   : > { %v1616_v48 = vadd.f32 %v1613_v46, %v3516_v60 }
 0xd2d   : > { %v1619_v49 = vsel %vm670_vm0, %v1616_v48, 0.0 }
 0xd2e   : > { %1620 = vadd.xlane.f32.xlu1 %v1619_v49 }
 0xdb7   : > { %v1621_v24 = vpop.xlane.xlu1 %1620 }
 0xdb8   : > { %v1622_v50 = vmul.f32 0.03125, %v1621_v24 }
 0xdba   : > { %v1623_v51 = vsub.f32 %v1616_v48, %v1622_v50 }
 0xdbc   : > { %v1624_v53 = vmul.f32 %v1623_v51, %v1623_v51 }
 0xdbe   : > { %v1625_v54 = vsel %vm670_vm0, %v1624_v53, 0.0  ;;  %v2773_v53 = vld [vmem:[%s3794_s7 + $0x38] sm:$0xff] }
 0xdbf   : > { %1626 = vadd.xlane.f32.xlu1 %v1625_v54  ;;  %v2772_v54 = vld [vmem:[%s3794_s7 + $0x30] sm:$0xff] }
 0xe48   : > { %v1627_v59 = vpop.xlane.xlu1 %1626 }
 0xe49   : > { %v1628_v60 = vmul.f32 0.03125, %v1627_v59 }
 0xe4b   : > { %v1629_v61 = vadd.f32 1e-12, %v1628_v60 }
 0xe4d   : > { %3131 = vrsqrt.f32 %v1629_v61 }
 0xe5a   : > { %v3132_v62 = vpop.eup %3131 }
 0xe5b   : > { %v1631_v0 = vmul.f32 %v3132_v62, %v1623_v51 }
 0xe5d   : > { %v1638_v2 = vmul.f32 %v2751_v63, %v1631_v0  ;;  %v2775_v63 = vld [vmem:[%s3795_s8 + $0x1] ss:$0 sm:$0xff] }
 0xe5f   : > { %v3597_v3 = vadd.f32 %v2752_v1, %v1638_v2 }
 0xe61   : > { %2999 = vmatmul.mubr.msk.f32.vlgmr.msra.gmra.mxu1 %vm722_vm2, %v3597_v3 }
 0xe62   : > { %3002 = vmatpush3.msra.mxu1 %v3351_v14  ;;  %3009 = vmatprep.mubr.msk.f32.mxu1 %vm3173_vm1, %v3172_v10  ;;  %v2758_v14 = vld [vmem:[%s3831_s30 + $0x1] ss:$0 sm:$0xff] }
 0xe63   : > { %3003 = vmatprep.subr.mxu1 %v3172_v10 }
 0xe64   : > { %3004 = vmatpush3.msra.mxu1 %v3356_v15 }
 0xe65   : > { %3005 = vmatprep.subr.mxu1 %v3172_v10 }
 0xe66   : > { %3006 = vmatpush3.msra.mxu1 %v3381_v25 }
 0xe67   : > { %3007 = vmatprep.subr.mxu1 %v3172_v10 }
 0xe68   : > { %3008 = vmatpush3.msra.mxu1 %v3389_v26 }
 0xe69   : > { %3023 = vmatprep.subr.mxu1 %v3172_v10 }
 0xf21   : > { %v1728_v4 = vpop.f32.mrf.mxu1 }
 0xf22   : > { %v1729_v5 = vadd.f32 %v2758_v14, %v1728_v4 }
 0xf23   : > { %v3000_v6 = vpop.f32.mrf.mxu1 }
 0xf24   : > { %1805 = vrot.lane.b32.xlu1 %v1729_v5, %s3174_s4  ;;  %3010 = vmatmul.mubr.msk.f32.vlgmr.msra.gmra.mxu1 %vm722_vm2, %v1729_v5  ;;  %v1879_v12 = vmul.f32 %v1729_v5, %v3410_v31  ;;  %v1882_v16 = vmul.f32 %v1729_v5, %v3424_v39 }
 0xf25   : > { %3025 = vmatprep.mubr.msk.f32.mxu1 %vm3173_vm1, %v3172_v10 }
 0xf96   : > { %v1806_v15 = vpop.permute.xlu1 %1805 }
 0xf97   : > { %3021 = vmatmul.mubr.msk.f32.vlgmr.msra.gmra.mxu0 %vm722_vm2, %v1806_v15 }
 0xf98   : > { %3035 = vmatprep.mubr.msk.f32.mxu0 %vm3173_vm1, %v3172_v10 }
 0xfe4   : > { %v1801_v25 = vpop.f32.mrf.mxu1 }
 0xfe5   : > { %v1880_v8 = vmul.f32 %v1801_v25, %v3420_v35 }
 0xfe6   : > { %v3011_v26 = vpop.f32.mrf.mxu1 }
 0xfe7   : > { %v1881_v13 = vadd.f32 %v1880_v8, %v1879_v12  ;;  %v2783_v8 = vld [vmem:[%s3798_s11 + $0x30] sm:$0xff] }
0x1057   : > { %v1875_v7 = vpop.f32.mrf.mxu0 }
0x1058   : > { %v1883_v9 = vmul.f32 %v1875_v7, %v3420_v35  ;;  %v2784_v7 = vld [vmem:[%s3798_s11 + $0x38] sm:$0xff] }
0x1059   : > { %v3022_v11 = vpop.f32.mrf.mxu0 }
0x105a   : > { %1885 = vrot.lane.b32.xlu0 %v1883_v9, %s3175_s6  ;;  %s3834_s6 = smov 64   ;;  %v2781_v9 = vld [vmem:[%s3798_s11 + $0x20] sm:$0xff] }
0x105e   : > { %2057 = vrot.lane.b32.xlu0 %v1881_v13, %s3178_s23 }
0x10cc   : > { %v1886_v17 = vpop.permute.xlu0 %1885 }
0x10cd   : > { %v1888_v18 = vadd.f32 %v1886_v17, %v1882_v16  ;;  %v2779_v17 = vld [vmem:[%s3796_s9 + $0x1] ss:$0 sm:$0xff] }
0x10cf   : > { %1890 = vrot.lane.b32.xlu1 %v1888_v18, %s3174_s4  ;;  %s3833_s4 = smov 48  }
0x10d0   : > { %v2058_v35 = vpop.permute.xlu0 %2057 }
0x10d3   : > { %2059 = vrot.lane.b32.xlu1 %v1888_v18, %s3179_s3 }
0x1141   : > { %v1891_v19 = vpop.permute.xlu1 %1890 }
0x1142   : > { %3024 = vmatpush3.xpose.msk.msra.mxu1 %vm960_vm3, %v1891_v19  ;;  %v2780_v19 = vld [vmem:[%s3797_s10 + $0x1] ss:$0 sm:$0xff] }
0x1143   : > { %3028 = vmatprep.subr.mxu1 %v3172_v10 }
0x1145   : > { %3026 = vmatmul.mubr.msk.f32.vlgmr.msra.gmra.mxu1 %vm960_vm3, %v1881_v13  ;;  %v2060_v31 = vpop.permute.xlu1 %2059 }
0x1146   : > { %3034 = vmatpush3.xpose.msk.msra.mxu0 %vm960_vm3, %v2060_v31  ;;  %3030 = vmatprep.mubr.msk.f32.mxu1 %vm3173_vm1, %v3172_v10 }
0x1147   : > { %3043 = vmatprep.subr.mxu0 %v3172_v10 }
0x1149   : > { %3036 = vmatmul.mubr.msk.f32.vlgmr.msra.gmra.mxu0 %vm960_vm3, %v2058_v35 }
0x114a   : > { %3051 = vmatprep.mubr.msk.f32.mxu0 %vm3173_vm1, %v3172_v10  ;;  %3044 = vmatpush3.msra.mxu0 %v2773_v53 }
0x114b   : > { %3045 = vmatprep.subr.mxu0 %v3172_v10 }
0x114c   : > { %3046 = vmatpush3.msra.mxu0 %v2772_v54 }
0x114d   : > { %3047 = vmatprep.subr.mxu0 %v3172_v10 }
0x114e   : > { %3048 = vmatpush3.msra.mxu0 %v2771_v55 }
0x114f   : > { %3049 = vmatprep.subr.mxu0 %v3172_v10 }
0x1150   : > { %3050 = vmatpush3.msra.mxu0 %v2770_v56 }
0x1151   : > { %3065 = vmatprep.subr.mxu0 %v3172_v10 }
0x1205   : > { %v1963_v39 = vpop.f32.mrf.mxu1 }
0x1206   : > { %v1967_v20 = vmul.f32 0.25, %v1963_v39  ;;  %v2795_v39 = vld [vmem:[%s3800_s13 + $0x78] sm:$0xff] }
0x1207   : > { %v3027_v21 = vpop.f32.mrf.mxu1 }
0x1208   : > { %v1968_v22 = vadd.f32 %v1967_v20, %v3438_v52  ;;  %v2794_v20 = vld [vmem:[%s3800_s13 + $0x70] sm:$0xff]  ;;  %v2793_v21 = vld [vmem:[%s3800_s13 + $0x68] sm:$0xff] }
0x1209   : > { %v2131_v23 = vpop.f32.mrf.mxu0 }
0x120a   : > { %v2135_v27 = vmul.f32 0.25, %v2131_v23  ;;  %v1969_v28 = vsel %vm1038_vm5, %v1968_v22, -inf  ;;  %v2791_v23 = vld [vmem:[%s3800_s13 + $0x58] sm:$0xff] }
0x120b   : > { %1970 = vmax.xlane.f32.xlu1 %v1969_v28  ;;  %v3037_v29 = vpop.f32.mrf.mxu0  ;;  %v2789_v28 = vld [vmem:[%s3800_s13 + $0x48] sm:$0xff] }
0x120c   : > { %v2136_v30 = vadd.f32 %v2135_v27, %v3438_v52  ;;  %v2790_v27 = vld [vmem:[%s3800_s13 + $0x50] sm:$0xff]  ;;  %v2788_v29 = vld [vmem:[%s3800_s13 + $0x40] sm:$0xff] }
0x120e   : > { %v2137_v32 = vsel %vm1038_vm5, %v2136_v30, -inf }
0x120f   : > { %2138 = vmax.xlane.f32.xlu0 %v2137_v32 }
0x1294   : > { %v1971_v33 = vpop.xlane.xlu1 %1970 }
0x1295   : > { %v1972_v34 = vsub.f32 %v1968_v22, %v1971_v33  ;;  %v2792_v22 = vld [vmem:[%s3800_s13 + $0x60] sm:$0xff] }
0x1297   : > { %v1973_v36 = vmul.f32 1.442695, %v1972_v34 }
0x1298   : > { %v2139_v38 = vpop.xlane.xlu0 %2138 }
0x1299   : > { %3133 = vpow2.f32 %v1973_v36  ;;  %v2140_v40 = vsub.f32 %v2136_v30, %v2139_v38  ;;  %v2786_v30 = vld [vmem:[%s3799_s12 + $0x1] ss:$0 sm:$0xff] }
0x129b   : > { %v2141_v41 = vmul.f32 1.442695, %v2140_v40 }
0x129d   : > { %3135 = vpow2.f32 %v2141_v41 }
0x12a6   : > { %v3134_v42 = vpop.eup %3133 }
0x12a7   : > { %v1975_v43 = vsel %vm1038_vm5, %v3134_v42, 0.0 }
0x12a8   : > { %1976 = vadd.xlane.f32.xlu0 %v1975_v43 }
0x12aa   : > { %v3136_v44 = vpop.eup %3135 }
0x12ab   : > { %v2143_v45 = vsel %vm1038_vm5, %v3136_v44, 0.0 }
0x12ac   : > { %2144 = vadd.xlane.f32.xlu1 %v2143_v45 }
0x12bd   : > { %2148 = vrot.lane.b32.xlu1 %v1729_v5, %s3833_s4 }
0x12be   : > { %1980 = vrot.lane.b32.xlu0 %v1729_v5, %s3834_s6 }
0x1331   : > { %v1977_v52 = vpop.xlane.xlu0 %1976 }
0x1332   : > { %3137 = vrcp.f32 %v1977_v52 }
0x1335   : > { %v2145_v46 = vpop.xlane.xlu1 %2144  ;;  %v1981_v47 = vpop.permute.xlu0 %1980 }
0x1336   : > { %3139 = vrcp.f32 %v2145_v46  ;;  %3029 = vmatpush3.msk.msra.mxu1 %vm1056_vm6, %v1981_v47 }
0x1337   : > { %3038 = vmatprep.subr.mxu1 %v3172_v10 }
0x1339   : > { %v2149_v24 = vpop.permute.xlu1 %2148 }
0x133f   : > { %v3138_v48 = vpop.eup %3137 }
0x1340   : > { %v1979_v49 = vmul.f32 %v3138_v48, %v3134_v42 }
0x1342   : > { %3031 = vmatmul.mubr.msk.f32.vlgmr.msra.gmra.mxu1 %vm1052_vm7, %v1979_v49 }
0x1343   : > { %v3140_v50 = vpop.eup %3139  ;;  %3039 = vmatpush3.msk.msra.mxu1 %vm1056_vm6, %v2149_v24  ;;  %3040 = vmatprep.mubr.msk.f32.mxu1 %vm3173_vm1, %v3172_v10 }
0x1344   : > { %v2147_v51 = vmul.f32 %v3140_v50, %v3136_v44  ;;  %3054 = vmatprep.subr.mxu1 %v3172_v10 }
0x1346   : > { %3041 = vmatmul.mubr.msk.f32.vlgmr.msra.gmra.mxu1 %vm1052_vm7, %v2147_v51 }
0x1347   : > { %3062 = vmatprep.mubr.msk.f32.mxu1 %vm3173_vm1, %v3172_v10  ;;  %3055 = vmatpush3.msra.mxu1 %v2784_v7  ;;  %v2584_v7 = vld [vmem:[%s3807_s20 + $0x8] sm:$0xff] }
0x1348   : > { %3056 = vmatprep.subr.mxu1 %v3172_v10 }
0x1349   : > { %3057 = vmatpush3.msra.mxu1 %v2783_v8  ;;  %v2583_v8 = vld [vmem:[%s3807_s20] sm:$0xff] }
0x134a   : > { %3058 = vmatprep.subr.mxu1 %v3172_v10 }
0x1402   : > { %v2053_v57 = vpop.f32.mrf.mxu1 }
0x1404   : > { %v3032_v58 = vpop.f32.mrf.mxu1 }
0x1406   : > { %v2221_v59 = vpop.f32.mrf.mxu1 }
0x1407   : > { %2226 = vrot.lane.b32.xlu1 %v2221_v59, %s3835_s1 }
0x1408   : > { %v3042_v60 = vpop.f32.mrf.mxu1 }
0x1479   : > { %v2227_v61 = vpop.permute.xlu1 %2226 }
0x147a   : > { %v2229_v62 = vsel %vm960_vm3, %v2053_v57, %v2227_v61 }
0x147b   : > { %3052 = vmatmul.mubr.msk.f32.vlgmr.msra.gmra.mxu0 %vm722_vm2, %v2229_v62  ;;  %v2797_v62 = vld [vmem:[%s3801_s14 + $0x1] ss:$0 sm:$0xff] }
0x147c   : > { %3081 = vmatprep.mubr.msk.f32.mxu0 %vm3173_vm1, %v3172_v10  ;;  %3066 = vmatpush3.msra.mxu0 %v2795_v39 }
0x147d   : > { %3067 = vmatprep.subr.mxu0 %v3172_v10 }
0x147e   : > { %3068 = vmatpush3.msra.mxu0 %v2794_v20 }
0x147f   : > { %3069 = vmatprep.subr.mxu0 %v3172_v10 }
0x1480   : > { %3070 = vmatpush3.msra.mxu0 %v2793_v21 }
0x1481   : > { %3071 = vmatprep.subr.mxu0 %v3172_v10 }
0x1482   : > { %3072 = vmatpush3.msra.mxu0 %v2792_v22 }
0x1483   : > { %3073 = vmatprep.subr.mxu0 %v3172_v10 }
0x1484   : > { %3074 = vmatpush3.msra.mxu0 %v2791_v23 }
0x1485   : > { %3075 = vmatprep.subr.mxu0 %v3172_v10 }
0x1486   : > { %3076 = vmatpush3.msra.mxu0 %v2790_v27 }
0x1487   : > { %3077 = vmatprep.subr.mxu0 %v3172_v10 }
0x1488   : > { %3078 = vmatpush3.msra.mxu0 %v2789_v28 }
0x1489   : > { %3079 = vmatprep.subr.mxu0 %v3172_v10 }
0x148a   : > { %3080 = vmatpush3.msra.mxu0 %v2788_v29 }
0x153b   : > { %v2312_v0 = vpop.f32.mrf.mxu0 }
0x153c   : > { %v2313_v1 = vadd.f32 %v2775_v63, %v2312_v0 }
0x153d   : > { %v3053_v2 = vpop.f32.mrf.mxu0 }
0x153e   : > { %v2316_v14 = vadd.f32 %v2313_v1, %v3597_v3  ;;  %v2782_v3 = vld [vmem:[%s3798_s11 + $0x28] sm:$0xff] }
0x153f   : > { %3059 = vmatpush3.msra.mxu1 %v2782_v3 }
0x1540   : > { %v2321_v4 = vsel %vm670_vm0, %v2316_v14, 0.0  ;;  %3060 = vmatprep.subr.mxu1 %v3172_v10 }
0x1541   : > { %2322 = vadd.xlane.f32.xlu0 %v2321_v4  ;;  %3061 = vmatpush3.msra.mxu1 %v2781_v9 }
0x1542   : > { %3084 = vmatprep.subr.mxu1 %v3172_v10 }
0x15ca   : > { %v2323_v5 = vpop.xlane.xlu0 %2322 }
0x15cb   : > { %v2324_v6 = vmul.f32 0.03125, %v2323_v5 }
0x15cd   : > { %v2325_v15 = vsub.f32 %v2316_v14, %v2324_v6 }
0x15cf   : > { %v2326_v25 = vmul.f32 %v2325_v15, %v2325_v15 }
0x15d1   : > { %v2327_v26 = vsel %vm670_vm0, %v2326_v25, 0.0  ;;  %v2586_v25 = vld [vmem:[%s3807_s20 + $0x18] sm:$0xff] }
0x15d2   : > { %2328 = vadd.xlane.f32.xlu1 %v2327_v26  ;;  %v2585_v26 = vld [vmem:[%s3807_s20 + $0x10] sm:$0xff] }
0x165b   : > { %v2329_v11 = vpop.xlane.xlu1 %2328 }
0x165c   : > { %v2330_v12 = vmul.f32 0.03125, %v2329_v11 }
0x165e   : > { %v2331_v13 = vadd.f32 1e-12, %v2330_v12 }
0x1660   : > { %3141 = vrsqrt.f32 %v2331_v13  ;;  %v2801_v13 = vld [vmem:[%s3802_s15 + $0x1] ss:$0 sm:$0xff] }
0x166d   : > { %v3142_v16 = vpop.eup %3141 }
0x166e   : > { %v2333_v18 = vmul.f32 %v3142_v16, %v2325_v15 }
0x1670   : > { %v2340_v31 = vmul.f32 %v2779_v17, %v2333_v18  ;;  %v2802_v17 = vld [vmem:[%s3832_s28 + $0x1] ss:$0 sm:$0xff] }
0x1672   : > { %v3706_v35 = vadd.f32 %v2780_v19, %v2340_v31 }
0x1674   : > { %3063 = vmatmul.mubr.msk.f32.vlgmr.msra.gmra.mxu1 %vm722_vm2, %v3706_v35 }
0x1675   : > { %3092 = vmatprep.mubr.msk.f32.mxu1 %vm3173_vm1, %v3172_v10  ;;  %3085 = vmatpush3.msra.mxu1 %v2586_v25 }
0x1676   : > { %3086 = vmatprep.subr.mxu1 %v3172_v10 }
0x1677   : > { %3087 = vmatpush3.msra.mxu1 %v2585_v26 }
0x1678   : > { %3088 = vmatprep.subr.mxu1 %v3172_v10 }
0x1679   : > { %3089 = vmatpush3.msra.mxu1 %v2584_v7 }
0x167a   : > { %3090 = vmatprep.subr.mxu1 %v3172_v10  ;;  %v2803_v10 = vld [vmem:[%s3808_s21] ss:$0 sm:$0xff] }
0x167b   : > { %3091 = vmatpush3.msra.mxu1 %v2583_v8 }
0x1734   : > { %v2430_v32 = vpop.f32.mrf.mxu1 }
0x1735   : > { %v2431_v33 = vadd.f32 %v2786_v30, %v2430_v32 }
0x1736   : > { %v3064_v34 = vpop.f32.mrf.mxu1 }
0x1737   : > { %v2435_v36 = vmul.f32 0.70710677, %v2431_v33  ;;  %v2434_v59 = vmul.f32 0.5, %v2431_v33 }
0x1739   : > { %v2438_v38 = vand.u32 2147483647, %v2435_v36  ;;  %vm2436_vm10 = vcmp.ge.f32.partialorder %v2435_v36, 0.0 }
0x173a   : > { %v2437_v57 = vsel %vm2436_vm10, 1.0, %v3182_v37 }
0x173b   : > { %v2439_v40 = vmul.f32 0.3275911, %v2438_v38  ;;  %v2452_v42 = vsub.f32 0.0, %v2438_v38 }
0x173d   : > { %v2440_v41 = vadd.f32 1.0, %v2439_v40  ;;  %v2453_v43 = vmul.f32 %v2452_v42, %v2438_v38 }
0x173f   : > { %3143 = vrcp.f32 %v2440_v41  ;;  %v2454_v52 = vmul.f32 1.442695, %v2453_v43 }
0x1741   : > { %3145 = vpow2.f32 %v2454_v52 }
0x174c   : > { %v3144_v44 = vpop.eup %3143 }
0x174d   : > { %v2443_v45 = vmul.f32 1.0614054, %v3144_v44 }
0x174e   : > { %v3146_v54 = vpop.eup %3145 }
0x174f   : > { %v2444_v46 = vadd.f32 -1.4531521, %v2443_v45 }
0x1751   : > { %v2445_v47 = vmul.f32 %v3144_v44, %v2444_v46 }
0x1753   : > { %v2446_v48 = vadd.f32 1.4214138, %v2445_v47 }
0x1755   : > { %v2447_v49 = vmul.f32 %v3144_v44, %v2446_v48 }
0x1757   : > { %v2448_v24 = vadd.f32 -0.28449672, %v2447_v49 }
0x1759   : > { %v2449_v50 = vmul.f32 %v3144_v44, %v2448_v24 }
0x175b   : > { %v2450_v51 = vadd.f32 0.2548296, %v2449_v50 }
0x175d   : > { %v2451_v53 = vmul.f32 %v3144_v44, %v2450_v51 }
0x175f   : > { %v2456_v55 = vmul.f32 %v3146_v54, %v2451_v53 }
0x1761   : > { %v2457_v56 = vsub.f32 1.0, %v2456_v55 }
0x1763   : > { %v2458_v58 = vmul.f32 %v2457_v56, %v2437_v57 }
0x1765   : > { %v2459_v60 = vadd.f32 1.0, %v2458_v58 }
0x1767   : > { %v2460_v61 = vmul.f32 %v2459_v60, %v2434_v59 }
0x1769   : > { %3082 = vmatmul.mubr.msk.f32.vlgmr.msra.gmra.mxu0 %vm1542_vm9, %v2460_v61 }
0x1829   : > { %v2547_v63 = vpop.f32.mrf.mxu0 }
0x182a   : > { %v2548_v0 = vadd.f32 %v2797_v62, %v2547_v63 }
0x182b   : > { %v3083_v1 = vpop.f32.mrf.mxu0 }
0x182c   : > { %v2551_v2 = vadd.f32 %v2548_v0, %v3706_v35 }
0x182e   : > { %v2556_v14 = vsel %vm670_vm0, %v2551_v2, 0.0 }
0x182f   : > { %2557 = vadd.xlane.f32.xlu0 %v2556_v14 }
0x18b8   : > { %v2558_v4 = vpop.xlane.xlu0 %2557 }
0x18b9   : > { %v2559_v37 = vmul.f32 0.03125, %v2558_v4 }
0x18bb   : > { %v2560_v5 = vsub.f32 %v2551_v2, %v2559_v37 }
0x18bd   : > { %v2561_v6 = vmul.f32 %v2560_v5, %v2560_v5 }
0x18bf   : > { %v2562_v15 = vsel %vm670_vm0, %v2561_v6, 0.0 }
0x18c0   : > { %2563 = vadd.xlane.f32.xlu0 %v2562_v15 }
0x1949   : > { %v2564_v3 = vpop.xlane.xlu0 %2563 }
0x194a   : > { %v2565_v9 = vmul.f32 0.03125, %v2564_v3 }
0x194c   : > { %v2566_v11 = vadd.f32 1e-12, %v2565_v9 }
0x194e   : > { %3147 = vrsqrt.f32 %v2566_v11 }
0x195b   : > { %v3148_v12 = vpop.eup %3147 }
0x195c   : > { %v2568_v16 = vmul.f32 %v3148_v12, %v2560_v5 }
0x195e   : > { %v2575_v18 = vmul.f32 %v2801_v13, %v2568_v16 }
0x1960   : > { %v2582_v19 = vadd.f32 %v2802_v17, %v2575_v18 }
0x1962   : > { %3093 = vmatmul.mubr.msk.f32.vlgmr.msra.gmra.mxu1 %vm722_vm2, %v2582_v19 }
0x1a22   : > { %v2663_v31 = vpop.f32.mrf.mxu1 }
0x1a23   : > { %v2664_v35 = vadd.f32 %v2803_v10, %v2663_v31 }
0x1a24   : > { %v3094_v39 = vpop.f32.mrf.mxu1 }
0x1a25   : > { %2667 = vst [vmem:[%s658_s2] sm:$0x1f] %v2664_v35 }
0x1a26 PF: > { %s38_s0 = sadd.s32 1, %s3169_s0  }
0x1a27   : > { %p35_p9 = scmp.ge.s32.totalorder %s38_s0, 4  }
0x1a29   :  { %37 = sbr.rel (!%p35_p9) target bundleno = 30 (0x1e), region = 146 }

// kernel: _lambda_.2
= control target key start
LH: loop header
LB: loop body
LE: loop exit
PB: predicated region body
PF: predicated region fallthrough
CT: control target
= control target key end

     0   :  { %s18384_s0 = inlined_call_operand.vmem [shape: f32[8,9,32], index: 0, kind: input, shape index: {}]   ;;  %s18385_s1 = inlined_call_operand.vmem [shape: f32[1,32], index: 1, kind: input, shape index: {}]   ;;  %s18386_s2 = inlined_call_operand.vmem [shape: f32[1,32], index: 2, kind: input, shape index: {}]   ;;  %s18387_s3 = inlined_call_operand.vmem [shape: f32[1,32], index: 3, kind: input, shape index: {}]   ;;  %s18388_s4 = inlined_call_operand.vmem [shape: f32[2,32,96], index: 4, kind: input, shape index: {}]   ;;  %s18389_s5 = inlined_call_operand.vmem [shape: f32[2,1,96], index: 5, kind: input, shape index: {}]   ;;  %s18390_s6 = inlined_call_operand.vmem [shape: f32[2,32,32], index: 6, kind: input, shape index: {}]   ;;  %s18391_s7 = inlined_call_operand.vmem [shape: f32[2,1,32], index: 7, kind: input, shape index: {}]   ;;  %s18392_s8 = inlined_call_operand.vmem [shape: f32[2,1,32], index: 8, kind: input, shape index: {}]   ;;  %s18393_s9 = inlined_call_operand.vmem [shape: f32[2,1,32], index: 9, kind: input, shape index: {}]   ;;  %s18394_s10 = inlined_call_operand.vmem [shape: f32[2,32,64], index: 10, kind: input, shape index: {}]   ;;  %s18395_s11 = inlined_call_operand.vmem [shape: f32[2,1,64], index: 11, kind: input, shape index: {}]   ;;  %s18396_s12 = inlined_call_operand.vmem [shape: f32[2,64,32], index: 12, kind: input, shape index: {}]   ;;  %s18397_s13 = inlined_call_operand.vmem [shape: f32[2,1,32], index: 13, kind: input, shape index: {}]   ;;  %s18398_s14 = inlined_call_operand.vmem [shape: f32[2,1,32], index: 14, kind: input, shape index: {}]   ;;  %s18399_s15 = inlined_call_operand.vmem [shape: f32[2,1,32], index: 15, kind: input, shape index: {}]   ;;  %s18400_s16 = inlined_call_operand.vmem [shape: f32[32,32], index: 16, kind: input, shape index: {}]   ;;  %s18401_s17 = inlined_call_operand.vmem [shape: f32[9,32], index: 17, kind: input, shape index: {}]   ;;  %s18402_s18 = inlined_call_operand.vmem [shape: f32[9,32], index: 18, kind: input, shape index: {}]   ;;  %s18403_s19 = inlined_call_operand.vmem [shape: f32[8,1,32], index: 19, kind: output, shape index: {}]  }
   0x1   :  { %18592 = sst [smem:[#allocation66_spill]] %s18384_s0  ;;  %s14398_s0 = smov 0  }
   0x2   :  { %18593 = sst [smem:[#allocation67_spill]] %s18385_s1 }
   0x3   :  { %18594 = sst [smem:[#allocation68_spill]] %s18386_s2 }
   0x4   :  { %18595 = sst [smem:[#allocation69_spill]] %s18387_s3 }
   0x5 LB: > { %s13013_s30 = sadd.s32 4294967295, %s14285_s0   ;;  %p13017_p0 = scmp.ge.s32.totalorder %s14285_s0, 1  ;;  %s14285_s0 = sphi %s14398_s0, %s29_s0  }
   0x6   : > { %p539_p1 = scmp.lt.s32.totalorder %s14285_s0, 3 }
   0x8   : > { %p540_p2 = pnand %p13017_p0, %p539_p1 }
   0xa   : > { %543 = sbr.rel (%p540_p2) target bundleno = 7341 (0x1cad), region = 96 }
   0xf   : > { %s13018_s20 = sshll.u32 %s13013_s30, 2  ;;  %v627_v0 = vlaneseq  ;;  %s18596_s22 = sld [smem:[#allocation67_spill]]  ;;  %v14287_v2 = vmov 1966171168   ;;  %vm1273_vm0 = vcmask 261120   ;;  %vm1286_vm1 = vcmask 257024  }
  0x10   : > { %p596_p3 = scmp.lt.s32.totalorder %s13018_s20, 7  ;;  %v625_v3 = vunpack.c.l.s4 %v14287_v2  ;;  %s18597_s25 = sld [smem:[#allocation66_spill]]  ;;  %vm14289_vm2 = vmmov 0   ;;  %vm4312_vm3 = vcmask 130048   ;;  %vm5101_vm4 = vcmask 65536  }
  0x11   : > { %v14409_v4 = vshrl.u32 %v627_v0, 7  ;;  %s18619_s27 = sld [smem:[#allocation68_spill]]  ;;  %vm5097_vm5 = vcmask 72704   ;;  %s14293_s23 = smov 80   ;;  %vm5261_vm6 = vcmask 1040384   ;;  %vm7600_vm9 = vcmask 523264  }
  0x12   : > { %s18874_s20 = smov (!%p596_p3, %s13018_s20), 7  ;;  %v626_v5 = vunpack.c.0.s8 %v625_v3  ;;  %s18620_s30 = sld [smem:[#allocation69_spill]] }
  0x13   : > { %s13265_s2 = sshll.u32 %s18874_s20, 4  ;;  %s14294_s24 = smov 112  }
  0x14   : > { %v14415_v7 = vsub.s32 %v626_v5, %v14409_v4  ;;  %s18537_s26 = smov 16   ;;  %s605_s28 = scalar_lea.vmem %s18403_s19, %s18874_s20 }
  0x15   : > { %v13026_v1 = vld [vmem:[%s18596_s22] ss:$0 sm:$0xff] }
  0x16   : > { %v917_v6 = vcombine.high %v13026_v1, %v13026_v1  ;;  %s14420_s3 = scalar_lea.vmem %s18597_s25, %s13265_s2  ;;  %v924_v9 = vrot.slane %v13026_v1, %v14415_v7  ;;  %s14290_s25 = smov 96  }
  0x17   : > { %v607_v8 = vld [vmem:[%s14420_s3] sm:$0xff]  ;;  %v14426_v11 = vld [vmem:[%s14420_s3 + $0x10] sm:$0xff]  ;;  %v13023_v12 = vld.sshfl [vmem:[%s14420_s3 + $0x18] sm:$0x1 pattern:$0x75316420] }
  0x18   : > { %v931_v10 = vrot.slane %v917_v6, %v14415_v7  ;;  %v623_v13 = vcombine.high %v607_v8, %v607_v8  ;;  %v630_v14 = vrot.slane %v607_v8, %v14415_v7  ;;  %v686_v15 = vcombine.high %v14426_v11, %v14426_v11  ;;  %v611_v33 = vld [vmem:[%s14420_s3 + $0x20] sm:$0xff]  ;;  %v13022_v8 = vld.sshfl [vmem:[%s14420_s3 + $0x8] sm:$0x1 pattern:$0x75316420]  ;;  %s14292_s2 = smov 64  }
  0x19   : > { %v748_v16 = vrot.slane %v13023_v12, %v14415_v7  ;;  %v932_v17 = vcombine.high %v924_v9, %v924_v9  ;;  %v14434_v19 = vrot.slane %v924_v9, %v14415_v7  ;;  %v749_v45 = vcombine.high %v611_v33, %v611_v33 }
  0x1a   : > { %v933_v18 = vcombine.high %v931_v10, %v931_v10  ;;  %v14437_v20 = vrot.slane %v931_v10, %v14415_v7  ;;  %v637_v21 = vrot.slane %v623_v13, %v14415_v7  ;;  %v638_v22 = vcombine.high %v630_v14, %v630_v14 }
  0x1b   : > { %v646_v23 = vrot.slane %v630_v14, %v14415_v7  ;;  %v14442_v24 = vrot.slane %v686_v15, %v14415_v7  ;;  %v14445_v25 = vrot.slane %v932_v17, %v14415_v7  ;;  %v14452_v27 = vcombine.high %v14434_v19, %v14434_v19 }
  0x1c   : > { %v14448_v26 = vrot.slane %v933_v18, %v14415_v7  ;;  %v14456_v28 = vcombine.high %v14437_v20, %v14437_v20  ;;  %v639_v29 = vcombine.high %v637_v21, %v637_v21  ;;  %v653_v30 = vrot.slane %v637_v21, %v14415_v7 }
  0x1d   : > { %v660_v31 = vrot.slane %v638_v22, %v14415_v7  ;;  %v668_v32 = vcombine.high %v646_v23, %v646_v23  ;;  %v14463_v34 = vcombine.high %v14445_v25, %v14445_v25  ;;  %v14470_v36 = vadd.f32 %v14434_v19, %v646_v23 }
  0x1e   : > { %v14467_v35 = vcombine.high %v14448_v26, %v14448_v26  ;;  %v702_v37 = vcombine.high %v14442_v24, %v14442_v24  ;;  %v667_v38 = vrot.slane %v639_v29, %v14415_v7  ;;  %v669_v39 = vcombine.high %v653_v30, %v653_v30 }
  0x1f   : > { %v670_v40 = vcombine.high %v660_v31, %v660_v31  ;;  %v14476_v41 = vadd.f32 %v14445_v25, %v660_v31  ;;  %v14479_v42 = vadd.f32 %v14452_v27, %v668_v32  ;;  %v14482_v43 = vadd.f32 %v14437_v20, %v653_v30 }
  0x20   : > { %v730_v44 = vrot.slane %v702_v37, %v14415_v7  ;;  %v671_v46 = vcombine.high %v667_v38, %v667_v38  ;;  %v14489_v48 = vadd.f32 %v14448_v26, %v667_v38  ;;  %v14492_v49 = vadd.f32 %v14456_v28, %v669_v39 }
  0x21   : > { %v14486_v47 = vadd.f32 %v14463_v34, %v670_v40  ;;  %v1048_v50 = vcombine.low %v14470_v36, %v14476_v41  ;;  %v756_v52 = vrot.slane %v611_v33, %v14415_v7  ;;  %v763_v53 = vrot.slane %v749_v45, %v14415_v7 }
  0x22   : > { %v734_v51 = vcombine.high %v730_v44, %v730_v44  ;;  %v14499_v54 = vadd.f32 %v14467_v35, %v671_v46  ;;  %v1050_v56 = vcombine.low %v14482_v43, %v14489_v48  ;;  %v14506_v57 = vadd.f32 %v14445_v25, %v748_v16 }
  0x23   : > { %v1049_v55 = vcombine.low %v14479_v42, %v14486_v47  ;;  %v1058_v58 = vrot.slane %v1048_v50, %v14415_v7  ;;  %v764_v59 = vcombine.high %v756_v52, %v756_v52  ;;  %v765_v60 = vcombine.high %v763_v53, %v763_v53 }
  0x24   : > { %v772_v61 = vrot.slane %v756_v52, %v14415_v7  ;;  %v1051_v62 = vcombine.low %v14492_v49, %v14499_v54  ;;  %v1072_v0 = vrot.slane %v1050_v56, %v14415_v7  ;;  %v14515_v1 = vrot.slane %v763_v53, %v14415_v7 }
  0x25   : > { %v1065_v63 = vrot.slane %v1049_v55, %v14415_v7  ;;  %v786_v2 = vrot.slane %v764_v59, %v14415_v7  ;;  %v14519_v3 = vrot.slane %v765_v60, %v14415_v7  ;;  %v14522_v6 = vadd.f32 %v14434_v19, %v734_v51 }
  0x26   : > { %v794_v5 = vcombine.high %v772_v61, %v772_v61  ;;  %v1079_v9 = vrot.slane %v1051_v62, %v14415_v7  ;;  %v14527_v12 = vadd.f32 %v14452_v27, %v772_v61  ;;  %v14531_v13 = vadd.f32 %v14456_v28, %v14515_v1 }
  0x27   : > { %v1080_v10 = vcombine.low %v1058_v58, %v1065_v63  ;;  %v796_v14 = vcombine.high %v786_v2, %v786_v2  ;;  %v14534_v15 = vadd.f32 %v14463_v34, %v786_v2  ;;  %v14541_v17 = vadd.f32 %v14467_v35, %v14519_v3  ;;  %v13024_v63 = vld.sshfl [vmem:[%s14420_s3 + $0x28] sm:$0x1 pattern:$0x75316420] }
  0x28   : > { %v14537_v16 = vadd.f32 %v14437_v20, %v794_v5  ;;  %v1081_v18 = vcombine.low %v1072_v0, %v1079_v9  ;;  %v1146_v22 = vcombine.low %v14522_v6, %v14506_v57  ;;  %v685_v23 = vrot.slane %v13022_v8, %v14415_v7 }
  0x29   : > { %v1088_v21 = vrot.slane %v1080_v10, %v14415_v7  ;;  %v14548_v29 = vadd.f32 %v14448_v26, %v796_v14  ;;  %v1147_v30 = vcombine.low %v14527_v12, %v14534_v15  ;;  %v1149_v31 = vcombine.low %v14531_v13, %v14541_v17  ;;  %v613_v14 = vld [vmem:[%s14420_s3 + $0x30] sm:$0xff] }
  0x2a   : > { %v693_v32 = vrot.slane %v14426_v11, %v14415_v7  ;;  %v1095_v33 = vrot.slane %v1081_v18, %v14415_v7  ;;  %v1156_v37 = vrot.slane %v1146_v22, %v14415_v7  ;;  %v716_v38 = vrot.slane %v14442_v24, %v14415_v7 }
  0x2b   : > { %v14561_v39 = vadd.f32 %v14434_v19, %v685_v23  ;;  %v1148_v40 = vcombine.low %v14537_v16, %v14548_v29  ;;  %v1163_v45 = vrot.slane %v1147_v30, %v14415_v7  ;;  %v1177_v46 = vrot.slane %v1149_v31, %v14415_v7 }
  0x2c   : > { %v701_v50 = vcombine.high %v693_v32, %v693_v32  ;;  %v1096_v11 = vcombine.low %v1088_v21, %v1095_v33  ;;  %v709_v51 = vrot.slane %v693_v32, %v14415_v7  ;;  %v732_v52 = vcombine.high %v716_v38, %v716_v38 }
  0x2d   : > { %v14569_v53 = vadd.f32 %v14448_v26, %v716_v38  ;;  %v1170_v24 = vrot.slane %v1148_v40, %v14415_v7  ;;  %v1178_v55 = vcombine.low %v1156_v37, %v1163_v45  ;;  %v14574_v58 = vadd.f32 %v14456_v28, %v730_v44 }
  0x2e   : > { %v723_v56 = vrot.slane %v701_v50, %v14415_v7  ;;  %v1274_v59 = vsel %vm1273_vm0, %v1096_v11, 0.0  ;;  %v731_v60 = vcombine.high %v709_v51, %v709_v51  ;;  %v14578_v61 = vadd.f32 %v14445_v25, %v709_v51 }
  0x2f   : > { %v14581_v62 = vadd.f32 %v14467_v35, %v732_v52  ;;  %1275 = vadd.xlane.f32.xlu0 %v1274_v59  ;;  %v1179_v0 = vcombine.low %v1170_v24, %v1177_v46  ;;  %v1186_v2 = vrot.slane %v1178_v55, %v14415_v7  ;;  %v795_v18 = vcombine.high %v14515_v1, %v14515_v1 }
  0x30   : > { %v733_v5 = vcombine.high %v723_v56, %v723_v56  ;;  %v14586_v8 = vadd.f32 %v14452_v27, %v723_v56  ;;  %v14589_v44 = vadd.f32 %v14463_v34, %v731_v60  ;;  %v1097_v9 = vcombine.low %v14561_v39, %v14578_v61 }
  0x31   : > { %v1100_v10 = vcombine.low %v14574_v58, %v14581_v62  ;;  %v1193_v21 = vrot.slane %v1179_v0, %v14415_v7  ;;  %v797_v23 = vcombine.high %v14519_v3, %v14519_v3  ;;  %v811_v30 = vrot.slane %v13024_v63, %v14415_v7 }
  0x32   : > { %v14600_v22 = vadd.f32 %v14437_v20, %v733_v5  ;;  %v1098_v31 = vcombine.low %v14586_v8, %v14589_v44  ;;  %v1107_v32 = vrot.slane %v1097_v9, %v14415_v7  ;;  %v812_v37 = vcombine.high %v613_v14, %v613_v14 }
  0x33   : > { %v1128_v33 = vrot.slane %v1100_v10, %v14415_v7  ;;  %v1194_v38 = vcombine.low %v1186_v2, %v1193_v21  ;;  %v819_v40 = vrot.slane %v613_v14, %v14415_v7  ;;  %v14613_v45 = vadd.f32 %v14434_v19, %v795_v18  ;;  %v13025_v10 = vld.sshfl [vmem:[%s14420_s3 + $0x38] sm:$0x1 pattern:$0x75316420]  ;;  %s18539_s3 = smov 48  }
  0x34   : > { %v1099_v1 = vcombine.low %v14600_v22, %v14569_v53  ;;  %v1114_v3 = vrot.slane %v1098_v31, %v14415_v7  ;;  %v826_v46 = vrot.slane %v812_v37, %v14415_v7  ;;  %v14618_v50 = vadd.f32 %v14445_v25, %v797_v23 }
  0x35   : > { %v14621_v11 = vadd.f32 %v14452_v27, %v811_v30  ;;  %v1280_v51 = vsel %vm1273_vm0, %v1194_v38, 0.0  ;;  %v827_v24 = vcombine.high %v819_v40, %v819_v40  ;;  %v835_v55 = vrot.slane %v819_v40, %v14415_v7 }
  0x36   : > { %v1121_v52 = vrot.slane %v1099_v1, %v14415_v7  ;;  %1281 = vadd.xlane.f32.xlu1 %v1280_v51  ;;  %v1129_v56 = vcombine.low %v1107_v32, %v1114_v3  ;;  %v842_v59 = vrot.slane %v826_v46, %v14415_v7  ;;  %v1195_v60 = vcombine.low %v14613_v45, %v14618_v50 }
  0x37   : > { %v828_v63 = vcombine.high %v826_v46, %v826_v46  ;;  %v849_v2 = vrot.slane %v827_v24, %v14415_v7  ;;  %v857_v5 = vcombine.high %v835_v55, %v835_v55  ;;  %v14631_v9 = vadd.f32 %v14463_v34, %v835_v55 }
  0x38   : > { %v1130_v0 = vcombine.low %v1121_v52, %v1128_v33  ;;  %v1137_v14 = vrot.slane %v1129_v56, %v14415_v7  ;;  %v14636_v18 = vadd.f32 %v14467_v35, %v842_v59  ;;  %v1205_v21 = vrot.slane %v1195_v60, %v14415_v7 }
  0x39   : > { %v856_v23 = vrot.slane %v828_v63, %v14415_v7  ;;  %v859_v31 = vcombine.high %v849_v2, %v849_v2  ;;  %v14642_v32 = vadd.f32 %v14437_v20, %v849_v2  ;;  %v14645_v33 = vadd.f32 %v14448_v26, %v857_v5 }
  0x3a   : > { %v1144_v30 = vrot.slane %v1130_v0, %v14415_v7  ;;  %v1196_v37 = vcombine.low %v14621_v11, %v14631_v9  ;;  %v858_v38 = vcombine.high %v842_v59, %v842_v59  ;;  %v874_v35 = vrot.slane %v13025_v10, %v14415_v7 }
  0x3b   : > { %v860_v1 = vcombine.high %v856_v23, %v856_v23  ;;  %v14651_v3 = vadd.f32 %v14456_v28, %v859_v31  ;;  %v1197_v46 = vcombine.low %v14642_v32, %v14645_v33  ;;  %v14656_v20 = vadd.f32 %v14434_v19, %v856_v23 }
  0x3c   : > { %v1145_v40 = vcombine.low %v1137_v14, %v1144_v30  ;;  %v1212_v26 = vrot.slane %v1196_v37, %v14415_v7  ;;  %v14660_v51 = vadd.f32 %v14445_v25, %v858_v38  ;;  %v14666_v24 = vadd.f32 %v14463_v34, %v874_v35 }
  0x3d   : > { %v14663_v52 = vadd.f32 %v14452_v27, %v860_v1  ;;  %v1198_v55 = vcombine.low %v14651_v3, %v14636_v18  ;;  %v1219_v56 = vrot.slane %v1197_v46, %v14415_v7  ;;  %v14685_v30 = vsub.s32 0, %v14409_v4 }
  0x3e   : > { %v1277_v28 = vsel %vm1273_vm0, %v1145_v40, 0.0  ;;  %v1227_v19 = vcombine.low %v1205_v21, %v1212_v26  ;;  %v1244_v59 = vcombine.low %v14656_v20, %v14660_v51  ;;  %v14688_v31 = vsub.s32 1, %v14409_v4 }
  0x3f   : > { %1278 = vadd.xlane.f32.xlu0 %v1277_v28  ;;  %v1245_v25 = vcombine.low %v14663_v52, %v14666_v24  ;;  %v1226_v27 = vrot.slane %v1198_v55, %v14415_v7  ;;  %v14691_v37 = vsub.s32 2, %v14409_v4  ;;  %v14694_v38 = vsub.s32 3, %v14409_v4 }
  0x40   : > { %v1252_v34 = vrot.slane %v1244_v59, %v14415_v7  ;;  %v1235_v0 = vrot.slane %v1227_v19, %v14415_v7  ;;  %v14697_v35 = vsub.s32 4, %v14409_v4  ;;  %v14700_v40 = vsub.s32 5, %v14409_v4 }
  0x41   : > { %v1259_v60 = vrot.slane %v1245_v25, %v14415_v7  ;;  %v1228_v63 = vcombine.low %v1219_v56, %v1226_v27  ;;  %v14703_v46 = vsub.s32 6, %v14409_v4  ;;  %v14706_v26 = vsub.s32 7, %v14409_v4 }
  0x43   : > { %v1260_v2 = vcombine.low %v1252_v34, %v1259_v60  ;;  %v1242_v5 = vrot.slane %v1228_v63, %v14415_v7 }
  0x45   : > { %v1267_v10 = vrot.slane %v1260_v2, %v14415_v7  ;;  %v1243_v14 = vcombine.low %v1235_v0, %v1242_v5 }
  0x47   : > { %v1287_v21 = vsel %vm1286_vm1, %v1267_v10, 0.0  ;;  %v1283_v23 = vsel %vm1273_vm0, %v1243_v14, 0.0 }
  0x48   : > { %1288 = vadd.xlane.f32.xlu0 %v1287_v21  ;;  %1284 = vadd.xlane.f32.xlu1 %v1283_v23 }
  0xb8   : > { %v1276_v1 = vpop.xlane.xlu0 %1275 }
  0xb9   : > { %v1291_v28 = vmul.f32 0.03125, %v1276_v1 }
  0xbb   : > { %v1304_v55 = vrot.slane %v1291_v28, %v14685_v30  ;;  %v1308_v56 = vrot.slane %v1291_v28, %v14688_v31  ;;  %v1312_v19 = vrot.slane %v1291_v28, %v14691_v37  ;;  %v1316_v59 = vrot.slane %v1291_v28, %v14694_v38 }
  0xbc   : > { %v1320_v25 = vrot.slane %v1291_v28, %v14697_v35  ;;  %v1324_v27 = vrot.slane %v1291_v28, %v14700_v40  ;;  %v1328_v34 = vrot.slane %v1291_v28, %v14703_v46  ;;  %v1332_v60 = vrot.slane %v1291_v28, %v14706_v26 }
  0xbd   : > { %v14717_v4 = vsub.f32 %v14470_v36, %v1304_v55  ;;  %v14720_v63 = vsub.f32 %v14476_v41, %v1308_v56  ;;  %v14723_v0 = vsub.f32 %v14479_v42, %v1312_v19  ;;  %v14726_v2 = vsub.f32 %v14486_v47, %v1316_v59 }
  0xbe   : > { %v14729_v5 = vsub.f32 %v14482_v43, %v1320_v25  ;;  %v14732_v10 = vsub.f32 %v14489_v48, %v1324_v27  ;;  %v14735_v14 = vsub.f32 %v14492_v49, %v1328_v34  ;;  %v14738_v36 = vsub.f32 %v14499_v54, %v1332_v60 }
  0xbf   : > { %v1282_v41 = vpop.xlane.xlu1 %1281  ;;  %v1517_v42 = vmul.f32 %v14717_v4, %v14717_v4  ;;  %v1518_v47 = vmul.f32 %v14720_v63, %v14720_v63  ;;  %v1519_v43 = vmul.f32 %v14723_v0, %v14723_v0  ;;  %v1520_v48 = vmul.f32 %v14726_v2, %v14726_v2 }
  0xc0   : > { %18598 = vst [vmem:[#allocation2_spill] sm:$0xff] %v14735_v14  ;;  %18599 = vst [vmem:[#allocation3_spill] sm:$0xff] %v14738_v36  ;;  %v1293_v21 = vmul.f32 0.03125, %v1282_v41  ;;  %v1521_v49 = vmul.f32 %v14729_v5, %v14729_v5  ;;  %v1522_v54 = vmul.f32 %v14732_v10, %v14732_v10  ;;  %v1523_v23 = vmul.f32 %v14735_v14, %v14735_v14 }
  0xc1   : > { %v1524_v1 = vmul.f32 %v14738_v36, %v14738_v36  ;;  %v1589_v28 = vcombine.low %v1517_v42, %v1518_v47  ;;  %v1590_v55 = vcombine.low %v1519_v43, %v1520_v48 }
  0xc2   : > { %v1591_v56 = vcombine.low %v1521_v49, %v1522_v54  ;;  %v1368_v19 = vrot.slane %v1293_v21, %v14685_v30  ;;  %v1372_v59 = vrot.slane %v1293_v21, %v14688_v31  ;;  %v1376_v25 = vrot.slane %v1293_v21, %v14691_v37 }
  0xc3   : > { %v1592_v27 = vcombine.low %v1523_v23, %v1524_v1  ;;  %v1599_v34 = vrot.slane %v1589_v28, %v14415_v7  ;;  %v1606_v60 = vrot.slane %v1590_v55, %v14415_v7  ;;  %v1380_v41 = vrot.slane %v1293_v21, %v14694_v38 }
  0xc4   : > { %v1613_v14 = vrot.slane %v1591_v56, %v14415_v7  ;;  %v1384_v36 = vrot.slane %v1293_v21, %v14697_v35  ;;  %v1388_v42 = vrot.slane %v1293_v21, %v14700_v40  ;;  %v1392_v47 = vrot.slane %v1293_v21, %v14703_v46 }
  0xc5   : > { %v1620_v43 = vrot.slane %v1592_v27, %v14415_v7  ;;  %v1621_v48 = vcombine.low %v1599_v34, %v1606_v60  ;;  %v1396_v49 = vrot.slane %v1293_v21, %v14706_v26  ;;  %v14769_v54 = vsub.f32 %v14522_v6, %v1368_v19 }
  0xc6   : > { %v14772_v23 = vsub.f32 %v14506_v57, %v1372_v59  ;;  %v14775_v1 = vsub.f32 %v14527_v12, %v1376_v25  ;;  %v14778_v28 = vsub.f32 %v14534_v15, %v1380_v41  ;;  %v14781_v55 = vsub.f32 %v14537_v16, %v1384_v36 }
  0xc7   : > { %v1622_v27 = vcombine.low %v1613_v14, %v1620_v43  ;;  %v1629_v34 = vrot.slane %v1621_v48, %v14415_v7  ;;  %v14785_v21 = vsub.f32 %v14548_v29, %v1388_v42  ;;  %v14788_v6 = vsub.f32 %v14531_v13, %v1392_v47 }
  0xc8   : > { %v1279_v56 = vpop.xlane.xlu0 %1278  ;;  %v14791_v12 = vsub.f32 %v14541_v17, %v1396_v49  ;;  %v1533_v15 = vmul.f32 %v14769_v54, %v14769_v54  ;;  %v1534_v16 = vmul.f32 %v14772_v23, %v14772_v23  ;;  %v1535_v36 = vmul.f32 %v14775_v1, %v14775_v1 }
  0xc9   : > { %18600 = vst [vmem:[#allocation4_spill] sm:$0xff] %v14785_v21  ;;  %18601 = vst [vmem:[#allocation5_spill] sm:$0xff] %v14788_v6  ;;  %v1292_v57 = vmul.f32 0.03125, %v1279_v56  ;;  %v1636_v14 = vrot.slane %v1622_v27, %v14415_v7  ;;  %v1536_v29 = vmul.f32 %v14778_v28, %v14778_v28  ;;  %v1537_v13 = vmul.f32 %v14781_v55, %v14781_v55 }
  0xca   : > { %v1538_v17 = vmul.f32 %v14785_v21, %v14785_v21  ;;  %v1539_v19 = vmul.f32 %v14788_v6, %v14788_v6  ;;  %v1540_v59 = vmul.f32 %v14791_v12, %v14791_v12  ;;  %v1687_v25 = vcombine.low %v1533_v15, %v1534_v16 }
  0xcb   : > { %v1637_v60 = vcombine.low %v1629_v34, %v1636_v14  ;;  %v1688_v41 = vcombine.low %v1535_v36, %v1536_v29  ;;  %v1336_v42 = vrot.slane %v1292_v57, %v14685_v30  ;;  %v1340_v47 = vrot.slane %v1292_v57, %v14688_v31 }
  0xcc   : > { %v1689_v43 = vcombine.low %v1537_v13, %v1538_v17  ;;  %v1690_v48 = vcombine.low %v1539_v19, %v1540_v59  ;;  %v1697_v49 = vrot.slane %v1687_v25, %v14415_v7  ;;  %v1344_v56 = vrot.slane %v1292_v57, %v14691_v37 }
  0xcd   : > { %v1814_v27 = vsel %vm1273_vm0, %v1637_v60, 0.0  ;;  %v1704_v6 = vrot.slane %v1688_v41, %v14415_v7  ;;  %v1348_v21 = vrot.slane %v1292_v57, %v14694_v38  ;;  %v1352_v15 = vrot.slane %v1292_v57, %v14697_v35 }
  0xce   : > { %1815 = vadd.xlane.f32.xlu1 %v1814_v27  ;;  %v1711_v34 = vrot.slane %v1689_v43, %v14415_v7  ;;  %v1718_v16 = vrot.slane %v1690_v48, %v14415_v7  ;;  %v1356_v14 = vrot.slane %v1292_v57, %v14700_v40  ;;  %v1360_v36 = vrot.slane %v1292_v57, %v14703_v46 }
  0xcf   : > { %v1719_v29 = vcombine.low %v1697_v49, %v1704_v6  ;;  %v1364_v13 = vrot.slane %v1292_v57, %v14706_v26  ;;  %v14824_v17 = vsub.f32 %v14561_v39, %v1336_v42  ;;  %v14827_v19 = vsub.f32 %v14578_v61, %v1340_v47 }
  0xd0   : > { %v1720_v25 = vcombine.low %v1711_v34, %v1718_v16  ;;  %v14830_v60 = vsub.f32 %v14586_v8, %v1344_v56  ;;  %v14833_v41 = vsub.f32 %v14589_v44, %v1348_v21  ;;  %v14836_v43 = vsub.f32 %v14600_v22, %v1352_v15 }
  0xd1   : > { %v1289_v59 = vpop.xlane.xlu0 %1288  ;;  %v1285_v6 = vpop.xlane.xlu1 %1284  ;;  %v1727_v57 = vrot.slane %v1719_v29, %v14415_v7  ;;  %v14840_v39 = vsub.f32 %v14569_v53, %v1356_v14  ;;  %v14843_v61 = vsub.f32 %v14574_v58, %v1360_v36  ;;  %v14847_v47 = vsub.f32 %v14581_v62, %v1364_v13 }
  0xd2   : > { %18602 = vst [vmem:[#allocation6_spill] sm:$0xff] %v14833_v41  ;;  %18603 = vst [vmem:[#allocation7_spill] sm:$0xff] %v14836_v43  ;;  %v1295_v48 = vmul.f32 0.03125, %v1289_v59  ;;  %v1294_v42 = vmul.f32 0.03125, %v1285_v6  ;;  %v1734_v8 = vrot.slane %v1720_v25, %v14415_v7  ;;  %v1525_v44 = vmul.f32 %v14824_v17, %v14824_v17 }
  0xd3   : > { %18604 = vst [vmem:[#allocation8_spill] sm:$0xff] %v14840_v39  ;;  %18605 = vst [vmem:[#allocation9_spill] sm:$0xff] %v14843_v61  ;;  %v1526_v58 = vmul.f32 %v14827_v19, %v14827_v19  ;;  %v1527_v27 = vmul.f32 %v14830_v60, %v14830_v60  ;;  %v1528_v62 = vmul.f32 %v14833_v41, %v14833_v41 }
  0xd4   : > { %18606 = vst [vmem:[#allocation10_spill] sm:$0xff] %v14847_v47  ;;  %v1432_v22 = vrot.slane %v1295_v48, %v14685_v30  ;;  %v1436_v21 = vrot.slane %v1295_v48, %v14688_v31  ;;  %v1440_v49 = vrot.slane %v1295_v48, %v14691_v37  ;;  %v1444_v53 = vrot.slane %v1295_v48, %v14694_v38 }
  0xd5   : > { %v1735_v56 = vcombine.low %v1727_v57, %v1734_v8  ;;  %v1529_v29 = vmul.f32 %v14836_v43, %v14836_v43  ;;  %v1530_v13 = vmul.f32 %v14840_v39, %v14840_v39  ;;  %v1639_v59 = vcombine.low %v1527_v27, %v1528_v62 }
  0xd6   : > { %v14862_v15 = vsub.f32 %v14656_v20, %v1432_v22  ;;  %v14865_v34 = vsub.f32 %v14660_v51, %v1436_v21  ;;  %v14868_v16 = vsub.f32 %v14663_v52, %v1440_v49  ;;  %v14871_v14 = vsub.f32 %v14666_v24, %v1444_v53 }
  0xd7   : > { %v1820_v36 = vsel %vm1273_vm0, %v1735_v56, 0.0  ;;  %v1531_v20 = vmul.f32 %v14843_v61, %v14843_v61  ;;  %v1532_v51 = vmul.f32 %v14847_v47, %v14847_v47  ;;  %v1638_v52 = vcombine.low %v1525_v44, %v1526_v58  ;;  %v18622_v61 = vld [vmem:[#allocation3_spill] sm:$0xff] }
  0xd8   : > { %18607 = vst [vmem:[#allocation11_spill] sm:$0xff] %v14862_v15  ;;  %18608 = vst [vmem:[#allocation12_spill] sm:$0xff] %v14865_v34  ;;  %1821 = vadd.xlane.f32.xlu1 %v1820_v36  ;;  %v1400_v24 = vrot.slane %v1294_v42, %v14685_v30  ;;  %v1640_v25 = vcombine.low %v1529_v29, %v1530_v13  ;;  %v1404_v6 = vrot.slane %v1294_v42, %v14688_v31 }
  0xd9   : > { %18609 = vst [vmem:[#allocation13_spill] sm:$0xff] %v14868_v16  ;;  %18610 = vst [vmem:[#allocation14_spill] sm:$0xff] %v14871_v14  ;;  %v1408_v48 = vrot.slane %v1294_v42, %v14691_v37  ;;  %v1412_v57 = vrot.slane %v1294_v42, %v14694_v38  ;;  %v1641_v8 = vcombine.low %v1531_v20, %v1532_v51 }
  0xda   : > { %v1648_v22 = vrot.slane %v1638_v52, %v14415_v7  ;;  %v1655_v21 = vrot.slane %v1639_v59, %v14415_v7  ;;  %v1416_v49 = vrot.slane %v1294_v42, %v14697_v35  ;;  %v1662_v53 = vrot.slane %v1640_v25, %v14415_v7 }
  0xdb   : > { %v1420_v44 = vrot.slane %v1294_v42, %v14700_v40  ;;  %v1424_v56 = vrot.slane %v1294_v42, %v14703_v46  ;;  %v1428_v58 = vrot.slane %v1294_v42, %v14706_v26  ;;  %v1669_v27 = vrot.slane %v1641_v8, %v14415_v7 }
  0xdc   : > { %v1670_v62 = vcombine.low %v1648_v22, %v1655_v21  ;;  %v14895_v36 = vsub.f32 %v14613_v45, %v1400_v24  ;;  %v14898_v29 = vsub.f32 %v14618_v50, %v1404_v6  ;;  %v14901_v13 = vsub.f32 %v14621_v11, %v1408_v48 }
  0xdd   : > { %v14904_v20 = vsub.f32 %v14631_v9, %v1412_v57  ;;  %v14907_v51 = vsub.f32 %v14642_v32, %v1416_v49  ;;  %v14910_v42 = vsub.f32 %v14645_v33, %v1420_v44  ;;  %v1671_v52 = vcombine.low %v1662_v53, %v1669_v27 }
  0xde   : > { %18611 = vst [vmem:[#allocation15_spill] sm:$0xff] %v14895_v36  ;;  %18612 = vst [vmem:[#allocation16_spill] sm:$0xff] %v14898_v29  ;;  %v1678_v59 = vrot.slane %v1670_v62, %v14415_v7  ;;  %v14914_v45 = vsub.f32 %v14651_v3, %v1424_v56  ;;  %v14917_v50 = vsub.f32 %v14636_v18, %v1428_v58 }
  0xdf   : > { %18613 = vst [vmem:[#allocation17_spill] sm:$0xff] %v14901_v13  ;;  %18614 = vst [vmem:[#allocation18_spill] sm:$0xff] %v14904_v20  ;;  %v1541_v11 = vmul.f32 %v14895_v36, %v14895_v36  ;;  %v1542_v9 = vmul.f32 %v14898_v29, %v14898_v29  ;;  %v1543_v32 = vmul.f32 %v14901_v13, %v14901_v13  ;;  %v18621_v36 = vld [vmem:[#allocation2_spill] sm:$0xff] }
  0xe0   : > { %18615 = vst [vmem:[#allocation19_spill] sm:$0xff] %v14907_v51  ;;  %18616 = vst [vmem:[#allocation20_spill] sm:$0xff] %v14910_v42  ;;  %v1544_v33 = vmul.f32 %v14904_v20, %v14904_v20  ;;  %v1685_v24 = vrot.slane %v1671_v52, %v14415_v7  ;;  %v1545_v3 = vmul.f32 %v14907_v51, %v14907_v51 }
  0xe1   : > { %18617 = vst [vmem:[#allocation21_spill] sm:$0xff] %v14914_v45  ;;  %18618 = vst [vmem:[#allocation22_spill] sm:$0xff] %v14917_v50  ;;  %v1546_v18 = vmul.f32 %v14910_v42, %v14910_v42  ;;  %v1547_v25 = vmul.f32 %v14914_v45, %v14914_v45  ;;  %v1548_v6 = vmul.f32 %v14917_v50, %v14917_v50 }
  0xe2   : > { %v1736_v48 = vcombine.low %v1541_v11, %v1542_v9  ;;  %v1737_v57 = vcombine.low %v1543_v32, %v1544_v33  ;;  %v1549_v8 = vmul.f32 %v14862_v15, %v14862_v15  ;;  %v1686_v22 = vcombine.low %v1678_v59, %v1685_v24 }
  0xe3   : > { %v1738_v21 = vcombine.low %v1545_v3, %v1546_v18  ;;  %v1550_v49 = vmul.f32 %v14865_v34, %v14865_v34  ;;  %v1551_v53 = vmul.f32 %v14868_v16, %v14868_v16  ;;  %v1739_v44 = vcombine.low %v1547_v25, %v1548_v6 }
  0xe4   : > { %v1746_v56 = vrot.slane %v1736_v48, %v14415_v7  ;;  %v1753_v58 = vrot.slane %v1737_v57, %v14415_v7  ;;  %v1552_v27 = vmul.f32 %v14871_v14, %v14871_v14  ;;  %v1817_v62 = vsel %vm1273_vm0, %v1686_v22, 0.0 }
  0xe5   : > { %v1760_v52 = vrot.slane %v1738_v21, %v14415_v7  ;;  %v1785_v59 = vcombine.low %v1549_v8, %v1550_v49  ;;  %1818 = vadd.xlane.f32.xlu0 %v1817_v62  ;;  %v1767_v11 = vrot.slane %v1739_v44, %v14415_v7  ;;  %v2272_v21 = vld [vmem:[%s18388_s4 + $0x18] sm:$0xff]  ;;  %v18408_v49 = vmov 0.0   ;;  %v2270_v44 = vld [vmem:[%s18388_s4 + $0x8] sm:$0xff]  ;;  %v13027_v62 = vld [vmem:[%s18619_s27] ss:$0 sm:$0xff]  ;;  %s14291_s27 = smov 32  }
  0xe6   : > { %v1768_v9 = vcombine.low %v1746_v56, %v1753_v58  ;;  %v1786_v32 = vcombine.low %v1551_v53, %v1552_v27  ;;  %13510 = vmatprep.subr.mxu0 %v18408_v49  ;;  %v2271_v53 = vld [vmem:[%s18388_s4 + $0x10] sm:$0xff]  ;;  %13518 = vmatprep.mubr.msk.f32.mxu0 %vm14289_vm2, %v18408_v49  ;;  %v2269_v56 = vld [vmem:[%s18388_s4] sm:$0xff]  ;;  %v14981_v58 = vld [vmem:[%s18400_s16 + $0x18] sm:$0xff] }
  0xe7   : > { %v1793_v33 = vrot.slane %v1785_v59, %v14415_v7  ;;  %v1769_v24 = vcombine.low %v1760_v52, %v1767_v11  ;;  %13511 = vmatpush3.msra.mxu0 %v2272_v21  ;;  %14026 = vmatprep.subr.mxu1 %v18408_v49  ;;  %v14987_v27 = vld [vmem:[%s18400_s16 + $0x10] sm:$0xff]  ;;  %v13028_v52 = vld [vmem:[%s18620_s30] ss:$0 sm:$0xff] }
  0xe8   : > { %v1776_v3 = vrot.slane %v1768_v9, %v14415_v7  ;;  %v1800_v18 = vrot.slane %v1786_v32, %v14415_v7  ;;  %13512 = vmatprep.subr.mxu0 %v18408_v49  ;;  %13547 = vmatprep.mubr.msk.f32.mxu1 %vm14289_vm2, %v18408_v49  ;;  %v2070_v9 = vcombine.high %v13027_v62, %v13027_v62 }
  0xe9   : > { %v1783_v25 = vrot.slane %v1769_v24, %v14415_v7  ;;  %13513 = vmatpush3.msra.mxu0 %v2271_v53  ;;  %14030 = vmatpush3.msra.mxu1 %v14981_v58  ;;  %v2168_v32 = vcombine.high %v13028_v52, %v13028_v52  ;;  %v2077_v24 = vrot.slane %v13027_v62, %v14415_v7 }
  0xea   : > { %v1801_v6 = vcombine.low %v1793_v33, %v1800_v18  ;;  %13514 = vmatprep.subr.mxu0 %v18408_v49  ;;  %14027 = vmatprep.subr.mxu1 %v18408_v49  ;;  %v2175_v18 = vrot.slane %v13028_v52, %v14415_v7 }
  0xeb   : > { %v1784_v48 = vcombine.low %v1776_v3, %v1783_v25  ;;  %13515 = vmatpush3.msra.mxu0 %v2270_v44  ;;  %14031 = vmatpush3.msra.mxu1 %v14987_v27  ;;  %v2084_v3 = vrot.slane %v2070_v9, %v14415_v7  ;;  %v2182_v25 = vrot.slane %v2168_v32, %v14415_v7 }
  0xec   : > { %v1808_v57 = vrot.slane %v1801_v6, %v14415_v7  ;;  %13516 = vmatprep.subr.mxu0 %v18408_v49  ;;  %14028 = vmatprep.subr.mxu1 %v18408_v49  ;;  %v15003_v44 = vrot.slane %v2077_v24, %v14415_v7 }
  0xed   : > { %v1823_v8 = vsel %vm1273_vm0, %v1784_v48, 0.0  ;;  %13517 = vmatpush3.msra.mxu0 %v2269_v56  ;;  %v2085_v48 = vcombine.high %v2077_v24, %v2077_v24  ;;  %v2184_v21 = vcombine.high %v2182_v25, %v2182_v25  ;;  %v15006_v56 = vrot.slane %v2084_v3, %v14415_v7 }
  0xee   : > { %v1826_v22 = vsel %vm1286_vm1, %v1808_v57, 0.0  ;;  %1824 = vadd.xlane.f32.xlu0 %v1823_v8  ;;  %13533 = vmatprep.subr.mxu0 %v18408_v49  ;;  %v2086_v57 = vcombine.high %v2084_v3, %v2084_v3 }
  0xef   : > { %1827 = vadd.xlane.f32.xlu1 %v1826_v22  ;;  %v2183_v22 = vcombine.high %v2175_v18, %v2175_v18  ;;  %v15009_v62 = vrot.slane %v2085_v48, %v14415_v7  ;;  %v15024_v32 = vrot.slane %v2184_v21, %v14415_v7  ;;  %v15032_v24 = vcombine.high %v15006_v56, %v15006_v56 }
  0xf0   : > { %v15012_v52 = vrot.slane %v2086_v57, %v14415_v7 }
  0xf1   : > { %v15021_v9 = vrot.slane %v2183_v22, %v14415_v7  ;;  %v15036_v3 = vcombine.high %v15009_v62, %v15009_v62 }
  0xf3   : > { %v15052_v57 = vcombine.high %v15021_v9, %v15021_v9 }
 0x157   : > { %v1816_v59 = vpop.xlane.xlu1 %1815 }
 0x158   : > { %v1829_v11 = vmul.f32 0.03125, %v1816_v59  ;;  %v15015_v59 = vrot.slane %v2175_v18, %v14415_v7 }
 0x15a   : > { %v1834_v33 = vadd.f32 1e-12, %v1829_v11  ;;  %v15018_v11 = vrot.slane %v2182_v25, %v14415_v7  ;;  %v15040_v18 = vcombine.high %v15015_v59, %v15015_v59 }
 0x15c   : > { %14059 = vrsqrt.f32 %v1834_v33  ;;  %v15028_v33 = vcombine.high %v15003_v44, %v15003_v44  ;;  %v15048_v48 = vcombine.high %v15018_v11, %v15018_v11 }
 0x161   : > { %v1822_v6 = vpop.xlane.xlu1 %1821 }
 0x162   : > { %v1831_v8 = vmul.f32 0.03125, %v1822_v6  ;;  %v15044_v6 = vcombine.high %v15012_v52, %v15012_v52 }
 0x164   : > { %v1836_v53 = vadd.f32 1e-12, %v1831_v8  ;;  %v15056_v8 = vcombine.high %v15024_v32, %v15024_v32 }
 0x166   : > { %14061 = vrsqrt.f32 %v1836_v53 }
 0x169   : > { %v14060_v25 = vpop.eup %14059 }
 0x16a   : > { %v1852_v22 = vrot.slane %v14060_v25, %v14685_v30  ;;  %v1856_v21 = vrot.slane %v14060_v25, %v14688_v31  ;;  %v1860_v53 = vrot.slane %v14060_v25, %v14691_v37  ;;  %v1864_v49 = vrot.slane %v14060_v25, %v14694_v38 }
 0x16b   : > { %v1868_v14 = vrot.slane %v14060_v25, %v14697_v35  ;;  %v1872_v16 = vrot.slane %v14060_v25, %v14700_v40  ;;  %v1876_v34 = vrot.slane %v14060_v25, %v14703_v46  ;;  %v1880_v15 = vrot.slane %v14060_v25, %v14706_v26 }
 0x16c   : > { %v2029_v50 = vmul.f32 %v1852_v22, %v14717_v4  ;;  %v2030_v45 = vmul.f32 %v1856_v21, %v14720_v63  ;;  %v2031_v42 = vmul.f32 %v1860_v53, %v14723_v0  ;;  %v2032_v51 = vmul.f32 %v1864_v49, %v14726_v2 }
 0x16d   : > { %v2033_v13 = vmul.f32 %v1868_v14, %v14729_v5  ;;  %v2034_v29 = vmul.f32 %v1872_v16, %v14732_v10  ;;  %v2035_v47 = vmul.f32 %v1876_v34, %v18621_v36  ;;  %v2036_v39 = vmul.f32 %v1880_v15, %v18622_v61 }
 0x16e   : > { %v1819_v20 = vpop.xlane.xlu0 %1818  ;;  %v2127_v25 = vmul.f32 %v15003_v44, %v2029_v50  ;;  %v2128_v4 = vmul.f32 %v15009_v62, %v2030_v45  ;;  %v2129_v63 = vmul.f32 %v15028_v33, %v2031_v42  ;;  %v2130_v0 = vmul.f32 %v15036_v3, %v2032_v51 }
 0x16f   : > { %v1830_v43 = vmul.f32 0.03125, %v1819_v20  ;;  %v2131_v2 = vmul.f32 %v15006_v56, %v2033_v13  ;;  %v2132_v49 = vmul.f32 %v15012_v52, %v2034_v29  ;;  %v2133_v5 = vmul.f32 %v15032_v24, %v2035_v47 }
 0x170   : > { %v2134_v34 = vmul.f32 %v15044_v6, %v2036_v39  ;;  %v2225_v61 = vadd.f32 %v15015_v59, %v2127_v25  ;;  %v2226_v15 = vadd.f32 %v15021_v9, %v2128_v4  ;;  %v2227_v16 = vadd.f32 %v15040_v18, %v2129_v63 }
 0x171   : > { %v1835_v10 = vadd.f32 1e-12, %v1830_v43  ;;  %v2228_v14 = vadd.f32 %v15052_v57, %v2130_v0  ;;  %v2229_v36 = vadd.f32 %v15018_v11, %v2131_v2  ;;  %v2230_v20 = vadd.f32 %v15024_v32, %v2132_v49 }
 0x172   : > { %v2231_v29 = vadd.f32 %v15048_v48, %v2133_v5  ;;  %v2232_v43 = vadd.f32 %v15056_v8, %v2134_v34  ;;  %v2316_v47 = vcombine.low %v2225_v61, %v2226_v15 }
 0x173   : > { %v14062_v13 = vpop.eup %14061  ;;  %14063 = vrsqrt.f32 %v1835_v10  ;;  %v2317_v39 = vcombine.low %v2227_v16, %v2228_v14  ;;  %v2318_v51 = vcombine.low %v2229_v36, %v2230_v20 }
 0x174   : > { %v1916_v42 = vrot.slane %v14062_v13, %v14685_v30  ;;  %v1920_v45 = vrot.slane %v14062_v13, %v14688_v31  ;;  %v2319_v50 = vcombine.low %v2231_v29, %v2232_v43  ;;  %v2326_v22 = vrot.slane %v2316_v47, %v14415_v7 }
 0x175   : > { %v1924_v21 = vrot.slane %v14062_v13, %v14691_v37  ;;  %v1928_v53 = vrot.slane %v14062_v13, %v14694_v38  ;;  %v2333_v25 = vrot.slane %v2317_v39, %v14415_v7  ;;  %v2340_v4 = vrot.slane %v2318_v51, %v14415_v7 }
 0x176   : > { %v1932_v63 = vrot.slane %v14062_v13, %v14697_v35  ;;  %v1936_v0 = vrot.slane %v14062_v13, %v14700_v40  ;;  %v2347_v5 = vrot.slane %v2319_v50, %v14415_v7  ;;  %v1940_v10 = vrot.slane %v14062_v13, %v14703_v46  ;;  %v18623_v50 = vld [vmem:[#allocation4_spill] sm:$0xff] }
 0x177   : > { %v1825_v49 = vpop.xlane.xlu0 %1824  ;;  %v1944_v34 = vrot.slane %v14062_v13, %v14706_v26  ;;  %v2045_v61 = vmul.f32 %v1916_v42, %v14769_v54  ;;  %v2348_v14 = vcombine.low %v2326_v22, %v2333_v25  ;;  %v2046_v36 = vmul.f32 %v1920_v45, %v14772_v23  ;;  %v18624_v54 = vld [vmem:[#allocation5_spill] sm:$0xff] }
 0x178   : > { %v1828_v2 = vpop.xlane.xlu1 %1827  ;;  %v1832_v16 = vmul.f32 0.03125, %v1825_v49  ;;  %v2349_v20 = vcombine.low %v2340_v4, %v2347_v5  ;;  %v2047_v29 = vmul.f32 %v1924_v21, %v14775_v1  ;;  %v2048_v43 = vmul.f32 %v1928_v53, %v14778_v28 }
 0x179   : > { %v1833_v15 = vmul.f32 0.03125, %v1828_v2  ;;  %v2049_v47 = vmul.f32 %v1932_v63, %v14781_v55  ;;  %v2356_v51 = vrot.slane %v2348_v14, %v14415_v7  ;;  %v2050_v41 = vmul.f32 %v1936_v0, %v18623_v50 }
 0x17a   : > { %v1837_v39 = vadd.f32 1e-12, %v1832_v16  ;;  %v2363_v13 = vrot.slane %v2349_v20, %v14415_v7  ;;  %v2051_v42 = vmul.f32 %v1940_v10, %v18624_v54  ;;  %v2052_v22 = vmul.f32 %v1944_v34, %v14791_v12 }
 0x17b   : > { %v2143_v23 = vmul.f32 %v15003_v44, %v2045_v61  ;;  %v1838_v45 = vadd.f32 1e-12, %v1833_v15  ;;  %v2144_v1 = vmul.f32 %v15009_v62, %v2046_v36  ;;  %v2145_v28 = vmul.f32 %v15028_v33, %v2047_v29 }
 0x17c   : > { %v2146_v55 = vmul.f32 %v15036_v3, %v2048_v43  ;;  %14065 = vrsqrt.f32 %v1837_v39  ;;  %v15116_v21 = vcombine.low %v2356_v51, %v2363_v13  ;;  %v2147_v53 = vmul.f32 %v15006_v56, %v2049_v47 }
 0x17d   : > { %v2148_v25 = vmul.f32 %v15012_v52, %v2050_v41  ;;  %v2149_v4 = vmul.f32 %v15032_v24, %v2051_v42  ;;  %v2150_v12 = vmul.f32 %v15044_v6, %v2052_v22  ;;  %v2241_v63 = vadd.f32 %v15015_v59, %v2143_v23  ;;  %v18627_v42 = vld [vmem:[#allocation6_spill] sm:$0xff]  ;;  %v18628_v23 = vld [vmem:[#allocation7_spill] sm:$0xff] }
 0x17e   : > { %18625 = vst [vmem:[#allocation2_spill] sm:$0xff] %v15116_v21  ;;  %v2242_v0 = vadd.f32 %v15021_v9, %v2144_v1  ;;  %13519 = vmatmul.mubr.msk.f32.vlgmr.msra.gmra.mxu0 %vm1273_vm0, %v15116_v21  ;;  %v2243_v2 = vadd.f32 %v15040_v18, %v2145_v28  ;;  %v2244_v49 = vadd.f32 %v15052_v57, %v2146_v55  ;;  %14067 = vrsqrt.f32 %v1838_v45  ;;  %v18629_v1 = vld [vmem:[#allocation8_spill] sm:$0xff]  ;;  %v18630_v55 = vld [vmem:[#allocation9_spill] sm:$0xff] }
 0x17f   : > { %v2245_v5 = vadd.f32 %v15018_v11, %v2147_v53  ;;  %v2246_v10 = vadd.f32 %v15024_v32, %v2148_v25  ;;  %v18626_v34 = vmov 0.0   ;;  %v2247_v61 = vadd.f32 %v15048_v48, %v2149_v4  ;;  %13534 = vmatpush3.msra.mxu0 %v14981_v58  ;;  %v18631_v25 = vld [vmem:[#allocation10_spill] sm:$0xff] }
 0x180   : > { %v14064_v41 = vpop.eup %14063  ;;  %13521 = vmatprep.mubr.msk.f32.mxu0 %vm14289_vm2, %v18626_v34  ;;  %v2248_v15 = vadd.f32 %v15056_v8, %v2150_v12  ;;  %v2414_v16 = vcombine.low %v2241_v63, %v2242_v0  ;;  %13535 = vmatprep.subr.mxu0 %v18626_v34 }
 0x181   : > { %v1884_v14 = vrot.slane %v14064_v41, %v14685_v30  ;;  %v1888_v36 = vrot.slane %v14064_v41, %v14688_v31  ;;  %v1892_v20 = vrot.slane %v14064_v41, %v14691_v37  ;;  %v1896_v29 = vrot.slane %v14064_v41, %v14694_v38  ;;  %13536 = vmatpush3.msra.mxu0 %v14987_v27 }
 0x182   : > { %v1900_v43 = vrot.slane %v14064_v41, %v14697_v35  ;;  %v1904_v47 = vrot.slane %v14064_v41, %v14700_v40  ;;  %v1908_v39 = vrot.slane %v14064_v41, %v14703_v46  ;;  %v1912_v51 = vrot.slane %v14064_v41, %v14706_v26  ;;  %13537 = vmatprep.subr.mxu0 %v18626_v34 }
 0x183   : > { %v2037_v50 = vmul.f32 %v1884_v14, %v14824_v17  ;;  %v2038_v13 = vmul.f32 %v1888_v36, %v14827_v19  ;;  %v2039_v54 = vmul.f32 %v1892_v20, %v14830_v60  ;;  %v2040_v22 = vmul.f32 %v1896_v29, %v18627_v42 }
 0x184   : > { %v2041_v45 = vmul.f32 %v1900_v43, %v18628_v23  ;;  %v2042_v28 = vmul.f32 %v1904_v47, %v18629_v1  ;;  %v2043_v53 = vmul.f32 %v1908_v39, %v18630_v55  ;;  %v2044_v4 = vmul.f32 %v1912_v51, %v18631_v25 }
 0x185   : > { %v2135_v12 = vmul.f32 %v15003_v44, %v2037_v50  ;;  %v2136_v17 = vmul.f32 %v15009_v62, %v2038_v13  ;;  %v2137_v19 = vmul.f32 %v15028_v33, %v2039_v54  ;;  %v2138_v60 = vmul.f32 %v15036_v3, %v2040_v22 }
 0x186   : > { %v2139_v63 = vmul.f32 %v15006_v56, %v2041_v45  ;;  %v2140_v0 = vmul.f32 %v15012_v52, %v2042_v28  ;;  %v2141_v41 = vmul.f32 %v15032_v24, %v2043_v53  ;;  %v2142_v14 = vmul.f32 %v15044_v6, %v2044_v4 }
 0x187   : > { %v2233_v36 = vadd.f32 %v15015_v59, %v2135_v12  ;;  %v2234_v20 = vadd.f32 %v15021_v9, %v2136_v17  ;;  %v2235_v29 = vadd.f32 %v15040_v18, %v2137_v19  ;;  %v2236_v43 = vadd.f32 %v15052_v57, %v2138_v60 }
 0x188   : > { %v2237_v47 = vadd.f32 %v15018_v11, %v2139_v63  ;;  %v2238_v39 = vadd.f32 %v15024_v32, %v2140_v0  ;;  %v2239_v51 = vadd.f32 %v15048_v48, %v2141_v41  ;;  %v2240_v50 = vadd.f32 %v15056_v8, %v2142_v14 }
 0x189   : > { %v2365_v13 = vcombine.low %v2233_v36, %v2234_v20  ;;  %v2366_v54 = vcombine.low %v2235_v29, %v2236_v43  ;;  %v2415_v42 = vcombine.low %v2243_v2, %v2244_v49  ;;  %v2416_v22 = vcombine.low %v2245_v5, %v2246_v10  ;;  %v14066_v23 = vpop.eup %14065 }
 0x18a   : > { %v2367_v45 = vcombine.low %v2237_v47, %v2238_v39  ;;  %v2368_v1 = vcombine.low %v2239_v51, %v2240_v50  ;;  %v2417_v28 = vcombine.low %v2247_v61, %v2248_v15  ;;  %v2424_v55 = vrot.slane %v2414_v16, %v14415_v7  ;;  %v18632_v51 = vld [vmem:[#allocation15_spill] sm:$0xff] }
 0x18b   : > { %v2375_v53 = vrot.slane %v2365_v13, %v14415_v7  ;;  %v2382_v25 = vrot.slane %v2366_v54, %v14415_v7  ;;  %v2431_v4 = vrot.slane %v2415_v42, %v14415_v7  ;;  %v2438_v12 = vrot.slane %v2416_v22, %v14415_v7  ;;  %v14068_v5 = vpop.eup %14067  ;;  %v18633_v13 = vld [vmem:[#allocation16_spill] sm:$0xff]  ;;  %v18634_v42 = vld [vmem:[#allocation17_spill] sm:$0xff]  ;;  %v18635_v22 = vld [vmem:[#allocation18_spill] sm:$0xff] }
 0x18c   : > { %v2389_v17 = vrot.slane %v2367_v45, %v14415_v7  ;;  %v2396_v19 = vrot.slane %v2368_v1, %v14415_v7  ;;  %v2445_v2 = vrot.slane %v2417_v28, %v14415_v7  ;;  %v1948_v49 = vrot.slane %v14066_v23, %v14685_v30  ;;  %v18636_v1 = vld [vmem:[#allocation19_spill] sm:$0xff] }
 0x18d   : > { %v2397_v10 = vcombine.low %v2375_v53, %v2382_v25  ;;  %v2446_v61 = vcombine.low %v2424_v55, %v2431_v4  ;;  %v1952_v15 = vrot.slane %v14066_v23, %v14688_v31  ;;  %v1956_v16 = vrot.slane %v14066_v23, %v14691_v37  ;;  %v18640_v25 = vld [vmem:[#allocation21_spill] sm:$0xff] }
 0x18e   : > { %v2398_v60 = vcombine.low %v2389_v17, %v2396_v19  ;;  %v2447_v63 = vcombine.low %v2438_v12, %v2445_v2  ;;  %v1960_v0 = vrot.slane %v14066_v23, %v14694_v38  ;;  %v1964_v41 = vrot.slane %v14066_v23, %v14697_v35  ;;  %v18641_v12 = vld [vmem:[#allocation22_spill] sm:$0xff] }
 0x18f   : > { %v2405_v14 = vrot.slane %v2397_v10, %v14415_v7  ;;  %v2454_v36 = vrot.slane %v2446_v61, %v14415_v7  ;;  %v1968_v20 = vrot.slane %v14066_v23, %v14700_v40  ;;  %v1972_v29 = vrot.slane %v14066_v23, %v14703_v46  ;;  %v18639_v46 = vld [vmem:[#allocation20_spill] sm:$0xff] }
 0x190   : > { %v2412_v43 = vrot.slane %v2398_v60, %v14415_v7  ;;  %v2461_v47 = vrot.slane %v2447_v63, %v14415_v7  ;;  %v1976_v39 = vrot.slane %v14066_v23, %v14706_v26  ;;  %v2053_v50 = vmul.f32 %v1948_v49, %v18632_v51 }
 0x191   : > { %v2054_v54 = vmul.f32 %v1952_v15, %v18633_v13  ;;  %v2055_v35 = vmul.f32 %v1956_v16, %v18634_v42  ;;  %v2056_v45 = vmul.f32 %v1960_v0, %v18635_v22  ;;  %v2057_v28 = vmul.f32 %v1964_v41, %v18636_v1 }
 0x192   : > { %v15195_v55 = vcombine.low %v2405_v14, %v2412_v43  ;;  %v15197_v40 = vcombine.low %v2454_v36, %v2461_v47  ;;  %v2058_v53 = vmul.f32 %v1968_v20, %v18639_v46  ;;  %v2059_v4 = vmul.f32 %v1972_v29, %v18640_v25 }
 0x193   : > { %v2060_v26 = vmul.f32 %v1976_v39, %v18641_v12  ;;  %v2151_v23 = vmul.f32 %v15003_v44, %v2053_v50  ;;  %v2152_v17 = vmul.f32 %v15009_v62, %v2054_v54  ;;  %v2153_v19 = vmul.f32 %v15028_v33, %v2055_v35  ;;  %v18644_v50 = vld [vmem:[#allocation13_spill] sm:$0xff]  ;;  %v18645_v54 = vld [vmem:[#allocation14_spill] sm:$0xff] }
 0x194   : > { %18637 = vst [vmem:[#allocation3_spill] sm:$0xff] %v15195_v55  ;;  %18638 = vst [vmem:[#allocation4_spill] sm:$0xff] %v15197_v40  ;;  %13522 = vmatmul.mubr.msk.f32.gmra.mxu0 %vm1273_vm0, %v15195_v55  ;;  %v2154_v2 = vmul.f32 %v15036_v3, %v2056_v45  ;;  %v2155_v49 = vmul.f32 %v15006_v56, %v2057_v28  ;;  %v2156_v10 = vmul.f32 %v15012_v52, %v2058_v53 }
 0x195   : > { %v2157_v61 = vmul.f32 %v15032_v24, %v2059_v4  ;;  %13524 = vmatprep.mubr.msk.f32.mxu0 %vm14289_vm2, %v18626_v34  ;;  %v2158_v15 = vmul.f32 %v15044_v6, %v2060_v26  ;;  %v2249_v16 = vadd.f32 %v15015_v59, %v2151_v23  ;;  %v2250_v60 = vadd.f32 %v15021_v9, %v2152_v17  ;;  %v13029_v23 = vld [vmem:[%s18389_s5] ss:$0 sm:$0xff] }
 0x196   : > { %v2251_v63 = vadd.f32 %v15040_v18, %v2153_v19  ;;  %v2252_v0 = vadd.f32 %v15052_v57, %v2154_v2  ;;  %v2253_v41 = vadd.f32 %v15018_v11, %v2155_v49  ;;  %v2254_v56 = vadd.f32 %v15024_v32, %v2156_v10 }
 0x197   : > { %v2255_v52 = vadd.f32 %v15048_v48, %v2157_v61  ;;  %v2256_v24 = vadd.f32 %v15056_v8, %v2158_v15  ;;  %v2463_v14 = vcombine.low %v2249_v16, %v2250_v60  ;;  %v1980_v36 = vrot.slane %v14068_v5, %v14685_v30  ;;  %v18642_v8 = vld [vmem:[#allocation11_spill] sm:$0xff]  ;;  %v18643_v30 = vld [vmem:[#allocation12_spill] sm:$0xff]  ;;  %v2263_v16 = vld [vmem:[%s18402_s18] sm:$0xff] }
 0x198   : > { %v1984_v6 = vrot.slane %v14068_v5, %v14688_v31  ;;  %13525 = vmatmul.mubr.msk.f32.gmra.mxu0 %vm1273_vm0, %v15197_v40  ;;  %v2464_v20 = vcombine.low %v2251_v63, %v2252_v0  ;;  %v2465_v29 = vcombine.low %v2253_v41, %v2254_v56  ;;  %v1988_v43 = vrot.slane %v14068_v5, %v14691_v37 }
 0x199   : > { %v1992_v11 = vrot.slane %v14068_v5, %v14694_v38  ;;  %13527 = vmatprep.mubr.msk.f32.mxu0 %vm14289_vm2, %v18626_v34  ;;  %v2466_v32 = vcombine.low %v2255_v52, %v2256_v24  ;;  %v2473_v48 = vrot.slane %v2463_v14, %v14415_v7  ;;  %v2061_v47 = vmul.f32 %v1980_v36, %v18642_v8 }
 0x19a   : > { %v2062_v39 = vmul.f32 %v1984_v6, %v18643_v30  ;;  %v2480_v31 = vrot.slane %v2464_v20, %v14415_v7  ;;  %v2487_v51 = vrot.slane %v2465_v29, %v14415_v7  ;;  %v2063_v13 = vmul.f32 %v1988_v43, %v18644_v50  ;;  %v13045_v30 = vld.sshfl [vmem:[%s18402_s18 + $0x8] sm:$0x1 pattern:$0x75316420] }
 0x19b   : > { %v2064_v37 = vmul.f32 %v1992_v11, %v18645_v54  ;;  %v2494_v38 = vrot.slane %v2466_v32, %v14415_v7  ;;  %v2159_v5 = vmul.f32 %v15003_v44, %v2061_v47  ;;  %v3116_v0 = vrot.slane %v2263_v16, %v14415_v7 }
 0x19c   : > { %v2160_v42 = vmul.f32 %v15009_v62, %v2062_v39  ;;  %v2495_v35 = vcombine.low %v2473_v48, %v2480_v31  ;;  %v2161_v22 = vmul.f32 %v15028_v33, %v2063_v13  ;;  %v3109_v24 = vcombine.high %v2263_v16, %v2263_v16 }
 0x19d   : > { %v2162_v45 = vmul.f32 %v15036_v3, %v2064_v37  ;;  %v2496_v1 = vcombine.low %v2487_v51, %v2494_v38  ;;  %v2257_v28 = vadd.f32 %v15015_v59, %v2159_v5  ;;  %v15317_v52 = vrot.slane %v3116_v0, %v14415_v7 }
 0x19e   : > { %v2258_v46 = vadd.f32 %v15021_v9, %v2160_v42  ;;  %v2503_v53 = vrot.slane %v2495_v35, %v14415_v7  ;;  %v2259_v25 = vadd.f32 %v15040_v18, %v2161_v22  ;;  %v2266_v18 = vld [vmem:[%s18400_s16 + $0x8] sm:$0xff]  ;;  %v3124_v36 = vcombine.high %v3116_v0, %v3116_v0  ;;  %v2261_v22 = vld [vmem:[%s18401_s17] sm:$0xff] }
 0x19f   : > { %v2260_v4 = vadd.f32 %v15052_v57, %v2162_v45  ;;  %v2510_v44 = vrot.slane %v2496_v1, %v14415_v7  ;;  %v2265_v57 = vld [vmem:[%s18400_s16] sm:$0xff]  ;;  %13538 = vmatpush3.msra.mxu0 %v2266_v18  ;;  %14032 = vmatpush3.msra.mxu1 %v2266_v18  ;;  %18648 = vst [vmem:[#allocation7_spill] sm:$0xff] %v15317_v52 }
 0x1a0   : > { %v2512_v12 = vcombine.low %v2257_v28, %v2258_v46  ;;  %13539 = vmatprep.subr.mxu0 %v18626_v34  ;;  %14029 = vmatprep.subr.mxu1 %v18626_v34  ;;  %v15329_v20 = vcombine.high %v15317_v52, %v15317_v52  ;;  %v3123_v29 = vrot.slane %v3109_v24, %v14415_v7 }
 0x1a1   : > { %v2513_v62 = vcombine.low %v2259_v25, %v2260_v4  ;;  %v15248_v26 = vcombine.low %v2503_v53, %v2510_v44  ;;  %13540 = vmatpush3.msra.mxu0 %v2265_v57  ;;  %14033 = vmatpush3.msra.mxu1 %v2265_v57  ;;  %v15333_v43 = vrot.slane %v3124_v36, %v14415_v7 }
 0x1a2   : > { %v2520_v33 = vrot.slane %v2512_v12, %v14415_v7  ;;  %13556 = vmatprep.subr.mxu0 %v18626_v34  ;;  %18649 = vst [vmem:[#allocation8_spill] sm:$0xff] %v15329_v20  ;;  %v15340_v11 = vrot.slane %v3123_v29, %v14415_v7  ;;  %v3125_v48 = vcombine.high %v3123_v29, %v3123_v29 }
 0x1a3   : > { %18646 = vst [vmem:[#allocation5_spill] sm:$0xff] %v15248_v26  ;;  %v2527_v3 = vrot.slane %v2513_v62, %v14415_v7  ;;  %13528 = vmatmul.mubr.msk.f32.gmra.mxu0 %vm1273_vm0, %v15248_v26  ;;  %18650 = vst [vmem:[#allocation9_spill] sm:$0xff] %v15333_v43  ;;  %v15344_v32 = vcombine.high %v15333_v43, %v15333_v43  ;;  %v15365_v39 = vrot.slane %v13045_v30, %v14415_v7 }
 0x1a4   : > { %13530 = vmatprep.mubr.msk.f32.mxu0 %vm14289_vm2, %v18626_v34  ;;  %18651 = vst [vmem:[#allocation10_spill] sm:$0xff] %v15340_v11  ;;  %v15352_v8 = vcombine.high %v15340_v11, %v15340_v11  ;;  %v15355_v47 = vrot.slane %v3125_v48, %v14415_v7  ;;  %v3480_v28 = vcombine.high %v2261_v22, %v2261_v22 }
 0x1a5   : > { %v2528_v59 = vcombine.low %v2520_v33, %v2527_v3  ;;  %18652 = vst [vmem:[#allocation15_spill] sm:$0xff] %v15344_v32  ;;  %18655 = vst [vmem:[#allocation18_spill] sm:$0xff] %v15365_v39  ;;  %v3487_v25 = vrot.slane %v2261_v22, %v14415_v7 }
 0x1a6   : > { %18653 = vst [vmem:[#allocation16_spill] sm:$0xff] %v15352_v8  ;;  %18654 = vst [vmem:[#allocation17_spill] sm:$0xff] %v15355_v47  ;;  %v15369_v31 = vcombine.high %v15355_v47, %v15355_v47  ;;  %v3494_v33 = vrot.slane %v3480_v28, %v14415_v7 }
 0x1a7   : > { %v15257_v9 = vrot.slane %v2528_v59, %v14415_v7 }
 0x1a8   : > { %18656 = vst [vmem:[#allocation19_spill] sm:$0xff] %v15369_v31 }
 0x1a9   : > { %18647 = vst [vmem:[#allocation6_spill] sm:$0xff] %v15257_v9  ;;  %13531 = vmatmul.mubr.msk.f32.gmra.mxu0 %vm1273_vm0, %v15257_v9 }
 0x1aa   : > { %13541 = vmatprep.mubr.msk.f32.mxu0 %vm14289_vm2, %v18626_v34 }
 0x23e   : > { %v2612_v17 = vpop.f32.mrf.mxu0 }
 0x23f   : > { %v15275_v19 = vadd.f32 %v13029_v23, %v2612_v17 }
 0x240   : > { %v13520_v2 = vpop.f32.mrf.mxu0 }
 0x241   : > { %2741 = vrot.lane.b32.xlu0 %v15275_v19, %s14290_s25  ;;  %13542 = vmatmul.mubr.msk.f32.vlgmr.msra.gmra.mxu0 %vm1273_vm0, %v15275_v19  ;;  %v2851_v38 = vcombine.high %v15275_v19, %v15275_v19  ;;  %v2858_v5 = vrot.slane %v15275_v19, %v14415_v7 }
 0x242   : > { %13544 = vmatprep.mubr.msk.f32.mxu0 %vm14289_vm2, %v18626_v34  ;;  %13557 = vmatpush3.msra.mxu0 %v14981_v58 }
 0x243   : > { %13558 = vmatprep.subr.mxu0 %v18626_v34  ;;  %v2865_v42 = vrot.slane %v2851_v38, %v14415_v7  ;;  %v2866_v35 = vcombine.high %v2858_v5, %v2858_v5  ;;  %v15397_v1 = vrot.slane %v2858_v5, %v14415_v7 }
 0x244   : > { %13559 = vmatpush3.msra.mxu0 %v14987_v27 }
 0x245   : > { %13560 = vmatprep.subr.mxu0 %v18626_v34  ;;  %v2867_v45 = vcombine.high %v2865_v42, %v2865_v42  ;;  %v15400_v46 = vrot.slane %v2865_v42, %v14415_v7  ;;  %v15403_v53 = vrot.slane %v2866_v35, %v14415_v7  ;;  %v15415_v62 = vcombine.high %v15397_v1, %v15397_v1 }
 0x246   : > { %13561 = vmatpush3.msra.mxu0 %v2266_v18  ;;  %v3495_v18 = vcombine.high %v3487_v25, %v3487_v25  ;;  %v3181_v17 = vmul.f32 %v15317_v52, %v15397_v1 }
 0x247   : > { %13562 = vmatprep.subr.mxu0 %v18626_v34  ;;  %18657 = vst [vmem:[#allocation20_spill] sm:$0xff] %v15400_v46  ;;  %v15407_v4 = vrot.slane %v2867_v45, %v14415_v7  ;;  %v15420_v3 = vcombine.high %v15400_v46, %v15400_v46  ;;  %v15424_v59 = vcombine.high %v15403_v53, %v15403_v53 }
 0x248   : > { %13563 = vmatpush3.msra.mxu0 %v2265_v57  ;;  %v3182_v2 = vmul.f32 %v15333_v43, %v15403_v53  ;;  %v15455_v24 = vrot.slane %v3495_v18, %v14415_v7 }
 0x249   : > { %18658 = vst [vmem:[#allocation21_spill] sm:$0xff] %v15420_v3  ;;  %v3187_v16 = vmul.f32 %v15352_v8, %v15420_v3 }
 0x24a   : > { %18663 = vst [vmem:[#allocation14_spill] sm:$0xff] %v15455_v24  ;;  %v15485_v45 = vcombine.high %v15455_v24, %v15455_v24 }
 0x24c   : > { %18668 = vst [vmem:[#allocation27_spill] sm:$0xff] %v15485_v45 }
 0x254   : > { %v2617_v49 = vpop.f32.mrf.mxu0 }
 0x255   : > { %v15288_v10 = vadd.f32 %v13029_v23, %v2617_v49  ;;  %v3183_v49 = vmul.f32 %v15329_v20, %v15415_v62 }
 0x256   : > { %v13523_v61 = vpop.f32.mrf.mxu0 }
 0x257   : > { %2743 = vrot.lane.b32.xlu1 %v15288_v10, %s14290_s25  ;;  %13545 = vmatmul.mubr.msk.f32.gmra.mxu0 %vm1273_vm0, %v15288_v10  ;;  %v2900_v44 = vcombine.high %v15288_v10, %v15288_v10  ;;  %v2907_v12 = vrot.slane %v15288_v10, %v14415_v7  ;;  %v3496_v10 = vcombine.high %v3494_v33, %v3494_v33 }
 0x258   : > { %v2622_v58 = vpop.f32.mrf.mxu0  ;;  %13564 = vmatprep.mubr.msk.f32.mxu0 %vm14289_vm2, %v18626_v34  ;;  %v3184_v61 = vmul.f32 %v15344_v32, %v15424_v59 }
 0x259   : > { %v15296_v27 = vadd.f32 %v13029_v23, %v2622_v58  ;;  %v2914_v57 = vrot.slane %v2900_v44, %v14415_v7  ;;  %v2915_v19 = vcombine.high %v2907_v12, %v2907_v12  ;;  %v3185_v58 = vmul.f32 %v15340_v11, %v15400_v46 }
 0x25a   : > { %v13526_v15 = vpop.f32.mrf.mxu0 }
 0x25b   : > { %2745 = vrot.lane.b32.xlu1 %v15296_v27, %s14290_s25  ;;  %13548 = vmatmul.mubr.msk.f32.vlgmr.msra.gmra.mxu1 %vm1273_vm0, %v15296_v27  ;;  %v3186_v15 = vmul.f32 %v15355_v47, %v15407_v4  ;;  %v2916_v36 = vcombine.high %v2914_v57, %v2914_v57  ;;  %v15461_v30 = vrot.slane %v2914_v57, %v14415_v7 }
 0x25c   : > { %13550 = vmatprep.mubr.msk.f32.mxu1 %vm14289_vm2, %v18626_v34 }
 0x263   : > { %v2627_v60 = vpop.f32.mrf.mxu0 }
 0x264   : > { %v15307_v63 = vadd.f32 %v13029_v23, %v2627_v60  ;;  %v15446_v60 = vrot.slane %v2907_v12, %v14415_v7 }
 0x265   : > { %v13529_v41 = vpop.f32.mrf.mxu0 }
 0x266   : > { %2747 = vrot.lane.b32.xlu1 %v15307_v63, %s14290_s25  ;;  %13551 = vmatmul.mubr.msk.f32.gmra.mxu1 %vm1273_vm0, %v15307_v63  ;;  %18660 = vst [vmem:[#allocation11_spill] sm:$0xff] %v15446_v60  ;;  %v15449_v41 = vrot.slane %v3487_v25, %v14415_v7 }
 0x267   : > { %13553 = vmatprep.mubr.msk.f32.mxu1 %vm14289_vm2, %v18626_v34 }
 0x268   : > { %18661 = vst [vmem:[#allocation12_spill] sm:$0xff] %v15449_v41  ;;  %v15477_v35 = vcombine.high %v15449_v41, %v15449_v41 }
 0x269   : > { %v2632_v56 = vpop.f32.mrf.mxu0 }
 0x26a   : > { %v15319_v14 = vadd.f32 %v13029_v23, %v2632_v56  ;;  %3624 = vrot.lane.b32.xlu1 %v15317_v52, %s14291_s27  ;;  %v15429_v23 = vcombine.high %v15407_v4, %v15407_v4  ;;  %v15452_v56 = vrot.slane %v3494_v33, %v14415_v7  ;;  %18666 = vst [vmem:[#allocation25_spill] sm:$0xff] %v15477_v35 }
 0x26b   : > { %v13532_v6 = vpop.f32.mrf.mxu0  ;;  %v15494_v33 = vrot.slane %v2916_v36, %v14415_v7 }
 0x26c   : > { %2749 = vrot.lane.b32.xlu0 %v15319_v14, %s14290_s25  ;;  %13554 = vmatmul.mubr.msk.f32.gmra.mxu1 %vm1273_vm0, %v15319_v14  ;;  %18659 = vst [vmem:[#allocation22_spill] sm:$0xff] %v15429_v23  ;;  %18662 = vst [vmem:[#allocation13_spill] sm:$0xff] %v15452_v56  ;;  %v3188_v6 = vmul.f32 %v15369_v31, %v15429_v23  ;;  %v15481_v22 = vcombine.high %v15452_v56, %v15452_v56 }
 0x26d   : > { %18669 = vst [vmem:[#allocation28_spill] sm:$0xff] %v15494_v33 }
 0x26e   : > { %3628 = vrot.lane.b32.xlu1 %v15329_v20, %s14291_s27  ;;  %18667 = vst [vmem:[#allocation26_spill] sm:$0xff] %v15481_v22 }
 0x270   : > { %3626 = vrot.lane.b32.xlu0 %v15333_v43, %s14291_s27 }
 0x272   : > { %3632 = vrot.lane.b32.xlu1 %v15340_v11, %s14291_s27 }
 0x274   : > { %3630 = vrot.lane.b32.xlu0 %v15344_v32, %s14291_s27 }
 0x276   : > { %3636 = vrot.lane.b32.xlu1 %v15352_v8, %s14291_s27 }
 0x278   : > { %3634 = vrot.lane.b32.xlu0 %v15355_v47, %s14291_s27 }
 0x27a   : > { %3640 = vrot.lane.b32.xlu1 %v15365_v39, %s14291_s27 }
 0x27c   : > { %3638 = vrot.lane.b32.xlu0 %v15369_v31, %s14291_s27 }
 0x2b3   : > { %v2742_v51 = vpop.permute.xlu0 %2741 }
 0x2b4   : > { %13565 = vmatmul.mubr.msk.f32.vlgmr.msra.gmra.mxu0 %vm1273_vm0, %v2742_v51  ;;  %v15464_v51 = vrot.slane %v2915_v19, %v14415_v7 }
 0x2b5   : > { %13567 = vmatprep.mubr.msk.f32.mxu0 %vm14289_vm2, %v18626_v34 }
 0x2b6   : > { %18664 = vst [vmem:[#allocation23_spill] sm:$0xff] %v15464_v51  ;;  %v15508_v36 = vmul.f32 %v15317_v52, %v15464_v51 }
 0x2c9   : > { %v2744_v50 = vpop.permute.xlu1 %2743 }
 0x2ca   : > { %13568 = vmatmul.mubr.msk.f32.gmra.mxu0 %vm1273_vm0, %v2744_v50  ;;  %v2949_v50 = vcombine.high %v15296_v27, %v15296_v27 }
 0x2cb   : > { %13570 = vmatprep.mubr.msk.f32.mxu0 %vm14289_vm2, %v18626_v34 }
 0x2cc   : > { %v2963_v18 = vrot.slane %v2949_v50, %v14415_v7  ;;  %v15512_v50 = vmul.f32 %v15344_v32, %v15461_v30 }
 0x2cd   : > { %v2746_v13 = vpop.permute.xlu1 %2745 }
 0x2ce   : > { %13571 = vmatmul.mubr.msk.f32.gmra.mxu0 %vm1273_vm0, %v2746_v13  ;;  %v15469_v13 = vrot.slane %v3496_v10, %v14415_v7  ;;  %v2965_v39 = vcombine.high %v2963_v18, %v2963_v18 }
 0x2cf   : > { %13573 = vmatprep.mubr.msk.f32.mxu0 %vm14289_vm2, %v18626_v34 }
 0x2d0   : > { %18665 = vst [vmem:[#allocation24_spill] sm:$0xff] %v15469_v13  ;;  %v15499_v57 = vcombine.high %v15469_v13, %v15469_v13 }
 0x2d2   : > { %18670 = vst [vmem:[#allocation29_spill] sm:$0xff] %v15499_v57 }
 0x2d8   : > { %v2748_v54 = vpop.permute.xlu1 %2747 }
 0x2d9   : > { %13574 = vmatmul.mubr.msk.f32.gmra.mxu0 %vm1273_vm0, %v2748_v54 }
 0x2da   : > { %13576 = vmatprep.mubr.msk.f32.mxu0 %vm14289_vm2, %v18626_v34 }
 0x2de   : > { %v2750_v37 = vpop.permute.xlu0 %2749 }
 0x2df   : > { %13577 = vmatmul.mubr.msk.f32.gmra.mxu0 %vm1273_vm0, %v2750_v37  ;;  %v2956_v37 = vrot.slane %v15296_v27, %v14415_v7  ;;  %v15489_v27 = vcombine.high %v15446_v60, %v15446_v60  ;;  %v2998_v60 = vcombine.high %v15307_v63, %v15307_v63 }
 0x301   : > { %v2717_v0 = vpop.f32.mrf.mxu0 }
 0x302   : > { %v3222_v29 = vcombine.high %v2717_v0, %v2717_v0  ;;  %v3229_v48 = vrot.slane %v2717_v0, %v14415_v7 }
 0x303   : > { %v13543_v54 = vpop.f32.mrf.mxu0 }
 0x304   : > { %v3236_v38 = vrot.slane %v3222_v29, %v14415_v7  ;;  %v3237_v5 = vcombine.high %v3229_v48, %v3229_v48  ;;  %v3245_v42 = vrot.slane %v3229_v48, %v14415_v7 }
 0x306   : > { %v3238_v28 = vcombine.high %v3236_v38, %v3236_v38  ;;  %v3252_v25 = vrot.slane %v3236_v38, %v14415_v7  ;;  %v3259_v44 = vrot.slane %v3237_v5, %v14415_v7  ;;  %v3267_v12 = vcombine.high %v3245_v42, %v3245_v42 }
 0x307   : > { %v3552_v19 = vmul.f32 %v15449_v41, %v3245_v42 }
 0x308   : > { %v3266_v10 = vrot.slane %v3238_v28, %v14415_v7  ;;  %v3268_v0 = vcombine.high %v3252_v25, %v3252_v25  ;;  %v3269_v29 = vcombine.high %v3259_v44, %v3259_v44  ;;  %v3553_v48 = vmul.f32 %v15455_v24, %v3259_v44 }
 0x309   : > { %v3554_v54 = vmul.f32 %v15477_v35, %v3267_v12  ;;  %v3556_v38 = vmul.f32 %v15452_v56, %v3252_v25  ;;  %v2964_v44 = vcombine.high %v2956_v37, %v2956_v37  ;;  %v3588_v26 = vadd.f32 %v3552_v19, %v3181_v17 }
 0x30a   : > { %v3270_v5 = vcombine.high %v3266_v10, %v3266_v10  ;;  %v3555_v42 = vmul.f32 %v15485_v45, %v3269_v29  ;;  %v3557_v28 = vmul.f32 %v15469_v13, %v3266_v10  ;;  %v3558_v9 = vmul.f32 %v15481_v22, %v3268_v0 }
 0x30b   : > { %v3589_v12 = vadd.f32 %v3553_v48, %v3182_v2  ;;  %v3590_v40 = vadd.f32 %v3554_v54, %v3183_v49  ;;  %v3592_v21 = vadd.f32 %v3556_v38, %v3185_v58  ;;  %v3005_v29 = vrot.slane %v15307_v63, %v14415_v7 }
 0x30c   : > { %v3559_v25 = vmul.f32 %v15499_v57, %v3270_v5  ;;  %v3591_v55 = vadd.f32 %v3555_v42, %v3184_v61  ;;  %v3593_v34 = vadd.f32 %v3557_v28, %v3186_v15  ;;  %v3594_v10 = vadd.f32 %v3558_v9, %v3187_v16 }
 0x30d   : > { %v4173_v23 = vcombine.low %v3588_v26, %v3589_v12  ;;  %v15523_v17 = vrot.slane %v2956_v37, %v14415_v7  ;;  %v15526_v2 = vrot.slane %v2963_v18, %v14415_v7  ;;  %v15530_v49 = vcombine.high %v15464_v51, %v15464_v51 }
 0x30e   : > { %v3595_v3 = vadd.f32 %v3559_v25, %v3188_v6  ;;  %v4174_v0 = vcombine.low %v3590_v40, %v3591_v55  ;;  %v4175_v46 = vcombine.low %v3592_v21, %v3593_v34  ;;  %v15534_v61 = vcombine.high %v15461_v30, %v15461_v30 }
 0x30f   : > { %18671 = vst [vmem:[#allocation30_spill] sm:$0xff] %v15523_v17  ;;  %18672 = vst [vmem:[#allocation31_spill] sm:$0xff] %v15526_v2  ;;  %v15537_v26 = vrot.slane %v2964_v44, %v14415_v7  ;;  %v4183_v21 = vrot.slane %v4173_v23, %v14415_v7  ;;  %v15542_v55 = vrot.slane %v2965_v39, %v14415_v7 }
 0x310   : > { %18673 = vst [vmem:[#allocation32_spill] sm:$0xff] %v15534_v61  ;;  %v4176_v9 = vcombine.low %v3594_v10, %v3595_v3  ;;  %v4190_v34 = vrot.slane %v4174_v0, %v14415_v7  ;;  %v3013_v40 = vcombine.high %v3005_v29, %v3005_v29  ;;  %v15546_v63 = vmul.f32 %v15333_v43, %v15489_v27 }
 0x311   : > { %18674 = vst [vmem:[#allocation33_spill] sm:$0xff] %v15537_v26  ;;  %18675 = vst [vmem:[#allocation34_spill] sm:$0xff] %v15542_v55  ;;  %v15550_v58 = vcombine.high %v15494_v33, %v15494_v33  ;;  %v3012_v15 = vrot.slane %v2998_v60, %v14415_v7  ;;  %v4197_v3 = vrot.slane %v4175_v46, %v14415_v7 }
 0x312   : > { %v4204_v23 = vrot.slane %v4176_v9, %v14415_v7  ;;  %v4205_v16 = vcombine.low %v4183_v21, %v4190_v34  ;;  %v15557_v39 = vmul.f32 %v15340_v11, %v15494_v33  ;;  %v15561_v6 = vmul.f32 %v15369_v31, %v15523_v17 }
 0x313   : > { %18676 = vst [vmem:[#allocation35_spill] sm:$0xff] %v15550_v58  ;;  %v15565_v37 = vmul.f32 %v15329_v20, %v15526_v2  ;;  %v15569_v60 = vmul.f32 %v15329_v20, %v15530_v49  ;;  %v15573_v18 = vmul.f32 %v15355_v47, %v15534_v61  ;;  %v15577_v19 = vcombine.high %v15523_v17, %v15523_v17 }
 0x314   : > { %v4206_v46 = vcombine.low %v4197_v3, %v4204_v23  ;;  %v15581_v48 = vcombine.high %v15537_v26, %v15537_v26  ;;  %v15584_v54 = vrot.slane %v3013_v40, %v14415_v7  ;;  %v15588_v38 = vmul.f32 %v15352_v8, %v15550_v58 }
 0x315   : > { %18677 = vst [vmem:[#allocation36_spill] sm:$0xff] %v15577_v19  ;;  %v15592_v5 = vcombine.high %v15526_v2, %v15526_v2  ;;  %v15596_v42 = vcombine.high %v15542_v55, %v15542_v55  ;;  %v3014_v28 = vcombine.high %v3012_v15, %v3012_v15  ;;  %v15599_v44 = vrot.slane %v3012_v15, %v14415_v7 }
 0x316   : > { %18678 = vst [vmem:[#allocation37_spill] sm:$0xff] %v15581_v48  ;;  %18679 = vst [vmem:[#allocation38_spill] sm:$0xff] %v15584_v54  ;;  %v4213_v25 = vrot.slane %v4205_v16, %v14415_v7  ;;  %v4220_v10 = vrot.slane %v4206_v46, %v14415_v7  ;;  %v3053_v0 = vrot.slane %v15319_v14, %v14415_v7 }
 0x317   : > { %18680 = vst [vmem:[#allocation39_spill] sm:$0xff] %v15592_v5  ;;  %18681 = vst [vmem:[#allocation40_spill] sm:$0xff] %v15596_v42  ;;  %v2722_v12 = vpop.f32.mrf.mxu0  ;;  %v15608_v40 = vmul.f32 %v15344_v32, %v15542_v55  ;;  %v15614_v15 = vmul.f32 %v15317_v52, %v15577_v19  ;;  %v15618_v23 = vmul.f32 %v15333_v43, %v15581_v48 }
 0x318   : > { %18682 = vst [vmem:[#allocation41_spill] sm:$0xff] %v15599_v44  ;;  %v3271_v9 = vcombine.high %v2722_v12, %v2722_v12  ;;  %v3278_v21 = vrot.slane %v2722_v12, %v14415_v7  ;;  %v15610_v3 = vcombine.low %v4213_v25, %v4220_v10  ;;  %v15621_v14 = vrot.slane %v3005_v29, %v14415_v7 }
 0x319   : > { %v13546_v34 = vpop.f32.mrf.mxu0  ;;  %v15626_v12 = vcombine.high %v15584_v54, %v15584_v54  ;;  %v15629_v25 = vrot.slane %v3014_v28, %v14415_v7  ;;  %v15633_v10 = vcombine.high %v15599_v44, %v15599_v44  ;;  %v15639_v29 = vmul.f32 %v15340_v11, %v15592_v5 }
 0x31a   : > { %18683 = vst [vmem:[#allocation42_spill] sm:$0xff] %v15610_v3  ;;  %18684 = vst [vmem:[#allocation43_spill] sm:$0xff] %v15621_v14  ;;  %v3285_v16 = vrot.slane %v3271_v9, %v14415_v7  ;;  %v3286_v46 = vcombine.high %v3278_v21, %v3278_v21  ;;  %13583 = vmatprep.mubr.msk.f32.mxu1 %vm4312_vm3, %v15610_v3  ;;  %v15643_v9 = vmul.f32 %v15355_v47, %v15596_v42 }
 0x31b   : > { %18685 = vst [vmem:[#allocation44_spill] sm:$0xff] %v15626_v12  ;;  %18686 = vst [vmem:[#allocation45_spill] sm:$0xff] %v15629_v25  ;;  %v3054_v34 = vcombine.high %v3053_v0, %v3053_v0  ;;  %v15646_v19 = vrot.slane %v3053_v0, %v14415_v7  ;;  %v15649_v2 = vrot.slane %v3278_v21, %v14415_v7  ;;  %v2727_v48 = vpop.f32.mrf.mxu1 }
 0x31c   : > { %18687 = vst [vmem:[#allocation46_spill] sm:$0xff] %v15633_v10  ;;  %v3287_v28 = vcombine.high %v3285_v16, %v3285_v16  ;;  %v3301_v55 = vrot.slane %v3285_v16, %v14415_v7  ;;  %v3308_v3 = vrot.slane %v3286_v46, %v14415_v7  ;;  %v3320_v26 = vcombine.high %v2727_v48, %v2727_v48 }
 0x31d   : > { %18688 = vst [vmem:[#allocation47_spill] sm:$0xff] %v15646_v19  ;;  %18689 = vst [vmem:[#allocation48_spill] sm:$0xff] %v15649_v2  ;;  %v3327_v5 = vrot.slane %v2727_v48, %v14415_v7  ;;  %v13549_v17 = vpop.f32.mrf.mxu1  ;;  %v15656_v42 = vmul.f32 %v15352_v8, %v15621_v14  ;;  %v15660_v0 = vmul.f32 %v15369_v31, %v15584_v54 }
 0x31e   : > { %v15664_v21 = vmul.f32 %v15317_v52, %v15626_v12  ;;  %v15668_v16 = vmul.f32 %v15333_v43, %v15599_v44  ;;  %v3315_v46 = vrot.slane %v3287_v28, %v14415_v7  ;;  %v3334_v17 = vrot.slane %v3320_v26, %v14415_v7 }
 0x31f   : > { %v15674_v48 = vmul.f32 %v15329_v20, %v15629_v25  ;;  %v15678_v54 = vcombine.high %v15629_v25, %v15629_v25  ;;  %v15681_v14 = vrot.slane %v3054_v34, %v14415_v7  ;;  %v3316_v52 = vcombine.high %v15649_v2, %v15649_v2 }
 0x320   : > { %v15687_v43 = vmul.f32 %v15344_v32, %v15633_v10  ;;  %v15691_v26 = vcombine.high %v15646_v19, %v15646_v19  ;;  %v3317_v28 = vcombine.high %v3301_v55, %v3301_v55  ;;  %v3318_v20 = vcombine.high %v3308_v3, %v3308_v3 }
 0x321   : > { %18690 = vst [vmem:[#allocation49_spill] sm:$0xff] %v15678_v54  ;;  %18691 = vst [vmem:[#allocation50_spill] sm:$0xff] %v15681_v14  ;;  %v3335_v12 = vcombine.high %v3327_v5, %v3327_v5  ;;  %v15695_v25 = vmul.f32 %v15355_v47, %v15646_v19  ;;  %v3561_v34 = vmul.f32 %v15449_v41, %v3308_v3 }
 0x322   : > { %18692 = vst [vmem:[#allocation51_spill] sm:$0xff] %v15691_v26  ;;  %v3564_v44 = vmul.f32 %v15485_v45, %v3301_v55  ;;  %v3336_v2 = vcombine.high %v3334_v17, %v3334_v17  ;;  %v3343_v58 = vrot.slane %v3327_v5, %v14415_v7  ;;  %v3319_v32 = vcombine.high %v3315_v46, %v3315_v46 }
 0x323   : > { %v3350_v10 = vrot.slane %v3334_v17, %v14415_v7  ;;  %v15702_v33 = vrot.slane %v3335_v12, %v14415_v7  ;;  %v15706_v61 = vmul.f32 %v15340_v11, %v15678_v54  ;;  %v3562_v47 = vmul.f32 %v15455_v24, %v3316_v52 }
 0x324   : > { %v3565_v19 = vmul.f32 %v15452_v56, %v3315_v46  ;;  %v3364_v3 = vrot.slane %v3336_v2, %v14415_v7  ;;  %v15713_v55 = vmul.f32 %v15352_v8, %v15681_v14  ;;  %v3563_v5 = vmul.f32 %v15477_v35, %v3318_v20 }
 0x325   : > { %18693 = vst [vmem:[#allocation52_spill] sm:$0xff] %v15702_v33  ;;  %v3365_v17 = vcombine.high %v3343_v58, %v3343_v58  ;;  %v3367_v12 = vcombine.high %v15702_v33, %v15702_v33  ;;  %v15720_v11 = vmul.f32 %v15369_v31, %v15691_v26  ;;  %v3566_v52 = vmul.f32 %v15469_v13, %v3317_v28 }
 0x326   : > { %v15724_v46 = vadd.f32 %v3561_v34, %v15508_v36  ;;  %v15727_v2 = vadd.f32 %v3564_v44, %v15512_v50  ;;  %v3568_v8 = vmul.f32 %v15499_v57, %v3343_v58  ;;  %v2732_v14 = vpop.f32.mrf.mxu1  ;;  %v3567_v20 = vmul.f32 %v15481_v22, %v3319_v32 }
 0x327   : > { %v3366_v54 = vcombine.high %v3350_v10, %v3350_v10  ;;  %v3572_v33 = vmul.f32 %v15477_v35, %v3350_v10  ;;  %v3573_v51 = vmul.f32 %v15485_v45, %v3364_v3  ;;  %v15734_v31 = vadd.f32 %v3565_v19, %v15557_v39 }
 0x328   : > { %v3369_v28 = vcombine.high %v2732_v14, %v2732_v14  ;;  %v3376_v36 = vrot.slane %v2732_v14, %v14415_v7  ;;  %v13552_v34 = vpop.f32.mrf.mxu1  ;;  %v15738_v50 = vadd.f32 %v3562_v47, %v15546_v63  ;;  %v3368_v44 = vcombine.high %v3364_v3, %v3364_v3 }
 0x329   : > { %v3570_v58 = vmul.f32 %v15449_v41, %v3365_v17  ;;  %v3571_v32 = vmul.f32 %v15455_v24, %v3367_v12  ;;  %v15743_v26 = vadd.f32 %v3563_v5, %v15569_v60  ;;  %v15746_v10 = vadd.f32 %v3568_v8, %v15561_v6 }
 0x32a   : > { %v3383_v39 = vrot.slane %v3369_v28, %v14415_v7  ;;  %v3384_v19 = vcombine.high %v3376_v36, %v3376_v36  ;;  %v15750_v14 = vrot.slane %v3376_v36, %v14415_v7  ;;  %v3574_v47 = vmul.f32 %v15452_v56, %v3366_v54 }
 0x32b   : > { %v15754_v63 = vadd.f32 %v3572_v33, %v15565_v37  ;;  %v15757_v3 = vadd.f32 %v3573_v51, %v15608_v40  ;;  %v3602_v60 = vadd.f32 %v3566_v52, %v15573_v18  ;;  %v3603_v12 = vadd.f32 %v3567_v20, %v15588_v38 }
 0x32c   : > { %v2737_v17 = vpop.f32.mrf.mxu1  ;;  %v3385_v5 = vcombine.high %v3383_v39, %v3383_v39  ;;  %v3399_v8 = vrot.slane %v3383_v39, %v14415_v7  ;;  %v3406_v6 = vrot.slane %v3384_v19, %v14415_v7  ;;  %v3576_v28 = vmul.f32 %v15481_v22, %v15750_v14 }
 0x32d   : > { %v3424_v54 = vrot.slane %v2737_v17, %v14415_v7  ;;  %v3606_v37 = vadd.f32 %v3570_v58, %v15614_v15  ;;  %v3607_v51 = vadd.f32 %v3571_v32, %v15618_v23  ;;  %v3575_v39 = vmul.f32 %v15469_v13, %v3368_v44 }
 0x32e   : > { %v13555_v33 = vpop.f32.mrf.mxu1  ;;  %v3413_v40 = vrot.slane %v3385_v5, %v14415_v7  ;;  %v3415_v18 = vcombine.high %v3399_v8, %v3399_v8  ;;  %v3416_v52 = vcombine.high %v3406_v6, %v3406_v6  ;;  %v3577_v36 = vmul.f32 %v15499_v57, %v3406_v6 }
 0x32f   : > { %v3580_v34 = vmul.f32 %v15455_v24, %v3399_v8  ;;  %v3612_v38 = vadd.f32 %v3576_v28, %v15656_v42  ;;  %v3425_v20 = vcombine.high %v3424_v54, %v3424_v54  ;;  %v3432_v5 = vrot.slane %v3424_v54, %v14415_v7 }
 0x330   : > { %v3417_v19 = vcombine.high %v3413_v40, %v3413_v40  ;;  %v3579_v17 = vmul.f32 %v15449_v41, %v3416_v52  ;;  %v3581_v15 = vmul.f32 %v15477_v35, %v3413_v40  ;;  %v3582_v23 = vmul.f32 %v15485_v45, %v3415_v18 }
 0x331   : > { %v3613_v58 = vadd.f32 %v3577_v36, %v15660_v0  ;;  %v3616_v32 = vadd.f32 %v3580_v34, %v15668_v16  ;;  %v15780_v8 = vrot.slane %v3425_v20, %v14415_v7  ;;  %v3440_v40 = vcombine.high %v3432_v5, %v3432_v5 }
 0x332   : > { %v3583_v42 = vmul.f32 %v15452_v56, %v3417_v19  ;;  %v3615_v44 = vadd.f32 %v3579_v17, %v15664_v21  ;;  %v3617_v6 = vadd.f32 %v3581_v15, %v15674_v48  ;;  %v3618_v28 = vadd.f32 %v3582_v23, %v15687_v43 }
 0x333   : > { %v4639_v33 = vcombine.low %v3612_v38, %v3613_v58  ;;  %v3584_v18 = vmul.f32 %v15469_v13, %v3432_v5  ;;  %v3611_v0 = vadd.f32 %v3575_v39, %v15643_v9  ;;  %v3585_v54 = vmul.f32 %v15481_v22, %v15780_v8 }
 0x334   : > { %v4867_v16 = vcombine.low %v3615_v44, %v3616_v32  ;;  %v4868_v52 = vcombine.low %v3617_v6, %v3618_v28  ;;  %v3619_v36 = vadd.f32 %v3583_v42, %v15706_v61  ;;  %v3586_v34 = vmul.f32 %v15499_v57, %v3440_v40 }
 0x335   : > { %v3620_v21 = vadd.f32 %v3584_v18, %v15695_v25  ;;  %v4405_v43 = vcombine.low %v15724_v46, %v15738_v50  ;;  %v4406_v48 = vcombine.low %v15743_v26, %v15727_v2  ;;  %v3621_v38 = vadd.f32 %v3585_v54, %v15713_v55 }
 0x336   : > { %v4877_v9 = vrot.slane %v4867_v16, %v14415_v7  ;;  %v4884_v20 = vrot.slane %v4868_v52, %v14415_v7  ;;  %v3610_v39 = vadd.f32 %v3574_v47, %v15639_v29  ;;  %v4637_v61 = vcombine.low %v15754_v63, %v15757_v3 }
 0x337   : > { %v3622_v19 = vadd.f32 %v3586_v34, %v15720_v11  ;;  %v4869_v25 = vcombine.low %v3619_v36, %v3620_v21  ;;  %v4636_v17 = vcombine.low %v3606_v37, %v3607_v51  ;;  %v4407_v46 = vcombine.low %v15734_v31, %v3602_v60 }
 0x338   : > { %v4638_v15 = vcombine.low %v3610_v39, %v3611_v0  ;;  %v4408_v26 = vcombine.low %v3603_v12, %v15746_v10  ;;  %v4415_v50 = vrot.slane %v4405_v43, %v14415_v7  ;;  %v4422_v23 = vrot.slane %v4406_v48, %v14415_v7 }
 0x339   : > { %v4870_v2 = vcombine.low %v3621_v38, %v3622_v19  ;;  %v4891_v55 = vrot.slane %v4869_v25, %v14415_v7  ;;  %v4667_v29 = vrot.slane %v4639_v33, %v14415_v7  ;;  %v4899_v47 = vcombine.low %v4877_v9, %v4884_v20 }
 0x33a   : > { %v4429_v63 = vrot.slane %v4407_v46, %v14415_v7  ;;  %v4436_v11 = vrot.slane %v4408_v26, %v14415_v7  ;;  %v4437_v37 = vcombine.low %v4415_v50, %v4422_v23  ;;  %v4646_v31 = vrot.slane %v4636_v17, %v14415_v7 }
 0x33b   : > { %v4898_v3 = vrot.slane %v4870_v2, %v14415_v7  ;;  %v4653_v10 = vrot.slane %v4637_v61, %v14415_v7  ;;  %v4660_v12 = vrot.slane %v4638_v15, %v14415_v7  ;;  %v4907_v44 = vrot.slane %v4899_v47, %v14415_v7  ;;  %v13046_v47 = vld.sshfl [vmem:[%s18401_s17 + $0x8] sm:$0x1 pattern:$0x75316420] }
 0x33c   : > { %v4438_v60 = vcombine.low %v4429_v63, %v4436_v11  ;;  %v4445_v32 = vrot.slane %v4437_v37, %v14415_v7 }
 0x33d   : > { %v4900_v51 = vcombine.low %v4891_v55, %v4898_v3  ;;  %v4668_v58 = vcombine.low %v4646_v31, %v4653_v10  ;;  %v4669_v42 = vcombine.low %v4660_v12, %v4667_v29 }
 0x33e   : > { %v4452_v5 = vrot.slane %v4438_v60, %v14415_v7  ;;  %v15859_v60 = vrot.slane %v13046_v47, %v14415_v7 }
 0x33f   : > { %v4914_v6 = vrot.slane %v4900_v51, %v14415_v7  ;;  %v4676_v33 = vrot.slane %v4668_v58, %v14415_v7  ;;  %v4683_v40 = vrot.slane %v4669_v42, %v14415_v7 }
 0x340   : > { %v15820_v28 = vcombine.low %v4445_v32, %v4452_v5  ;;  %18695 = vst [vmem:[#allocation54_spill] sm:$0xff] %v15859_v60 }
 0x341   : > { %v15824_v18 = vcombine.low %v4907_v44, %v4914_v6  ;;  %v15826_v0 = vcombine.low %v4676_v33, %v4683_v40 }
 0x343   : > { %18694 = vst [vmem:[#allocation53_spill] sm:$0xff] %v15824_v18  ;;  %13604 = vmatprep.mubr.msk.f32.mxu0 %vm4312_vm3, %v15824_v18 }
 0x374   : > { %v2827_v16 = vpop.f32.mrf.mxu0 }
 0x375   : > { %v3692_v52 = vcombine.high %v2827_v16, %v2827_v16  ;;  %v3699_v54 = vrot.slane %v2827_v16, %v14415_v7 }
 0x376   : > { %v13566_v36 = vpop.f32.mrf.mxu0 }
 0x377   : > { %v3706_v34 = vrot.slane %v3692_v52, %v14415_v7  ;;  %v3707_v21 = vcombine.high %v3699_v54, %v3699_v54  ;;  %v3715_v43 = vrot.slane %v3699_v54, %v14415_v7 }
 0x379   : > { %v3729_v48 = vrot.slane %v3707_v21, %v14415_v7  ;;  %v3737_v38 = vcombine.high %v3715_v43, %v3715_v43  ;;  %v3948_v9 = vmul.f32 %v3715_v43, %v15449_v41  ;;  %v3708_v20 = vcombine.high %v3706_v34, %v3706_v34 }
 0x37a   : > { %v3722_v19 = vrot.slane %v3706_v34, %v14415_v7 }
 0x37b   : > { %v3949_v39 = vmul.f32 %v3729_v48, %v15455_v24  ;;  %v3739_v61 = vcombine.high %v3729_v48, %v3729_v48  ;;  %4020 = vrot.lane.b32.xlu0 %v3948_v9, %s14291_s27  ;;  %v3950_v25 = vmul.f32 %v3737_v38, %v15477_v35  ;;  %v3736_v15 = vrot.slane %v3708_v20, %v14415_v7 }
 0x37c   : > { %v3952_v46 = vmul.f32 %v3722_v19, %v15452_v56  ;;  %v3738_v26 = vcombine.high %v3722_v19, %v3722_v19 }
 0x37d   : > { %4022 = vrot.lane.b32.xlu1 %v3949_v39, %s14291_s27  ;;  %v3951_v17 = vmul.f32 %v3739_v61, %v15485_v45  ;;  %v3953_v2 = vmul.f32 %v3736_v15, %v15469_v13  ;;  %v3740_v55 = vcombine.high %v3736_v15, %v3736_v15 }
 0x37e   : > { %v3954_v50 = vmul.f32 %v3738_v26, %v15481_v22 }
 0x37f   : > { %4024 = vrot.lane.b32.xlu0 %v3950_v25, %s14291_s27  ;;  %v3955_v23 = vmul.f32 %v3740_v55, %v15499_v57 }
 0x381   : > { %4026 = vrot.lane.b32.xlu1 %v3951_v17, %s14291_s27 }
 0x383   : > { %4028 = vrot.lane.b32.xlu0 %v3952_v46, %s14291_s27 }
 0x385   : > { %4030 = vrot.lane.b32.xlu1 %v3953_v2, %s14291_s27 }
 0x387   : > { %4032 = vrot.lane.b32.xlu0 %v3954_v50, %s14291_s27 }
 0x389   : > { %4034 = vrot.lane.b32.xlu1 %v3955_v23, %s14291_s27 }
 0x38a   : > { %v2832_v29 = vpop.f32.mrf.mxu0 }
 0x38b   : > { %v3741_v63 = vcombine.high %v2832_v29, %v2832_v29  ;;  %v3748_v11 = vrot.slane %v2832_v29, %v14415_v7 }
 0x38c   : > { %v13569_v3 = vpop.f32.mrf.mxu0 }
 0x38d   : > { %v3755_v37 = vrot.slane %v3741_v63, %v14415_v7  ;;  %v3756_v31 = vcombine.high %v3748_v11, %v3748_v11  ;;  %v3764_v10 = vrot.slane %v3748_v11, %v14415_v7 }
 0x38e   : > { %v2837_v12 = vpop.f32.mrf.mxu0 }
 0x38f   : > { %v3778_v51 = vrot.slane %v3756_v31, %v14415_v7  ;;  %v3786_v58 = vcombine.high %v3764_v10, %v3764_v10  ;;  %v3956_v5 = vmul.f32 %v3764_v10, %v15859_v60  ;;  %v3757_v42 = vcombine.high %v3755_v37, %v3755_v37 }
 0x390   : > { %v13572_v32 = vpop.f32.mrf.mxu0  ;;  %v3771_v33 = vrot.slane %v3755_v37, %v14415_v7  ;;  %v3797_v16 = vrot.slane %v2837_v12, %v14415_v7  ;;  %v3790_v21 = vcombine.high %v2837_v12, %v2837_v12 }
 0x391   : > { %v3957_v44 = vmul.f32 %v3778_v51, %v15449_v41  ;;  %v3788_v6 = vcombine.high %v3778_v51, %v3778_v51  ;;  %4036 = vrot.lane.b32.xlu0 %v3956_v5, %s14291_s27  ;;  %v3958_v40 = vmul.f32 %v3786_v58, %v15455_v24  ;;  %v3785_v54 = vrot.slane %v3757_v42, %v14415_v7 }
 0x392   : > { %v3960_v36 = vmul.f32 %v3771_v33, %v15485_v45  ;;  %v3787_v34 = vcombine.high %v3771_v33, %v3771_v33  ;;  %v3805_v43 = vcombine.high %v3797_v16, %v3797_v16  ;;  %v3813_v39 = vrot.slane %v3797_v16, %v14415_v7 }
 0x393   : > { %4038 = vrot.lane.b32.xlu1 %v3957_v44, %s14291_s27  ;;  %v3959_v52 = vmul.f32 %v3788_v6, %v15477_v35  ;;  %v3961_v38 = vmul.f32 %v3785_v54, %v15452_v56  ;;  %v3789_v9 = vcombine.high %v3785_v54, %v3785_v54  ;;  %v3804_v19 = vrot.slane %v3790_v21, %v14415_v7 }
 0x394   : > { %v3962_v61 = vmul.f32 %v3787_v34, %v15469_v13  ;;  %v3827_v25 = vrot.slane %v3805_v43, %v14415_v7  ;;  %v3835_v46 = vcombine.high %v3813_v39, %v3813_v39  ;;  %v3964_v2 = vmul.f32 %v3813_v39, %v15499_v57 }
 0x395   : > { %4040 = vrot.lane.b32.xlu0 %v3958_v40, %s14291_s27  ;;  %v3963_v17 = vmul.f32 %v3789_v9, %v15481_v22  ;;  %v3806_v55 = vcombine.high %v3804_v19, %v3804_v19  ;;  %v3820_v29 = vrot.slane %v3804_v19, %v14415_v7 }
 0x396   : > { %v3965_v50 = vmul.f32 %v3827_v25, %v15859_v60  ;;  %v3837_v23 = vcombine.high %v3827_v25, %v3827_v25  ;;  %v3966_v47 = vmul.f32 %v3835_v46, %v15449_v41 }
 0x397   : > { %4042 = vrot.lane.b32.xlu1 %v3959_v52, %s14291_s27  ;;  %v3834_v3 = vrot.slane %v3806_v55, %v14415_v7  ;;  %v3968_v37 = vmul.f32 %v3820_v29, %v15477_v35  ;;  %v3836_v31 = vcombine.high %v3820_v29, %v3820_v29  ;;  %v15935_v29 = vpop.permute.xlu1 %3624 }
 0x398   : > { %v3967_v11 = vmul.f32 %v3837_v23, %v15455_v24  ;;  %18696 = vst [vmem:[#allocation55_spill] sm:$0xff] %v15935_v29 }
 0x399   : > { %v2842_v48 = vpop.f32.mrf.mxu0  ;;  %4044 = vrot.lane.b32.xlu0 %v3960_v36, %s14291_s27  ;;  %v3969_v51 = vmul.f32 %v3834_v3, %v15485_v45  ;;  %v3838_v58 = vcombine.high %v3834_v3, %v3834_v3  ;;  %v3970_v5 = vmul.f32 %v3836_v31, %v15452_v56 }
 0x39a   : > { %v3846_v63 = vrot.slane %v2842_v48, %v14415_v7  ;;  %v3839_v10 = vcombine.high %v2842_v48, %v2842_v48 }
 0x39b   : > { %v13575_v20 = vpop.f32.mrf.mxu0  ;;  %4046 = vrot.lane.b32.xlu1 %v3961_v38, %s14291_s27  ;;  %v3971_v6 = vmul.f32 %v3838_v58, %v15469_v13 }
 0x39c   : > { %v3854_v12 = vcombine.high %v3846_v63, %v3846_v63  ;;  %v3862_v32 = vrot.slane %v3846_v63, %v14415_v7  ;;  %v3853_v42 = vrot.slane %v3839_v10, %v14415_v7  ;;  %v15939_v63 = vpop.permute.xlu1 %3628 }
 0x39d   : > { %4048 = vrot.lane.b32.xlu0 %v3962_v61, %s14291_s27  ;;  %18698 = vst [vmem:[#allocation57_spill] sm:$0xff] %v15939_v63 }
 0x39e   : > { %v3876_v44 = vrot.slane %v3854_v12, %v14415_v7  ;;  %v3884_v33 = vcombine.high %v3862_v32, %v3862_v32  ;;  %v3972_v40 = vmul.f32 %v3862_v32, %v15481_v22  ;;  %v3855_v16 = vcombine.high %v3853_v42, %v3853_v42 }
 0x39f   : > { %v2847_v15 = vpop.f32.mrf.mxu0  ;;  %4050 = vrot.lane.b32.xlu1 %v3963_v17, %s14291_s27  ;;  %v3869_v36 = vrot.slane %v3853_v42, %v14415_v7 }
 0x3a0   : > { %v3973_v52 = vmul.f32 %v3876_v44, %v15499_v57  ;;  %v3886_v54 = vcombine.high %v3876_v44, %v3876_v44  ;;  %v3974_v34 = vmul.f32 %v3884_v33, %v15859_v60  ;;  %v3894_v21 = vrot.slane %v2847_v15, %v14415_v7  ;;  %v15943_v3 = vpop.permute.xlu1 %3632 }
 0x3a1   : > { %v13578_v26 = vpop.f32.mrf.mxu0  ;;  %4052 = vrot.lane.b32.xlu0 %v3964_v2, %s14291_s27  ;;  %v3883_v48 = vrot.slane %v3855_v16, %v14415_v7  ;;  %v3976_v38 = vmul.f32 %v3869_v36, %v15455_v24  ;;  %v3885_v9 = vcombine.high %v3869_v36, %v3869_v36  ;;  %18700 = vst [vmem:[#allocation59_spill] sm:$0xff] %v15943_v3 }
 0x3a2   : > { %v3975_v43 = vmul.f32 %v3886_v54, %v15449_v41  ;;  %v3895_v20 = vcombine.high %v3894_v21, %v3894_v21  ;;  %v3902_v19 = vrot.slane %v3894_v21, %v14415_v7 }
 0x3a3   : > { %4054 = vrot.lane.b32.xlu1 %v3965_v50, %s14291_s27  ;;  %v3977_v39 = vmul.f32 %v3883_v48, %v15477_v35  ;;  %v3887_v61 = vcombine.high %v3883_v48, %v3883_v48  ;;  %v3978_v25 = vmul.f32 %v3885_v9, %v15485_v45 }
 0x3a4   : > { %v3909_v17 = vrot.slane %v3895_v20, %v14415_v7  ;;  %v3910_v46 = vcombine.high %v3902_v19, %v3902_v19  ;;  %v3980_v26 = vmul.f32 %v3902_v19, %v15469_v13  ;;  %v15947_v31 = vpop.permute.xlu1 %3636  ;;  %v18707_v19 = vld [vmem:[#allocation22_spill] sm:$0xff] }
 0x3a5   : > { %4056 = vrot.lane.b32.xlu0 %v3966_v47, %s14291_s27  ;;  %v3979_v15 = vmul.f32 %v3887_v61, %v15452_v56  ;;  %v15937_v47 = vpop.permute.xlu0 %3626  ;;  %18702 = vst [vmem:[#allocation61_spill] sm:$0xff] %v15947_v31 }
 0x3a6   : > { %v3981_v2 = vmul.f32 %v3909_v17, %v15481_v22  ;;  %v3911_v55 = vcombine.high %v3909_v17, %v3909_v17  ;;  %v3982_v50 = vmul.f32 %v3910_v46, %v15499_v57  ;;  %18697 = vst [vmem:[#allocation56_spill] sm:$0xff] %v15937_v47  ;;  %v3652_v44 = vmul.f32 %v15937_v47, %v15403_v53  ;;  %v18720_v57 = vld [vmem:[#allocation39_spill] sm:$0xff] }
 0x3a7   : > { %4058 = vrot.lane.b32.xlu1 %v3967_v11, %s14291_s27  ;;  %v18721_v22 = vld [vmem:[#allocation43_spill] sm:$0xff] }
 0x3a8   : > { %v3983_v23 = vmul.f32 %v3911_v55, %v15859_v60  ;;  %v15951_v12 = vpop.permute.xlu1 %3640 }
 0x3a9   : > { %4060 = vrot.lane.b32.xlu0 %v3968_v37, %s14291_s27  ;;  %v15941_v11 = vpop.permute.xlu0 %3630  ;;  %18704 = vst [vmem:[#allocation63_spill] sm:$0xff] %v15951_v12 }
 0x3aa   : > { %18699 = vst [vmem:[#allocation58_spill] sm:$0xff] %v15941_v11 }
 0x3ab   : > { %4062 = vrot.lane.b32.xlu1 %v3969_v51, %s14291_s27 }
 0x3ad   : > { %4064 = vrot.lane.b32.xlu0 %v3970_v5, %s14291_s27  ;;  %v15945_v37 = vpop.permute.xlu0 %3634  ;;  %v3654_v5 = vmul.f32 %v15941_v11, %v15424_v59 }
 0x3ae   : > { %18701 = vst [vmem:[#allocation60_spill] sm:$0xff] %v15945_v37  ;;  %v3656_v36 = vmul.f32 %v15945_v37, %v15407_v4 }
 0x3af   : > { %4066 = vrot.lane.b32.xlu1 %v3971_v6, %s14291_s27  ;;  %v3653_v6 = vmul.f32 %v15939_v63, %v15415_v62  ;;  %v18706_v62 = vld [vmem:[#allocation21_spill] sm:$0xff] }
 0x3b1   : > { %4068 = vrot.lane.b32.xlu0 %v3972_v40, %s14291_s27  ;;  %v15949_v10 = vpop.permute.xlu0 %3638  ;;  %v3651_v40 = vmul.f32 %v15935_v29, %v15397_v1 }
 0x3b2   : > { %18703 = vst [vmem:[#allocation62_spill] sm:$0xff] %v15949_v10 }
 0x3b3   : > { %4070 = vrot.lane.b32.xlu1 %v3973_v52, %s14291_s27 }
 0x3b5   : > { %4072 = vrot.lane.b32.xlu0 %v3974_v34, %s14291_s27 }
 0x3b7   : > { %4074 = vrot.lane.b32.xlu1 %v3975_v43, %s14291_s27  ;;  %v18705_v43 = vld [vmem:[#allocation20_spill] sm:$0xff] }
 0x3b8   : > { %v3655_v48 = vmul.f32 %v15943_v3, %v18705_v43 }
 0x3b9   : > { %4076 = vrot.lane.b32.xlu0 %v3976_v38, %s14291_s27 }
 0x3bb   : > { %4078 = vrot.lane.b32.xlu1 %v3977_v39, %s14291_s27  ;;  %v3657_v39 = vmul.f32 %v15947_v31, %v18706_v62 }
 0x3bd   : > { %4080 = vrot.lane.b32.xlu0 %v3978_v25, %s14291_s27  ;;  %v3658_v25 = vmul.f32 %v15949_v10, %v18707_v19 }
 0x3bf   : > { %4082 = vrot.lane.b32.xlu1 %v3979_v15, %s14291_s27 }
 0x3c1   : > { %4084 = vrot.lane.b32.xlu0 %v3980_v26, %s14291_s27 }
 0x3c3   : > { %4086 = vrot.lane.b32.xlu1 %v3981_v2, %s14291_s27 }
 0x3c5   : > { %4088 = vrot.lane.b32.xlu0 %v3982_v50, %s14291_s27 }
 0x3c7   : > { %4090 = vrot.lane.b32.xlu1 %v3983_v23, %s14291_s27 }
 0x3ed   : > { %v4021_v51 = vpop.permute.xlu0 %4020 }
 0x3ee   : > { %v4128_v21 = vadd.f32 %v4021_v51, %v3651_v40 }
 0x3ef   : > { %v4023_v58 = vpop.permute.xlu1 %4022 }
 0x3f0   : > { %v4129_v16 = vadd.f32 %v4023_v58, %v3652_v44 }
 0x3f1   : > { %v4025_v32 = vpop.permute.xlu0 %4024 }
 0x3f2   : > { %v4130_v52 = vadd.f32 %v4025_v32, %v3653_v6  ;;  %v4245_v9 = vcombine.low %v4128_v21, %v4129_v16 }
 0x3f3   : > { %v4027_v42 = vpop.permute.xlu1 %4026 }
 0x3f4   : > { %v4131_v33 = vadd.f32 %v4027_v42, %v3654_v5  ;;  %v4255_v55 = vrot.slane %v4245_v9, %v14415_v7  ;;  %v18708_v5 = vld [vmem:[#allocation11_spill] sm:$0xff]  ;;  %v3662_v9 = vmul.f32 %v15939_v63, %v15530_v49 }
 0x3f5   : > { %v4029_v54 = vpop.permute.xlu0 %4028  ;;  %v3659_v42 = vmul.f32 %v15951_v12, %v18708_v5 }
 0x3f6   : > { %v4246_v59 = vcombine.low %v4130_v52, %v4131_v33  ;;  %v4132_v20 = vadd.f32 %v4029_v54, %v3655_v48 }
 0x3f7   : > { %v4031_v34 = vpop.permute.xlu1 %4030 }
 0x3f8   : > { %v4133_v38 = vadd.f32 %v4031_v34, %v3656_v36  ;;  %v4262_v15 = vrot.slane %v4246_v59, %v14415_v7  ;;  %v3663_v59 = vmul.f32 %v15941_v11, %v15461_v30 }
 0x3f9   : > { %v4033_v61 = vpop.permute.xlu0 %4032 }
 0x3fa   : > { %v4247_v46 = vcombine.low %v4132_v20, %v4133_v38  ;;  %v4134_v26 = vadd.f32 %v4033_v61, %v3657_v39  ;;  %v4277_v23 = vcombine.low %v4255_v55, %v4262_v15  ;;  %v3661_v38 = vmul.f32 %v15937_v47, %v15489_v27  ;;  %v18709_v39 = vld [vmem:[#allocation23_spill] sm:$0xff]  ;;  %v18711_v55 = vld [vmem:[#allocation28_spill] sm:$0xff] }
 0x3fb   : > { %v4035_v17 = vpop.permute.xlu1 %4034  ;;  %v3660_v61 = vmul.f32 %v15935_v29, %v18709_v39 }
 0x3fc   : > { %v4135_v2 = vadd.f32 %v4035_v17, %v3658_v25  ;;  %v4269_v51 = vrot.slane %v4247_v46, %v14415_v7  ;;  %v4285_v40 = vrot.slane %v4277_v23, %v14415_v7  ;;  %v18710_v17 = vld [vmem:[#allocation32_spill] sm:$0xff] }
 0x3fd   : > { %v3665_v15 = vmul.f32 %v15945_v37, %v18710_v17 }
 0x3fe   : > { %v4248_v50 = vcombine.low %v4134_v26, %v4135_v2 }
 0x400   : > { %v4276_v58 = vrot.slane %v4248_v50, %v14415_v7  ;;  %v3664_v50 = vmul.f32 %v15943_v3, %v18711_v55 }
 0x402   : > { %v4278_v32 = vcombine.low %v4269_v51, %v4276_v58 }
 0x403   : > { %v4037_v44 = vpop.permute.xlu0 %4036 }
 0x404   : > { %v4136_v6 = vadd.f32 %v4037_v44, %v3659_v42  ;;  %v4292_v16 = vrot.slane %v4278_v32, %v14415_v7  ;;  %v18712_v42 = vld [vmem:[#allocation35_spill] sm:$0xff] }
 0x405   : > { %v4039_v33 = vpop.permute.xlu1 %4038  ;;  %v3666_v44 = vmul.f32 %v15947_v31, %v18712_v42 }
 0x406   : > { %v4300_v52 = vrot.slane %v4136_v6, %v14415_v7  ;;  %v15978_v54 = vcombine.low %v4285_v40, %v4292_v16  ;;  %v4137_v26 = vadd.f32 %v4039_v33, %v3660_v61  ;;  %v18713_v6 = vld [vmem:[#allocation30_spill] sm:$0xff] }
 0x407   : > { %v4041_v36 = vpop.permute.xlu0 %4040  ;;  %v3667_v40 = vmul.f32 %v15949_v10, %v18713_v6 }
 0x408   : > { %v15981_v21 = vrot.slane %v4300_v52, %v14415_v7  ;;  %4308 = vrot.lane.b32.xlu1 %v15978_v54, %s14290_s25  ;;  %v4138_v19 = vadd.f32 %v4041_v36, %v3661_v38  ;;  %v18714_v52 = vld [vmem:[#allocation33_spill] sm:$0xff] }
 0x409   : > { %v4043_v34 = vpop.permute.xlu1 %4042  ;;  %v3668_v36 = vmul.f32 %v15951_v12, %v18714_v52 }
 0x40a   : > { %4310 = vrot.lane.b32.xlu0 %v15981_v21, %s14290_s25  ;;  %v4139_v25 = vadd.f32 %v4043_v34, %v3662_v9  ;;  %v4477_v58 = vcombine.low %v4137_v26, %v4138_v19 }
 0x40b   : > { %v4045_v48 = vpop.permute.xlu0 %4044 }
 0x40c   : > { %v4140_v20 = vadd.f32 %v4045_v48, %v3663_v59 }
 0x40d   : > { %v4047_v62 = vpop.permute.xlu1 %4046 }
 0x40e   : > { %v4478_v2 = vcombine.low %v4139_v25, %v4140_v20  ;;  %v4141_v32 = vadd.f32 %v4047_v62, %v3664_v50  ;;  %v4487_v20 = vrot.slane %v4477_v58, %v14415_v7 }
 0x40f   : > { %v4049_v46 = vpop.permute.xlu0 %4048 }
 0x410   : > { %v4142_v23 = vadd.f32 %v4049_v46, %v3665_v15  ;;  %v4494_v33 = vrot.slane %v4478_v2, %v14415_v7 }
 0x411   : > { %v4051_v51 = vpop.permute.xlu1 %4050 }
 0x412   : > { %v4479_v34 = vcombine.low %v4141_v32, %v4142_v23  ;;  %v4143_v59 = vadd.f32 %v4051_v51, %v3666_v44  ;;  %v4509_v25 = vcombine.low %v4487_v20, %v4494_v33  ;;  %v18715_v51 = vld [vmem:[#allocation34_spill] sm:$0xff]  ;;  %v18717_v33 = vld [vmem:[#allocation31_spill] sm:$0xff] }
 0x413   : > { %v4053_v16 = vpop.permute.xlu0 %4052  ;;  %v3672_v58 = vmul.f32 %v15941_v11, %v18715_v51 }
 0x414   : > { %v4144_v48 = vadd.f32 %v4053_v16, %v3667_v40  ;;  %v4501_v15 = vrot.slane %v4479_v34, %v14415_v7  ;;  %v4517_v44 = vrot.slane %v4509_v25, %v14415_v7  ;;  %v18716_v16 = vld [vmem:[#allocation37_spill] sm:$0xff]  ;;  %v3671_v34 = vmul.f32 %v15939_v63, %v18717_v33 }
 0x415   : > { %v4055_v38 = vpop.permute.xlu1 %4054 }
 0x416   : > { %v4145_v9 = vadd.f32 %v4055_v38, %v3668_v36  ;;  %v4480_v62 = vcombine.low %v4143_v59, %v4144_v48  ;;  %v3670_v36 = vmul.f32 %v15937_v47, %v18716_v16  ;;  %v18718_v38 = vld [vmem:[#allocation36_spill] sm:$0xff] }
 0x417   : > { %v4057_v19 = vpop.permute.xlu0 %4056 }
 0x418   : > { %v4532_v61 = vrot.slane %v4145_v9, %v14415_v7  ;;  %v4508_v46 = vrot.slane %v4480_v62, %v14415_v7  ;;  %v3669_v9 = vmul.f32 %v15935_v29, %v18718_v38 }
 0x419   : > { %v4059_v26 = vpop.permute.xlu1 %4058 }
 0x41a   : > { %v16011_v50 = vrot.slane %v4532_v61, %v14415_v7  ;;  %v4510_v2 = vcombine.low %v4501_v15, %v4508_v46  ;;  %v4147_v20 = vadd.f32 %v4059_v26, %v3670_v36  ;;  %v18719_v15 = vld [vmem:[#allocation40_spill] sm:$0xff]  ;;  %v3675_v26 = vmul.f32 %v15947_v31, %v18721_v22  ;;  %v18722_v36 = vld [vmem:[#allocation38_spill] sm:$0xff] }
 0x41b   : > { %v4061_v23 = vpop.permute.xlu0 %4060  ;;  %v3674_v25 = vmul.f32 %v15945_v37, %v18719_v15  ;;  %v16039_v15 = vcombine.high %v18721_v22, %v18721_v22 }
 0x41c   : > { %4542 = vrot.lane.b32.xlu0 %v16011_v50, %s14290_s25  ;;  %v4524_v40 = vrot.slane %v4510_v2, %v14415_v7  ;;  %v4148_v62 = vadd.f32 %v4061_v23, %v3671_v34  ;;  %v4146_v2 = vadd.f32 %v4057_v19, %v3669_v9  ;;  %v3676_v34 = vmul.f32 %v15949_v10, %v18722_v36 }
 0x41d   : > { %v4063_v32 = vpop.permute.xlu1 %4062 }
 0x41e   : > { %v4149_v59 = vadd.f32 %v4063_v32, %v3672_v58  ;;  %v16023_v48 = vcombine.low %v4517_v44, %v4524_v40  ;;  %v3673_v58 = vmul.f32 %v15943_v3, %v18720_v57  ;;  %v4708_v44 = vcombine.low %v4146_v2, %v4147_v20 }
 0x41f   : > { %v4065_v61 = vpop.permute.xlu0 %4064  ;;  %v3677_v20 = vmul.f32 %v15951_v12, %v16039_v15 }
 0x420   : > { %4540 = vrot.lane.b32.xlu1 %v16023_v48, %s14290_s25  ;;  %v4709_v16 = vcombine.low %v4148_v62, %v4149_v59  ;;  %v4150_v40 = vadd.f32 %v4065_v61, %v3673_v58  ;;  %v4718_v62 = vrot.slane %v4708_v44, %v14415_v7 }
 0x421   : > { %v4067_v46 = vpop.permute.xlu1 %4066 }
 0x422   : > { %v4151_v32 = vadd.f32 %v4067_v46, %v3674_v25  ;;  %v4725_v19 = vrot.slane %v4709_v16, %v14415_v7 }
 0x423   : > { %v4069_v23 = vpop.permute.xlu0 %4068 }
 0x424   : > { %v4710_v59 = vcombine.low %v4150_v40, %v4151_v32  ;;  %v4152_v9 = vadd.f32 %v4069_v23, %v3675_v26  ;;  %v4740_v58 = vcombine.low %v4718_v62, %v4725_v19  ;;  %v18726_v62 = vld [vmem:[#allocation44_spill] sm:$0xff] }
 0x425   : > { %v4071_v38 = vpop.permute.xlu1 %4070 }
 0x426   : > { %v4153_v57 = vadd.f32 %v4071_v38, %v3676_v34  ;;  %v4732_v13 = vrot.slane %v4710_v59, %v14415_v7  ;;  %v4748_v23 = vrot.slane %v4740_v58, %v14415_v7  ;;  %v18723_v34 = vld [vmem:[#allocation46_spill] sm:$0xff]  ;;  %v18727_v58 = vld [vmem:[#allocation47_spill] sm:$0xff] }
 0x427   : > { %v4073_v25 = vpop.permute.xlu0 %4072  ;;  %v3681_v38 = vmul.f32 %v15941_v11, %v18723_v34 }
 0x428   : > { %v4711_v61 = vcombine.low %v4152_v9, %v4153_v57  ;;  %v4154_v46 = vadd.f32 %v4073_v25, %v3677_v20  ;;  %v18724_v9 = vld [vmem:[#allocation41_spill] sm:$0xff] }
 0x429   : > { %v4075_v2 = vpop.permute.xlu1 %4074 }
 0x42a   : > { %v4739_v45 = vrot.slane %v4711_v61, %v14415_v7  ;;  %v4763_v56 = vrot.slane %v4154_v46, %v14415_v7  ;;  %v3678_v61 = vmul.f32 %v15935_v29, %v18726_v62 }
 0x42b   : > { %v4077_v32 = vpop.permute.xlu0 %4076 }
 0x42c   : > { %v4741_v16 = vcombine.low %v4732_v13, %v4739_v45  ;;  %v16049_v26 = vrot.slane %v4763_v56, %v14415_v7  ;;  %v3679_v13 = vmul.f32 %v15937_v47, %v18724_v9  ;;  %v18725_v45 = vld [vmem:[#allocation45_spill] sm:$0xff] }
 0x42d   : > { %v4079_v40 = vpop.permute.xlu1 %4078  ;;  %v3680_v56 = vmul.f32 %v15939_v63, %v18725_v45  ;;  %v18728_v47 = vld [vmem:[#allocation49_spill] sm:$0xff] }
 0x42e   : > { %v4755_v44 = vrot.slane %v4741_v16, %v14415_v7  ;;  %4773 = vrot.lane.b32.xlu0 %v16049_v26, %s14290_s25  ;;  %v4156_v25 = vadd.f32 %v4077_v32, %v3679_v13  ;;  %v3683_v16 = vmul.f32 %v15945_v37, %v18727_v58  ;;  %v3682_v35 = vmul.f32 %v15943_v3, %v18728_v47 }
 0x42f   : > { %v4081_v19 = vpop.permute.xlu0 %4080  ;;  %v4157_v46 = vadd.f32 %v4079_v40, %v3680_v56  ;;  %v18730_v40 = vld [vmem:[#allocation51_spill] sm:$0xff] }
 0x430   : > { %v16057_v59 = vcombine.low %v4748_v23, %v4755_v44  ;;  %v4158_v57 = vadd.f32 %v4081_v19, %v3681_v38  ;;  %v4155_v44 = vadd.f32 %v4075_v2, %v3678_v61  ;;  %v18729_v19 = vld [vmem:[#allocation50_spill] sm:$0xff]  ;;  %v3685_v13 = vmul.f32 %v15949_v10, %v18730_v40 }
 0x431   : > { %v4083_v20 = vpop.permute.xlu1 %4082  ;;  %v16073_v24 = vcombine.high %v18729_v19, %v18729_v19  ;;  %v3684_v32 = vmul.f32 %v15947_v31, %v18729_v19 }
 0x432   : > { %4771 = vrot.lane.b32.xlu1 %v16057_v59, %s14290_s25  ;;  %v4940_v11 = vcombine.low %v4157_v46, %v4158_v57  ;;  %v4939_v41 = vcombine.low %v4155_v44, %v4156_v25  ;;  %v4159_v18 = vadd.f32 %v4083_v20, %v3682_v35 }
 0x433   : > { %v4085_v23 = vpop.permute.xlu0 %4084  ;;  %v3686_v2 = vmul.f32 %v15951_v12, %v16073_v24 }
 0x434   : > { %v4160_v63 = vadd.f32 %v4085_v23, %v3683_v16  ;;  %v4956_v57 = vrot.slane %v4940_v11, %v14415_v7  ;;  %v4949_v25 = vrot.slane %v4939_v41, %v14415_v7  ;;  %v18731_v11 = vld [vmem:[#allocation48_spill] sm:$0xff] }
 0x435   : > { %v4087_v38 = vpop.permute.xlu1 %4086 }
 0x436   : > { %v4941_v61 = vcombine.low %v4159_v18, %v4160_v63  ;;  %v4161_v46 = vadd.f32 %v4087_v38, %v3684_v32  ;;  %v4971_v44 = vcombine.low %v4949_v25, %v4956_v57  ;;  %v18732_v38 = vld [vmem:[#allocation18_spill] sm:$0xff] }
 0x437   : > { %v4089_v56 = vpop.permute.xlu0 %4088  ;;  %v3189_v32 = vmul.f32 %v18732_v38, %v18708_v5 }
 0x438   : > { %v4162_v16 = vadd.f32 %v4089_v56, %v3685_v13  ;;  %v4963_v31 = vrot.slane %v4941_v61, %v14415_v7  ;;  %v4979_v18 = vrot.slane %v4971_v44, %v14415_v7  ;;  %v3198_v61 = vmul.f32 %v18732_v38, %v18714_v52 }
 0x439   : > { %v4091_v23 = vpop.permute.xlu1 %4090 }
 0x43a   : > { %v4163_v37 = vadd.f32 %v4091_v23, %v3686_v2  ;;  %v4942_v35 = vcombine.low %v4161_v46, %v4162_v16  ;;  %v18733_v2 = vld [vmem:[#allocation52_spill] sm:$0xff] }
 0x43b   : > { %v3569_v57 = vmul.f32 %v15859_v60, %v18733_v2 }
 0x43c   : > { %v4994_v20 = vrot.slane %v4163_v37, %v14415_v7  ;;  %v4970_v10 = vrot.slane %v4942_v35, %v14415_v7  ;;  %v3560_v37 = vmul.f32 %v15859_v60, %v18731_v11 }
 0x43d   : > { %v3605_v46 = vadd.f32 %v3569_v57, %v3198_v61 }
 0x43e   : > { %v16087_v3 = vrot.slane %v4994_v20, %v14415_v7  ;;  %v4972_v12 = vcombine.low %v4963_v31, %v4970_v10  ;;  %v3596_v13 = vadd.f32 %v3560_v37, %v3189_v32  ;;  %v3414_v20 = vcombine.high %v15750_v14, %v15750_v14 }
 0x43f   : > { %v4460_v23 = vrot.slane %v3605_v46, %v14415_v7 }
 0x440   : > { %5004 = vrot.lane.b32.xlu0 %v16087_v3, %s14290_s25  ;;  %v4986_v63 = vrot.slane %v4972_v12, %v14415_v7  ;;  %v4228_v12 = vrot.slane %v3596_v13, %v14415_v7  ;;  %v3578_v44 = vmul.f32 %v15859_v60, %v3414_v20  ;;  %v3441_v13 = vcombine.high %v15780_v8, %v15780_v8 }
 0x441   : > { %v16123_v35 = vrot.slane %v4460_v23, %v14415_v7 }
 0x442   : > { %v16093_v41 = vcombine.low %v4979_v18, %v4986_v63  ;;  %v16107_v56 = vrot.slane %v4228_v12, %v14415_v7  ;;  %v3207_v18 = vmul.f32 %v18732_v38, %v16039_v15 }
 0x444   : > { %5002 = vrot.lane.b32.xlu1 %v16093_v41, %s14290_s25  ;;  %v3614_v63 = vadd.f32 %v3578_v44, %v3207_v18 }
 0x446   : > { %v4691_v14 = vrot.slane %v3614_v63, %v14415_v7 }
 0x448   : > { %v16140_v32 = vrot.slane %v4691_v14, %v14415_v7 }
 0x47a   : > { %v4309_v10 = vpop.permute.xlu1 %4308 }
 0x47c   : > { %v4311_v31 = vpop.permute.xlu0 %4310 }
 0x47d   : > { %13579 = vmatprep.subr.msk.mxu1 %vm4312_vm3, %v4311_v31 }
 0x47e   : > { %13580 = vmatpush3.xpose.msk.msra.mxu1 %vm4312_vm3, %v4311_v31  ;;  %v3587_v31 = vmul.f32 %v15859_v60, %v3441_v13  ;;  %v5493_v60 = vcombine.low %v18721_v22, %v18722_v36 }
 0x47f   : > { %13581 = vmatprep.subr.msk.mxu1 %vm4312_vm3, %v4309_v10 }
 0x482   : > { %13582 = vmatpush3.xpose.msk.msra.mxu1 %vm4312_vm3, %v4309_v10  ;;  %v3216_v10 = vmul.f32 %v18732_v38, %v16073_v24 }
 0x484   : > { %v3623_v12 = vadd.f32 %v3587_v31, %v3216_v10 }
 0x485   : > { %13584 = vmatmul.mubr.msk.f32.vlgmr.msra.gmra.mxu1 %vm4312_vm3, %v16107_v56 }
 0x486   : > { %13590 = vmatprep.mubr.msk.f32.mxu1 %vm4312_vm3, %v15820_v28  ;;  %v4922_v57 = vrot.slane %v3623_v12, %v14415_v7 }
 0x488   : > { %v16155_v8 = vrot.slane %v4922_v57, %v14415_v7 }
 0x48e   : > { %v4543_v16 = vpop.permute.xlu0 %4542 }
 0x48f   : > { %13586 = vmatprep.subr.msk.mxu1 %vm4312_vm3, %v4543_v16 }
 0x490   : > { %13587 = vmatpush3.xpose.msk.msra.mxu1 %vm4312_vm3, %v4543_v16 }
 0x492   : > { %v4541_v25 = vpop.permute.xlu1 %4540 }
 0x493   : > { %13588 = vmatprep.subr.msk.mxu1 %vm4312_vm3, %v4541_v25 }
 0x494   : > { %13589 = vmatpush3.xpose.msk.msra.mxu1 %vm4312_vm3, %v4541_v25 }
 0x497   : > { %13591 = vmatmul.mubr.msk.f32.vlgmr.msra.gmra.mxu1 %vm4312_vm3, %v16123_v35 }
 0x498   : > { %13597 = vmatprep.mubr.msk.f32.mxu1 %vm4312_vm3, %v15826_v0 }
 0x4a0   : > { %v4774_v11 = vpop.permute.xlu0 %4773 }
 0x4a1   : > { %13593 = vmatprep.subr.msk.mxu1 %vm4312_vm3, %v4774_v11 }
 0x4a2   : > { %13594 = vmatpush3.xpose.msk.msra.mxu1 %vm4312_vm3, %v4774_v11 }
 0x4a4   : > { %v4772_v37 = vpop.permute.xlu1 %4771 }
 0x4a5   : > { %13595 = vmatprep.subr.msk.mxu1 %vm4312_vm3, %v4772_v37 }
 0x4a6   : > { %13596 = vmatpush3.xpose.msk.msra.mxu1 %vm4312_vm3, %v4772_v37 }
 0x4a9   : > { %13598 = vmatmul.mubr.msk.f32.vlgmr.msra.gmra.mxu1 %vm4312_vm3, %v16140_v32 }
 0x4b2   : > { %v5005_v2 = vpop.permute.xlu0 %5004 }
 0x4b3   : > { %13600 = vmatprep.subr.msk.mxu0 %vm4312_vm3, %v5005_v2 }
 0x4b4   : > { %13601 = vmatpush3.xpose.msk.msra.mxu0 %vm4312_vm3, %v5005_v2 }
 0x4b6   : > { %v5003_v61 = vpop.permute.xlu1 %5002 }
 0x4b7   : > { %13602 = vmatprep.subr.msk.mxu0 %vm4312_vm3, %v5003_v61 }
 0x4b8   : > { %13603 = vmatpush3.xpose.msk.msra.mxu0 %vm4312_vm3, %v5003_v61 }
 0x4bb   : > { %13605 = vmatmul.mubr.msk.f32.vlgmr.msra.gmra.mxu0 %vm4312_vm3, %v16155_v8 }
 0x545   : > { %v13585_v46 = vpop.f32.mrf.mxu1 }
 0x546   : > { %v16159_v16 = vmul.f32 0.25, %v13585_v46 }
 0x547   : > { %v4387_v23 = vpop.f32.mrf.mxu1 }
 0x548   : > { %v16161_v25 = vmul.f32 0.25, %v4387_v23  ;;  %v5102_v20 = vsel %vm5101_vm4, %v16159_v16, -inf }
 0x549   : > { %5103 = vmax.xlane.f32.xlu1 %v5102_v20 }
 0x54a   : > { %v5098_v44 = vsel %vm5097_vm5, %v16161_v25, -inf }
 0x54b   : > { %5099 = vmax.xlane.f32.xlu0 %v5098_v44 }
 0x557   : > { %v13592_v18 = vpop.f32.mrf.mxu1 }
 0x558   : > { %v16167_v63 = vmul.f32 0.25, %v13592_v18 }
 0x559   : > { %v4618_v11 = vpop.f32.mrf.mxu1 }
 0x55a   : > { %v16169_v37 = vmul.f32 0.25, %v4618_v11  ;;  %v5108_v14 = vsel %vm5101_vm4, %v16167_v63, -inf  ;;  %v5189_v11 = vcombine.low %v18705_v43, %v15407_v4 }
 0x55b   : > { %5109 = vmax.xlane.f32.xlu0 %v5108_v14  ;;  %v13064_v14 = vcombine.high %v18705_v43, %v15407_v4 }
 0x55c   : > { %v5105_v13 = vsel %vm5097_vm5, %v16169_v37, -inf }
 0x55f   : > { %5106 = vmax.xlane.f32.xlu0 %v5105_v13 }
 0x569   : > { %v13599_v31 = vpop.f32.mrf.mxu1 }
 0x56a   : > { %v16175_v10 = vmul.f32 0.25, %v13599_v31  ;;  %v5187_v31 = vcombine.low %v15397_v1, %v15403_v53 }
 0x56b   : > { %v4849_v12 = vpop.f32.mrf.mxu1 }
 0x56c   : > { %v16177_v2 = vmul.f32 0.25, %v4849_v12  ;;  %v5114_v57 = vsel %vm5101_vm4, %v16175_v10, -inf  ;;  %v13063_v12 = vcombine.high %v15397_v1, %v15403_v53  ;;  %v5340_v1 = vcombine.low %v15530_v49, %v15461_v30 }
 0x56d   : > { %5115 = vmax.xlane.f32.xlu1 %v5114_v57  ;;  %v5211_v57 = vrot.slane %v5189_v11, %v14415_v7  ;;  %v5341_v53 = vcombine.low %v18711_v55, %v18710_v17  ;;  %v5394_v30 = vrot.slane %v18714_v52, %v14415_v7  ;;  %v13071_v49 = vcombine.high %v18713_v6, %v18714_v52 }
 0x56e   : > { %v5111_v61 = vsel %vm5097_vm5, %v16177_v2, -inf  ;;  %v5521_v17 = vrot.slane %v5493_v60, %v14415_v7  ;;  %v5356_v55 = vrot.slane %v5340_v1, %v14415_v7  ;;  %v5643_v60 = vcombine.low %v18728_v47, %v18727_v58 }
 0x56f   : > { %5112 = vmax.xlane.f32.xlu0 %v5111_v61  ;;  %v5218_v61 = vrot.slane %v13064_v14, %v14415_v7  ;;  %v5491_v14 = vcombine.low %v18717_v33, %v18715_v51  ;;  %v5363_v36 = vrot.slane %v5341_v53, %v14415_v7  ;;  %v5644_v52 = vcombine.low %v18729_v19, %v18730_v40 }
 0x570   : > { %v5696_v1 = vrot.slane %v16073_v24, %v14415_v7 }
 0x571   : > { %v5220_v4 = vcombine.low %v5211_v57, %v5218_v61  ;;  %v5672_v40 = vrot.slane %v5644_v52, %v14415_v7 }
 0x573   : > { %v5234_v29 = vrot.slane %v5220_v4, %v14415_v7 }
 0x57b   : > { %v13606_v46 = vpop.f32.mrf.mxu0 }
 0x57c   : > { %v16183_v23 = vmul.f32 0.25, %v13606_v46  ;;  %v5197_v46 = vrot.slane %v5187_v31, %v14415_v7 }
 0x57d   : > { %v5080_v20 = vpop.f32.mrf.mxu0 }
 0x57e   : > { %v16185_v44 = vmul.f32 0.25, %v5080_v20  ;;  %v5120_v18 = vsel %vm5101_vm4, %v16183_v23, -inf  ;;  %v5204_v20 = vrot.slane %v13063_v12, %v14415_v7  ;;  %v5545_v12 = vrot.slane %v16039_v15, %v14415_v7 }
 0x57f   : > { %5121 = vmax.xlane.f32.xlu1 %v5120_v18  ;;  %v5342_v18 = vcombine.low %v18712_v42, %v18713_v6  ;;  %v5339_v42 = vcombine.low %v18709_v39, %v15489_v27  ;;  %v5242_v27 = vrot.slane %v18708_v5, %v14415_v7  ;;  %v5500_v5 = vrot.slane %v13071_v49, %v14415_v7 }
 0x580   : > { %v5117_v13 = vsel %vm5097_vm5, %v16185_v44, -inf  ;;  %v5219_v43 = vcombine.low %v5197_v46, %v5204_v20  ;;  %v5641_v46 = vcombine.low %v18726_v62, %v18724_v9  ;;  %v5642_v20 = vcombine.low %v18725_v45, %v18723_v34 }
 0x581   : > { %5118 = vmax.xlane.f32.xlu0 %v5117_v13  ;;  %v13072_v13 = vcombine.high %v18717_v33, %v18715_v51  ;;  %v5370_v31 = vrot.slane %v5342_v18, %v14415_v7  ;;  %v5349_v51 = vrot.slane %v5339_v42, %v14415_v7  ;;  %v16241_v33 = vrot.slane %v5394_v30, %v14415_v7  ;;  %v18734_v30 = vld [vmem:[#allocation42_spill] sm:$0xff] }
 0x582   : > { %v5227_v11 = vrot.slane %v5219_v43, %v14415_v7  ;;  %v16253_v58 = vrot.slane %v5242_v27, %v14415_v7  ;;  %v5665_v15 = vrot.slane %v5643_v60, %v14415_v7  ;;  %v16259_v4 = vrot.slane %v5545_v12, %v14415_v7 }
 0x583   : > { %v5514_v39 = vrot.slane %v13072_v13, %v14415_v7  ;;  %v5372_v6 = vcombine.low %v5363_v36, %v5370_v31  ;;  %v5371_v61 = vcombine.low %v5349_v51, %v5356_v55  ;;  %v5651_v45 = vrot.slane %v5641_v46, %v14415_v7 }
 0x584   : > { %v16220_v22 = vcombine.low %v5227_v11, %v5234_v29  ;;  %v5507_v29 = vrot.slane %v5491_v14, %v14415_v7  ;;  %v5658_v62 = vrot.slane %v5642_v20, %v14415_v7  ;;  %v5674_v53 = vcombine.low %v5665_v15, %v5672_v40 }
 0x585   : > { %v5523_v57 = vcombine.low %v5514_v39, %v5521_v17  ;;  %v5386_v19 = vrot.slane %v5372_v6, %v14415_v7  ;;  %v5379_v34 = vrot.slane %v5371_v61, %v14415_v7  ;;  %v16281_v13 = vrot.slane %v5696_v1, %v14415_v7 }
 0x586   : > { %v5522_v47 = vcombine.low %v5500_v5, %v5507_v29  ;;  %v5673_v14 = vcombine.low %v5651_v45, %v5658_v62  ;;  %v5688_v42 = vrot.slane %v5674_v53, %v14415_v7 }
 0x587   : > { %v5537_v9 = vrot.slane %v5523_v57, %v14415_v7  ;;  %v16270_v18 = vcombine.low %v5379_v34, %v5386_v19 }
 0x588   : > { %v5530_v43 = vrot.slane %v5522_v47, %v14415_v7  ;;  %v5681_v24 = vrot.slane %v5673_v14, %v14415_v7 }
 0x58a   : > { %v16274_v11 = vcombine.low %v5530_v43, %v5537_v9  ;;  %v16289_v31 = vcombine.low %v5681_v24, %v5688_v42 }
 0x590   : > { %5250 = vrot.lane.b32.xlu1 %v16220_v22, %s14292_s2 }
 0x594   : > { %5404 = vrot.lane.b32.xlu1 %v16241_v33, %s14292_s2 }
 0x597   : > { %5252 = vrot.lane.b32.xlu0 %v16253_v58, %s14292_s2 }
 0x598   : > { %5555 = vrot.lane.b32.xlu1 %v16259_v4, %s14292_s2 }
 0x59b   : > { %5402 = vrot.lane.b32.xlu0 %v16270_v18, %s14292_s2 }
 0x59c   : > { %5553 = vrot.lane.b32.xlu1 %v16274_v11, %s14292_s2 }
 0x59f   : > { %5706 = vrot.lane.b32.xlu0 %v16281_v13, %s14292_s2 }
 0x5a0   : > { %5798 = vrot.lane.b32.xlu1 %v15981_v21, %s14293_s23 }
 0x5a3   : > { %5704 = vrot.lane.b32.xlu0 %v16289_v31, %s14292_s2 }
 0x5a4   : > { %5796 = vrot.lane.b32.xlu1 %v15978_v54, %s14293_s23 }
 0x5a7   : > { %5889 = vrot.lane.b32.xlu0 %v16011_v50, %s14293_s23 }
 0x5a8   : > { %5792 = vrot.lane.b32.xlu1 %v18734_v30, %s14294_s24  ;;  %v18735_v30 = vld [vmem:[#allocation53_spill] sm:$0xff] }
 0x5ab   : > { %5794 = vrot.lane.b32.xlu0 %v16107_v56, %s14294_s24 }
 0x5ac   : > { %5887 = vrot.lane.b32.xlu1 %v16023_v48, %s14293_s23 }
 0x5af   : > { %5980 = vrot.lane.b32.xlu0 %v16049_v26, %s14293_s23 }
 0x5b0   : > { %5883 = vrot.lane.b32.xlu1 %v15820_v28, %s14294_s24 }
 0x5d2   : > { %v5104_v54 = vpop.xlane.xlu1 %5103 }
 0x5d3   : > { %v5124_v21 = vsub.f32 %v16159_v16, %v5104_v54 }
 0x5d4   : > { %v5100_v50 = vpop.xlane.xlu0 %5099 }
 0x5d5   : > { %v5133_v49 = vmul.f32 1.442695, %v5124_v21  ;;  %v5123_v17 = vsub.f32 %v16161_v25, %v5100_v50 }
 0x5d7   : > { %14069 = vpow2.f32 %v5133_v49  ;;  %v5131_v55 = vmul.f32 1.442695, %v5123_v17 }
 0x5d9   : > { %14071 = vpow2.f32 %v5131_v55 }
 0x5e4   : > { %v16309_v56 = vpop.eup %14069  ;;  %v5110_v36 = vpop.xlane.xlu0 %5109 }
 0x5e5   : > { %v5126_v48 = vsub.f32 %v16167_v63, %v5110_v36  ;;  %v5150_v26 = vsel %vm5101_vm4, %v16309_v56, 0.0 }
 0x5e6   : > { %v16314_v27 = vpop.eup %14071  ;;  %5151 = vadd.xlane.f32.xlu1 %v5150_v26 }
 0x5e7   : > { %v5137_v28 = vmul.f32 1.442695, %v5126_v48  ;;  %v5147_v16 = vsel %vm5097_vm5, %v16314_v27, 0.0 }
 0x5e8   : > { %5148 = vadd.xlane.f32.xlu0 %v5147_v16  ;;  %v5107_v25 = vpop.xlane.xlu0 %5106 }
 0x5e9   : > { %14073 = vpow2.f32 %v5137_v28  ;;  %v5125_v29 = vsub.f32 %v16169_v37, %v5107_v25 }
 0x5eb   : > { %v5135_v39 = vmul.f32 1.442695, %v5125_v29 }
 0x5ed   : > { %14075 = vpow2.f32 %v5135_v39 }
 0x5f6   : > { %v16319_v51 = vpop.eup %14073  ;;  %v5116_v52 = vpop.xlane.xlu1 %5115 }
 0x5f7   : > { %v5156_v63 = vsel %vm5101_vm4, %v16319_v51, 0.0  ;;  %v5128_v12 = vsub.f32 %v16175_v10, %v5116_v52 }
 0x5f8   : > { %5157 = vadd.xlane.f32.xlu0 %v5156_v63  ;;  %v5113_v5 = vpop.xlane.xlu0 %5112 }
 0x5f9   : > { %v5141_v61 = vmul.f32 1.442695, %v5128_v12  ;;  %v5127_v20 = vsub.f32 %v16177_v2, %v5113_v5 }
 0x5fa   : > { %v16323_v6 = vpop.eup %14075 }
 0x5fb   : > { %v5153_v60 = vsel %vm5097_vm5, %v16323_v6, 0.0  ;;  %v5139_v34 = vmul.f32 1.442695, %v5127_v20 }
 0x5fc   : > { %5154 = vadd.xlane.f32.xlu0 %v5153_v60 }
 0x608   : > { %v5122_v57 = vpop.xlane.xlu1 %5121 }
 0x609   : > { %v5130_v37 = vsub.f32 %v16183_v23, %v5122_v57 }
 0x60a   : > { %v5119_v46 = vpop.xlane.xlu0 %5118 }
 0x60b   : > { %v5145_v47 = vmul.f32 1.442695, %v5130_v37  ;;  %v5129_v19 = vsub.f32 %v16185_v44, %v5119_v46 }
 0x60c   : > { %v5251_v15 = vpop.permute.xlu1 %5250 }
 0x60d   : > { %14077 = vpow2.f32 %v5145_v47  ;;  %v5143_v40 = vmul.f32 1.442695, %v5129_v19 }
 0x60e   : > { %14079 = vpow2.f32 %v5141_v61  ;;  %v5253_v9 = vpop.permute.xlu0 %5252 }
 0x60f   : > { %14081 = vpow2.f32 %v5143_v40  ;;  %13607 = vmatprep.subr.msk.mxu1 %vm5261_vm6, %v5253_v9 }
 0x610   : > { %v5405_v10 = vpop.permute.xlu1 %5404  ;;  %13608 = vmatpush3.msk.msra.mxu1 %vm5261_vm6, %v5253_v9  ;;  %14083 = vpow2.f32 %v5139_v34 }
 0x611   : > { %13609 = vmatprep.subr.mxu1 %v5251_v15  ;;  %13614 = vmatprep.subr.msk.mxu0 %vm5261_vm6, %v5405_v10 }
 0x612   : > { %13610 = vmatpush3.msra.mxu1 %v5251_v15  ;;  %13615 = vmatpush3.msk.msra.mxu0 %vm5261_vm6, %v5405_v10  ;;  %v5403_v2 = vpop.permute.xlu0 %5402 }
 0x613   : > { %13616 = vmatprep.subr.mxu0 %v5403_v2 }
 0x614   : > { %v5556_v23 = vpop.permute.xlu1 %5555  ;;  %13617 = vmatpush3.msra.mxu0 %v5403_v2 }
 0x615   : > { %13621 = vmatprep.subr.msk.mxu1 %vm5261_vm6, %v5556_v23 }
 0x616   : > { %v5707_v44 = vpop.permute.xlu0 %5706 }
 0x617   : > { %13628 = vmatprep.subr.msk.mxu0 %vm5261_vm6, %v5707_v44 }
 0x61a   : > { %v16337_v45 = vpop.eup %14077 }
 0x61b   : > { %v16339_v62 = vpop.eup %14079  ;;  %v5168_v43 = vsel %vm5101_vm4, %v16337_v45, 0.0 }
 0x61c   : > { %v16343_v1 = vpop.eup %14081  ;;  %5169 = vadd.xlane.f32.xlu1 %v5168_v43  ;;  %v5162_v14 = vsel %vm5101_vm4, %v16339_v62, 0.0 }
 0x61d   : > { %v5165_v53 = vsel %vm5097_vm5, %v16343_v1, 0.0  ;;  %v16349_v42 = vpop.eup %14083 }
 0x61e   : > { %5166 = vadd.xlane.f32.xlu0 %v5165_v53  ;;  %v5159_v24 = vsel %vm5097_vm5, %v16349_v42, 0.0 }
 0x620   : > { %5163 = vadd.xlane.f32.xlu1 %v5162_v14 }
 0x624   : > { %5160 = vadd.xlane.f32.xlu1 %v5159_v24 }
 0x634   : > { %5885 = vrot.lane.b32.xlu0 %v16123_v35, %s14294_s24  ;;  %v5554_v35 = vpop.permute.xlu1 %5553 }
 0x635   : > { %5978 = vrot.lane.b32.xlu1 %v16057_v59, %s14293_s23 }
 0x638   : > { %6071 = vrot.lane.b32.xlu0 %v16087_v3, %s14293_s23  ;;  %v16369_v59 = vpop.permute.xlu1 %5798  ;;  %v5705_v3 = vpop.permute.xlu0 %5704 }
 0x639   : > { %5974 = vrot.lane.b32.xlu1 %v15826_v0, %s14294_s24 }
 0x63c   : > { %5976 = vrot.lane.b32.xlu0 %v16140_v32, %s14294_s24  ;;  %v16371_v54 = vpop.permute.xlu1 %5796  ;;  %v5890_v0 = vpop.permute.xlu0 %5889 }
 0x63d   : > { %6069 = vrot.lane.b32.xlu1 %v16093_v41, %s14293_s23 }
 0x640   : > { %6065 = vrot.lane.b32.xlu0 %v18735_v30, %s14294_s24  ;;  %v16373_v21 = vpop.permute.xlu1 %5792  ;;  %v16375_v32 = vpop.permute.xlu0 %5794 }
 0x641   : > { %6067 = vrot.lane.b32.xlu1 %v16155_v8, %s14294_s24 }
 0x644   : > { %v5888_v50 = vpop.permute.xlu1 %5887  ;;  %v16377_v41 = vpop.permute.xlu0 %5980 }
 0x648   : > { %v5884_v49 = vpop.permute.xlu1 %5883 }
 0x66f   : > { %v5152_v17 = vpop.xlane.xlu1 %5151 }
 0x670   : > { %14085 = vrcp.f32 %v5152_v17 }
 0x671   : > { %v5149_v55 = vpop.xlane.xlu0 %5148 }
 0x672   : > { %14087 = vrcp.f32 %v5149_v55 }
 0x67d   : > { %v14086_v8 = vpop.eup %14085 }
 0x67e   : > { %v5174_v28 = vmul.f32 %v14086_v8, %v16309_v56 }
 0x67f   : > { %v14088_v36 = vpop.eup %14087 }
 0x680   : > { %v5172_v48 = vmul.f32 %v14088_v36, %v16314_v27 }
 0x681   : > { %v5158_v26 = vpop.xlane.xlu0 %5157 }
 0x682   : > { %13611 = vmatprep.mubr.msk.f32.mxu1 %vm5097_vm5, %v5172_v48  ;;  %14089 = vrcp.f32 %v5158_v26 }
 0x683   : > { %13612 = vmatmul.mubr.msk.f32.vlgmr.msra.gmra.mxu1 %vm5097_vm5, %v5174_v28 }
 0x684   : > { %13622 = vmatpush3.msk.msra.mxu1 %vm5261_vm6, %v5556_v23 }
 0x685   : > { %13623 = vmatprep.subr.mxu1 %v5554_v35  ;;  %v5155_v16 = vpop.xlane.xlu0 %5154 }
 0x686   : > { %13624 = vmatpush3.msra.mxu1 %v5554_v35  ;;  %14091 = vrcp.f32 %v5155_v16 }
 0x687   : > { %13635 = vmatprep.subr.msk.mxu1 %vm4312_vm3, %v16369_v59 }
 0x68f   : > { %v14090_v25 = vpop.eup %14089 }
 0x690   : > { %v5178_v56 = vmul.f32 %v14090_v25, %v16319_v51 }
 0x693   : > { %v14092_v29 = vpop.eup %14091 }
 0x694   : > { %v5176_v27 = vmul.f32 %v14092_v29, %v16323_v6 }
 0x696   : > { %13618 = vmatprep.mubr.msk.f32.mxu0 %vm5097_vm5, %v5176_v27 }
 0x697   : > { %13619 = vmatmul.mubr.msk.f32.vlgmr.msra.gmra.mxu0 %vm5097_vm5, %v5178_v56 }
 0x698   : > { %13629 = vmatpush3.msk.msra.mxu0 %vm5261_vm6, %v5707_v44 }
 0x699   : > { %13630 = vmatprep.subr.mxu0 %v5705_v3 }
 0x69a   : > { %13631 = vmatpush3.msra.mxu0 %v5705_v3 }
 0x69b   : > { %13642 = vmatprep.subr.msk.mxu0 %vm4312_vm3, %v5890_v0 }
 0x6a5   : > { %v5170_v39 = vpop.xlane.xlu1 %5169 }
 0x6a6   : > { %14093 = vrcp.f32 %v5170_v39 }
 0x6a7   : > { %v5167_v63 = vpop.xlane.xlu0 %5166 }
 0x6a8   : > { %14095 = vrcp.f32 %v5167_v63 }
 0x6a9   : > { %v5164_v60 = vpop.xlane.xlu1 %5163 }
 0x6aa   : > { %14097 = vrcp.f32 %v5164_v60 }
 0x6ab   : > { %v5886_v6 = vpop.permute.xlu0 %5885 }
 0x6ad   : > { %v5161_v52 = vpop.xlane.xlu1 %5160 }
 0x6ae   : > { %14099 = vrcp.f32 %v5161_v52 }
 0x6af   : > { %v6072_v5 = vpop.permute.xlu0 %6071 }
 0x6b1   : > { %v5979_v57 = vpop.permute.xlu1 %5978 }
 0x6b3   : > { %v14094_v51 = vpop.eup %14093  ;;  %v5977_v47 = vpop.permute.xlu0 %5976 }
 0x6b4   : > { %v5186_v61 = vmul.f32 %v14094_v51, %v16337_v45 }
 0x6b5   : > { %v14096_v12 = vpop.eup %14095  ;;  %v5975_v19 = vpop.permute.xlu1 %5974 }
 0x6b6   : > { %v5184_v37 = vmul.f32 %v14096_v12, %v16343_v1 }
 0x6b7   : > { %v14098_v46 = vpop.eup %14097  ;;  %v6066_v9 = vpop.permute.xlu0 %6065 }
 0x6b8   : > { %13632 = vmatprep.mubr.msk.f32.mxu0 %vm5097_vm5, %v5184_v37  ;;  %v5182_v40 = vmul.f32 %v14098_v46, %v16339_v62 }
 0x6b9   : > { %13633 = vmatmul.mubr.msk.f32.vlgmr.msra.gmra.mxu0 %vm5097_vm5, %v5186_v61  ;;  %v6070_v34 = vpop.permute.xlu1 %6069 }
 0x6ba   : > { %13643 = vmatpush3.xpose.msk.msra.mxu0 %vm4312_vm3, %v5890_v0  ;;  %13646 = vmatprep.mubr.msk.f32.mxu0 %vm4312_vm3, %v5884_v49 }
 0x6bb   : > { %v14100_v20 = vpop.eup %14099  ;;  %13644 = vmatprep.subr.msk.mxu0 %vm4312_vm3, %v5888_v50 }
 0x6bc   : > { %v5180_v15 = vmul.f32 %v14100_v20, %v16349_v42 }
 0x6bd   : > { %v6068_v10 = vpop.permute.xlu1 %6067 }
 0x6be   : > { %13645 = vmatpush3.xpose.msk.msra.mxu0 %vm4312_vm3, %v5888_v50  ;;  %13625 = vmatprep.mubr.msk.f32.mxu1 %vm5097_vm5, %v5180_v15 }
 0x6bf   : > { %13656 = vmatprep.subr.msk.mxu0 %vm4312_vm3, %v6072_v5  ;;  %13626 = vmatmul.mubr.msk.f32.vlgmr.msra.gmra.mxu1 %vm5097_vm5, %v5182_v40 }
 0x6c0   : > { %13636 = vmatpush3.xpose.msk.msra.mxu1 %vm4312_vm3, %v16369_v59  ;;  %13639 = vmatprep.mubr.msk.f32.mxu1 %vm4312_vm3, %v16373_v21 }
 0x6c1   : > { %13637 = vmatprep.subr.msk.mxu1 %vm4312_vm3, %v16371_v54  ;;  %13647 = vmatmul.mubr.msk.f32.vlgmr.msra.gmra.mxu0 %vm4312_vm3, %v5886_v6 }
 0x6c2   : > { %13657 = vmatpush3.xpose.msk.msra.mxu0 %vm4312_vm3, %v6072_v5  ;;  %13660 = vmatprep.mubr.msk.f32.mxu0 %vm4312_vm3, %v6066_v9 }
 0x6c3   : > { %13658 = vmatprep.subr.msk.mxu0 %vm4312_vm3, %v6070_v34 }
 0x6c4   : > { %13638 = vmatpush3.xpose.msk.msra.mxu1 %vm4312_vm3, %v16371_v54 }
 0x6c5   : > { %13649 = vmatprep.subr.msk.mxu1 %vm4312_vm3, %v16377_v41 }
 0x6c6   : > { %13659 = vmatpush3.xpose.msk.msra.mxu0 %vm4312_vm3, %v6070_v34 }
 0x6c7   : > { %13640 = vmatmul.mubr.msk.f32.vlgmr.msra.gmra.mxu1 %vm4312_vm3, %v16375_v32 }
 0x6c8   : > { %13650 = vmatpush3.xpose.msk.msra.mxu1 %vm4312_vm3, %v16377_v41  ;;  %13653 = vmatprep.mubr.msk.f32.mxu1 %vm4312_vm3, %v5975_v19 }
 0x6c9   : > { %13651 = vmatprep.subr.msk.mxu1 %vm4312_vm3, %v5979_v57  ;;  %13661 = vmatmul.mubr.msk.f32.vlgmr.msra.gmra.mxu0 %vm4312_vm3, %v6068_v10 }
 0x6cc   : > { %13652 = vmatpush3.xpose.msk.msra.mxu1 %vm4312_vm3, %v5979_v57 }
 0x6cf   : > { %13654 = vmatmul.mubr.msk.f32.vlgmr.msra.gmra.mxu1 %vm4312_vm3, %v5977_v47 }
 0x743   : > { %v16433_v44 = vpop.f32.mrf.mxu1 }
 0x745   : > { %v16437_v62 = vpop.f32.mrf.mxu1 }
 0x757   : > { %v16429_v2 = vpop.f32.mrf.mxu0 }
 0x759   : > { %v16431_v23 = vpop.f32.mrf.mxu0 }
 0x779   : > { %v16435_v45 = vpop.f32.mrf.mxu0 }
 0x77b   : > { %v16439_v43 = vpop.f32.mrf.mxu0 }
 0x77f   : > { %v16441_v1 = vpop.f32.mrf.mxu1 }
 0x781   : > { %v13648_v53 = vpop.f32.mrf.mxu0  ;;  %v16443_v24 = vpop.f32.mrf.mxu1 }
 0x782   : > { %v6159_v0 = vmul.f32 0.25, %v13648_v53 }
 0x783   : > { %v5965_v14 = vpop.f32.mrf.mxu0 }
 0x784   : > { %v6158_v42 = vmul.f32 0.25, %v5965_v14  ;;  %v6173_v17 = vsel %vm5101_vm4, %v6159_v0, -inf }
 0x786   : > { %v6170_v30 = vsel %vm5097_vm5, %v6158_v42, -inf }
 0x787   : > { %v13641_v35 = vpop.f32.mrf.mxu1  ;;  %6171 = vmax.xlane.f32.xlu0 %v6170_v30 }
 0x788   : > { %v6157_v59 = vmul.f32 0.25, %v13641_v35 }
 0x789   : > { %v5874_v54 = vpop.f32.mrf.mxu1  ;;  %v13662_v32 = vpop.f32.mrf.mxu0 }
 0x78a   : > { %v6156_v3 = vmul.f32 0.25, %v5874_v54  ;;  %v6167_v21 = vsel %vm5101_vm4, %v6157_v59, -inf  ;;  %v6163_v36 = vmul.f32 0.25, %v13662_v32 }
 0x78b   : > { %6168 = vmax.xlane.f32.xlu1 %v6167_v21  ;;  %v6147_v55 = vpop.f32.mrf.mxu0 }
 0x78c   : > { %v6164_v50 = vsel %vm5097_vm5, %v6156_v3, -inf  ;;  %v6162_v28 = vmul.f32 0.25, %v6147_v55  ;;  %v6185_v25 = vsel %vm5101_vm4, %v6163_v36, -inf }
 0x78d   : > { %6165 = vmax.xlane.f32.xlu0 %v6164_v50 }
 0x78e   : > { %v6182_v29 = vsel %vm5097_vm5, %v6162_v28, -inf }
 0x78f   : > { %v13655_v49 = vpop.f32.mrf.mxu1 }
 0x790   : > { %v6161_v41 = vmul.f32 0.25, %v13655_v49 }
 0x791   : > { %6174 = vmax.xlane.f32.xlu0 %v6173_v17  ;;  %v6056_v8 = vpop.f32.mrf.mxu1 }
 0x792   : > { %v6160_v48 = vmul.f32 0.25, %v6056_v8  ;;  %v6179_v26 = vsel %vm5101_vm4, %v6161_v41, -inf }
 0x793   : > { %6180 = vmax.xlane.f32.xlu1 %v6179_v26 }
 0x794   : > { %v6176_v16 = vsel %vm5097_vm5, %v6160_v48, -inf }
 0x795   : > { %6177 = vmax.xlane.f32.xlu0 %v6176_v16 }
 0x797   : > { %6186 = vmax.xlane.f32.xlu1 %v6185_v25 }
 0x799   : > { %6183 = vmax.xlane.f32.xlu0 %v6182_v29 }
 0x7a8   : > { %6252 = vrot.lane.b32.xlu1 %v16220_v22, %s18539_s3 }
 0x7ac   : > { %6342 = vrot.lane.b32.xlu1 %v16241_v33, %s18539_s3 }
 0x7af   : > { %6254 = vrot.lane.b32.xlu0 %v16253_v58, %s18539_s3 }
 0x7b0   : > { %6340 = vrot.lane.b32.xlu1 %v16270_v18, %s18539_s3 }
 0x7b3   : > { %6430 = vrot.lane.b32.xlu0 %v16259_v4, %s18539_s3 }
 0x7b4   : > { %6428 = vrot.lane.b32.xlu1 %v16274_v11, %s18539_s3 }
 0x810   : > { %v6172_v27 = vpop.xlane.xlu0 %6171 }
 0x811   : > { %v6190_v56 = vsub.f32 %v6158_v42, %v6172_v27 }
 0x813   : > { %v6200_v39 = vmul.f32 1.442695, %v6190_v56 }
 0x814   : > { %v6169_v22 = vpop.xlane.xlu1 %6168 }
 0x815   : > { %14101 = vpow2.f32 %v6200_v39  ;;  %v6189_v33 = vsub.f32 %v6157_v59, %v6169_v22 }
 0x816   : > { %v6166_v63 = vpop.xlane.xlu0 %6165 }
 0x817   : > { %v6188_v60 = vsub.f32 %v6156_v3, %v6166_v63  ;;  %v6198_v18 = vmul.f32 1.442695, %v6189_v33 }
 0x819   : > { %v6196_v52 = vmul.f32 1.442695, %v6188_v60 }
 0x81a   : > { %v6175_v6 = vpop.xlane.xlu0 %6174 }
 0x81b   : > { %14103 = vpow2.f32 %v6196_v52  ;;  %v6191_v58 = vsub.f32 %v6159_v0, %v6175_v6 }
 0x81c   : > { %v6181_v51 = vpop.xlane.xlu1 %6180 }
 0x81d   : > { %v6202_v12 = vmul.f32 1.442695, %v6191_v58  ;;  %v6193_v4 = vsub.f32 %v6161_v41, %v6181_v51  ;;  %v18736_v51 = vmov 0.0  }
 0x81e   : > { %v6178_v5 = vpop.xlane.xlu0 %6177 }
 0x81f   : > { %14105 = vpow2.f32 %v6202_v12  ;;  %v6192_v11 = vsub.f32 %v6160_v48, %v6178_v5  ;;  %v6206_v15 = vmul.f32 1.442695, %v6193_v4 }
 0x820   : > { %v6187_v57 = vpop.xlane.xlu1 %6186  ;;  %14107 = vpow2.f32 %v6198_v18 }
 0x821   : > { %v6195_v37 = vsub.f32 %v6163_v36, %v6187_v57  ;;  %v6204_v9 = vmul.f32 1.442695, %v6192_v11 }
 0x822   : > { %v14102_v61 = vpop.eup %14101  ;;  %v6184_v46 = vpop.xlane.xlu0 %6183 }
 0x823   : > { %v6210_v20 = vmul.f32 1.442695, %v6195_v37  ;;  %v6194_v47 = vsub.f32 %v6162_v28, %v6184_v46  ;;  %v6218_v19 = vsel %vm5097_vm5, %v14102_v61, 0.0 }
 0x824   : > { %v6253_v40 = vpop.permute.xlu1 %6252  ;;  %6219 = vadd.xlane.f32.xlu0 %v6218_v19 }
 0x825   : > { %14109 = vpow2.f32 %v6210_v20  ;;  %v6208_v34 = vmul.f32 1.442695, %v6194_v47 }
 0x826   : > { %v6255_v10 = vpop.permute.xlu0 %6254 }
 0x827   : > { %14111 = vpow2.f32 %v6208_v34  ;;  %13663 = vmatprep.subr.msk.mxu1 %vm5261_vm6, %v6255_v10  ;;  %v6907_v34 = vld [vmem:[%s18390_s6 + $0x18] sm:$0xff] }
 0x828   : > { %v14104_v53 = vpop.eup %14103  ;;  %14113 = vpow2.f32 %v6206_v15  ;;  %v6343_v14 = vpop.permute.xlu1 %6342  ;;  %13664 = vmatpush3.msk.msra.mxu1 %vm5261_vm6, %v6255_v10 }
 0x829   : > { %14115 = vpow2.f32 %v6204_v9  ;;  %13665 = vmatprep.subr.mxu1 %v6253_v40  ;;  %13670 = vmatprep.subr.msk.mxu0 %vm5261_vm6, %v6343_v14  ;;  %v6212_v42 = vsel %vm5097_vm5, %v14104_v53, 0.0 }
 0x82a   : > { %13671 = vmatpush3.msk.msra.mxu0 %vm5261_vm6, %v6343_v14  ;;  %6213 = vadd.xlane.f32.xlu0 %v6212_v42  ;;  %v16471_v30 = vpop.permute.xlu0 %6430  ;;  %v6905_v14 = vld [vmem:[%s18390_s6 + $0x8] sm:$0xff]  ;;  %v6904_v42 = vld [vmem:[%s18390_s6] sm:$0xff] }
 0x82b   : > { %13666 = vmatpush3.msra.mxu1 %v6253_v40 }
 0x82c   : > { %v14106_v35 = vpop.eup %14105  ;;  %13677 = vmatprep.subr.msk.mxu1 %vm5261_vm6, %v16471_v30  ;;  %v6341_v59 = vpop.permute.xlu1 %6340 }
 0x82d   : > { %13672 = vmatprep.subr.mxu0 %v6341_v59  ;;  %v6221_v54 = vsel %vm5101_vm4, %v14106_v35, 0.0  ;;  %v14108_v3 = vpop.eup %14107 }
 0x82e   : > { %13673 = vmatpush3.msra.mxu0 %v6341_v59  ;;  %6222 = vadd.xlane.f32.xlu1 %v6221_v54  ;;  %v6215_v21 = vsel %vm5101_vm4, %v14108_v3, 0.0 }
 0x830   : > { %v6429_v48 = vpop.permute.xlu1 %6428 }
 0x832   : > { %v14110_v0 = vpop.eup %14109  ;;  %6216 = vadd.xlane.f32.xlu1 %v6215_v21 }
 0x833   : > { %v6233_v49 = vsel %vm5101_vm4, %v14110_v0, 0.0 }
 0x834   : > { %v14112_v50 = vpop.eup %14111 }
 0x835   : > { %v14114_v32 = vpop.eup %14113  ;;  %v6230_v41 = vsel %vm5097_vm5, %v14112_v50, 0.0 }
 0x836   : > { %v14116_v17 = vpop.eup %14115  ;;  %6234 = vadd.xlane.f32.xlu1 %v6233_v49  ;;  %6231 = vadd.xlane.f32.xlu0 %v6230_v41  ;;  %v6227_v55 = vsel %vm5101_vm4, %v14114_v32, 0.0 }
 0x837   : > { %v6224_v8 = vsel %vm5097_vm5, %v14116_v17, 0.0 }
 0x83a   : > { %6228 = vadd.xlane.f32.xlu1 %v6227_v55  ;;  %6225 = vadd.xlane.f32.xlu0 %v6224_v8 }
 0x84b   : > { %6516 = vrot.lane.b32.xlu1 %v16289_v31, %s18539_s3 }
 0x850   : > { %6518 = vrot.lane.b32.xlu0 %v16281_v13, %s18539_s3 }
 0x8ad   : > { %v6220_v36 = vpop.xlane.xlu0 %6219 }
 0x8ae   : > { %14117 = vrcp.f32 %v6220_v36 }
 0x8b3   : > { %v6214_v26 = vpop.xlane.xlu0 %6213 }
 0x8b4   : > { %14119 = vrcp.f32 %v6214_v26 }
 0x8b7   : > { %v6223_v28 = vpop.xlane.xlu1 %6222 }
 0x8b8   : > { %14121 = vrcp.f32 %v6223_v28 }
 0x8bb   : > { %v14118_v16 = vpop.eup %14117  ;;  %v6217_v25 = vpop.xlane.xlu1 %6216 }
 0x8bc   : > { %14123 = vrcp.f32 %v6217_v25  ;;  %v6241_v29 = vmul.f32 %v14118_v16, %v14102_v61 }
 0x8be   : > { %13674 = vmatprep.mubr.msk.f32.mxu0 %vm5097_vm5, %v6241_v29 }
 0x8bf   : > { %v6235_v27 = vpop.xlane.xlu1 %6234  ;;  %v6232_v56 = vpop.xlane.xlu0 %6231 }
 0x8c0   : > { %14125 = vrcp.f32 %v6235_v27 }
 0x8c1   : > { %v14120_v31 = vpop.eup %14119  ;;  %14127 = vrcp.f32 %v6232_v56 }
 0x8c2   : > { %v6237_v39 = vmul.f32 %v14120_v31, %v14104_v53  ;;  %v6906_v53 = vld [vmem:[%s18390_s6 + $0x10] sm:$0xff] }
 0x8c3   : > { %v6229_v13 = vpop.xlane.xlu1 %6228  ;;  %v6226_v22 = vpop.xlane.xlu0 %6225 }
 0x8c4   : > { %14129 = vrcp.f32 %v6229_v13  ;;  %13667 = vmatprep.mubr.msk.f32.mxu1 %vm5097_vm5, %v6237_v39 }
 0x8c5   : > { %v14122_v63 = vpop.eup %14121  ;;  %14131 = vrcp.f32 %v6226_v22 }
 0x8c6   : > { %v6243_v60 = vmul.f32 %v14122_v63, %v14106_v35 }
 0x8c7   : > { %v6519_v33 = vpop.permute.xlu0 %6518  ;;  %v6517_v6 = vpop.permute.xlu1 %6516 }
 0x8c8   : > { %13675 = vmatmul.mubr.msk.f32.vlgmr.msra.gmra.mxu0 %vm5097_vm5, %v6243_v60  ;;  %13684 = vmatprep.subr.msk.mxu0 %vm5261_vm6, %v6519_v33 }
 0x8c9   : > { %v14124_v52 = vpop.eup %14123  ;;  %13685 = vmatpush3.msk.msra.mxu0 %vm5261_vm6, %v6519_v33 }
 0x8ca   : > { %13686 = vmatprep.subr.mxu0 %v6517_v6  ;;  %v6239_v58 = vmul.f32 %v14124_v52, %v14108_v3 }
 0x8cb   : > { %13687 = vmatpush3.msra.mxu0 %v6517_v6 }
 0x8cc   : > { %13668 = vmatmul.mubr.msk.f32.vlgmr.msra.gmra.mxu1 %vm5097_vm5, %v6239_v58  ;;  %13714 = vmatprep.subr.mxu0 %v18736_v51 }
 0x8cd   : > { %v14126_v18 = vpop.eup %14125  ;;  %13678 = vmatpush3.msk.msra.mxu1 %vm5261_vm6, %v16471_v30 }
 0x8ce   : > { %v14128_v12 = vpop.eup %14127  ;;  %13679 = vmatprep.subr.mxu1 %v6429_v48  ;;  %v6251_v5 = vmul.f32 %v14126_v18, %v14110_v0 }
 0x8cf   : > { %13680 = vmatpush3.msra.mxu1 %v6429_v48  ;;  %v6249_v4 = vmul.f32 %v14128_v12, %v14112_v50 }
 0x8d0   : > { %13691 = vmatprep.subr.mxu1 %v18736_v51 }
 0x8d1   : > { %v14130_v57 = vpop.eup %14129  ;;  %13688 = vmatprep.mubr.msk.f32.mxu0 %vm5097_vm5, %v6249_v4 }
 0x8d2   : > { %v14132_v11 = vpop.eup %14131  ;;  %13689 = vmatmul.mubr.msk.f32.vlgmr.msra.gmra.mxu0 %vm5097_vm5, %v6251_v5  ;;  %v6247_v37 = vmul.f32 %v14130_v57, %v14114_v32 }
 0x8d3   : > { %v6245_v61 = vmul.f32 %v14132_v11, %v14116_v17  ;;  %13722 = vmatprep.mubr.msk.f32.mxu0 %vm14289_vm2, %v18736_v51 }
 0x8d5   : > { %13681 = vmatprep.mubr.msk.f32.mxu1 %vm5097_vm5, %v6245_v61 }
 0x8d6   : > { %13682 = vmatmul.mubr.msk.f32.vlgmr.msra.gmra.mxu1 %vm5097_vm5, %v6247_v37 }
 0x8d7   : > { %13699 = vmatprep.mubr.msk.f32.mxu1 %vm14289_vm2, %v18736_v51  ;;  %13692 = vmatpush3.msra.mxu1 %v6907_v34 }
 0x8d8   : > { %13693 = vmatprep.subr.mxu1 %v18736_v51 }
 0x8d9   : > { %13694 = vmatpush3.msra.mxu1 %v6906_v53 }
 0x8da   : > { %13695 = vmatprep.subr.mxu1 %v18736_v51 }
 0x8db   : > { %13696 = vmatpush3.msra.mxu1 %v6905_v14 }
 0x8dc   : > { %13697 = vmatprep.subr.mxu1 %v18736_v51 }
 0x8dd   : > { %13698 = vmatpush3.msra.mxu1 %v6904_v42 }
 0x8de   : > { %13737 = vmatprep.subr.mxu1 %v18736_v51 }
 0x988   : > { %v13676_v46 = vpop.f32.mrf.mxu0 }
 0x98a   : > { %v6419_v20 = vpop.f32.mrf.mxu0 }
 0x98b   : > { %6616 = vrot.lane.b32.xlu1 %v6419_v20, %s18537_s26 }
 0x98c   : > { %v13669_v47 = vpop.f32.mrf.mxu1 }
 0x98e   : > { %v6331_v19 = vpop.f32.mrf.mxu1 }
 0x98f   : > { %6612 = vrot.lane.b32.xlu0 %v6331_v19, %s18537_s26 }
 0x992   : > { %v13690_v40 = vpop.f32.mrf.mxu0 }
 0x993   : > { %6614 = vrot.lane.b32.xlu0 %v13669_v47, %s18537_s26 }
 0x994   : > { %v6595_v10 = vpop.f32.mrf.mxu0 }
 0x996   : > { %v13683_v15 = vpop.f32.mrf.mxu1 }
 0x997   : > { %6618 = vrot.lane.b32.xlu0 %v13676_v46, %s18537_s26 }
 0x998   : > { %v6507_v9 = vpop.f32.mrf.mxu1 }
 0x999   : > { %6620 = vrot.lane.b32.xlu1 %v6507_v9, %s18537_s26 }
 0x99b   : > { %6622 = vrot.lane.b32.xlu0 %v13683_v15, %s18537_s26 }
 0x99d   : > { %6624 = vrot.lane.b32.xlu1 %v6595_v10, %s18537_s26 }
 0x9a1   : > { %6626 = vrot.lane.b32.xlu1 %v13690_v40, %s18537_s26 }
 0x9fd   : > { %v6617_v30 = vpop.permute.xlu1 %6616 }
 0x9fe   : > { %v6638_v35 = vsel %vm4312_vm3, %v16431_v23, %v6617_v30 }
 0x9ff   : > { %v6715_v59 = vcombine.high %v6638_v35, %v6638_v35  ;;  %v6722_v54 = vrot.slane %v6638_v35, %v14415_v7 }
 0xa01   : > { %v6729_v3 = vrot.slane %v6715_v59, %v14415_v7  ;;  %v6730_v21 = vcombine.high %v6722_v54, %v6722_v54  ;;  %v6738_v0 = vrot.slane %v6722_v54, %v14415_v7  ;;  %v6613_v50 = vpop.permute.xlu0 %6612 }
 0xa02   : > { %v6636_v32 = vsel %vm4312_vm3, %v16437_v62, %v6613_v50 }
 0xa03   : > { %v6731_v49 = vcombine.high %v6729_v3, %v6729_v3  ;;  %v6745_v41 = vrot.slane %v6729_v3, %v14415_v7  ;;  %v6752_v17 = vrot.slane %v6730_v21, %v14415_v7  ;;  %v6652_v55 = vcombine.high %v6636_v32, %v6636_v32 }
 0xa04   : > { %v6659_v23 = vrot.slane %v6636_v32, %v14415_v7  ;;  %v6760_v36 = vcombine.high %v6738_v0, %v6738_v0 }
 0xa05   : > { %v6759_v8 = vrot.slane %v6731_v49, %v14415_v7  ;;  %v6761_v48 = vcombine.high %v6745_v41, %v6745_v41  ;;  %v6762_v26 = vcombine.high %v6752_v17, %v6752_v17  ;;  %v6615_v28 = vpop.permute.xlu0 %6614  ;;  %v6666_v16 = vrot.slane %v6652_v55, %v14415_v7 }
 0xa06   : > { %v6667_v25 = vcombine.high %v6659_v23, %v6659_v23  ;;  %v6637_v62 = vsel %vm4312_vm3, %v16433_v44, %v6615_v28  ;;  %v6675_v31 = vrot.slane %v6659_v23, %v14415_v7  ;;  %v6965_v13 = vcombine.low %v6752_v17, %v6760_v36 }
 0xa07   : > { %v6966_v29 = vcombine.low %v6762_v26, %v6745_v41  ;;  %v6707_v27 = vrot.slane %v6637_v62, %v14415_v7  ;;  %v6668_v56 = vcombine.high %v6666_v16, %v6666_v16  ;;  %v6967_v22 = vcombine.low %v6759_v8, %v6761_v48 }
 0xa08   : > { %v6689_v39 = vrot.slane %v6667_v25, %v14415_v7  ;;  %v6682_v63 = vrot.slane %v6666_v16, %v14415_v7  ;;  %v6763_v5 = vcombine.high %v6759_v8, %v6759_v8  ;;  %v6981_v53 = vrot.slane %v6965_v13, %v14415_v7 }
 0xa09   : > { %v6714_v60 = vrot.slane %v6707_v27, %v14415_v7  ;;  %v6619_v33 = vpop.permute.xlu0 %6618  ;;  %v6696_v52 = vrot.slane %v6668_v56, %v14415_v7  ;;  %v6988_v18 = vrot.slane %v6966_v29, %v14415_v7  ;;  %v6995_v20 = vrot.slane %v6967_v22, %v14415_v7 }
 0xa0a   : > { %v6915_v6 = vcombine.low %v6675_v31, %v6689_v39  ;;  %v13108_v58 = vcombine.high %v6675_v31, %v6689_v39  ;;  %v6639_v44 = vsel %vm4312_vm3, %v16429_v2, %v6619_v33 }
 0xa0b   : > { %v6964_v12 = vcombine.low %v6714_v60, %v6738_v0  ;;  %v6770_v4 = vrot.slane %v6639_v44, %v14415_v7  ;;  %v6621_v57 = vpop.permute.xlu1 %6620  ;;  %v6917_v11 = vcombine.low %v6682_v63, %v6696_v52  ;;  %v13109_v37 = vcombine.high %v6682_v63, %v6696_v52 }
 0xa0c   : > { %v6925_v61 = vrot.slane %v6915_v6, %v14415_v7  ;;  %v6932_v46 = vrot.slane %v13108_v58, %v14415_v7  ;;  %v6640_v2 = vsel %vm4312_vm3, %v16443_v24, %v6621_v57  ;;  %v6997_v0 = vcombine.low %v6988_v18, %v6995_v20 }
 0xa0d   : > { %v6974_v47 = vrot.slane %v6964_v12, %v14415_v7  ;;  %v6777_v19 = vrot.slane %v6770_v4, %v14415_v7  ;;  %v6623_v15 = vpop.permute.xlu0 %6622  ;;  %v6939_v40 = vrot.slane %v6917_v11, %v14415_v7  ;;  %v6946_v9 = vrot.slane %v13109_v37, %v14415_v7 }
 0xa0e   : > { %v6947_v34 = vcombine.low %v6925_v61, %v6932_v46  ;;  %v6778_v10 = vcombine.high %v6640_v2, %v6640_v2  ;;  %v6785_v42 = vrot.slane %v6640_v2, %v14415_v7  ;;  %v6641_v30 = vsel %vm4312_vm3, %v16441_v1, %v6623_v15 }
 0xa0f   : > { %v7013_v14 = vcombine.low %v6763_v5, %v6777_v19  ;;  %v6625_v35 = vpop.permute.xlu1 %6624  ;;  %v6833_v24 = vrot.slane %v6641_v30, %v14415_v7  ;;  %v6996_v54 = vcombine.low %v6974_v47, %v6981_v53  ;;  %v6948_v50 = vcombine.low %v6939_v40, %v6946_v9 }
 0xa10   : > { %v6792_v59 = vrot.slane %v6778_v10, %v14415_v7  ;;  %v6793_v3 = vcombine.high %v6785_v42, %v6785_v42  ;;  %v6642_v21 = vsel %vm4312_vm3, %v16439_v43, %v6625_v35  ;;  %v6955_v32 = vrot.slane %v6947_v34, %v14415_v7 }
 0xa11   : > { %v6841_v41 = vcombine.high %v6642_v21, %v6642_v21  ;;  %v7023_v17 = vrot.slane %v7013_v14, %v14415_v7  ;;  %v6801_v1 = vrot.slane %v6785_v42, %v14415_v7  ;;  %v6848_v23 = vrot.slane %v6642_v21, %v14415_v7 }
 0xa12   : > { %v6794_v49 = vcombine.high %v6792_v59, %v6792_v59  ;;  %v6815_v55 = vrot.slane %v6793_v3, %v14415_v7  ;;  %v6808_v8 = vrot.slane %v6792_v59, %v14415_v7  ;;  %v6840_v43 = vrot.slane %v6833_v24, %v14415_v7 }
 0xa13   : > { %v6855_v48 = vrot.slane %v6841_v41, %v14415_v7  ;;  %v6627_v26 = vpop.permute.xlu1 %6626  ;;  %v6856_v25 = vcombine.high %v6848_v23, %v6848_v23  ;;  %v6864_v62 = vrot.slane %v6848_v23, %v14415_v7  ;;  %v6962_v31 = vrot.slane %v6948_v50, %v14415_v7  ;;  %v13107_v50 = vld [vmem:[%s18391_s7] ss:$0 sm:$0xff] }
 0xa14   : > { %v6822_v36 = vrot.slane %v6794_v49, %v14415_v7  ;;  %v7014_v28 = vcombine.low %v6801_v1, %v6815_v55  ;;  %v13110_v16 = vcombine.high %v6801_v1, %v6815_v55  ;;  %v6643_v63 = vsel %vm4312_vm3, %v16435_v45, %v6627_v26 }
 0xa15   : > { %v6857_v56 = vcombine.high %v6855_v48, %v6855_v48  ;;  %v6878_v13 = vrot.slane %v6856_v25, %v14415_v7  ;;  %v6886_v22 = vcombine.high %v6864_v62, %v6864_v62  ;;  %v6871_v52 = vrot.slane %v6855_v48, %v14415_v7 }
 0xa16   : > { %v7016_v29 = vcombine.low %v6808_v8, %v6822_v36  ;;  %v13111_v27 = vcombine.high %v6808_v8, %v6822_v36  ;;  %v7030_v39 = vrot.slane %v7014_v28, %v14415_v7  ;;  %v7037_v60 = vrot.slane %v13110_v16, %v14415_v7 }
 0xa17   : > { %v6885_v6 = vrot.slane %v6857_v56, %v14415_v7  ;;  %v6888_v58 = vcombine.high %v6878_v13, %v6878_v13  ;;  %v7063_v44 = vcombine.low %v6840_v43, %v6864_v62  ;;  %v7064_v18 = vcombine.low %v6878_v13, %v6886_v22  ;;  %v18738_v43 = vld [vmem:[#allocation3_spill] sm:$0xff]  ;;  %v18739_v62 = vld [vmem:[#allocation4_spill] sm:$0xff]  ;;  %v18740_v13 = vld [vmem:[#allocation5_spill] sm:$0xff] }
 0xa18   : > { %v7044_v33 = vrot.slane %v7016_v29, %v14415_v7  ;;  %v7004_v12 = vrot.slane %v6996_v54, %v14415_v7  ;;  %v7045_v5 = vcombine.low %v7023_v17, %v7030_v39  ;;  %v7072_v57 = vrot.slane %v13111_v27, %v14415_v7  ;;  %v18737_v17 = vld [vmem:[#allocation2_spill] sm:$0xff] }
 0xa19   : > { %v6896_v11 = vrot.slane %v6643_v63, %v14415_v7  ;;  %v7065_v45 = vcombine.low %v6888_v58, %v6871_v52  ;;  %v7079_v37 = vrot.slane %v7063_v44, %v14415_v7  ;;  %v6889_v61 = vcombine.high %v6885_v6, %v6885_v6 }
 0xa1a   : > { %v7046_v4 = vcombine.low %v7037_v60, %v7044_v33  ;;  %v6963_v46 = vcombine.low %v6955_v32, %v6962_v31  ;;  %v6887_v20 = vcombine.high %v6871_v52, %v6871_v52  ;;  %v7011_v47 = vrot.slane %v6997_v0, %v14415_v7 }
 0xa1b   : > { %v7086_v19 = vrot.slane %v7064_v18, %v14415_v7  ;;  %v7093_v2 = vrot.slane %v7065_v45, %v14415_v7  ;;  %v6903_v15 = vrot.slane %v6896_v11, %v14415_v7  ;;  %v7094_v34 = vcombine.low %v7072_v57, %v7079_v37 }
 0xa1c   : > { %13700 = vmatmul.mubr.msk.f32.vlgmr.msra.gmra.mxu1 %vm1273_vm0, %v6963_v46  ;;  %v7060_v40 = vrot.slane %v7046_v4, %v14415_v7  ;;  %v7012_v9 = vcombine.low %v7004_v12, %v7011_v47  ;;  %v7053_v53 = vrot.slane %v7045_v5, %v14415_v7  ;;  %v7111_v42 = vcombine.low %v6885_v6, %v6887_v20  ;;  %v18741_v6 = vld [vmem:[#allocation6_spill] sm:$0xff] }
 0xa1d   : > { %13702 = vmatprep.mubr.msk.f32.mxu1 %vm14289_vm2, %v18736_v51  ;;  %v7112_v10 = vcombine.low %v6889_v61, %v6903_v15  ;;  %v7095_v14 = vcombine.low %v7086_v19, %v7093_v2  ;;  %v7102_v24 = vrot.slane %v7094_v34, %v14415_v7 }
 0xa1e   : > { %v7061_v30 = vcombine.low %v7053_v53, %v7060_v40  ;;  %v7119_v3 = vrot.slane %v7111_v42, %v14415_v7 }
 0xa1f   : > { %v7109_v35 = vrot.slane %v7095_v14, %v14415_v7  ;;  %v7126_v59 = vrot.slane %v7112_v10, %v14415_v7 }
 0xa20   : > { %13703 = vmatmul.mubr.msk.f32.gmra.mxu1 %vm1273_vm0, %v7012_v9 }
 0xa21   : > { %13705 = vmatprep.mubr.msk.f32.mxu1 %vm14289_vm2, %v18736_v51  ;;  %v7110_v54 = vcombine.low %v7102_v24, %v7109_v35  ;;  %v7127_v21 = vcombine.low %v7119_v3, %v7126_v59  ;;  %v7337_v24 = vld [vmem:[%s18394_s10 + $0x18] sm:$0xff]  ;;  %v7335_v3 = vld [vmem:[%s18394_s10 + $0x8] sm:$0xff] }
 0xa22   : > { %13715 = vmatpush3.msra.mxu0 %v7337_v24 }
 0xa23   : > { %v7134_v0 = vrot.slane %v7127_v21, %v14415_v7  ;;  %13716 = vmatprep.subr.mxu0 %v18736_v51  ;;  %v7334_v21 = vld [vmem:[%s18394_s10] sm:$0xff] }
 0xa24   : > { %13706 = vmatmul.mubr.msk.f32.gmra.mxu1 %vm1273_vm0, %v7061_v30 }
 0xa25   : > { %13708 = vmatprep.mubr.msk.f32.mxu1 %vm14289_vm2, %v18736_v51 }
 0xa28   : > { %13709 = vmatmul.mubr.msk.f32.gmra.mxu1 %vm1273_vm0, %v7110_v54  ;;  %v7336_v54 = vld [vmem:[%s18394_s10 + $0x10] sm:$0xff] }
 0xa29   : > { %13711 = vmatprep.mubr.msk.f32.mxu1 %vm14289_vm2, %v18736_v51  ;;  %13717 = vmatpush3.msra.mxu0 %v7336_v54 }
 0xa2a   : > { %13718 = vmatprep.subr.mxu0 %v18736_v51 }
 0xa2b   : > { %13719 = vmatpush3.msra.mxu0 %v7335_v3 }
 0xa2c   : > { %13712 = vmatmul.mubr.msk.f32.gmra.mxu1 %vm1273_vm0, %v7134_v0  ;;  %13720 = vmatprep.subr.mxu0 %v18736_v51 }
 0xa2d   : > { %13753 = vmatprep.mubr.msk.f32.mxu1 %vm14289_vm2, %v18736_v51  ;;  %13721 = vmatpush3.msra.mxu0 %v7334_v21 }
 0xa2e   : > { %13768 = vmatprep.subr.mxu0 %v18736_v51 }
 0xadc   : > { %v7211_v32 = vpop.f32.mrf.mxu1 }
 0xadd   : > { %v7212_v49 = vadd.f32 %v13107_v50, %v7211_v32 }
 0xade   : > { %v13701_v41 = vpop.f32.mrf.mxu1 }
 0xadf   : > { %v7240_v1 = vadd.f32 %v7212_v49, %v18737_v17 }
 0xae0   : > { %v7216_v55 = vpop.f32.mrf.mxu1 }
 0xae1   : > { %v7217_v23 = vadd.f32 %v13107_v50, %v7216_v55  ;;  %v7247_v8 = vsel %vm1273_vm0, %v7240_v1, 0.0 }
 0xae2   : > { %7248 = vadd.xlane.f32.xlu0 %v7247_v8  ;;  %v13704_v36 = vpop.f32.mrf.mxu1 }
 0xae3   : > { %v7241_v48 = vadd.f32 %v7217_v23, %v18738_v43 }
 0xae4   : > { %v7221_v26 = vpop.f32.mrf.mxu1 }
 0xae5   : > { %v7222_v28 = vadd.f32 %v13107_v50, %v7221_v26  ;;  %v7250_v16 = vsel %vm1273_vm0, %v7241_v48, 0.0 }
 0xae6   : > { %7251 = vadd.xlane.f32.xlu1 %v7250_v16  ;;  %v13707_v25 = vpop.f32.mrf.mxu1  ;;  %v13117_v16 = vld [vmem:[%s18392_s8] ss:$0 sm:$0xff] }
 0xae7   : > { %v7242_v29 = vadd.f32 %v7222_v28, %v18739_v62 }
 0xae8   : > { %v7226_v27 = vpop.f32.mrf.mxu1 }
 0xae9   : > { %v7227_v56 = vadd.f32 %v13107_v50, %v7226_v27  ;;  %v7253_v31 = vsel %vm1273_vm0, %v7242_v29, 0.0 }
 0xaea   : > { %7254 = vadd.xlane.f32.xlu0 %v7253_v31  ;;  %v13710_v39 = vpop.f32.mrf.mxu1 }
 0xaeb   : > { %v7243_v22 = vadd.f32 %v7227_v56, %v18740_v13 }
 0xaec   : > { %v7231_v63 = vpop.f32.mrf.mxu1 }
 0xaed   : > { %v7232_v60 = vadd.f32 %v13107_v50, %v7231_v63  ;;  %v7256_v33 = vsel %vm1273_vm0, %v7243_v22, 0.0 }
 0xaee   : > { %7257 = vadd.xlane.f32.xlu0 %v7256_v33  ;;  %v13713_v52 = vpop.f32.mrf.mxu1 }
 0xaef   : > { %v7244_v58 = vadd.f32 %v7232_v60, %v18741_v6 }
 0xaf1   : > { %v7259_v44 = vsel %vm1286_vm1, %v7244_v58, 0.0 }
 0xaf2   : > { %7260 = vadd.xlane.f32.xlu0 %v7259_v44 }
 0xb6b   : > { %v7249_v18 = vpop.xlane.xlu0 %7248 }
 0xb6c   : > { %v7262_v12 = vmul.f32 0.03125, %v7249_v18 }
 0xb6e   : > { %v7267_v5 = vsub.f32 %v7240_v1, %v7262_v12 }
 0xb6f   : > { %v7252_v4 = vpop.xlane.xlu1 %7251 }
 0xb70   : > { %v7263_v57 = vmul.f32 0.03125, %v7252_v4  ;;  %v7272_v11 = vmul.f32 %v7267_v5, %v7267_v5 }
 0xb72   : > { %v16630_v45 = vsub.f32 %v7241_v48, %v7263_v57  ;;  %v7277_v37 = vsel %vm1273_vm0, %v7272_v11, 0.0  ;;  %v7592_v11 = vld [vmem:[%s18396_s12 + $0x38] sm:$0xff] }
 0xb73   : > { %7278 = vadd.xlane.f32.xlu1 %v7277_v37  ;;  %v7255_v61 = vpop.xlane.xlu0 %7254  ;;  %13738 = vmatpush3.msra.mxu1 %v7592_v11  ;;  %v7590_v37 = vld [vmem:[%s18396_s12 + $0x28] sm:$0xff] }
 0xb74   : > { %v7264_v46 = vmul.f32 0.03125, %v7255_v61  ;;  %v7273_v20 = vmul.f32 %v16630_v45, %v16630_v45  ;;  %13739 = vmatprep.subr.mxu1 %v18736_v51  ;;  %v7589_v61 = vld [vmem:[%s18396_s12 + $0x20] sm:$0xff] }
 0xb76   : > { %v16635_v47 = vsub.f32 %v7242_v29, %v7264_v46  ;;  %v7280_v19 = vsel %vm1273_vm0, %v7273_v20, 0.0  ;;  %v13118_v29 = vld [vmem:[%s18393_s9] ss:$0 sm:$0xff]  ;;  %v7588_v46 = vld [vmem:[%s18396_s12 + $0x18] sm:$0xff]  ;;  %v7587_v20 = vld [vmem:[%s18396_s12 + $0x10] sm:$0xff] }
 0xb77   : > { %7281 = vadd.xlane.f32.xlu0 %v7280_v19  ;;  %v7258_v2 = vpop.xlane.xlu0 %7257  ;;  %v7585_v19 = vld [vmem:[%s18396_s12] sm:$0xff] }
 0xb78   : > { %v7265_v15 = vmul.f32 0.03125, %v7258_v2  ;;  %v7274_v40 = vmul.f32 %v16635_v47, %v16635_v47  ;;  %v13119_v2 = vld [vmem:[%s18395_s11] ss:$0 sm:$0xff] }
 0xb7a   : > { %v16640_v9 = vsub.f32 %v7243_v22, %v7265_v15  ;;  %v7283_v34 = vsel %vm1273_vm0, %v7274_v40, 0.0 }
 0xb7b   : > { %7284 = vadd.xlane.f32.xlu1 %v7283_v34  ;;  %v7261_v10 = vpop.xlane.xlu0 %7260 }
 0xb7c   : > { %v7266_v53 = vmul.f32 0.03125, %v7261_v10  ;;  %v7275_v14 = vmul.f32 %v16640_v9, %v16640_v9 }
 0xb7e   : > { %v16645_v42 = vsub.f32 %v7244_v58, %v7266_v53  ;;  %v7286_v30 = vsel %vm1273_vm0, %v7275_v14, 0.0 }
 0xb7f   : > { %7287 = vadd.xlane.f32.xlu0 %v7286_v30 }
 0xb80   : > { %v7276_v35 = vmul.f32 %v16645_v42, %v16645_v42 }
 0xb82   : > { %v7289_v59 = vsel %vm1286_vm1, %v7276_v35, 0.0 }
 0xb83   : > { %7290 = vadd.xlane.f32.xlu1 %v7289_v59 }
 0xbfc   : > { %v7279_v0 = vpop.xlane.xlu1 %7278 }
 0xbfd   : > { %v7292_v50 = vmul.f32 0.03125, %v7279_v0 }
 0xbff   : > { %v7297_v32 = vadd.f32 1e-12, %v7292_v50 }
 0xc00   : > { %v7282_v49 = vpop.xlane.xlu0 %7281 }
 0xc01   : > { %14133 = vrsqrt.f32 %v7297_v32  ;;  %v7293_v41 = vmul.f32 0.03125, %v7282_v49 }
 0xc03   : > { %v7298_v17 = vadd.f32 1e-12, %v7293_v41 }
 0xc04   : > { %v7285_v1 = vpop.xlane.xlu1 %7284 }
 0xc05   : > { %14135 = vrsqrt.f32 %v7298_v17  ;;  %v7294_v55 = vmul.f32 0.03125, %v7285_v1 }
 0xc07   : > { %v7299_v23 = vadd.f32 1e-12, %v7294_v55 }
 0xc08   : > { %v7288_v8 = vpop.xlane.xlu0 %7287 }
 0xc09   : > { %14137 = vrsqrt.f32 %v7299_v23  ;;  %v7295_v36 = vmul.f32 0.03125, %v7288_v8 }
 0xc0b   : > { %v7300_v43 = vadd.f32 1e-12, %v7295_v36 }
 0xc0c   : > { %v7291_v48 = vpop.xlane.xlu1 %7290 }
 0xc0d   : > { %14139 = vrsqrt.f32 %v7300_v43  ;;  %v7296_v26 = vmul.f32 0.03125, %v7291_v48 }
 0xc0e   : > { %v14134_v28 = vpop.eup %14133 }
 0xc0f   : > { %v7301_v25 = vadd.f32 1e-12, %v7296_v26  ;;  %v7307_v62 = vmul.f32 %v14134_v28, %v7267_v5 }
 0xc11   : > { %14141 = vrsqrt.f32 %v7301_v25  ;;  %v7318_v27 = vmul.f32 %v13117_v16, %v7307_v62 }
 0xc12   : > { %v14136_v56 = vpop.eup %14135 }
 0xc13   : > { %v16673_v31 = vadd.f32 %v13118_v29, %v7318_v27  ;;  %v7308_v39 = vmul.f32 %v14136_v56, %v16630_v45  ;;  %v7591_v45 = vld [vmem:[%s18396_s12 + $0x30] sm:$0xff] }
 0xc14   : > { %13740 = vmatpush3.msra.mxu1 %v7591_v45 }
 0xc15   : > { %13723 = vmatmul.mubr.msk.f32.vlgmr.msra.gmra.mxu0 %vm1273_vm0, %v16673_v31  ;;  %v7319_v13 = vmul.f32 %v13117_v16, %v7308_v39  ;;  %13741 = vmatprep.subr.mxu1 %v18736_v51 }
 0xc16   : > { %v14138_v22 = vpop.eup %14137  ;;  %13725 = vmatprep.mubr.msk.f32.mxu0 %vm14289_vm2, %v18736_v51  ;;  %13742 = vmatpush3.msra.mxu1 %v7590_v37 }
 0xc17   : > { %v16680_v63 = vadd.f32 %v13118_v29, %v7319_v13  ;;  %v7309_v60 = vmul.f32 %v14138_v22, %v16635_v47  ;;  %13743 = vmatprep.subr.mxu1 %v18736_v51  ;;  %v7586_v47 = vld [vmem:[%s18396_s12 + $0x8] sm:$0xff] }
 0xc18   : > { %13744 = vmatpush3.msra.mxu1 %v7589_v61 }
 0xc19   : > { %13726 = vmatmul.mubr.msk.f32.gmra.mxu0 %vm1273_vm0, %v16680_v63  ;;  %v7320_v33 = vmul.f32 %v13117_v16, %v7309_v60  ;;  %13745 = vmatprep.subr.mxu1 %v18736_v51 }
 0xc1a   : > { %v14140_v52 = vpop.eup %14139  ;;  %13728 = vmatprep.mubr.msk.f32.mxu0 %vm14289_vm2, %v18736_v51  ;;  %13746 = vmatpush3.msra.mxu1 %v7588_v46 }
 0xc1b   : > { %v16687_v6 = vadd.f32 %v13118_v29, %v7320_v33  ;;  %v7310_v58 = vmul.f32 %v14140_v52, %v16640_v9  ;;  %13747 = vmatprep.subr.mxu1 %v18736_v51 }
 0xc1c   : > { %13748 = vmatpush3.msra.mxu1 %v7587_v20 }
 0xc1d   : > { %13729 = vmatmul.mubr.msk.f32.gmra.mxu0 %vm1273_vm0, %v16687_v6  ;;  %v7321_v44 = vmul.f32 %v13117_v16, %v7310_v58  ;;  %13749 = vmatprep.subr.mxu1 %v18736_v51 }
 0xc1e   : > { %v14142_v18 = vpop.eup %14141  ;;  %13731 = vmatprep.mubr.msk.f32.mxu0 %vm14289_vm2, %v18736_v51  ;;  %13750 = vmatpush3.msra.mxu1 %v7586_v47 }
 0xc1f   : > { %v16694_v12 = vadd.f32 %v13118_v29, %v7321_v44  ;;  %v7311_v5 = vmul.f32 %v14142_v18, %v16645_v42  ;;  %13751 = vmatprep.subr.mxu1 %v18736_v51 }
 0xc20   : > { %13752 = vmatpush3.msra.mxu1 %v7585_v19 }
 0xc21   : > { %13732 = vmatmul.mubr.msk.f32.gmra.mxu0 %vm1273_vm0, %v16694_v12  ;;  %v7322_v4 = vmul.f32 %v13117_v16, %v7311_v5  ;;  %13791 = vmatprep.subr.mxu1 %v18736_v51 }
 0xc22   : > { %13734 = vmatprep.mubr.msk.f32.mxu0 %vm14289_vm2, %v18736_v51 }
 0xc23   : > { %v16701_v57 = vadd.f32 %v13118_v29, %v7322_v4 }
 0xc25   : > { %13735 = vmatmul.mubr.msk.f32.gmra.mxu0 %vm1273_vm0, %v16701_v57 }
 0xc26   : > { %13776 = vmatprep.mubr.msk.f32.mxu0 %vm14289_vm2, %v18736_v51 }
 0xcd5   : > { %v7426_v15 = vpop.f32.mrf.mxu0 }
 0xcd6   : > { %v16742_v40 = vadd.f32 %v13119_v2, %v7426_v15 }
 0xcd7   : > { %v13724_v9 = vpop.f32.mrf.mxu0 }
 0xcd8   : > { %v16745_v34 = vmul.f32 0.70710677, %v16742_v40 }
 0xcd9   : > { %v7431_v10 = vpop.f32.mrf.mxu0 }
 0xcda   : > { %v7470_v53 = vand.u32 2147483647, %v16745_v34  ;;  %v16748_v14 = vadd.f32 %v13119_v2, %v7431_v10  ;;  %vm7460_vm7 = vcmp.ge.f32.partialorder %v16745_v34, 0.0 }
 0xcdb   : > { %v13727_v42 = vpop.f32.mrf.mxu0 }
 0xcdc   : > { %v7475_v30 = vmul.f32 0.3275911, %v7470_v53  ;;  %v16751_v35 = vmul.f32 0.70710677, %v16748_v14  ;;  %v7540_v36 = vsub.f32 0.0, %v7470_v53 }
 0xcdd   : > { %v7436_v59 = vpop.f32.mrf.mxu0 }
 0xcde   : > { %v7480_v24 = vadd.f32 1.0, %v7475_v30  ;;  %v7471_v54 = vand.u32 2147483647, %v16751_v35  ;;  %v16754_v3 = vadd.f32 %v13119_v2, %v7436_v59  ;;  %v7545_v62 = vmul.f32 %v7540_v36, %v7470_v53 }
 0xcdf   : > { %v13730_v21 = vpop.f32.mrf.mxu0  ;;  %vm7461_vm8 = vcmp.ge.f32.partialorder %v16751_v35, 0.0 }
 0xce0   : > { %14143 = vrcp.f32 %v7480_v24  ;;  %v7476_v0 = vmul.f32 0.3275911, %v7471_v54  ;;  %v16757_v50 = vmul.f32 0.70710677, %v16754_v3  ;;  %v7541_v29 = vsub.f32 0.0, %v7471_v54 }
 0xce1   : > { %v7441_v32 = vpop.f32.mrf.mxu0  ;;  %v7550_v60 = vmul.f32 1.442695, %v7545_v62 }
 0xce2   : > { %v7481_v49 = vadd.f32 1.0, %v7476_v0  ;;  %v16759_v41 = vadd.f32 %v13119_v2, %v7441_v32  ;;  %v7472_v17 = vand.u32 2147483647, %v16757_v50  ;;  %v7546_v33 = vmul.f32 %v7541_v29, %v7471_v54 }
 0xce3   : > { %v13733_v1 = vpop.f32.mrf.mxu0  ;;  %vm7462_vm10 = vcmp.ge.f32.partialorder %v16757_v50, 0.0 }
 0xce4   : > { %14145 = vrcp.f32 %v7481_v49  ;;  %v7477_v55 = vmul.f32 0.3275911, %v7472_v17  ;;  %v16763_v23 = vmul.f32 0.70710677, %v16759_v41  ;;  %v7542_v58 = vsub.f32 0.0, %v7472_v17 }
 0xce5   : > { %v7446_v8 = vpop.f32.mrf.mxu0  ;;  %v7552_v11 = vmul.f32 1.442695, %v7546_v33 }
 0xce6   : > { %v16765_v43 = vadd.f32 %v13119_v2, %v7446_v8  ;;  %v7482_v48 = vadd.f32 1.0, %v7477_v55  ;;  %v7473_v26 = vand.u32 2147483647, %v16763_v23  ;;  %v7547_v45 = vmul.f32 %v7542_v58, %v7472_v17 }
 0xce7   : > { %v13736_v28 = vpop.f32.mrf.mxu0  ;;  %vm7463_vm11 = vcmp.ge.f32.partialorder %v16763_v23, 0.0  ;;  %v16812_v23 = vld [vmem:[%s18400_s16 + $0x8] sm:$0xff] }
 0xce8   : > { %v16769_v16 = vmul.f32 0.70710677, %v16765_v43  ;;  %14147 = vrcp.f32 %v7482_v48  ;;  %v7478_v25 = vmul.f32 0.3275911, %v7473_v26  ;;  %v7543_v37 = vsub.f32 0.0, %v7473_v26 }
 0xce9   : > { %v7554_v9 = vmul.f32 1.442695, %v7547_v45 }
 0xcea   : > { %v7474_v27 = vand.u32 2147483647, %v16769_v16  ;;  %v7483_v56 = vadd.f32 1.0, %v7478_v25  ;;  %v7548_v10 = vmul.f32 %v7543_v37, %v7473_v26  ;;  %vm7464_vm12 = vcmp.ge.f32.partialorder %v16769_v16, 0.0 }
 0xcec   : > { %v7479_v39 = vmul.f32 0.3275911, %v7474_v27  ;;  %14149 = vrcp.f32 %v7483_v56  ;;  %v7544_v2 = vsub.f32 0.0, %v7474_v27  ;;  %v7556_v49 = vmul.f32 1.442695, %v7548_v10 }
 0xced   : > { %v14144_v13 = vpop.eup %14143 }
 0xcee   : > { %v7495_v22 = vmul.f32 1.0614054, %v14144_v13  ;;  %v7484_v52 = vadd.f32 1.0, %v7479_v39  ;;  %v7549_v21 = vmul.f32 %v7544_v2, %v7474_v27 }
 0xcf0   : > { %v7500_v44 = vadd.f32 -1.4531521, %v7495_v22  ;;  %14151 = vrcp.f32 %v7484_v52  ;;  %v7558_v25 = vmul.f32 1.442695, %v7549_v21 }
 0xcf1   : > { %v14146_v18 = vpop.eup %14145  ;;  %14153 = vpow2.f32 %v7550_v60 }
 0xcf2   : > { %v7505_v5 = vmul.f32 %v14144_v13, %v7500_v44  ;;  %v7496_v4 = vmul.f32 1.0614054, %v14146_v18  ;;  %14155 = vpow2.f32 %v7552_v11 }
 0xcf3   : > { %14157 = vpow2.f32 %v7554_v9 }
 0xcf4   : > { %v7510_v61 = vadd.f32 1.4214138, %v7505_v5  ;;  %v7501_v46 = vadd.f32 -1.4531521, %v7496_v4  ;;  %14159 = vpow2.f32 %v7556_v49  ;;  %v18541_v5 = vmov -1.0  }
 0xcf5   : > { %v14148_v20 = vpop.eup %14147  ;;  %14161 = vpow2.f32 %v7558_v25  ;;  %v7465_v4 = vsel %vm7460_vm7, 1.0, %v18541_v5  ;;  %v7466_v9 = vsel %vm7461_vm8, 1.0, %v18541_v5  ;;  %v7452_v25 = vmul.f32 0.5, %v16754_v3 }
 0xcf6   : > { %v7515_v47 = vmul.f32 %v14144_v13, %v7510_v61  ;;  %v7506_v19 = vmul.f32 %v14146_v18, %v7501_v46  ;;  %v7497_v15 = vmul.f32 1.0614054, %v14148_v20 }
 0xcf8   : > { %v7520_v53 = vadd.f32 -0.28449672, %v7515_v47  ;;  %v7511_v42 = vadd.f32 1.4214138, %v7506_v19  ;;  %v7502_v30 = vadd.f32 -1.4531521, %v7497_v15 }
 0xcf9   : > { %v14150_v59 = vpop.eup %14149  ;;  %v7450_v19 = vmul.f32 0.5, %v16742_v40 }
 0xcfa   : > { %v7525_v24 = vmul.f32 %v14144_v13, %v7520_v53  ;;  %v7516_v54 = vmul.f32 %v14146_v18, %v7511_v42  ;;  %v7507_v0 = vmul.f32 %v14148_v20, %v7502_v30  ;;  %v7498_v32 = vmul.f32 1.0614054, %v14150_v59 }
 0xcfc   : > { %v7530_v17 = vadd.f32 0.2548296, %v7525_v24  ;;  %v7521_v1 = vadd.f32 -0.28449672, %v7516_v54  ;;  %v7512_v8 = vadd.f32 1.4214138, %v7507_v0 }
 0xcfd   : > { %v16772_v55 = vpop.eup %14151  ;;  %v7503_v36 = vadd.f32 -1.4531521, %v7498_v32  ;;  %v7451_v0 = vmul.f32 0.5, %v16748_v14  ;;  %v7467_v14 = vsel %vm7462_vm10, 1.0, %v18541_v5 }
 0xcfe   : > { %v7535_v48 = vmul.f32 %v14144_v13, %v7530_v17  ;;  %v7526_v28 = vmul.f32 %v14146_v18, %v7521_v1  ;;  %v7499_v26 = vmul.f32 1.0614054, %v16772_v55  ;;  %v14154_v62 = vpop.eup %14153  ;;  %v7517_v29 = vmul.f32 %v14148_v20, %v7512_v8 }
 0xcff   : > { %v7508_v56 = vmul.f32 %v14150_v59, %v7503_v36  ;;  %v14156_v13 = vpop.eup %14155 }
 0xd00   : > { %v7560_v27 = vmul.f32 %v14154_v62, %v7535_v48  ;;  %v7531_v39 = vadd.f32 0.2548296, %v7526_v28  ;;  %v7504_v22 = vadd.f32 -1.4531521, %v7499_v26  ;;  %v7522_v60 = vadd.f32 -0.28449672, %v7517_v29  ;;  %v14158_v42 = vpop.eup %14157 }
 0xd01   : > { %v7513_v33 = vadd.f32 1.4214138, %v7508_v56  ;;  %v14160_v50 = vpop.eup %14159  ;;  %v16800_v48 = vld [vmem:[%s18400_s16 + $0x10] sm:$0xff] }
 0xd02   : > { %v7565_v52 = vsub.f32 1.0, %v7560_v27  ;;  %v7536_v58 = vmul.f32 %v14146_v18, %v7531_v39  ;;  %v7509_v44 = vmul.f32 %v16772_v55, %v7504_v22  ;;  %v7527_v11 = vmul.f32 %v14148_v20, %v7522_v60  ;;  %v14162_v26 = vpop.eup %14161  ;;  %v16821_v39 = vld [vmem:[%s18400_s16] sm:$0xff] }
 0xd03   : > { %v7518_v45 = vmul.f32 %v14150_v59, %v7513_v33  ;;  %v7453_v60 = vmul.f32 0.5, %v16759_v41  ;;  %v13125_v41 = vld [vmem:[%s18397_s13] ss:$0 sm:$0xff] }
 0xd04   : > { %v7570_v37 = vmul.f32 %v7565_v52, %v7465_v4  ;;  %v7561_v34 = vmul.f32 %v14156_v13, %v7536_v58  ;;  %v7514_v61 = vadd.f32 1.4214138, %v7509_v44  ;;  %v7532_v46 = vadd.f32 0.2548296, %v7527_v11 }
 0xd05   : > { %v7523_v47 = vadd.f32 -0.28449672, %v7518_v45  ;;  %v7469_v52 = vsel %vm7464_vm12, 1.0, %v18541_v5  ;;  %v7454_v44 = vmul.f32 0.5, %v16765_v43 }
 0xd06   : > { %v7575_v2 = vadd.f32 1.0, %v7570_v37  ;;  %v7566_v18 = vsub.f32 1.0, %v7561_v34  ;;  %v7519_v15 = vmul.f32 %v16772_v55, %v7514_v61  ;;  %v7537_v10 = vmul.f32 %v14148_v20, %v7532_v46  ;;  %v16791_v20 = vld [vmem:[%s18400_s16 + $0x18] sm:$0xff] }
 0xd07   : > { %v7528_v53 = vmul.f32 %v14150_v59, %v7523_v47 }
 0xd08   : > { %v7580_v30 = vmul.f32 %v7575_v2, %v7450_v19  ;;  %v7571_v24 = vmul.f32 %v7566_v18, %v7466_v9  ;;  %v7524_v54 = vadd.f32 -0.28449672, %v7519_v15  ;;  %v7562_v35 = vmul.f32 %v14158_v42, %v7537_v10 }
 0xd09   : > { %v7533_v21 = vadd.f32 0.2548296, %v7528_v53 }
 0xd0a   : > { %v7576_v40 = vadd.f32 1.0, %v7571_v24  ;;  %v7529_v32 = vmul.f32 %v16772_v55, %v7524_v54  ;;  %13754 = vmatmul.mubr.msk.f32.vlgmr.msra.gmra.mxu1 %vm7600_vm9, %v7580_v30  ;;  %v7567_v49 = vsub.f32 1.0, %v7562_v35 }
 0xd0b   : > { %v7538_v17 = vmul.f32 %v14150_v59, %v7533_v21  ;;  %13756 = vmatprep.mubr.msk.f32.mxu1 %vm14289_vm2, %v18736_v51  ;;  %13792 = vmatpush3.msra.mxu1 %v16791_v20 }
 0xd0c   : > { %v7581_v1 = vmul.f32 %v7576_v40, %v7451_v0  ;;  %v7534_v8 = vadd.f32 0.2548296, %v7529_v32  ;;  %13793 = vmatprep.subr.mxu1 %v18736_v51  ;;  %v7572_v36 = vmul.f32 %v7567_v49, %v7467_v14 }
 0xd0d   : > { %v7563_v59 = vmul.f32 %v14160_v50, %v7538_v17  ;;  %13794 = vmatpush3.msra.mxu1 %v16800_v48 }
 0xd0e   : > { %v7539_v28 = vmul.f32 %v16772_v55, %v7534_v8  ;;  %13757 = vmatmul.mubr.msk.f32.gmra.mxu1 %vm7600_vm9, %v7581_v1  ;;  %13795 = vmatprep.subr.mxu1 %v18736_v51  ;;  %v7577_v62 = vadd.f32 1.0, %v7572_v36  ;;  %v7468_v55 = vsel %vm7463_vm11, 1.0, %v18541_v5 }
 0xd0f   : > { %v7568_v29 = vsub.f32 1.0, %v7563_v59  ;;  %13759 = vmatprep.mubr.msk.f32.mxu1 %vm14289_vm2, %v18736_v51  ;;  %13796 = vmatpush3.msra.mxu1 %v16812_v23 }
 0xd10   : > { %v7564_v56 = vmul.f32 %v14162_v26, %v7539_v28  ;;  %13797 = vmatprep.subr.mxu1 %v18736_v51  ;;  %v7582_v3 = vmul.f32 %v7577_v62, %v7452_v25 }
 0xd11   : > { %v7573_v27 = vmul.f32 %v7568_v29, %v7468_v55  ;;  %13798 = vmatpush3.msra.mxu1 %v16821_v39 }
 0xd12   : > { %v7569_v22 = vsub.f32 1.0, %v7564_v56  ;;  %13760 = vmatmul.mubr.msk.f32.gmra.mxu1 %vm7600_vm9, %v7582_v3 }
 0xd13   : > { %v7578_v33 = vadd.f32 1.0, %v7573_v27  ;;  %13762 = vmatprep.mubr.msk.f32.mxu1 %vm14289_vm2, %v18736_v51 }
 0xd14   : > { %v7574_v16 = vmul.f32 %v7569_v22, %v7469_v52 }
 0xd15   : > { %v7583_v58 = vmul.f32 %v7578_v33, %v7453_v60 }
 0xd16   : > { %v7579_v13 = vadd.f32 1.0, %v7574_v16  ;;  %v13136_v16 = vld [vmem:[%s18388_s4 + $0x38] sm:$0xff] }
 0xd17   : > { %13763 = vmatmul.mubr.msk.f32.gmra.mxu1 %vm7600_vm9, %v7583_v58  ;;  %v13135_v58 = vld [vmem:[%s18388_s4 + $0x30] sm:$0xff]  ;;  %13769 = vmatpush3.msra.mxu0 %v13136_v16 }
 0xd18   : > { %v7584_v4 = vmul.f32 %v7579_v13, %v7454_v44  ;;  %13765 = vmatprep.mubr.msk.f32.mxu1 %vm14289_vm2, %v18736_v51  ;;  %13770 = vmatprep.subr.mxu0 %v18736_v51  ;;  %v13134_v44 = vld [vmem:[%s18388_s4 + $0x28] sm:$0xff]  ;;  %v13133_v13 = vld [vmem:[%s18388_s4 + $0x20] sm:$0xff] }
 0xd19   : > { %13771 = vmatpush3.msra.mxu0 %v13135_v58 }
 0xd1a   : > { %13772 = vmatprep.subr.mxu0 %v18736_v51 }
 0xd1b   : > { %13766 = vmatmul.mubr.msk.f32.gmra.mxu1 %vm7600_vm9, %v7584_v4  ;;  %13773 = vmatpush3.msra.mxu0 %v13134_v44 }
 0xd1c   : > { %13799 = vmatprep.mubr.msk.f32.mxu1 %vm14289_vm2, %v18736_v51  ;;  %13774 = vmatprep.subr.mxu0 %v18736_v51 }
 0xd1d   : > { %13775 = vmatpush3.msra.mxu0 %v13133_v13 }
 0xd1e   : > { %13814 = vmatprep.subr.mxu0 %v18736_v51 }
 0xdca   : > { %v7682_v11 = vpop.f32.mrf.mxu1 }
 0xdcb   : > { %v7683_v45 = vadd.f32 %v13125_v41, %v7682_v11 }
 0xdcc   : > { %v13755_v37 = vpop.f32.mrf.mxu1 }
 0xdcd   : > { %v7706_v43 = vadd.f32 %v7683_v45, %v16673_v31 }
 0xdce   : > { %v7687_v34 = vpop.f32.mrf.mxu1 }
 0xdcf   : > { %v7688_v61 = vadd.f32 %v13125_v41, %v7687_v34  ;;  %v7713_v46 = vsel %vm1273_vm0, %v7706_v43, 0.0 }
 0xdd0   : > { %7714 = vadd.xlane.f32.xlu0 %v7713_v46  ;;  %v13758_v47 = vpop.f32.mrf.mxu1 }
 0xdd1   : > { %v7707_v19 = vadd.f32 %v7688_v61, %v16680_v63 }
 0xdd2   : > { %v7692_v2 = vpop.f32.mrf.mxu1 }
 0xdd3   : > { %v7716_v18 = vsel %vm1273_vm0, %v7707_v19, 0.0  ;;  %v7693_v15 = vadd.f32 %v13125_v41, %v7692_v2 }
 0xdd4   : > { %7717 = vadd.xlane.f32.xlu1 %v7716_v18  ;;  %v13761_v9 = vpop.f32.mrf.mxu1 }
 0xdd5   : > { %v7708_v10 = vadd.f32 %v7693_v15, %v16687_v6  ;;  %v13131_v9 = vld [vmem:[%s18398_s14] ss:$0 sm:$0xff] }
 0xdd7   : > { %v7697_v53 = vpop.f32.mrf.mxu1  ;;  %v7719_v31 = vsel %vm1273_vm0, %v7708_v10, 0.0 }
 0xdd8   : > { %v7698_v42 = vadd.f32 %v13125_v41, %v7697_v53  ;;  %7720 = vadd.xlane.f32.xlu0 %v7719_v31  ;;  %v13132_v31 = vld [vmem:[%s18399_s15] ss:$0 sm:$0xff] }
 0xdd9   : > { %v13764_v30 = vpop.f32.mrf.mxu1 }
 0xdda   : > { %v7709_v24 = vadd.f32 %v7698_v42, %v16694_v12 }
 0xddb   : > { %v7702_v54 = vpop.f32.mrf.mxu1 }
 0xddc   : > { %v7703_v35 = vadd.f32 %v13125_v41, %v7702_v54  ;;  %v7722_v63 = vsel %vm1273_vm0, %v7709_v24, 0.0 }
 0xddd   : > { %7723 = vadd.xlane.f32.xlu1 %v7722_v63  ;;  %v13767_v21 = vpop.f32.mrf.mxu1 }
 0xdde   : > { %v7710_v0 = vadd.f32 %v7703_v35, %v16701_v57 }
 0xde0   : > { %v7725_v40 = vsel %vm1286_vm1, %v7710_v0, 0.0 }
 0xde1   : > { %7726 = vadd.xlane.f32.xlu0 %v7725_v40 }
 0xe59   : > { %v7715_v6 = vpop.xlane.xlu0 %7714 }
 0xe5a   : > { %v7728_v32 = vmul.f32 0.03125, %v7715_v6 }
 0xe5c   : > { %v7733_v49 = vsub.f32 %v7706_v43, %v7728_v32 }
 0xe5d   : > { %v7718_v17 = vpop.xlane.xlu1 %7717 }
 0xe5e   : > { %v7729_v50 = vmul.f32 0.03125, %v7718_v17  ;;  %v7738_v1 = vmul.f32 %v7733_v49, %v7733_v49 }
 0xe60   : > { %v16849_v14 = vsub.f32 %v7707_v19, %v7729_v50  ;;  %v7743_v12 = vsel %vm1273_vm0, %v7738_v1, 0.0 }
 0xe61   : > { %7744 = vadd.xlane.f32.xlu1 %v7743_v12  ;;  %v7721_v8 = vpop.xlane.xlu0 %7720 }
 0xe62   : > { %v7739_v36 = vmul.f32 %v16849_v14, %v16849_v14  ;;  %v7730_v59 = vmul.f32 0.03125, %v7721_v8 }
 0xe64   : > { %v7746_v57 = vsel %vm1273_vm0, %v7739_v36, 0.0  ;;  %v16855_v28 = vsub.f32 %v7708_v10, %v7730_v59 }
 0xe65   : > { %7747 = vadd.xlane.f32.xlu0 %v7746_v57 }
 0xe66   : > { %v7724_v26 = vpop.xlane.xlu1 %7723  ;;  %v7740_v62 = vmul.f32 %v16855_v28, %v16855_v28 }
 0xe67   : > { %v7731_v25 = vmul.f32 0.03125, %v7724_v26 }
 0xe68   : > { %v7749_v55 = vsel %vm1273_vm0, %v7740_v62, 0.0 }
 0xe69   : > { %v16859_v29 = vsub.f32 %v7709_v24, %v7731_v25  ;;  %7750 = vadd.xlane.f32.xlu1 %v7749_v55 }
 0xe6a   : > { %v7727_v56 = vpop.xlane.xlu0 %7726 }
 0xe6b   : > { %v7732_v3 = vmul.f32 0.03125, %v7727_v56  ;;  %v7741_v27 = vmul.f32 %v16859_v29, %v16859_v29 }
 0xe6d   : > { %v16864_v22 = vsub.f32 %v7710_v0, %v7732_v3  ;;  %v7752_v60 = vsel %vm1273_vm0, %v7741_v27, 0.0 }
 0xe6e   : > { %7753 = vadd.xlane.f32.xlu0 %v7752_v60 }
 0xe6f   : > { %v7742_v33 = vmul.f32 %v16864_v22, %v16864_v22 }
 0xe71   : > { %v7755_v52 = vsel %vm1286_vm1, %v7742_v33, 0.0 }
 0xe72   : > { %7756 = vadd.xlane.f32.xlu1 %v7755_v52 }
 0xeea   : > { %v7745_v4 = vpop.xlane.xlu1 %7744 }
 0xeeb   : > { %v7758_v41 = vmul.f32 0.03125, %v7745_v4 }
 0xeed   : > { %v7763_v11 = vadd.f32 1e-12, %v7758_v41 }
 0xeee   : > { %v7748_v45 = vpop.xlane.xlu0 %7747 }
 0xeef   : > { %14163 = vrsqrt.f32 %v7763_v11  ;;  %v7759_v37 = vmul.f32 0.03125, %v7748_v45 }
 0xef1   : > { %v7764_v43 = vadd.f32 1e-12, %v7759_v37 }
 0xef2   : > { %v7751_v34 = vpop.xlane.xlu1 %7750 }
 0xef3   : > { %14165 = vrsqrt.f32 %v7764_v43  ;;  %v7760_v61 = vmul.f32 0.03125, %v7751_v34 }
 0xef5   : > { %v7765_v46 = vadd.f32 1e-12, %v7760_v61 }
 0xef7   : > { %v7754_v47 = vpop.xlane.xlu0 %7753  ;;  %14167 = vrsqrt.f32 %v7765_v46 }
 0xef8   : > { %v7761_v19 = vmul.f32 0.03125, %v7754_v47 }
 0xefa   : > { %v7766_v2 = vadd.f32 1e-12, %v7761_v19 }
 0xefb   : > { %v7757_v18 = vpop.xlane.xlu1 %7756 }
 0xefc   : > { %v14164_v15 = vpop.eup %14163  ;;  %14169 = vrsqrt.f32 %v7766_v2  ;;  %v7762_v10 = vmul.f32 0.03125, %v7757_v18 }
 0xefd   : > { %v7773_v53 = vmul.f32 %v14164_v15, %v7733_v49 }
 0xefe   : > { %v7767_v42 = vadd.f32 1e-12, %v7762_v10 }
 0xeff   : > { %v7784_v30 = vmul.f32 %v13131_v9, %v7773_v53 }
 0xf00   : > { %v14166_v24 = vpop.eup %14165  ;;  %14171 = vrsqrt.f32 %v7767_v42 }
 0xf01   : > { %v16892_v54 = vadd.f32 %v13132_v31, %v7784_v30  ;;  %v7774_v35 = vmul.f32 %v14166_v24, %v16849_v14  ;;  %v13138_v14 = vld [vmem:[%s18389_s5 + $0x1] ss:$0 sm:$0xff] }
 0xf03   : > { %18742 = vst [vmem:[#allocation20_spill] sm:$0xff] %v16892_v54  ;;  %13777 = vmatmul.mubr.msk.f32.vlgmr.msra.gmra.mxu0 %vm1273_vm0, %v16892_v54  ;;  %v7785_v63 = vmul.f32 %v13131_v9, %v7774_v35 }
 0xf04   : > { %13779 = vmatprep.mubr.msk.f32.mxu0 %vm14289_vm2, %v18736_v51  ;;  %13815 = vmatpush3.msra.mxu0 %v16791_v20  ;;  %v14168_v21 = vpop.eup %14167 }
 0xf05   : > { %v16900_v0 = vadd.f32 %v13132_v31, %v7785_v63  ;;  %13816 = vmatprep.subr.mxu0 %v18736_v51  ;;  %v7775_v40 = vmul.f32 %v14168_v21, %v16855_v28 }
 0xf06   : > { %13817 = vmatpush3.msra.mxu0 %v16800_v48 }
 0xf07   : > { %18743 = vst [vmem:[#allocation21_spill] sm:$0xff] %v16900_v0  ;;  %13780 = vmatmul.mubr.msk.f32.gmra.mxu0 %vm1273_vm0, %v16900_v0  ;;  %13818 = vmatprep.subr.mxu0 %v18736_v51  ;;  %v7786_v6 = vmul.f32 %v13131_v9, %v7775_v40 }
 0xf08   : > { %13782 = vmatprep.mubr.msk.f32.mxu0 %vm14289_vm2, %v18736_v51  ;;  %13819 = vmatpush3.msra.mxu0 %v16812_v23 }
 0xf09   : > { %v14170_v20 = vpop.eup %14169  ;;  %13820 = vmatprep.subr.mxu0 %v18736_v51  ;;  %v16912_v32 = vadd.f32 %v13132_v31, %v7786_v6 }
 0xf0a   : > { %v7776_v49 = vmul.f32 %v14170_v20, %v16859_v29  ;;  %13821 = vmatpush3.msra.mxu0 %v16821_v39 }
 0xf0b   : > { %18744 = vst [vmem:[#allocation22_spill] sm:$0xff] %v16912_v32  ;;  %13783 = vmatmul.mubr.msk.f32.gmra.mxu0 %vm1273_vm0, %v16912_v32 }
 0xf0c   : > { %v7787_v48 = vmul.f32 %v13131_v9, %v7776_v49  ;;  %13785 = vmatprep.mubr.msk.f32.mxu0 %vm14289_vm2, %v18736_v51 }
 0xf0d   : > { %v14172_v17 = vpop.eup %14171 }
 0xf0e   : > { %v16920_v50 = vadd.f32 %v13132_v31, %v7787_v48  ;;  %v7777_v23 = vmul.f32 %v14172_v17, %v16864_v22 }
 0xf10   : > { %18745 = vst [vmem:[#allocation11_spill] sm:$0xff] %v16920_v50  ;;  %13786 = vmatmul.mubr.msk.f32.gmra.mxu0 %vm1273_vm0, %v16920_v50  ;;  %v7788_v1 = vmul.f32 %v13131_v9, %v7777_v23 }
 0xf11   : > { %13788 = vmatprep.mubr.msk.f32.mxu0 %vm14289_vm2, %v18736_v51 }
 0xf12   : > { %v16927_v39 = vadd.f32 %v13132_v31, %v7788_v1 }
 0xf14   : > { %18746 = vst [vmem:[#allocation23_spill] sm:$0xff] %v16927_v39  ;;  %13789 = vmatmul.mubr.msk.f32.gmra.mxu0 %vm1273_vm0, %v16927_v39 }
 0xf15   : > { %13822 = vmatprep.mubr.msk.f32.mxu0 %vm14289_vm2, %v18736_v51 }
 0xfc3   : > { %v7894_v12 = vpop.f32.mrf.mxu0 }
 0xfc4   : > { %v7895_v8 = vadd.f32 %v13138_v14, %v7894_v12 }
 0xfc5   : > { %v13778_v36 = vpop.f32.mrf.mxu0 }
 0xfc6   : > { %8023 = vrot.lane.b32.xlu0 %v7895_v8, %s14290_s25  ;;  %13800 = vmatmul.mubr.msk.f32.vlgmr.msra.gmra.mxu1 %vm1273_vm0, %v7895_v8  ;;  %v8133_v33 = vcombine.high %v7895_v8, %v7895_v8  ;;  %v8140_v58 = vrot.slane %v7895_v8, %v14415_v7 }
 0xfc7   : > { %v7899_v59 = vpop.f32.mrf.mxu0  ;;  %13802 = vmatprep.mubr.msk.f32.mxu1 %vm14289_vm2, %v18736_v51 }
 0xfc8   : > { %v7900_v57 = vadd.f32 %v13138_v14, %v7899_v59  ;;  %v8147_v44 = vrot.slane %v8133_v33, %v14415_v7  ;;  %v8148_v43 = vcombine.high %v8140_v58, %v8140_v58  ;;  %v16970_v9 = vrot.slane %v8140_v58, %v14415_v7 }
 0xfc9   : > { %v13781_v28 = vpop.f32.mrf.mxu0 }
 0xfca   : > { %8025 = vrot.lane.b32.xlu1 %v7900_v57, %s14290_s25  ;;  %13803 = vmatmul.mubr.msk.f32.gmra.mxu1 %vm1273_vm0, %v7900_v57  ;;  %v8182_v16 = vcombine.high %v7900_v57, %v7900_v57  ;;  %v8189_v41 = vrot.slane %v7900_v57, %v14415_v7  ;;  %v8149_v34 = vcombine.high %v8147_v44, %v8147_v44 }
 0xfcb   : > { %v7904_v26 = vpop.f32.mrf.mxu0  ;;  %13805 = vmatprep.mubr.msk.f32.mxu1 %vm14289_vm2, %v18736_v51  ;;  %18749 = vst [vmem:[#allocation35_spill] sm:$0xff] %v16970_v9  ;;  %v16973_v10 = vrot.slane %v8147_v44, %v14415_v7  ;;  %v16979_v31 = vrot.slane %v8148_v43, %v14415_v7 }
 0xfcc   : > { %v7905_v25 = vadd.f32 %v13138_v14, %v7904_v26  ;;  %v8196_v45 = vrot.slane %v8182_v16, %v14415_v7  ;;  %v8197_v47 = vcombine.high %v8189_v41, %v8189_v41  ;;  %v16967_v15 = vrot.slane %v8189_v41, %v14415_v7 }
 0xfcd   : > { %v13784_v62 = vpop.f32.mrf.mxu0  ;;  %18750 = vst [vmem:[#allocation30_spill] sm:$0xff] %v16973_v10  ;;  %18752 = vst [vmem:[#allocation34_spill] sm:$0xff] %v16979_v31  ;;  %v16982_v30 = vrot.slane %v8149_v34, %v14415_v7  ;;  %v10291_v36 = vcombine.low %v16970_v9, %v16979_v31  ;;  %v13170_v59 = vcombine.high %v16970_v9, %v16979_v31 }
 0xfce   : > { %8027 = vrot.lane.b32.xlu1 %v7905_v25, %s14290_s25  ;;  %13806 = vmatmul.mubr.msk.f32.gmra.mxu1 %vm1273_vm0, %v7905_v25  ;;  %v8231_v13 = vcombine.high %v7905_v25, %v7905_v25  ;;  %v8238_v37 = vrot.slane %v7905_v25, %v14415_v7  ;;  %v8198_v18 = vcombine.high %v8196_v45, %v8196_v45 }
 0xfcf   : > { %13808 = vmatprep.mubr.msk.f32.mxu1 %vm14289_vm2, %v18736_v51  ;;  %18748 = vst [vmem:[#allocation28_spill] sm:$0xff] %v16967_v15  ;;  %v16976_v53 = vrot.slane %v8196_v45, %v14415_v7  ;;  %18753 = vst [vmem:[#allocation37_spill] sm:$0xff] %v16982_v30  ;;  %v16989_v63 = vrot.slane %v8197_v47, %v14415_v7  ;;  %v17008_v17 = vcombine.high %v16967_v15, %v16967_v15 }
 0xfd0   : > { %v7909_v29 = vpop.f32.mrf.mxu0  ;;  %v8245_v61 = vrot.slane %v8231_v13, %v14415_v7  ;;  %v8246_v42 = vcombine.high %v8238_v37, %v8238_v37  ;;  %v17001_v20 = vrot.slane %v8198_v18, %v14415_v7  ;;  %v17004_v49 = vrot.slane %v8238_v37, %v14415_v7 }
 0xfd1   : > { %v7910_v55 = vadd.f32 %v13138_v14, %v7909_v29  ;;  %18751 = vst [vmem:[#allocation33_spill] sm:$0xff] %v16976_v53  ;;  %18754 = vst [vmem:[#allocation31_spill] sm:$0xff] %v16989_v63  ;;  %v10293_v57 = vcombine.low %v16973_v10, %v16982_v30  ;;  %v17036_v26 = vcombine.high %v16989_v63, %v16989_v63 }
 0xfd2   : > { %v13787_v56 = vpop.f32.mrf.mxu0  ;;  %v8247_v24 = vcombine.high %v8245_v61, %v8245_v61  ;;  %18758 = vst [vmem:[#allocation43_spill] sm:$0xff] %v17001_v20  ;;  %18759 = vst [vmem:[#allocation38_spill] sm:$0xff] %v17004_v49  ;;  %v17011_v23 = vrot.slane %v8245_v61, %v14415_v7  ;;  %v17014_v1 = vrot.slane %v8246_v42, %v14415_v7 }
 0xfd3   : > { %8029 = vrot.lane.b32.xlu1 %v7910_v55, %s14290_s25  ;;  %13809 = vmatmul.mubr.msk.f32.gmra.mxu1 %vm1273_vm0, %v7910_v55  ;;  %v8280_v22 = vcombine.high %v7910_v55, %v7910_v55  ;;  %v8287_v11 = vrot.slane %v7910_v55, %v14415_v7  ;;  %18760 = vst [vmem:[#allocation46_spill] sm:$0xff] %v17008_v17  ;;  %18766 = vst [vmem:[#allocation50_spill] sm:$0xff] %v17036_v26 }
 0xfd4   : > { %v7914_v3 = vpop.f32.mrf.mxu0  ;;  %13811 = vmatprep.mubr.msk.f32.mxu1 %vm14289_vm2, %v18736_v51  ;;  %18761 = vst [vmem:[#allocation41_spill] sm:$0xff] %v17011_v23  ;;  %18762 = vst [vmem:[#allocation45_spill] sm:$0xff] %v17014_v1  ;;  %v17023_v8 = vrot.slane %v8247_v24, %v14415_v7  ;;  %v17051_v55 = vcombine.high %v17001_v20, %v17001_v20  ;;  %v13171_v56 = vcombine.high %v16973_v10, %v16982_v30 }
 0xfd5   : > { %v7915_v27 = vadd.f32 %v13138_v14, %v7914_v3  ;;  %v8294_v52 = vrot.slane %v8280_v22, %v14415_v7  ;;  %v8295_v19 = vcombine.high %v8287_v11, %v8287_v11  ;;  %v17018_v14 = vcombine.high %v16976_v53, %v16976_v53 }
 0xfd6   : > { %v13790_v60 = vpop.f32.mrf.mxu0  ;;  %18764 = vst [vmem:[#allocation47_spill] sm:$0xff] %v17023_v8  ;;  %v17032_v28 = vrot.slane %v8287_v11, %v14415_v7  ;;  %18770 = vst [vmem:[#allocation52_spill] sm:$0xff] %v17051_v55  ;;  %v10301_v3 = vrot.slane %v10291_v36, %v14415_v7  ;;  %v10308_v22 = vrot.slane %v13170_v59, %v14415_v7 }
 0xfd7   : > { %8031 = vrot.lane.b32.xlu0 %v7915_v27, %s14290_s25  ;;  %13812 = vmatmul.mubr.msk.f32.gmra.mxu1 %vm1273_vm0, %v7915_v27  ;;  %v8296_v4 = vcombine.high %v8294_v52, %v8294_v52  ;;  %v8335_v2 = vrot.slane %v7915_v27, %v14415_v7  ;;  %v16992_v21 = vrot.slane %v8294_v52, %v14415_v7 }
 0xfd8   : > { %v16995_v40 = vrot.slane %v8295_v19, %v14415_v7  ;;  %18763 = vst [vmem:[#allocation44_spill] sm:$0xff] %v17018_v14  ;;  %18765 = vst [vmem:[#allocation49_spill] sm:$0xff] %v17032_v28  ;;  %v10315_v60 = vrot.slane %v10293_v57, %v14415_v7  ;;  %v13178_v33 = vcombine.high %v17004_v49, %v17014_v1 }
 0xfd9   : > { %v16963_v46 = vrot.slane %v8296_v4, %v14415_v7  ;;  %18755 = vst [vmem:[#allocation36_spill] sm:$0xff] %v16992_v21  ;;  %v16998_v6 = vrot.slane %v8335_v2, %v14415_v7  ;;  %v8336_v48 = vcombine.high %v8335_v2, %v8335_v2  ;;  %v17044_v62 = vcombine.high %v16992_v21, %v16992_v21 }
 0xfda   : > { %18756 = vst [vmem:[#allocation40_spill] sm:$0xff] %v16995_v40  ;;  %v17040_v25 = vcombine.high %v16995_v40, %v16995_v40  ;;  %v10322_v52 = vrot.slane %v13171_v56, %v14415_v7  ;;  %v10594_v16 = vcombine.low %v17011_v23, %v17023_v8  ;;  %v13179_v58 = vcombine.high %v17011_v23, %v17023_v8 }
 0xfdb   : > { %18747 = vst [vmem:[#allocation32_spill] sm:$0xff] %v16963_v46  ;;  %v16986_v35 = vcombine.high %v16963_v46, %v16963_v46  ;;  %18757 = vst [vmem:[#allocation39_spill] sm:$0xff] %v16998_v6  ;;  %v17047_v29 = vrot.slane %v8336_v48, %v14415_v7  ;;  %v17058_v27 = vcombine.high %v16998_v6, %v16998_v6 }
 0xfdc   : > { %18767 = vst [vmem:[#allocation51_spill] sm:$0xff] %v17040_v25  ;;  %18768 = vst [vmem:[#allocation48_spill] sm:$0xff] %v17044_v62  ;;  %v10596_v44 = vcombine.low %v17032_v28, %v16995_v40  ;;  %v10744_v13 = vcombine.low %v17040_v25, %v16992_v21  ;;  %v10745_v4 = vcombine.low %v16963_v46, %v17044_v62 }
 0xfdd   : > { %v10746_v12 = vcombine.low %v16986_v35, %v16998_v6  ;;  %18769 = vst [vmem:[#allocation18_spill] sm:$0xff] %v17047_v29  ;;  %18771 = vst [vmem:[#allocation42_spill] sm:$0xff] %v17058_v27  ;;  %v10323_v41 = vcombine.low %v10301_v3, %v10308_v22  ;;  %v10603_v11 = vrot.slane %v13178_v33, %v14415_v7 }
 0xfde   : > { %v10324_v45 = vcombine.low %v10315_v60, %v10322_v52  ;;  %v10610_v37 = vrot.slane %v10594_v16, %v14415_v7  ;;  %v10617_v43 = vrot.slane %v13179_v58, %v14415_v7  ;;  %v10624_v34 = vrot.slane %v10596_v44, %v14415_v7 }
 0xfdf   : > { %v10747_v61 = vcombine.low %v17047_v29, %v17058_v27  ;;  %v10331_v47 = vrot.slane %v10323_v41, %v14415_v7  ;;  %v10442_v19 = vcombine.low %v16989_v63, %v17008_v17  ;;  %v10443_v2 = vcombine.low %v17036_v26, %v16976_v53 }
 0xfe0   : > { %v10338_v18 = vrot.slane %v10324_v45, %v14415_v7  ;;  %v10625_v42 = vcombine.low %v10603_v11, %v10610_v37  ;;  %v10626_v24 = vcombine.low %v10617_v43, %v10624_v34  ;;  %v10444_v48 = vcombine.low %v17001_v20, %v17018_v14 }
 0xfe1   : > { %v10445_v36 = vcombine.low %v17051_v55, %v17004_v49  ;;  %v10452_v59 = vrot.slane %v10442_v19, %v14415_v7  ;;  %v10459_v57 = vrot.slane %v10443_v2, %v14415_v7  ;;  %v10754_v16 = vrot.slane %v10744_v13, %v14415_v7 }
 0xfe2   : > { %v17093_v56 = vcombine.low %v10331_v47, %v10338_v18  ;;  %v10633_v3 = vrot.slane %v10625_v42, %v14415_v7  ;;  %v10640_v22 = vrot.slane %v10626_v24, %v14415_v7  ;;  %v10466_v60 = vrot.slane %v10444_v48, %v14415_v7 }
 0xfe3   : > { %v10473_v33 = vrot.slane %v10445_v36, %v14415_v7  ;;  %v10474_v52 = vcombine.low %v10452_v59, %v10459_v57  ;;  %v10761_v44 = vrot.slane %v10745_v4, %v14415_v7  ;;  %v10768_v41 = vrot.slane %v10746_v12, %v14415_v7 }
 0xfe4   : > { %18772 = vst [vmem:[#allocation53_spill] sm:$0xff] %v17093_v56  ;;  %v17100_v58 = vcombine.low %v10633_v3, %v10640_v22  ;;  %v10775_v11 = vrot.slane %v10747_v61, %v14415_v7  ;;  %v17128_v48 = vcombine.high %v16970_v9, %v16970_v9  ;;  %v17132_v36 = vcombine.high %v16973_v10, %v16973_v10  ;;  %v18780_v3 = vld [vmem:[#allocation7_spill] sm:$0xff] }
 0xfe5   : > { %v10475_v45 = vcombine.low %v10466_v60, %v10473_v33  ;;  %v10776_v37 = vcombine.low %v10754_v16, %v10761_v44  ;;  %v10482_v34 = vrot.slane %v10474_v52, %v14415_v7  ;;  %v17136_v59 = vcombine.high %v16979_v31, %v16979_v31  ;;  %v18781_v60 = vld [vmem:[#allocation9_spill] sm:$0xff]  ;;  %v18782_v52 = vld [vmem:[#allocation8_spill] sm:$0xff]  ;;  %v18783_v44 = vld [vmem:[#allocation15_spill] sm:$0xff] }
 0xfe6   : > { %18773 = vst [vmem:[#allocation2_spill] sm:$0xff] %v17100_v58  ;;  %v10777_v43 = vcombine.low %v10768_v41, %v10775_v11  ;;  %18776 = vst [vmem:[#allocation5_spill] sm:$0xff] %v17128_v48  ;;  %v17140_v57 = vcombine.high %v16982_v30, %v16982_v30  ;;  %v17144_v22 = vmul.f32 %v16970_v9, %v18780_v3  ;;  %v18784_v11 = vld [vmem:[#allocation10_spill] sm:$0xff]  ;;  %v18802_v9 = vld [vmem:[#allocation24_spill] sm:$0xff] }
 0xfe7   : > { %v10489_v47 = vrot.slane %v10475_v45, %v14415_v7  ;;  %v10784_v19 = vrot.slane %v10776_v37, %v14415_v7  ;;  %18777 = vst [vmem:[#allocation6_spill] sm:$0xff] %v17132_v36  ;;  %18778 = vst [vmem:[#allocation64_spill] sm:$0xff] %v17136_v59  ;;  %v17148_v33 = vmul.f32 %v16979_v31, %v18781_v60  ;;  %v18785_v37 = vld [vmem:[#allocation17_spill] sm:$0xff] }
 0xfe8   : > { %v10791_v2 = vrot.slane %v10777_v43, %v14415_v7  ;;  %18779 = vst [vmem:[#allocation65_spill] sm:$0xff] %v17140_v57  ;;  %v17152_v16 = vmul.f32 %v17128_v48, %v18782_v52  ;;  %v17156_v41 = vmul.f32 %v17136_v59, %v18783_v44  ;;  %v17160_v45 = vmul.f32 %v16973_v10, %v18784_v11  ;;  %v18800_v10 = vld [vmem:[#allocation13_spill] sm:$0xff] }
 0xfe9   : > { %v17109_v13 = vcombine.low %v10482_v34, %v10489_v47  ;;  %v17164_v43 = vmul.f32 %v16982_v30, %v18785_v37  ;;  %v18786_v34 = vld [vmem:[#allocation16_spill] sm:$0xff]  ;;  %v17196_v5 = vmul.f32 %v17001_v20, %v18784_v11  ;;  %v17200_v39 = vmul.f32 %v17018_v14, %v18785_v37  ;;  %v18799_v30 = vld [vmem:[#allocation25_spill] sm:$0xff] }
 0xfea   : > { %v17111_v18 = vcombine.low %v10784_v19, %v10791_v2  ;;  %v17168_v47 = vmul.f32 %v17132_v36, %v18786_v34  ;;  %v18787_v19 = vld [vmem:[#allocation19_spill] sm:$0xff]  ;;  %v17208_v32 = vmul.f32 %v17014_v1, %v18732_v38  ;;  %v17212_v0 = vcombine.high %v17004_v49, %v17004_v49 }
 0xfeb   : > { %18774 = vst [vmem:[#allocation3_spill] sm:$0xff] %v17109_v13  ;;  %v17172_v2 = vmul.f32 %v17140_v57, %v18787_v19  ;;  %v17204_v50 = vmul.f32 %v17004_v49, %v18787_v19  ;;  %v17216_v54 = vcombine.high %v17014_v1, %v17014_v1  ;;  %v17228_v13 = vmul.f32 %v17023_v8, %v18783_v44  ;;  %v18798_v57 = vld [vmem:[#allocation14_spill] sm:$0xff] }
 0xfec   : > { %18775 = vst [vmem:[#allocation4_spill] sm:$0xff] %v17111_v18  ;;  %18788 = vst [vmem:[#allocation7_spill] sm:$0xff] %v17212_v0  ;;  %v17224_v18 = vmul.f32 %v17011_v23, %v18782_v52  ;;  %v17232_v58 = vcombine.high %v17011_v23, %v17011_v23  ;;  %v17236_v1 = vmul.f32 %v17032_v28, %v18786_v34 }
 0xfed   : > { %18789 = vst [vmem:[#allocation9_spill] sm:$0xff] %v17216_v54  ;;  %v17240_v49 = vmul.f32 %v16995_v40, %v18787_v19  ;;  %v17248_v14 = vcombine.high %v17032_v28, %v17032_v28  ;;  %v17265_v28 = vmul.f32 %v17047_v29, %v18786_v34 }
 0xfee   : > { %18790 = vst [vmem:[#allocation8_spill] sm:$0xff] %v17232_v58 }
 0xfef   : > { %18792 = vst [vmem:[#allocation10_spill] sm:$0xff] %v17248_v14 }
0x1038   : > { %v8024_v4 = vpop.permute.xlu0 %8023 }
0x1039   : > { %13823 = vmatmul.mubr.msk.f32.vlgmr.msra.gmra.mxu0 %vm1273_vm0, %v8024_v4  ;;  %v17176_v4 = vmul.f32 %v16967_v15, %v18732_v38 }
0x103a   : > { %13825 = vmatprep.mubr.msk.f32.mxu0 %vm14289_vm2, %v18736_v51 }
0x103c   : > { %v8026_v12 = vpop.permute.xlu1 %8025 }
0x103d   : > { %13826 = vmatmul.mubr.msk.f32.gmra.mxu0 %vm1273_vm0, %v8026_v12  ;;  %v17180_v12 = vmul.f32 %v16989_v63, %v18780_v3 }
0x103e   : > { %13828 = vmatprep.mubr.msk.f32.mxu0 %vm14289_vm2, %v18736_v51 }
0x1040   : > { %v8028_v61 = vpop.permute.xlu1 %8027 }
0x1041   : > { %13829 = vmatmul.mubr.msk.f32.gmra.mxu0 %vm1273_vm0, %v8028_v61  ;;  %v17184_v61 = vmul.f32 %v17008_v17, %v18781_v60 }
0x1042   : > { %13831 = vmatprep.mubr.msk.f32.mxu0 %vm14289_vm2, %v18736_v51 }
0x1045   : > { %v8030_v42 = vpop.permute.xlu1 %8029 }
0x1046   : > { %13832 = vmatmul.mubr.msk.f32.gmra.mxu0 %vm1273_vm0, %v8030_v42  ;;  %v17188_v42 = vmul.f32 %v17036_v26, %v18782_v52  ;;  %v17257_v26 = vmul.f32 %v16963_v46, %v18782_v52 }
0x1047   : > { %13834 = vmatprep.mubr.msk.f32.mxu0 %vm14289_vm2, %v18736_v51  ;;  %v17220_v51 = vmul.f32 %v17051_v55, %v18786_v34  ;;  %v17244_v55 = vcombine.high %v17023_v8, %v17023_v8  ;;  %v17261_v8 = vmul.f32 %v16998_v6, %v18785_v37  ;;  %v17279_v6 = vmul.f32 %v17232_v58, %v18784_v11 }
0x1049   : > { %v8032_v24 = vpop.permute.xlu0 %8031  ;;  %18791 = vst [vmem:[#allocation15_spill] sm:$0xff] %v17244_v55  ;;  %v17283_v34 = vmul.f32 %v17244_v55, %v18785_v37  ;;  %v18796_v55 = vld [vmem:[#allocation12_spill] sm:$0xff] }
0x104a   : > { %13835 = vmatmul.mubr.msk.f32.gmra.mxu0 %vm1273_vm0, %v8032_v24  ;;  %v17192_v24 = vmul.f32 %v16976_v53, %v18783_v44  ;;  %v17253_v53 = vmul.f32 %v16992_v21, %v18781_v60  ;;  %v17273_v21 = vmul.f32 %v17216_v54, %v18781_v60  ;;  %v17291_v60 = vmul.f32 %v17040_v25, %v18780_v3 }
0x104b   : > { %18793 = vst [vmem:[#allocation17_spill] sm:$0xff] %v17283_v34  ;;  %v18803_v34 = vld [vmem:[#allocation26_spill] sm:$0xff] }
0x104c   : > { %18794 = vst [vmem:[#allocation16_spill] sm:$0xff] %v17291_v60 }
0x1086   : > { %v7999_v56 = vpop.f32.mrf.mxu1 }
0x1087   : > { %v8430_v20 = vcombine.high %v7999_v56, %v7999_v56  ;;  %v8437_v23 = vrot.slane %v7999_v56, %v14415_v7  ;;  %v17269_v56 = vmul.f32 %v17212_v0, %v18780_v3  ;;  %v17287_v0 = vmul.f32 %v17248_v14, %v18732_v38 }
0x1088   : > { %v13801_v40 = vpop.f32.mrf.mxu1  ;;  %v17303_v3 = vcombine.high %v17047_v29, %v17047_v29  ;;  %v18801_v29 = vld [vmem:[#allocation27_spill] sm:$0xff] }
0x1089   : > { %v8444_v52 = vrot.slane %v8430_v20, %v14415_v7  ;;  %v8445_v46 = vcombine.high %v8437_v23, %v8437_v23  ;;  %v8453_v40 = vrot.slane %v8437_v23, %v14415_v7  ;;  %v17295_v20 = vmul.f32 %v17044_v62, %v18783_v44 }
0x108a   : > { %v8004_v37 = vpop.f32.mrf.mxu1  ;;  %18797 = vst [vmem:[#allocation12_spill] sm:$0xff] %v17303_v3 }
0x108b   : > { %18795 = vst [vmem:[#allocation19_spill] sm:$0xff] %v17295_v20  ;;  %v8446_v23 = vcombine.high %v8444_v52, %v8444_v52  ;;  %v8460_v58 = vrot.slane %v8444_v52, %v14415_v7  ;;  %v8467_v54 = vrot.slane %v8445_v46, %v14415_v7  ;;  %v8475_v17 = vcombine.high %v8453_v40, %v8453_v40 }
0x108c   : > { %v8686_v63 = vmul.f32 %v8453_v40, %v18796_v55  ;;  %v8479_v15 = vcombine.high %v8004_v37, %v8004_v37  ;;  %v8486_v14 = vrot.slane %v8004_v37, %v14415_v7  ;;  %v13804_v52 = vpop.f32.mrf.mxu1  ;;  %v17312_v37 = vmul.f32 %v16986_v35, %v18784_v11 }
0x108d   : > { %v8474_v25 = vrot.slane %v8446_v23, %v14415_v7  ;;  %v8476_v44 = vcombine.high %v8460_v58, %v8460_v58  ;;  %v8477_v62 = vcombine.high %v8467_v54, %v8467_v54  ;;  %v8687_v36 = vmul.f32 %v8467_v54, %v18798_v57 }
0x108e   : > { %v8688_v46 = vmul.f32 %v8475_v17, %v18799_v30  ;;  %v8690_v59 = vmul.f32 %v8460_v58, %v18800_v10  ;;  %v8493_v40 = vrot.slane %v8479_v15, %v14415_v7  ;;  %v8009_v60 = vpop.f32.mrf.mxu1  ;;  %v8494_v52 = vcombine.high %v8486_v14, %v8486_v14  ;;  %v18804_v58 = vld [vmem:[#allocation29_spill] sm:$0xff] }
0x108f   : > { %v8478_v48 = vcombine.high %v8474_v25, %v8474_v25  ;;  %v8689_v31 = vmul.f32 %v8477_v62, %v18801_v29  ;;  %v8691_v23 = vmul.f32 %v8474_v25, %v18802_v9  ;;  %v8692_v20 = vmul.f32 %v8476_v44, %v18803_v34 }
0x1090   : > { %v8723_v54 = vadd.f32 %v8687_v36, %v17148_v33  ;;  %v17320_v17 = vmul.f32 %v17058_v27, %v18787_v19  ;;  %v17324_v15 = vmul.f32 %v17303_v3, %v18732_v38  ;;  %v8722_v62 = vadd.f32 %v8686_v63, %v17144_v22  ;;  %v13807_v36 = vpop.f32.mrf.mxu1 }
0x1091   : > { %v8693_v11 = vmul.f32 %v8478_v48, %v18804_v58  ;;  %v17329_v25 = vadd.f32 %v8688_v46, %v17152_v16  ;;  %v17332_v44 = vadd.f32 %v8689_v31, %v17156_v41  ;;  %v17335_v33 = vadd.f32 %v8690_v59, %v17160_v45 }
0x1092   : > { %v8495_v19 = vcombine.high %v8493_v40, %v8493_v40  ;;  %v8502_v27 = vrot.slane %v8486_v14, %v14415_v7  ;;  %v8509_v38 = vrot.slane %v8493_v40, %v14415_v7  ;;  %v17340_v3 = vadd.f32 %v8691_v23, %v17164_v43  ;;  %v18805_v43 = vld [vmem:[#allocation54_spill] sm:$0xff] }
0x1093   : > { %v17343_v63 = vadd.f32 %v8692_v20, %v17168_v47  ;;  %v9280_v48 = vcombine.low %v8722_v62, %v8723_v54  ;;  %v8516_v22 = vrot.slane %v8494_v52, %v14415_v7  ;;  %v17347_v31 = vadd.f32 %v8693_v11, %v17172_v2  ;;  %v8014_v45 = vpop.f32.mrf.mxu1 }
0x1094   : > { %v8523_v59 = vrot.slane %v8495_v19, %v14415_v7  ;;  %v8524_v16 = vcombine.high %v8502_v27, %v8502_v27  ;;  %v8525_v41 = vcombine.high %v8509_v38, %v8509_v38  ;;  %v8694_v40 = vmul.f32 %v8502_v27, %v18805_v43 }
0x1095   : > { %v8526_v46 = vcombine.high %v8516_v22, %v8516_v22  ;;  %v8695_v47 = vmul.f32 %v8516_v22, %v18796_v55  ;;  %v8698_v54 = vmul.f32 %v8509_v38, %v18801_v29  ;;  %v13810_v52 = vpop.f32.mrf.mxu1  ;;  %v17368_v22 = vrot.slane %v9280_v48, %v14415_v7 }
0x1096   : > { %v8527_v20 = vcombine.high %v8523_v59, %v8523_v59  ;;  %v8696_v23 = vmul.f32 %v8524_v16, %v18798_v57  ;;  %v8699_v2 = vmul.f32 %v8523_v59, %v18800_v10  ;;  %v8700_v62 = vmul.f32 %v8525_v41, %v18802_v9 }
0x1097   : > { %v8697_v11 = vmul.f32 %v8526_v46, %v18799_v30  ;;  %v17360_v36 = vadd.f32 %v8694_v40, %v17176_v4  ;;  %v17363_v19 = vadd.f32 %v8695_v47, %v17180_v12  ;;  %v8019_v16 = vpop.f32.mrf.mxu1  ;;  %v8528_v12 = vcombine.high %v8009_v60, %v8009_v60 }
0x1098   : > { %v8701_v38 = vmul.f32 %v8527_v20, %v18803_v34  ;;  %v17372_v59 = vadd.f32 %v8696_v23, %v17184_v61  ;;  %v8535_v46 = vrot.slane %v8009_v60, %v14415_v7  ;;  %v17381_v40 = vadd.f32 %v8698_v54, %v17192_v24 }
0x1099   : > { %18806 = vst [vmem:[#allocation14_spill] sm:$0xff] %v17360_v36  ;;  %v17377_v4 = vadd.f32 %v8697_v11, %v17188_v42  ;;  %v17384_v48 = vadd.f32 %v8699_v2, %v17196_v5  ;;  %v8577_v47 = vcombine.high %v8014_v45, %v8014_v45  ;;  %v8584_v61 = vrot.slane %v8014_v45, %v14415_v7  ;;  %v13813_v20 = vpop.f32.mrf.mxu1 }
0x109a   : > { %v17388_v23 = vadd.f32 %v8700_v62, %v17200_v39  ;;  %v8542_v52 = vrot.slane %v8528_v12, %v14415_v7  ;;  %v8543_v11 = vcombine.high %v8535_v46, %v8535_v46  ;;  %v8551_v60 = vrot.slane %v8535_v46, %v14415_v7 }
0x109b   : > { %v8737_v24 = vadd.f32 %v8701_v38, %v17220_v51  ;;  %v8591_v5 = vrot.slane %v8577_v47, %v14415_v7  ;;  %v8592_v54 = vcombine.high %v8584_v61, %v8584_v61  ;;  %v8600_v41 = vrot.slane %v8584_v61, %v14415_v7 }
0x109c   : > { %v8544_v2 = vcombine.high %v8542_v52, %v8542_v52  ;;  %v8558_v39 = vrot.slane %v8542_v52, %v14415_v7  ;;  %v8565_v62 = vrot.slane %v8543_v11, %v14415_v7  ;;  %v8573_v20 = vcombine.high %v8551_v60, %v8551_v60 }
0x109d   : > { %v8702_v42 = vmul.f32 %v8551_v60, %v18804_v58  ;;  %v8593_v12 = vcombine.high %v8591_v5, %v8591_v5  ;;  %v8607_v47 = vrot.slane %v8591_v5, %v14415_v7  ;;  %v8614_v11 = vrot.slane %v8592_v54, %v14415_v7 }
0x109e   : > { %v17403_v46 = vrot.slane %v8544_v2, %v14415_v7  ;;  %v8574_v51 = vcombine.high %v8558_v39, %v8558_v39  ;;  %v8703_v38 = vmul.f32 %v8565_v62, %v18805_v43  ;;  %v8575_v45 = vcombine.high %v8565_v62, %v8565_v62 }
0x109f   : > { %v8706_v27 = vmul.f32 %v8558_v39, %v18799_v30  ;;  %v8738_v52 = vadd.f32 %v8702_v42, %v17204_v50  ;;  %v9513_v60 = vcombine.low %v17384_v48, %v17388_v23  ;;  %v8704_v61 = vmul.f32 %v8573_v20, %v18796_v55 }
0x10a0   : > { %v8707_v2 = vmul.f32 %v17403_v46, %v18801_v29  ;;  %v8632_v14 = vrot.slane %v8019_v16, %v14415_v7  ;;  %v17417_v36 = vadd.f32 %v8703_v38, %v17208_v32  ;;  %v8621_v50 = vrot.slane %v8593_v12, %v14415_v7 }
0x10a1   : > { %v17420_v5 = vadd.f32 %v8706_v27, %v17224_v18  ;;  %v9514_v39 = vcombine.low %v8737_v24, %v8738_v52  ;;  %v8622_v48 = vcombine.high %v8600_v41, %v8600_v41  ;;  %v8623_v23 = vcombine.high %v8607_v47, %v8607_v47 }
0x10a2   : > { %v17424_v42 = vadd.f32 %v8707_v2, %v17228_v13  ;;  %v8624_v54 = vcombine.high %v8614_v11, %v8614_v11  ;;  %v8576_v62 = vcombine.high %v17403_v46, %v17403_v46  ;;  %v8705_v16 = vmul.f32 %v8575_v45, %v18798_v57 }
0x10a3   : > { %v8708_v32 = vmul.f32 %v8574_v51, %v18800_v10  ;;  %v8710_v20 = vmul.f32 %v8600_v41, %v18803_v34  ;;  %v9542_v18 = vrot.slane %v9514_v39, %v14415_v7  ;;  %v8625_v24 = vcombine.high %v8621_v50, %v8621_v50 }
0x10a4   : > { %v9743_v27 = vcombine.low %v17420_v5, %v17424_v42  ;;  %v8711_v13 = vmul.f32 %v8614_v11, %v18804_v58  ;;  %v8712_v12 = vmul.f32 %v8622_v48, %v18805_v43  ;;  %v8713_v38 = vmul.f32 %v8624_v54, %v18796_v55 }
0x10a5   : > { %v8714_v46 = vmul.f32 %v8607_v47, %v18798_v57  ;;  %v8715_v45 = vmul.f32 %v8621_v50, %v18799_v30  ;;  %v8716_v51 = vmul.f32 %v8623_v23, %v18801_v29  ;;  %v8746_v41 = vadd.f32 %v8710_v20, %v17236_v1 }
0x10a6   : > { %v8747_v52 = vadd.f32 %v8711_v13, %v17240_v49  ;;  %v8633_v2 = vcombine.high %v8632_v14, %v8632_v14  ;;  %v8640_v11 = vrot.slane %v8632_v14, %v14415_v7  ;;  %v18807_v42 = vcombine.low %v17329_v25, %v17332_v44 }
0x10a7   : > { %v8750_v5 = vadd.f32 %v8714_v46, %v17253_v53  ;;  %v8751_v39 = vadd.f32 %v8715_v45, %v17257_v26  ;;  %v18808_v1 = vcombine.low %v17335_v33, %v17340_v3  ;;  %v18809_v53 = vcombine.low %v17343_v63, %v17347_v31 }
0x10a8   : > { %v9297_v47 = vrot.slane %v18807_v42, %v14415_v7  ;;  %v9745_v48 = vcombine.low %v8746_v41, %v8747_v52  ;;  %v8647_v50 = vrot.slane %v8633_v2, %v14415_v7  ;;  %v8717_v14 = vmul.f32 %v8625_v24, %v18800_v10 }
0x10a9   : > { %v9304_v49 = vrot.slane %v18808_v1, %v14415_v7  ;;  %v9311_v26 = vrot.slane %v18809_v53, %v14415_v7  ;;  %v8648_v23 = vcombine.high %v8640_v11, %v8640_v11  ;;  %v8718_v54 = vmul.f32 %v8640_v11, %v18802_v9  ;;  %v18812_v1 = vld [vmem:[#allocation16_spill] sm:$0xff] }
0x10aa   : > { %v9312_v25 = vcombine.low %v17368_v22, %v9297_v47  ;;  %v8649_v44 = vcombine.high %v8647_v50, %v8647_v50  ;;  %v8719_v20 = vmul.f32 %v8647_v50, %v18803_v34  ;;  %v18810_v3 = vcombine.low %v17363_v19, %v17372_v59 }
0x10ab   : > { %v9313_v13 = vcombine.low %v9304_v49, %v9311_v26  ;;  %v8720_v46 = vmul.f32 %v8648_v23, %v18804_v58  ;;  %v8754_v63 = vadd.f32 %v8718_v54, %v17261_v8  ;;  %v18811_v24 = vcombine.low %v17377_v4, %v17381_v40  ;;  %v18813_v49 = vld [vmem:[#allocation19_spill] sm:$0xff] }
0x10ac   : > { %v9521_v33 = vrot.slane %v18810_v3, %v14415_v7  ;;  %v9320_v31 = vrot.slane %v9312_v25, %v14415_v7  ;;  %v8721_v45 = vmul.f32 %v8649_v44, %v18805_v43  ;;  %v8755_v41 = vadd.f32 %v8719_v20, %v17265_v28 }
0x10ad   : > { %v9528_v22 = vrot.slane %v18811_v24, %v14415_v7  ;;  %v9327_v52 = vrot.slane %v9313_v13, %v14415_v7  ;;  %v9535_v19 = vrot.slane %v9513_v60, %v14415_v7  ;;  %v8740_v2 = vadd.f32 %v8704_v61, %v17269_v56 }
0x10ae   : > { %v8741_v8 = vadd.f32 %v8705_v16, %v17273_v21  ;;  %v8744_v11 = vadd.f32 %v8708_v32, %v17279_v6  ;;  %v8709_v4 = vmul.f32 %v8576_v62, %v18802_v9  ;;  %v17484_v40 = vadd.f32 %v8712_v12, %v17287_v0  ;;  %v18814_v6 = vld [vmem:[#allocation17_spill] sm:$0xff] }
0x10af   : > { %v9543_v59 = vcombine.low %v9521_v33, %v9528_v22  ;;  %v17480_v42 = vcombine.low %v9320_v31, %v9327_v52  ;;  %v9544_v47 = vcombine.low %v9535_v19, %v9542_v18  ;;  %v8749_v60 = vadd.f32 %v8713_v38, %v18812_v1 }
0x10b0   : > { %v9742_v50 = vcombine.low %v8740_v2, %v8741_v8  ;;  %v8752_v53 = vadd.f32 %v8716_v51, %v18813_v49  ;;  %v8745_v56 = vadd.f32 %v8709_v4, %v18814_v6  ;;  %v8753_v61 = vadd.f32 %v8717_v14, %v17312_v37 }
0x10b1   : > { %v9551_v28 = vrot.slane %v9543_v59, %v14415_v7  ;;  %13841 = vmatprep.mubr.msk.f32.mxu1 %vm4312_vm3, %v17480_v42  ;;  %v9558_v21 = vrot.slane %v9544_v47, %v14415_v7  ;;  %v8756_v62 = vadd.f32 %v8720_v46, %v17320_v17  ;;  %v9773_v0 = vrot.slane %v9745_v48, %v14415_v7 }
0x10b2   : > { %v17497_v16 = vadd.f32 %v8721_v45, %v17324_v15  ;;  %v9752_v32 = vrot.slane %v9742_v50, %v14415_v7  ;;  %v9759_v18 = vrot.slane %v9743_v27, %v14415_v7  ;;  %v9744_v38 = vcombine.low %v8744_v11, %v8745_v56 }
0x10b3   : > { %v17501_v12 = vcombine.low %v9551_v28, %v9558_v21  ;;  %v9973_v51 = vcombine.low %v8749_v60, %v8750_v5  ;;  %v9974_v26 = vcombine.low %v8751_v39, %v8752_v53  ;;  %v9975_v54 = vcombine.low %v8753_v61, %v8754_v63 }
0x10b4   : > { %v9774_v23 = vcombine.low %v9752_v32, %v9759_v18  ;;  %v9976_v25 = vcombine.low %v8755_v41, %v8756_v62  ;;  %v9766_v37 = vrot.slane %v9744_v38, %v14415_v7 }
0x10b5   : > { %13848 = vmatprep.mubr.msk.f32.mxu0 %vm4312_vm3, %v17501_v12  ;;  %v9983_v17 = vrot.slane %v9973_v51, %v14415_v7  ;;  %v9990_v15 = vrot.slane %v9974_v26, %v14415_v7  ;;  %v9997_v48 = vrot.slane %v9975_v54, %v14415_v7 }
0x10b6   : > { %v10004_v27 = vrot.slane %v9976_v25, %v14415_v7  ;;  %v9775_v14 = vcombine.low %v9766_v37, %v9773_v0  ;;  %v9782_v39 = vrot.slane %v9774_v23, %v14415_v7 }
0x10b7   : > { %v10005_v44 = vcombine.low %v9983_v17, %v9990_v15 }
0x10b8   : > { %v10006_v5 = vcombine.low %v9997_v48, %v10004_v27  ;;  %v9789_v20 = vrot.slane %v9775_v14, %v14415_v7 }
0x10b9   : > { %v10013_v13 = vrot.slane %v10005_v44, %v14415_v7 }
0x10ba   : > { %v10020_v3 = vrot.slane %v10006_v5, %v14415_v7  ;;  %v17514_v33 = vcombine.low %v9782_v39, %v9789_v20 }
0x10bc   : > { %v17516_v46 = vcombine.low %v10013_v13, %v10020_v3 }
0x10f9   : > { %v8109_v63 = vpop.f32.mrf.mxu0 }
0x10fa   : > { %v8799_v31 = vcombine.high %v8109_v63, %v8109_v63  ;;  %v8806_v24 = vrot.slane %v8109_v63, %v14415_v7 }
0x10fb   : > { %v13824_v22 = vpop.f32.mrf.mxu0 }
0x10fc   : > { %v8813_v45 = vrot.slane %v8799_v31, %v14415_v7  ;;  %v8814_v41 = vcombine.high %v8806_v24, %v8806_v24  ;;  %v8822_v52 = vrot.slane %v8806_v24, %v14415_v7 }
0x10fd   : > { %v8114_v19 = vpop.f32.mrf.mxu0 }
0x10fe   : > { %v8836_v59 = vrot.slane %v8814_v41, %v14415_v7  ;;  %v8844_v2 = vcombine.high %v8822_v52, %v8822_v52  ;;  %v9055_v8 = vmul.f32 %v8822_v52, %v18796_v55  ;;  %v8815_v47 = vcombine.high %v8813_v45, %v8813_v45 }
0x10ff   : > { %v13827_v11 = vpop.f32.mrf.mxu0  ;;  %v8829_v1 = vrot.slane %v8813_v45, %v14415_v7  ;;  %v8855_v53 = vrot.slane %v8114_v19, %v14415_v7  ;;  %v8848_v0 = vcombine.high %v8114_v19, %v8114_v19 }
0x1100   : > { %v8846_v4 = vcombine.high %v8836_v59, %v8836_v59  ;;  %v9056_v28 = vmul.f32 %v8836_v59, %v18798_v57  ;;  %9127 = vrot.lane.b32.xlu1 %v9055_v8, %s14291_s27  ;;  %v9057_v60 = vmul.f32 %v8844_v2, %v18799_v30  ;;  %v8843_v49 = vrot.slane %v8815_v47, %v14415_v7 }
0x1101   : > { %v8119_v50 = vpop.f32.mrf.mxu0  ;;  %v8845_v61 = vcombine.high %v8829_v1, %v8829_v1  ;;  %v9059_v62 = vmul.f32 %v8829_v1, %v18800_v10  ;;  %v8863_v32 = vcombine.high %v8855_v53, %v8855_v53  ;;  %v8871_v23 = vrot.slane %v8855_v53, %v14415_v7 }
0x1102   : > { %9129 = vrot.lane.b32.xlu0 %v9056_v28, %s14291_s27  ;;  %v9058_v6 = vmul.f32 %v8846_v4, %v18801_v29  ;;  %v9060_v38 = vmul.f32 %v8843_v49, %v18802_v9  ;;  %v8847_v51 = vcombine.high %v8843_v49, %v8843_v49  ;;  %v8862_v25 = vrot.slane %v8848_v0, %v14415_v7 }
0x1103   : > { %v13830_v21 = vpop.f32.mrf.mxu0  ;;  %v9061_v54 = vmul.f32 %v8845_v61, %v18803_v34  ;;  %v8885_v37 = vrot.slane %v8863_v32, %v14415_v7  ;;  %v8893_v48 = vcombine.high %v8871_v23, %v8871_v23  ;;  %v9063_v27 = vmul.f32 %v8871_v23, %v18805_v43 }
0x1104   : > { %9131 = vrot.lane.b32.xlu1 %v9057_v60, %s14291_s27  ;;  %v9062_v15 = vmul.f32 %v8847_v51, %v18804_v58  ;;  %v8864_v14 = vcombine.high %v8862_v25, %v8862_v25  ;;  %v8878_v39 = vrot.slane %v8862_v25, %v14415_v7  ;;  %v8904_v3 = vrot.slane %v8119_v50, %v14415_v7 }
0x1105   : > { %v8895_v44 = vcombine.high %v8885_v37, %v8885_v37  ;;  %v9064_v5 = vmul.f32 %v8885_v37, %v18796_v55  ;;  %v9065_v20 = vmul.f32 %v8893_v48, %v18798_v57  ;;  %v8897_v22 = vcombine.high %v8119_v50, %v8119_v50 }
0x1106   : > { %9133 = vrot.lane.b32.xlu0 %v9058_v6, %s14291_s27  ;;  %v17533_v56 = vpop.f32.mrf.mxu0  ;;  %v8892_v13 = vrot.slane %v8864_v14, %v14415_v7  ;;  %v8894_v31 = vcombine.high %v8878_v39, %v8878_v39  ;;  %v9067_v24 = vmul.f32 %v8878_v39, %v18801_v29  ;;  %v8912_v45 = vcombine.high %v8904_v3, %v8904_v3 }
0x1107   : > { %v9066_v63 = vmul.f32 %v8895_v44, %v18799_v30  ;;  %v8920_v19 = vrot.slane %v8904_v3, %v14415_v7  ;;  %v8911_v2 = vrot.slane %v8897_v22, %v14415_v7  ;;  %v8953_v21 = vrot.slane %v17533_v56, %v14415_v7 }
0x1108   : > { %v13833_v18 = vpop.f32.mrf.mxu0  ;;  %9135 = vrot.lane.b32.xlu1 %v9059_v62, %s14291_s27  ;;  %v9068_v41 = vmul.f32 %v8892_v13, %v18800_v10  ;;  %v8896_v52 = vcombine.high %v8892_v13, %v8892_v13  ;;  %v9069_v59 = vmul.f32 %v8894_v31, %v18802_v9  ;;  %v8934_v8 = vrot.slane %v8912_v45, %v14415_v7 }
0x1109   : > { %v8942_v47 = vcombine.high %v8920_v19, %v8920_v19  ;;  %v9071_v4 = vmul.f32 %v8920_v19, %v18804_v58  ;;  %v8913_v28 = vcombine.high %v8911_v2, %v8911_v2  ;;  %v8927_v60 = vrot.slane %v8911_v2, %v14415_v7 }
0x110a   : > { %9137 = vrot.lane.b32.xlu0 %v9060_v38, %s14291_s27  ;;  %v17539_v26 = vpop.f32.mrf.mxu0  ;;  %v9070_v11 = vmul.f32 %v8896_v52, %v18803_v34  ;;  %v8944_v50 = vcombine.high %v8934_v8, %v8934_v8  ;;  %v9072_v1 = vmul.f32 %v8934_v8, %v18805_v43  ;;  %v8946_v0 = vcombine.high %v17533_v56, %v17533_v56 }
0x110b   : > { %v9073_v49 = vmul.f32 %v8942_v47, %v18796_v55  ;;  %v8941_v53 = vrot.slane %v8913_v28, %v14415_v7  ;;  %v8943_v61 = vcombine.high %v8927_v60, %v8927_v60  ;;  %v9075_v62 = vmul.f32 %v8927_v60, %v18799_v30  ;;  %v18820_v60 = vld [vmem:[#allocation5_spill] sm:$0xff] }
0x110c   : > { %v13836_v17 = vpop.f32.mrf.mxu0  ;;  %9139 = vrot.lane.b32.xlu1 %v9061_v54, %s14291_s27  ;;  %v9074_v6 = vmul.f32 %v8944_v50, %v18798_v57  ;;  %v8961_v32 = vcombine.high %v8953_v21, %v8953_v21  ;;  %v8969_v51 = vrot.slane %v8953_v21, %v14415_v7  ;;  %v8960_v54 = vrot.slane %v8946_v0, %v14415_v7 }
0x110d   : > { %v9076_v18 = vmul.f32 %v8941_v53, %v18801_v29  ;;  %v8945_v38 = vcombine.high %v8941_v53, %v8941_v53  ;;  %v9077_v23 = vmul.f32 %v8943_v61, %v18800_v10  ;;  %v9001_v39 = vrot.slane %v17539_v26, %v14415_v7  ;;  %v18822_v53 = vld [vmem:[#allocation64_spill] sm:$0xff] }
0x110e   : > { %9141 = vrot.lane.b32.xlu0 %v9062_v15, %s14291_s27  ;;  %v8983_v25 = vrot.slane %v8961_v32, %v14415_v7  ;;  %v8991_v56 = vcombine.high %v8969_v51, %v8969_v51  ;;  %v9079_v17 = vmul.f32 %v8969_v51, %v18803_v34  ;;  %v8962_v15 = vcombine.high %v8960_v54, %v8960_v54  ;;  %v18823_v32 = vld [vmem:[#allocation59_spill] sm:$0xff] }
0x110f   : > { %v9078_v37 = vmul.f32 %v8945_v38, %v18802_v9  ;;  %v8976_v14 = vrot.slane %v8960_v54, %v14415_v7  ;;  %v9009_v22 = vrot.slane %v9001_v39, %v14415_v7  ;;  %v18826_v54 = vld [vmem:[#allocation37_spill] sm:$0xff] }
0x1110   : > { %9143 = vrot.lane.b32.xlu1 %v9063_v27, %s14291_s27  ;;  %v8993_v48 = vcombine.high %v8983_v25, %v8983_v25  ;;  %v9080_v27 = vmul.f32 %v8983_v25, %v18804_v58  ;;  %v9081_v44 = vmul.f32 %v8991_v56, %v18805_v43 }
0x1111   : > { %v8992_v13 = vcombine.high %v8976_v14, %v8976_v14  ;;  %v9083_v3 = vmul.f32 %v8976_v14, %v18798_v57  ;;  %v9017_v57 = vcombine.high %v9009_v22, %v9009_v22 }
0x1112   : > { %9145 = vrot.lane.b32.xlu0 %v9064_v5, %s14291_s27  ;;  %v8990_v5 = vrot.slane %v8962_v15, %v14415_v7 }
0x1113   : > { %v9085_v26 = vmul.f32 %v8992_v13, %v18801_v29  ;;  %v9089_v29 = vmul.f32 %v9017_v57, %v18804_v58  ;;  %v18829_v13 = vld [vmem:[#allocation62_spill] sm:$0xff] }
0x1114   : > { %9147 = vrot.lane.b32.xlu1 %v9065_v20, %s14291_s27  ;;  %v9082_v20 = vmul.f32 %v8993_v48, %v18796_v55  ;;  %v9084_v31 = vmul.f32 %v8990_v5, %v18799_v30  ;;  %v9087_v30 = vmul.f32 %v9009_v22, %v18802_v9  ;;  %v18817_v9 = vld [vmem:[#allocation56_spill] sm:$0xff] }
0x1116   : > { %9149 = vrot.lane.b32.xlu0 %v9066_v63, %s14291_s27  ;;  %v9002_v63 = vcombine.high %v9001_v39, %v9001_v39 }
0x1118   : > { %9151 = vrot.lane.b32.xlu1 %v9067_v24, %s14291_s27  ;;  %v8994_v24 = vcombine.high %v8990_v5, %v8990_v5  ;;  %v9016_v55 = vrot.slane %v9002_v63, %v14415_v7  ;;  %v18828_v5 = vld [vmem:[#allocation6_spill] sm:$0xff] }
0x111a   : > { %9153 = vrot.lane.b32.xlu0 %v9068_v41, %s14291_s27  ;;  %v9086_v45 = vmul.f32 %v8994_v24, %v18800_v10  ;;  %v9018_v41 = vcombine.high %v9016_v55, %v9016_v55  ;;  %v9088_v52 = vmul.f32 %v9016_v55, %v18803_v34  ;;  %v18815_v10 = vld [vmem:[#allocation55_spill] sm:$0xff]  ;;  %v18832_v55 = vld [vmem:[#allocation28_spill] sm:$0xff] }
0x111c   : > { %9155 = vrot.lane.b32.xlu1 %v9069_v59, %s14291_s27  ;;  %v9090_v19 = vmul.f32 %v9018_v41, %v18805_v43  ;;  %v18816_v59 = vld [vmem:[#allocation35_spill] sm:$0xff]  ;;  %v18821_v43 = vld [vmem:[#allocation58_spill] sm:$0xff] }
0x111d   : > { %v8758_v2 = vmul.f32 %v18816_v59, %v18815_v10  ;;  %v8761_v21 = vmul.f32 %v18822_v53, %v18821_v43 }
0x111e   : > { %9157 = vrot.lane.b32.xlu0 %v9070_v11, %s14291_s27  ;;  %v18818_v11 = vld [vmem:[#allocation34_spill] sm:$0xff] }
0x111f   : > { %v8759_v47 = vmul.f32 %v18818_v11, %v18817_v9  ;;  %v18834_v11 = vld [vmem:[#allocation46_spill] sm:$0xff] }
0x1120   : > { %9159 = vrot.lane.b32.xlu1 %v9071_v4, %s14291_s27 }
0x1122   : > { %9161 = vrot.lane.b32.xlu0 %v9072_v1, %s14291_s27  ;;  %v18819_v1 = vld [vmem:[#allocation57_spill] sm:$0xff] }
0x1123   : > { %v8760_v58 = vmul.f32 %v18820_v60, %v18819_v1 }
0x1124   : > { %9163 = vrot.lane.b32.xlu1 %v9073_v49, %s14291_s27 }
0x1126   : > { %9165 = vrot.lane.b32.xlu0 %v9074_v6, %s14291_s27 }
0x1128   : > { %9167 = vrot.lane.b32.xlu1 %v9075_v62, %s14291_s27 }
0x112a   : > { %9169 = vrot.lane.b32.xlu0 %v9076_v18, %s14291_s27  ;;  %v18824_v18 = vld [vmem:[#allocation30_spill] sm:$0xff] }
0x112b   : > { %v8762_v38 = vmul.f32 %v18824_v18, %v18823_v32 }
0x112c   : > { %9171 = vrot.lane.b32.xlu1 %v9077_v23, %s14291_s27  ;;  %v18825_v23 = vld [vmem:[#allocation60_spill] sm:$0xff] }
0x112d   : > { %v8763_v25 = vmul.f32 %v18826_v54, %v18825_v23 }
0x112e   : > { %9173 = vrot.lane.b32.xlu0 %v9078_v37, %s14291_s27 }
0x1130   : > { %9175 = vrot.lane.b32.xlu1 %v9079_v17, %s14291_s27 }
0x1132   : > { %9177 = vrot.lane.b32.xlu0 %v9080_v27, %s14291_s27 }
0x1134   : > { %9179 = vrot.lane.b32.xlu1 %v9081_v44, %s14291_s27  ;;  %v18827_v44 = vld [vmem:[#allocation61_spill] sm:$0xff] }
0x1135   : > { %v8764_v39 = vmul.f32 %v18828_v5, %v18827_v44 }
0x1136   : > { %9181 = vrot.lane.b32.xlu0 %v9082_v20, %s14291_s27 }
0x1138   : > { %9183 = vrot.lane.b32.xlu1 %v9083_v3, %s14291_s27  ;;  %v18830_v3 = vld [vmem:[#allocation65_spill] sm:$0xff] }
0x1139   : > { %v8765_v63 = vmul.f32 %v18830_v3, %v18829_v13 }
0x113a   : > { %9185 = vrot.lane.b32.xlu0 %v9084_v31, %s14291_s27 }
0x113c   : > { %9187 = vrot.lane.b32.xlu1 %v9085_v26, %s14291_s27  ;;  %v18831_v26 = vld [vmem:[#allocation63_spill] sm:$0xff] }
0x113e   : > { %9189 = vrot.lane.b32.xlu0 %v9086_v45, %s14291_s27  ;;  %v8766_v45 = vmul.f32 %v18832_v55, %v18831_v26 }
0x1140   : > { %9191 = vrot.lane.b32.xlu1 %v9087_v30, %s14291_s27 }
0x1142   : > { %9193 = vrot.lane.b32.xlu0 %v9088_v52, %s14291_s27 }
0x1144   : > { %9195 = vrot.lane.b32.xlu1 %v9089_v29, %s14291_s27 }
0x1146   : > { %9197 = vrot.lane.b32.xlu0 %v9090_v19, %s14291_s27  ;;  %s18866_s27 = smov 16  }
0x1172   : > { %v9128_v8 = vpop.permute.xlu1 %9127 }
0x1173   : > { %v9235_v4 = vadd.f32 %v9128_v8, %v8758_v2  ;;  %v18833_v2 = vld [vmem:[#allocation31_spill] sm:$0xff] }
0x1174   : > { %v9130_v34 = vpop.permute.xlu0 %9129  ;;  %v8767_v8 = vmul.f32 %v18833_v2, %v18815_v10 }
0x1175   : > { %v9236_v28 = vadd.f32 %v9130_v34, %v8759_v47  ;;  %v8768_v47 = vmul.f32 %v18834_v11, %v18817_v9 }
0x1176   : > { %v9132_v49 = vpop.permute.xlu1 %9131 }
0x1177   : > { %v9352_v50 = vcombine.low %v9235_v4, %v9236_v28  ;;  %v9237_v61 = vadd.f32 %v9132_v49, %v8760_v58 }
0x1178   : > { %v9134_v6 = vpop.permute.xlu0 %9133 }
0x1179   : > { %v9238_v62 = vadd.f32 %v9134_v6, %v8761_v21  ;;  %v9362_v56 = vrot.slane %v9352_v50, %v14415_v7  ;;  %v18835_v6 = vld [vmem:[#allocation50_spill] sm:$0xff] }
0x117a   : > { %v9136_v51 = vpop.permute.xlu1 %9135 }
0x117b   : > { %v9353_v0 = vcombine.low %v9237_v61, %v9238_v62  ;;  %v9239_v15 = vadd.f32 %v9136_v51, %v8762_v38  ;;  %v8769_v61 = vmul.f32 %v18835_v6, %v18819_v1  ;;  %v18836_v62 = vld [vmem:[#allocation33_spill] sm:$0xff] }
0x117c   : > { %v9138_v37 = vpop.permute.xlu0 %9137 }
0x117d   : > { %v9369_v17 = vrot.slane %v9353_v0, %v14415_v7  ;;  %v9240_v48 = vadd.f32 %v9138_v37, %v8763_v25  ;;  %v8770_v0 = vmul.f32 %v18836_v62, %v18821_v43 }
0x117e   : > { %v9140_v20 = vpop.permute.xlu1 %9139 }
0x117f   : > { %v9384_v27 = vcombine.low %v9362_v56, %v9369_v17  ;;  %v9354_v14 = vcombine.low %v9239_v15, %v9240_v48  ;;  %v9241_v24 = vadd.f32 %v9140_v20, %v8764_v39  ;;  %v18837_v56 = vld [vmem:[#allocation43_spill] sm:$0xff]  ;;  %v18838_v15 = vld [vmem:[#allocation44_spill] sm:$0xff] }
0x1180   : > { %v9142_v31 = vpop.permute.xlu0 %9141  ;;  %v8771_v17 = vmul.f32 %v18837_v56, %v18823_v32  ;;  %v8772_v48 = vmul.f32 %v18838_v15, %v18825_v23 }
0x1181   : > { %v9242_v22 = vadd.f32 %v9142_v31, %v8765_v63  ;;  %v9376_v29 = vrot.slane %v9354_v14, %v14415_v7  ;;  %v9392_v49 = vrot.slane %v9384_v27, %v14415_v7 }
0x1182   : > { %v9144_v30 = vpop.permute.xlu1 %9143 }
0x1183   : > { %v9355_v57 = vcombine.low %v9241_v24, %v9242_v22  ;;  %v9243_v41 = vadd.f32 %v9144_v30, %v8766_v45  ;;  %v18839_v24 = vld [vmem:[#allocation52_spill] sm:$0xff]  ;;  %v18840_v45 = vld [vmem:[#allocation38_spill] sm:$0xff] }
0x1184   : > { %v9146_v52 = vpop.permute.xlu0 %9145  ;;  %v8773_v22 = vmul.f32 %v18839_v24, %v18827_v44 }
0x1185   : > { %v9383_v19 = vrot.slane %v9355_v57, %v14415_v7  ;;  %v9407_v59 = vrot.slane %v9243_v41, %v14415_v7  ;;  %v9244_v50 = vadd.f32 %v9146_v52, %v8767_v8  ;;  %v8774_v57 = vmul.f32 %v18840_v45, %v18829_v13  ;;  %v18841_v41 = vld [vmem:[#allocation45_spill] sm:$0xff] }
0x1186   : > { %v9148_v4 = vpop.permute.xlu1 %9147  ;;  %v8775_v52 = vmul.f32 %v18841_v41, %v18831_v26 }
0x1187   : > { %v9385_v34 = vcombine.low %v9376_v29, %v9383_v19  ;;  %v17653_v28 = vrot.slane %v9407_v59, %v14415_v7  ;;  %v9245_v60 = vadd.f32 %v9148_v4, %v8768_v47  ;;  %v18842_v47 = vld [vmem:[#allocation7_spill] sm:$0xff] }
0x1188   : > { %v9150_v58 = vpop.permute.xlu0 %9149 }
0x1189   : > { %v9399_v53 = vrot.slane %v9385_v34, %v14415_v7  ;;  %v9583_v21 = vcombine.low %v9244_v50, %v9245_v60  ;;  %9417 = vrot.lane.b32.xlu1 %v17653_v28, %s14290_s25  ;;  %v9246_v51 = vadd.f32 %v9150_v58, %v8769_v61  ;;  %v8776_v34 = vmul.f32 %v18842_v47, %v18815_v10  ;;  %v18843_v50 = vld [vmem:[#allocation9_spill] sm:$0xff] }
0x118a   : > { %v9152_v18 = vpop.permute.xlu1 %9151  ;;  %v8777_v60 = vmul.f32 %v18843_v50, %v18817_v9  ;;  %v18850_v50 = vld [vmem:[#allocation10_spill] sm:$0xff] }
0x118b   : > { %v17663_v38 = vcombine.low %v9392_v49, %v9399_v53  ;;  %v9247_v54 = vadd.f32 %v9152_v18, %v8770_v0  ;;  %v9593_v14 = vrot.slane %v9583_v21, %v14415_v7  ;;  %v18844_v18 = vld [vmem:[#allocation41_spill] sm:$0xff] }
0x118c   : > { %v9154_v25 = vpop.permute.xlu0 %9153 }
0x118d   : > { %9415 = vrot.lane.b32.xlu0 %v17663_v38, %s14290_s25  ;;  %v9584_v37 = vcombine.low %v9246_v51, %v9247_v54  ;;  %v9248_v39 = vadd.f32 %v9154_v25, %v8771_v17  ;;  %v8778_v51 = vmul.f32 %v18844_v18, %v18819_v1  ;;  %v18845_v25 = vld [vmem:[#allocation47_spill] sm:$0xff] }
0x118e   : > { %v9156_v27 = vpop.permute.xlu1 %9155 }
0x118f   : > { %v9600_v5 = vrot.slane %v9584_v37, %v14415_v7  ;;  %v9249_v20 = vadd.f32 %v9156_v27, %v8772_v48  ;;  %v8779_v37 = vmul.f32 %v18845_v25, %v18821_v43 }
0x1190   : > { %v9158_v3 = vpop.permute.xlu0 %9157 }
0x1191   : > { %v9615_v63 = vcombine.low %v9593_v14, %v9600_v5  ;;  %v9585_v31 = vcombine.low %v9248_v39, %v9249_v20  ;;  %v9250_v29 = vadd.f32 %v9158_v3, %v8773_v22  ;;  %v18846_v20 = vld [vmem:[#allocation15_spill] sm:$0xff] }
0x1192   : > { %v9160_v30 = vpop.permute.xlu1 %9159  ;;  %v8781_v3 = vmul.f32 %v18846_v20, %v18825_v23  ;;  %v18853_v20 = vld [vmem:[#allocation32_spill] sm:$0xff] }
0x1193   : > { %v9251_v19 = vadd.f32 %v9160_v30, %v8774_v57  ;;  %v9607_v58 = vrot.slane %v9585_v31, %v14415_v7  ;;  %v9623_v17 = vrot.slane %v9615_v63, %v14415_v7  ;;  %v18847_v63 = vld [vmem:[#allocation8_spill] sm:$0xff] }
0x1194   : > { %v9162_v59 = vpop.permute.xlu0 %9161  ;;  %v8780_v45 = vmul.f32 %v18847_v63, %v18823_v32 }
0x1195   : > { %v9252_v2 = vadd.f32 %v9162_v59, %v8775_v52  ;;  %v9586_v8 = vcombine.low %v9250_v29, %v9251_v19  ;;  %v18848_v29 = vld [vmem:[#allocation49_spill] sm:$0xff] }
0x1196   : > { %v9164_v4 = vpop.permute.xlu1 %9163  ;;  %v8782_v19 = vmul.f32 %v18848_v29, %v18827_v44 }
0x1197   : > { %v9638_v11 = vrot.slane %v9252_v2, %v14415_v7  ;;  %v9614_v49 = vrot.slane %v9586_v8, %v14415_v7  ;;  %v9253_v6 = vadd.f32 %v9164_v4, %v8776_v34  ;;  %v18849_v2 = vld [vmem:[#allocation40_spill] sm:$0xff] }
0x1198   : > { %v9166_v53 = vpop.permute.xlu0 %9165  ;;  %v8783_v8 = vmul.f32 %v18849_v2, %v18829_v13 }
0x1199   : > { %v17687_v21 = vrot.slane %v9638_v11, %v14415_v7  ;;  %v9254_v61 = vadd.f32 %v9166_v53, %v8777_v60  ;;  %v9616_v62 = vcombine.low %v9607_v58, %v9614_v49  ;;  %v8784_v60 = vmul.f32 %v18850_v50, %v18831_v26 }
0x119a   : > { %v9168_v54 = vpop.permute.xlu1 %9167 }
0x119b   : > { %v9814_v0 = vcombine.low %v9253_v6, %v9254_v61  ;;  %9648 = vrot.lane.b32.xlu1 %v17687_v21, %s14290_s25  ;;  %v9630_v15 = vrot.slane %v9616_v62, %v14415_v7  ;;  %v9255_v48 = vadd.f32 %v9168_v54, %v8778_v51 }
0x119c   : > { %v9170_v56 = vpop.permute.xlu0 %9169 }
0x119d   : > { %v9256_v27 = vadd.f32 %v9170_v56, %v8779_v37  ;;  %v17697_v14 = vcombine.low %v9623_v17, %v9630_v15  ;;  %v9824_v24 = vrot.slane %v9814_v0, %v14415_v7  ;;  %v18851_v17 = vld [vmem:[#allocation48_spill] sm:$0xff] }
0x119e   : > { %v9172_v39 = vpop.permute.xlu1 %9171  ;;  %v8788_v15 = vmul.f32 %v18851_v17, %v18821_v43 }
0x119f   : > { %v9815_v5 = vcombine.low %v9255_v48, %v9256_v27  ;;  %9646 = vrot.lane.b32.xlu0 %v17697_v14, %s14290_s25  ;;  %v9257_v52 = vadd.f32 %v9172_v39, %v8780_v45  ;;  %v18855_v45 = vld [vmem:[#allocation51_spill] sm:$0xff] }
0x11a0   : > { %v9174_v31 = vpop.permute.xlu0 %9173  ;;  %v8785_v43 = vmul.f32 %v18855_v45, %v18815_v10 }
0x11a1   : > { %v9831_v22 = vrot.slane %v9815_v5, %v14415_v7  ;;  %v9258_v57 = vadd.f32 %v9174_v31, %v8781_v3  ;;  %v18852_v5 = vld [vmem:[#allocation36_spill] sm:$0xff]  ;;  %v8787_v3 = vmul.f32 %v18853_v20, %v18819_v1  ;;  %v18860_v20 = vld [vmem:[#allocation2_spill] sm:$0xff] }
0x11a2   : > { %v9176_v59 = vpop.permute.xlu1 %9175  ;;  %v8786_v39 = vmul.f32 %v18852_v5, %v18817_v9  ;;  %v10648_v5 = vrot.slane %v18850_v50, %v14415_v7  ;;  %v18861_v50 = vld [vmem:[#allocation3_spill] sm:$0xff] }
0x11a3   : > { %v9846_v30 = vcombine.low %v9824_v24, %v9831_v22  ;;  %v9816_v47 = vcombine.low %v9257_v52, %v9258_v57  ;;  %v9259_v34 = vadd.f32 %v9176_v59, %v8782_v19  ;;  %v18854_v22 = vld [vmem:[#allocation39_spill] sm:$0xff]  ;;  %v8789_v52 = vmul.f32 %v16986_v35, %v18823_v32 }
0x11a4   : > { %v9178_v11 = vpop.permute.xlu0 %9177  ;;  %v8790_v63 = vmul.f32 %v18854_v22, %v18825_v23  ;;  %v18857_v23 = vld [vmem:[#allocation42_spill] sm:$0xff] }
0x11a5   : > { %v9260_v4 = vadd.f32 %v9178_v11, %v8783_v8  ;;  %v9838_v61 = vrot.slane %v9816_v47, %v14415_v7  ;;  %v9854_v37 = vrot.slane %v9846_v30, %v14415_v7  ;;  %v18856_v47 = vld [vmem:[#allocation18_spill] sm:$0xff] }
0x11a6   : > { %v9180_v49 = vpop.permute.xlu1 %9179  ;;  %v18863_v22 = vld [vmem:[#allocation14_spill] sm:$0xff] }
0x11a7   : > { %v9817_v58 = vcombine.low %v9259_v34, %v9260_v4  ;;  %v9261_v53 = vadd.f32 %v9180_v49, %v8784_v60  ;;  %v8791_v34 = vmul.f32 %v18856_v47, %v18827_v44  ;;  %v8792_v4 = vmul.f32 %v18857_v23, %v18829_v13  ;;  %v18858_v60 = vld [vmem:[#allocation12_spill] sm:$0xff] }
0x11a8   : > { %v9182_v6 = vpop.permute.xlu0 %9181 }
0x11a9   : > { %v9845_v62 = vrot.slane %v9817_v58, %v14415_v7  ;;  %v9869_v0 = vrot.slane %v9261_v53, %v14415_v7  ;;  %v9262_v29 = vadd.f32 %v9182_v6, %v8785_v43  ;;  %v8793_v58 = vmul.f32 %v18858_v60, %v18831_v26 }
0x11aa   : > { %v9184_v51 = vpop.permute.xlu1 %9183  ;;  %v10346_v26 = vrot.slane %v18832_v55, %v14415_v7 }
0x11ab   : > { %v9847_v18 = vcombine.low %v9838_v61, %v9845_v62  ;;  %v17717_v54 = vrot.slane %v9869_v0, %v14415_v7  ;;  %v9263_v57 = vadd.f32 %v9184_v51, %v8786_v39  ;;  %v18859_v39 = vld [vmem:[#allocation53_spill] sm:$0xff] }
0x11ac   : > { %v9186_v25 = vpop.permute.xlu0 %9185  ;;  %v17760_v17 = vrot.slane %v10346_v26, %v14415_v7 }
0x11ad   : > { %v9861_v56 = vrot.slane %v9847_v18, %v14415_v7  ;;  %9879 = vrot.lane.b32.xlu1 %v17717_v54, %s14290_s25  ;;  %v9264_v30 = vadd.f32 %v9186_v25, %v8787_v3  ;;  %v10045_v8 = vcombine.low %v9262_v29, %v9263_v57  ;;  %v10799_v3 = vrot.slane %v18858_v60, %v14415_v7 }
0x11ae   : > { %v9188_v48 = vpop.permute.xlu1 %9187 }
0x11af   : > { %v17725_v27 = vcombine.low %v9854_v37, %v9861_v56  ;;  %v9265_v31 = vadd.f32 %v9188_v48, %v8788_v15  ;;  %v10055_v61 = vrot.slane %v10045_v8, %v14415_v7  ;;  %v10497_v15 = vrot.slane %v18841_v41, %v14415_v7 }
0x11b0   : > { %v9190_v24 = vpop.permute.xlu0 %9189  ;;  %v17780_v41 = vrot.slane %v10648_v5, %v14415_v7 }
0x11b1   : > { %9877 = vrot.lane.b32.xlu0 %v17725_v27, %s14290_s25  ;;  %v10046_v19 = vcombine.low %v9264_v30, %v9265_v31  ;;  %v9266_v1 = vadd.f32 %v9190_v24, %v8789_v52  ;;  %v17771_v55 = vrot.slane %v10497_v15, %v14415_v7  ;;  %v17793_v31 = vrot.slane %v10799_v3, %v14415_v7  ;;  %v18862_v24 = vld [vmem:[#allocation4_spill] sm:$0xff] }
0x11b2   : > { %v9192_v9 = vpop.permute.xlu1 %9191  ;;  %v9797_v52 = vrot.slane %v17484_v40, %v14415_v7 }
0x11b3   : > { %v9267_v59 = vadd.f32 %v9192_v9, %v8790_v63  ;;  %v10062_v35 = vrot.slane %v10046_v19, %v14415_v7  ;;  %v9335_v63 = vrot.slane %v18863_v22, %v14415_v7 }
0x11b4   : > { %v9194_v2 = vpop.permute.xlu0 %9193  ;;  %v17836_v9 = vrot.slane %v9797_v52, %v14415_v7 }
0x11b5   : > { %v10047_v11 = vcombine.low %v9266_v1, %v9267_v59  ;;  %v9268_v32 = vadd.f32 %v9194_v2, %v8791_v34  ;;  %v10077_v18 = vcombine.low %v10055_v61, %v10062_v35  ;;  %v10028_v1 = vrot.slane %v17497_v16, %v14415_v7 }
0x11b6   : > { %v9196_v10 = vpop.permute.xlu1 %9195 }
0x11b7   : > { %v9269_v49 = vadd.f32 %v9196_v10, %v8792_v4  ;;  %v10069_v44 = vrot.slane %v10047_v11, %v14415_v7  ;;  %v10085_v56 = vrot.slane %v10077_v18, %v14415_v7  ;;  %v17849_v2 = vrot.slane %v10028_v1, %v14415_v7 }
0x11b8   : > { %v9198_v53 = vpop.permute.xlu0 %9197 }
0x11b9   : > { %v9270_v6 = vadd.f32 %v9198_v53, %v8793_v58  ;;  %v10048_v62 = vcombine.low %v9268_v32, %v9269_v49 }
0x11bb   : > { %v10100_v0 = vrot.slane %v9270_v6, %v14415_v7  ;;  %v10076_v13 = vrot.slane %v10048_v62, %v14415_v7 }
0x11bd   : > { %v17751_v51 = vrot.slane %v10100_v0, %v14415_v7  ;;  %v10078_v25 = vcombine.low %v10069_v44, %v10076_v13 }
0x11bf   : > { %10110 = vrot.lane.b32.xlu1 %v17751_v51, %s14290_s25  ;;  %v10092_v37 = vrot.slane %v10078_v25, %v14415_v7 }
0x11c1   : > { %v17764_v48 = vcombine.low %v10085_v56, %v10092_v37 }
0x11c3   : > { %10356 = vrot.lane.b32.xlu1 %v17760_v17, %s14292_s2  ;;  %10108 = vrot.lane.b32.xlu0 %v17764_v48, %s14290_s25  ;;  %s18864_s25 = smov 48  }
0x11c7   : > { %10507 = vrot.lane.b32.xlu1 %v17771_v55, %s14292_s2  ;;  %10354 = vrot.lane.b32.xlu0 %v18859_v39, %s14292_s2 }
0x11cb   : > { %10658 = vrot.lane.b32.xlu1 %v17780_v41, %s14292_s2  ;;  %10656 = vrot.lane.b32.xlu0 %v18860_v20, %s14292_s2 }
0x11cf   : > { %10505 = vrot.lane.b32.xlu1 %v18861_v50, %s14292_s2  ;;  %10901 = vrot.lane.b32.xlu0 %v17653_v28, %s14293_s23  ;;  %v9342_v28 = vrot.slane %v9335_v63, %v14415_v7 }
0x11d3   : > { %10809 = vrot.lane.b32.xlu1 %v17793_v31, %s14292_s2  ;;  %10899 = vrot.lane.b32.xlu0 %v17663_v38, %s14293_s23 }
0x11d7   : > { %10807 = vrot.lane.b32.xlu1 %v18862_v24, %s14292_s2  ;;  %10895 = vrot.lane.b32.xlu0 %v17480_v42, %s14294_s24 }
0x11db   : > { %10992 = vrot.lane.b32.xlu1 %v17687_v21, %s14293_s23  ;;  %v9566_v21 = vrot.slane %v17417_v36, %v14415_v7 }
0x11dd   : > { %v17823_v57 = vrot.slane %v9566_v21, %v14415_v7 }
0x11df   : > { %10897 = vrot.lane.b32.xlu1 %v9342_v28, %s14294_s24 }
0x11fb   : > { %v9418_v45 = vpop.permute.xlu1 %9417 }
0x11fc   : > { %13837 = vmatprep.subr.msk.mxu1 %vm4312_vm3, %v9418_v45 }
0x11fd   : > { %13838 = vmatpush3.xpose.msk.msra.mxu1 %vm4312_vm3, %v9418_v45 }
0x11ff   : > { %v9416_v38 = vpop.permute.xlu0 %9415 }
0x1200   : > { %13839 = vmatprep.subr.msk.mxu1 %vm4312_vm3, %v9416_v38 }
0x1201   : > { %13840 = vmatpush3.xpose.msk.msra.mxu1 %vm4312_vm3, %v9416_v38 }
0x1204   : > { %13842 = vmatmul.mubr.msk.f32.vlgmr.msra.gmra.mxu1 %vm4312_vm3, %v9342_v28 }
0x1205   : > { %13855 = vmatprep.mubr.msk.f32.mxu1 %vm4312_vm3, %v17514_v33 }
0x120d   : > { %v9649_v42 = vpop.permute.xlu1 %9648 }
0x120e   : > { %13844 = vmatprep.subr.msk.mxu0 %vm4312_vm3, %v9649_v42 }
0x120f   : > { %13845 = vmatpush3.xpose.msk.msra.mxu0 %vm4312_vm3, %v9649_v42 }
0x1211   : > { %v9647_v43 = vpop.permute.xlu0 %9646 }
0x1212   : > { %13846 = vmatprep.subr.msk.mxu0 %vm4312_vm3, %v9647_v43 }
0x1213   : > { %13847 = vmatpush3.xpose.msk.msra.mxu0 %vm4312_vm3, %v9647_v43 }
0x1216   : > { %13849 = vmatmul.mubr.msk.f32.vlgmr.msra.gmra.mxu0 %vm4312_vm3, %v17823_v57 }
0x1217   : > { %13862 = vmatprep.mubr.msk.f32.mxu0 %vm4312_vm3, %v17516_v46 }
0x121f   : > { %v9880_v30 = vpop.permute.xlu1 %9879 }
0x1220   : > { %13851 = vmatprep.subr.msk.mxu1 %vm4312_vm3, %v9880_v30 }
0x1221   : > { %13852 = vmatpush3.xpose.msk.msra.mxu1 %vm4312_vm3, %v9880_v30 }
0x1223   : > { %v9878_v36 = vpop.permute.xlu0 %9877 }
0x1224   : > { %13853 = vmatprep.subr.msk.mxu1 %vm4312_vm3, %v9878_v36 }
0x1225   : > { %13854 = vmatpush3.xpose.msk.msra.mxu1 %vm4312_vm3, %v9878_v36 }
0x1228   : > { %13856 = vmatmul.mubr.msk.f32.vlgmr.msra.gmra.mxu1 %vm4312_vm3, %v17836_v9 }
0x1231   : > { %v10111_v29 = vpop.permute.xlu1 %10110 }
0x1232   : > { %13858 = vmatprep.subr.msk.mxu0 %vm4312_vm3, %v10111_v29 }
0x1233   : > { %13859 = vmatpush3.xpose.msk.msra.mxu0 %vm4312_vm3, %v10111_v29 }
0x1235   : > { %v10357_v19 = vpop.permute.xlu1 %10356  ;;  %v10109_v40 = vpop.permute.xlu0 %10108 }
0x1236   : > { %13865 = vmatprep.subr.msk.mxu1 %vm5261_vm6, %v10357_v19  ;;  %13860 = vmatprep.subr.msk.mxu0 %vm4312_vm3, %v10109_v40 }
0x1237   : > { %13866 = vmatpush3.msk.msra.mxu1 %vm5261_vm6, %v10357_v19  ;;  %13861 = vmatpush3.xpose.msk.msra.mxu0 %vm4312_vm3, %v10109_v40 }
0x1239   : > { %v10508_v59 = vpop.permute.xlu1 %10507  ;;  %v10355_v8 = vpop.permute.xlu0 %10354 }
0x123a   : > { %13872 = vmatprep.subr.msk.mxu0 %vm5261_vm6, %v10508_v59  ;;  %13863 = vmatmul.mubr.msk.f32.vlgmr.msra.gmra.mxu0 %vm4312_vm3, %v17849_v2 }
0x123b   : > { %13867 = vmatprep.subr.mxu1 %v10355_v8  ;;  %13873 = vmatpush3.msk.msra.mxu0 %vm5261_vm6, %v10508_v59 }
0x123c   : > { %13868 = vmatpush3.msra.mxu1 %v10355_v8 }
0x123d   : > { %v17855_v16 = vpop.permute.xlu1 %10658  ;;  %v17878_v22 = vpop.permute.xlu0 %10656 }
0x123e   : > { %13879 = vmatprep.subr.msk.mxu1 %vm5261_vm6, %v17855_v16 }
0x1241   : > { %v10506_v11 = vpop.permute.xlu1 %10505  ;;  %v17880_v63 = vpop.permute.xlu0 %10901 }
0x1242   : > { %13874 = vmatprep.subr.mxu0 %v10506_v11 }
0x1243   : > { %13875 = vmatpush3.msra.mxu0 %v10506_v11 }
0x1245   : > { %v17859_v47 = vpop.permute.xlu1 %10809  ;;  %v17884_v45 = vpop.permute.xlu0 %10899 }
0x1246   : > { %13886 = vmatprep.subr.msk.mxu0 %vm5261_vm6, %v17859_v47 }
0x1249   : > { %v17882_v28 = vpop.permute.xlu1 %10807  ;;  %v17888_v42 = vpop.permute.xlu0 %10895 }
0x124d   : > { %v17886_v38 = vpop.permute.xlu1 %10992 }
0x1251   : > { %v17890_v21 = vpop.permute.xlu1 %10897 }
0x12c4   : > { %v13843_v34 = vpop.f32.mrf.mxu1 }
0x12c5   : > { %v10196_v23 = vmul.f32 0.25, %v13843_v34 }
0x12c6   : > { %v9493_v4 = vpop.f32.mrf.mxu1 }
0x12c7   : > { %v10195_v10 = vmul.f32 0.25, %v9493_v4  ;;  %v10206_v60 = vsel %vm5101_vm4, %v10196_v23, -inf }
0x12c8   : > { %10207 = vmax.xlane.f32.xlu0 %v10206_v60 }
0x12c9   : > { %v10203_v58 = vsel %vm5097_vm5, %v10195_v10, -inf }
0x12ca   : > { %10204 = vmax.xlane.f32.xlu1 %v10203_v58 }
0x12d6   : > { %v13850_v35 = vpop.f32.mrf.mxu0 }
0x12d7   : > { %v10198_v32 = vmul.f32 0.25, %v13850_v35 }
0x12d8   : > { %v9724_v49 = vpop.f32.mrf.mxu0 }
0x12d9   : > { %v10197_v53 = vmul.f32 0.25, %v9724_v49  ;;  %v10212_v6 = vsel %vm5101_vm4, %v10198_v32, -inf }
0x12da   : > { %10213 = vmax.xlane.f32.xlu1 %v10212_v6 }
0x12db   : > { %v10209_v61 = vsel %vm5097_vm5, %v10197_v53, -inf }
0x12dc   : > { %10210 = vmax.xlane.f32.xlu0 %v10209_v61 }
0x12e8   : > { %v13857_v62 = vpop.f32.mrf.mxu1 }
0x12e9   : > { %v10200_v0 = vmul.f32 0.25, %v13857_v62 }
0x12ea   : > { %v9955_v18 = vpop.f32.mrf.mxu1 }
0x12eb   : > { %v10199_v44 = vmul.f32 0.25, %v9955_v18  ;;  %v10218_v13 = vsel %vm5101_vm4, %v10200_v0, -inf }
0x12ec   : > { %10219 = vmax.xlane.f32.xlu0 %v10218_v13 }
0x12ed   : > { %v10215_v26 = vsel %vm5097_vm5, %v10199_v44, -inf }
0x12f0   : > { %10216 = vmax.xlane.f32.xlu0 %v10215_v26 }
0x12fa   : > { %v13864_v25 = vpop.f32.mrf.mxu0 }
0x12fb   : > { %v17869_v37 = vmul.f32 0.25, %v13864_v25 }
0x12fc   : > { %v10186_v56 = vpop.f32.mrf.mxu0 }
0x12fd   : > { %v10201_v15 = vmul.f32 0.25, %v10186_v56  ;;  %v10224_v5 = vsel %vm5101_vm4, %v17869_v37, -inf }
0x12fe   : > { %10225 = vmax.xlane.f32.xlu0 %v10224_v5 }
0x12ff   : > { %v10221_v3 = vsel %vm5097_vm5, %v10201_v15, -inf }
0x1300   : > { %10222 = vmax.xlane.f32.xlu1 %v10221_v3 }
0x1311   : > { %11083 = vrot.lane.b32.xlu1 %v17717_v54, %s14293_s23 }
0x1314   : > { %10990 = vrot.lane.b32.xlu0 %v17697_v14, %s14293_s23 }
0x1351   : > { %v10208_v43 = vpop.xlane.xlu0 %10207 }
0x1352   : > { %v10228_v30 = vsub.f32 %v10196_v23, %v10208_v43 }
0x1353   : > { %v10205_v54 = vpop.xlane.xlu1 %10204 }
0x1354   : > { %v10237_v36 = vmul.f32 1.442695, %v10228_v30  ;;  %v10227_v52 = vsub.f32 %v10195_v10, %v10205_v54 }
0x1356   : > { %14173 = vpow2.f32 %v10237_v36  ;;  %v10235_v14 = vmul.f32 1.442695, %v10227_v52 }
0x1358   : > { %14175 = vpow2.f32 %v10235_v14 }
0x1363   : > { %v17892_v29 = vpop.eup %14173  ;;  %v10214_v19 = vpop.xlane.xlu1 %10213 }
0x1364   : > { %v10230_v1 = vsub.f32 %v10198_v32, %v10214_v19  ;;  %v10254_v40 = vsel %vm5101_vm4, %v17892_v29, 0.0 }
0x1365   : > { %v14176_v59 = vpop.eup %14175  ;;  %10255 = vadd.xlane.f32.xlu0 %v10254_v40  ;;  %v10211_v8 = vpop.xlane.xlu0 %10210 }
0x1366   : > { %v10241_v11 = vmul.f32 1.442695, %v10230_v1  ;;  %v10229_v34 = vsub.f32 %v10197_v53, %v10211_v8  ;;  %v10251_v23 = vsel %vm5097_vm5, %v14176_v59, 0.0 }
0x1367   : > { %10252 = vadd.xlane.f32.xlu1 %v10251_v23 }
0x1368   : > { %14177 = vpow2.f32 %v10241_v11  ;;  %v10239_v4 = vmul.f32 1.442695, %v10229_v34 }
0x136a   : > { %14179 = vpow2.f32 %v10239_v4 }
0x1375   : > { %v17897_v10 = vpop.eup %14177  ;;  %v10220_v60 = vpop.xlane.xlu0 %10219 }
0x1376   : > { %v10232_v58 = vsub.f32 %v10200_v0, %v10220_v60  ;;  %v10260_v35 = vsel %vm5101_vm4, %v17897_v10, 0.0 }
0x1377   : > { %v14180_v32 = vpop.eup %14179  ;;  %10261 = vadd.xlane.f32.xlu1 %v10260_v35 }
0x1378   : > { %v10245_v49 = vmul.f32 1.442695, %v10232_v58  ;;  %v10257_v53 = vsel %vm5097_vm5, %v14180_v32, 0.0 }
0x1379   : > { %v10217_v6 = vpop.xlane.xlu0 %10216 }
0x137a   : > { %14181 = vpow2.f32 %v10245_v49  ;;  %v10231_v61 = vsub.f32 %v10199_v44, %v10217_v6 }
0x137b   : > { %10258 = vadd.xlane.f32.xlu1 %v10257_v53 }
0x137c   : > { %v10243_v62 = vmul.f32 1.442695, %v10231_v61 }
0x137e   : > { %14183 = vpow2.f32 %v10243_v62 }
0x1387   : > { %v17902_v18 = vpop.eup %14181  ;;  %v10226_v5 = vpop.xlane.xlu0 %10225 }
0x1388   : > { %v10266_v13 = vsel %vm5101_vm4, %v17902_v18, 0.0  ;;  %v10234_v3 = vsub.f32 %v17869_v37, %v10226_v5 }
0x1389   : > { %10267 = vadd.xlane.f32.xlu0 %v10266_v13  ;;  %v10223_v25 = vpop.xlane.xlu1 %10222 }
0x138a   : > { %v10233_v44 = vsub.f32 %v10201_v15, %v10223_v25  ;;  %v10249_v30 = vmul.f32 1.442695, %v10234_v3 }
0x138b   : > { %v14184_v0 = vpop.eup %14183 }
0x138c   : > { %10988 = vrot.lane.b32.xlu1 %v17823_v57, %s14294_s24  ;;  %v10263_v26 = vsel %vm5097_vm5, %v14184_v0, 0.0  ;;  %v10247_v56 = vmul.f32 1.442695, %v10233_v44 }
0x138d   : > { %10264 = vadd.xlane.f32.xlu0 %v10263_v26 }
0x138e   : > { %14185 = vpow2.f32 %v10247_v56 }
0x138f   : > { %14187 = vpow2.f32 %v10249_v30 }
0x139b   : > { %v17912_v43 = vpop.eup %14185 }
0x139c   : > { %v10269_v54 = vsel %vm5097_vm5, %v17912_v43, 0.0  ;;  %v17916_v57 = vpop.eup %14187 }
0x139d   : > { %v10272_v15 = vsel %vm5101_vm4, %v17916_v57, 0.0 }
0x13a3   : > { %10986 = vrot.lane.b32.xlu0 %v17501_v12, %s14294_s24  ;;  %v17934_v12 = vpop.permute.xlu0 %10990 }
0x13b0   : > { %10270 = vadd.xlane.f32.xlu1 %v10269_v54 }
0x13c1   : > { %11174 = vrot.lane.b32.xlu1 %v17751_v51, %s14293_s23  ;;  %v11084_v51 = vpop.permute.xlu1 %11083 }
0x13c2   : > { %10273 = vadd.xlane.f32.xlu0 %v10272_v15 }
0x13c5   : > { %11079 = vrot.lane.b32.xlu1 %v17836_v9, %s14294_s24 }
0x13c9   : > { %11168 = vrot.lane.b32.xlu1 %v17516_v46, %s14294_s24 }
0x13d8   : > { %11081 = vrot.lane.b32.xlu0 %v17725_v27, %s14293_s23 }
0x13dc   : > { %11077 = vrot.lane.b32.xlu0 %v17514_v33, %s14294_s24 }
0x13e0   : > { %11172 = vrot.lane.b32.xlu0 %v17764_v48, %s14293_s23 }
0x13e4   : > { %11170 = vrot.lane.b32.xlu0 %v17849_v2, %s14294_s24 }
0x13ee   : > { %v10256_v37 = vpop.xlane.xlu0 %10255 }
0x13ef   : > { %14189 = vrcp.f32 %v10256_v37 }
0x13f0   : > { %v10253_v9 = vpop.xlane.xlu1 %10252 }
0x13f1   : > { %14191 = vrcp.f32 %v10253_v9 }
0x13fc   : > { %v14190_v46 = vpop.eup %14189 }
0x13fd   : > { %v10278_v14 = vmul.f32 %v14190_v46, %v17892_v29 }
0x13fe   : > { %v14192_v36 = vpop.eup %14191 }
0x13ff   : > { %v10276_v52 = vmul.f32 %v14192_v36, %v14176_v59 }
0x1400   : > { %v10262_v27 = vpop.xlane.xlu1 %10261 }
0x1401   : > { %13869 = vmatprep.mubr.msk.f32.mxu1 %vm5097_vm5, %v10276_v52  ;;  %14193 = vrcp.f32 %v10262_v27 }
0x1402   : > { %13870 = vmatmul.mubr.msk.f32.vlgmr.msra.gmra.mxu1 %vm5097_vm5, %v10278_v14 }
0x1403   : > { %13880 = vmatpush3.msk.msra.mxu1 %vm5261_vm6, %v17855_v16 }
0x1404   : > { %13881 = vmatprep.subr.mxu1 %v17878_v22  ;;  %v10259_v33 = vpop.xlane.xlu1 %10258 }
0x1405   : > { %14195 = vrcp.f32 %v10259_v33  ;;  %13882 = vmatpush3.msra.mxu1 %v17878_v22 }
0x1406   : > { %13893 = vmatprep.subr.msk.mxu1 %vm4312_vm3, %v17880_v63 }
0x140e   : > { %v14194_v48 = vpop.eup %14193 }
0x140f   : > { %v10282_v1 = vmul.f32 %v14194_v48, %v17897_v10 }
0x1412   : > { %v14196_v2 = vpop.eup %14195  ;;  %v10268_v29 = vpop.xlane.xlu0 %10267 }
0x1413   : > { %v10280_v19 = vmul.f32 %v14196_v2, %v14180_v32  ;;  %14197 = vrcp.f32 %v10268_v29 }
0x1415   : > { %13876 = vmatprep.mubr.msk.f32.mxu0 %vm5097_vm5, %v10280_v19 }
0x1416   : > { %13877 = vmatmul.mubr.msk.f32.vlgmr.msra.gmra.mxu0 %vm5097_vm5, %v10282_v1  ;;  %v10265_v16 = vpop.xlane.xlu0 %10264 }
0x1417   : > { %13887 = vmatpush3.msk.msra.mxu0 %vm5261_vm6, %v17859_v47  ;;  %14199 = vrcp.f32 %v10265_v16  ;;  %v10989_v47 = vpop.permute.xlu1 %10988 }
0x1418   : > { %13888 = vmatprep.subr.mxu0 %v17882_v28 }
0x1419   : > { %13889 = vmatpush3.msra.mxu0 %v17882_v28 }
0x141a   : > { %13900 = vmatprep.subr.msk.mxu0 %vm4312_vm3, %v17886_v38  ;;  %v10987_v11 = vpop.permute.xlu0 %10986 }
0x1420   : > { %v14198_v22 = vpop.eup %14197 }
0x1421   : > { %v10286_v8 = vmul.f32 %v14198_v22, %v17902_v18 }
0x1424   : > { %v14200_v40 = vpop.eup %14199 }
0x1425   : > { %v10284_v59 = vmul.f32 %v14200_v40, %v14184_v0 }
0x1427   : > { %13883 = vmatprep.mubr.msk.f32.mxu1 %vm5097_vm5, %v10284_v59 }
0x1428   : > { %13884 = vmatmul.mubr.msk.f32.vlgmr.msra.gmra.mxu1 %vm5097_vm5, %v10286_v8 }
0x1429   : > { %13894 = vmatpush3.xpose.msk.msra.mxu1 %vm4312_vm3, %v17880_v63  ;;  %13897 = vmatprep.mubr.msk.f32.mxu1 %vm4312_vm3, %v17888_v42 }
0x142a   : > { %13895 = vmatprep.subr.msk.mxu1 %vm4312_vm3, %v17884_v45 }
0x142d   : > { %13896 = vmatpush3.xpose.msk.msra.mxu1 %vm4312_vm3, %v17884_v45 }
0x142e   : > { %13907 = vmatprep.subr.msk.mxu1 %vm4312_vm3, %v11084_v51 }
0x1430   : > { %13898 = vmatmul.mubr.msk.f32.vlgmr.msra.gmra.mxu1 %vm4312_vm3, %v17890_v21 }
0x1431   : > { %13908 = vmatpush3.xpose.msk.msra.mxu1 %vm4312_vm3, %v11084_v51 }
0x1439   : > { %v10271_v28 = vpop.xlane.xlu1 %10270 }
0x143a   : > { %14201 = vrcp.f32 %v10271_v28 }
0x143d   : > { %v11175_v23 = vpop.permute.xlu1 %11174 }
0x1441   : > { %v11080_v4 = vpop.permute.xlu1 %11079 }
0x1445   : > { %v11169_v58 = vpop.permute.xlu1 %11168 }
0x1447   : > { %v14202_v63 = vpop.eup %14201 }
0x1448   : > { %v10288_v42 = vmul.f32 %v14202_v63, %v17912_v43 }
0x144a   : > { %13890 = vmatprep.mubr.msk.f32.mxu0 %vm5097_vm5, %v10288_v42 }
0x144b   : > { %v10274_v34 = vpop.xlane.xlu0 %10273 }
0x144c   : > { %14203 = vrcp.f32 %v10274_v34 }
0x144f   : > { %v11082_v45 = vpop.permute.xlu0 %11081 }
0x1450   : > { %13909 = vmatprep.subr.msk.mxu1 %vm4312_vm3, %v11082_v45 }
0x1451   : > { %13910 = vmatpush3.xpose.msk.msra.mxu1 %vm4312_vm3, %v11082_v45 }
0x1453   : > { %v11078_v21 = vpop.permute.xlu0 %11077 }
0x1454   : > { %13911 = vmatprep.mubr.msk.f32.mxu1 %vm4312_vm3, %v11078_v21 }
0x1455   : > { %13912 = vmatmul.mubr.msk.f32.vlgmr.msra.gmra.mxu1 %vm4312_vm3, %v11080_v4 }
0x1457   : > { %v11173_v35 = vpop.permute.xlu0 %11172 }
0x1459   : > { %v14204_v10 = vpop.eup %14203 }
0x145a   : > { %v10290_v60 = vmul.f32 %v14204_v10, %v17916_v57 }
0x145c   : > { %13891 = vmatmul.mubr.msk.f32.vlgmr.msra.gmra.mxu0 %vm5097_vm5, %v10290_v60 }
0x145d   : > { %13901 = vmatpush3.xpose.msk.msra.mxu0 %vm4312_vm3, %v17886_v38  ;;  %13904 = vmatprep.mubr.msk.f32.mxu0 %vm4312_vm3, %v10987_v11  ;;  %v11171_v38 = vpop.permute.xlu0 %11170 }
0x145e   : > { %13902 = vmatprep.subr.msk.mxu0 %vm4312_vm3, %v17934_v12 }
0x1461   : > { %13903 = vmatpush3.xpose.msk.msra.mxu0 %vm4312_vm3, %v17934_v12 }
0x1462   : > { %13914 = vmatprep.subr.msk.mxu0 %vm4312_vm3, %v11175_v23 }
0x1464   : > { %13905 = vmatmul.mubr.msk.f32.vlgmr.msra.gmra.mxu0 %vm4312_vm3, %v10989_v47 }
0x1465   : > { %13915 = vmatpush3.xpose.msk.msra.mxu0 %vm4312_vm3, %v11175_v23  ;;  %13918 = vmatprep.mubr.msk.f32.mxu0 %vm4312_vm3, %v11169_v58 }
0x1466   : > { %13916 = vmatprep.subr.msk.mxu0 %vm4312_vm3, %v11173_v35 }
0x1469   : > { %13917 = vmatpush3.xpose.msk.msra.mxu0 %vm4312_vm3, %v11173_v35 }
0x146c   : > { %13919 = vmatmul.mubr.msk.f32.vlgmr.msra.gmra.mxu0 %vm4312_vm3, %v11171_v38 }
0x14c2   : > { %v17991_v32 = vpop.f32.mrf.mxu1 }
0x14c4   : > { %v17993_v49 = vpop.f32.mrf.mxu1 }
0x14d6   : > { %v18001_v56 = vpop.f32.mrf.mxu0 }
0x14d8   : > { %v18004_v43 = vpop.f32.mrf.mxu0 }
0x14e8   : > { %v17995_v6 = vpop.f32.mrf.mxu1 }
0x14ea   : > { %v17997_v61 = vpop.f32.mrf.mxu1 }
0x14f0   : > { %v13899_v53 = vpop.f32.mrf.mxu1 }
0x14f1   : > { %v11260_v62 = vmul.f32 0.25, %v13899_v53 }
0x14f2   : > { %v10977_v18 = vpop.f32.mrf.mxu1 }
0x14f3   : > { %v11259_v13 = vmul.f32 0.25, %v10977_v18  ;;  %v11270_v0 = vsel %vm5101_vm4, %v11260_v62, -inf }
0x14f4   : > { %11271 = vmax.xlane.f32.xlu0 %v11270_v0 }
0x14f5   : > { %v11267_v26 = vsel %vm5097_vm5, %v11259_v13, -inf }
0x14f6   : > { %11268 = vmax.xlane.f32.xlu1 %v11267_v26 }
0x1515   : > { %v13913_v25 = vpop.f32.mrf.mxu1 }
0x1516   : > { %v11264_v46 = vmul.f32 0.25, %v13913_v25 }
0x1517   : > { %v11159_v44 = vpop.f32.mrf.mxu1 }
0x1518   : > { %v11263_v5 = vmul.f32 0.25, %v11159_v44  ;;  %v11282_v33 = vsel %vm5101_vm4, %v11264_v46, -inf }
0x151a   : > { %v11279_v3 = vsel %vm5097_vm5, %v11263_v5, -inf }
0x151b   : > { %11280 = vmax.xlane.f32.xlu1 %v11279_v3 }
0x151c   : > { %v18006_v30 = vpop.f32.mrf.mxu0 }
0x151e   : > { %v18008_v54 = vpop.f32.mrf.mxu0 }
0x1524   : > { %v13906_v57 = vpop.f32.mrf.mxu0 }
0x1525   : > { %v11262_v51 = vmul.f32 0.25, %v13906_v57 }
0x1526   : > { %v11068_v15 = vpop.f32.mrf.mxu0 }
0x1527   : > { %v11261_v12 = vmul.f32 0.25, %v11068_v15  ;;  %v11276_v36 = vsel %vm5101_vm4, %v11262_v51, -inf }
0x1529   : > { %v11273_v37 = vsel %vm5097_vm5, %v11261_v12, -inf }
0x152a   : > { %11274 = vmax.xlane.f32.xlu0 %v11273_v37 }
0x152c   : > { %v13920_v9 = vpop.f32.mrf.mxu0 }
0x152d   : > { %v11266_v14 = vmul.f32 0.25, %v13920_v9 }
0x152e   : > { %11277 = vmax.xlane.f32.xlu0 %v11276_v36  ;;  %v11250_v52 = vpop.f32.mrf.mxu0 }
0x152f   : > { %v11265_v27 = vmul.f32 0.25, %v11250_v52  ;;  %v11288_v2 = vsel %vm5101_vm4, %v11266_v14, -inf }
0x1531   : > { %v11285_v48 = vsel %vm5097_vm5, %v11265_v27, -inf }
0x1532   : > { %11283 = vmax.xlane.f32.xlu0 %v11282_v33  ;;  %11286 = vmax.xlane.f32.xlu1 %v11285_v48 }
0x1536   : > { %11289 = vmax.xlane.f32.xlu0 %v11288_v2 }
0x1543   : > { %11357 = vrot.lane.b32.xlu1 %v17760_v17, %s18864_s25 }
0x1547   : > { %11445 = vrot.lane.b32.xlu1 %v17771_v55, %s18864_s25 }
0x154b   : > { %11443 = vrot.lane.b32.xlu1 %v18861_v50, %s18864_s25 }
0x154c   : > { %11355 = vrot.lane.b32.xlu0 %v18859_v39, %s18864_s25 }
0x154f   : > { %11533 = vrot.lane.b32.xlu1 %v17780_v41, %s18864_s25 }
0x1550   : > { %11531 = vrot.lane.b32.xlu0 %v18860_v20, %s18864_s25 }
0x157d   : > { %v11272_v29 = vpop.xlane.xlu0 %11271 }
0x157e   : > { %v11292_v19 = vsub.f32 %v11260_v62, %v11272_v29 }
0x157f   : > { %v11269_v1 = vpop.xlane.xlu1 %11268 }
0x1580   : > { %v11301_v16 = vmul.f32 1.442695, %v11292_v19  ;;  %v11291_v17 = vsub.f32 %v11259_v13, %v11269_v1 }
0x1582   : > { %14205 = vpow2.f32 %v11301_v16  ;;  %v11299_v22 = vmul.f32 1.442695, %v11291_v17 }
0x1584   : > { %14207 = vpow2.f32 %v11299_v22 }
0x158f   : > { %v18027_v55 = vpop.eup %14205 }
0x1590   : > { %v11318_v50 = vsel %vm5101_vm4, %v18027_v55, 0.0 }
0x1591   : > { %v18031_v39 = vpop.eup %14207  ;;  %11319 = vadd.xlane.f32.xlu0 %v11318_v50 }
0x1592   : > { %v11315_v41 = vsel %vm5097_vm5, %v18031_v39, 0.0 }
0x1593   : > { %11316 = vadd.xlane.f32.xlu1 %v11315_v41 }
0x15a4   : > { %v11281_v20 = vpop.xlane.xlu1 %11280 }
0x15a5   : > { %v11295_v40 = vsub.f32 %v11263_v5, %v11281_v20 }
0x15a7   : > { %v11307_v47 = vmul.f32 1.442695, %v11295_v40 }
0x15b3   : > { %v11275_v59 = vpop.xlane.xlu0 %11274 }
0x15b4   : > { %v11293_v8 = vsub.f32 %v11261_v12, %v11275_v59 }
0x15b6   : > { %v11303_v28 = vmul.f32 1.442695, %v11293_v8 }
0x15b7   : > { %v11278_v63 = vpop.xlane.xlu0 %11277 }
0x15b8   : > { %14209 = vpow2.f32 %v11303_v28  ;;  %v11294_v11 = vsub.f32 %v11262_v51, %v11278_v63 }
0x15b9   : > { %14211 = vpow2.f32 %v11307_v47 }
0x15ba   : > { %v11305_v42 = vmul.f32 1.442695, %v11294_v11 }
0x15bb   : > { %v11287_v34 = vpop.xlane.xlu1 %11286  ;;  %v11284_v23 = vpop.xlane.xlu0 %11283 }
0x15bc   : > { %14213 = vpow2.f32 %v11305_v42  ;;  %v11297_v45 = vsub.f32 %v11265_v27, %v11287_v34  ;;  %v11296_v21 = vsub.f32 %v11264_v46, %v11284_v23  ;;  %v13217_v23 = vld [vmem:[%s18390_s6 + $0x38] sm:$0xff] }
0x15be   : > { %v11311_v4 = vmul.f32 1.442695, %v11297_v45  ;;  %v11309_v10 = vmul.f32 1.442695, %v11296_v21  ;;  %v13216_v45 = vld [vmem:[%s18390_s6 + $0x30] sm:$0xff]  ;;  %v13215_v21 = vld [vmem:[%s18390_s6 + $0x28] sm:$0xff] }
0x15bf   : > { %v11358_v60 = vpop.permute.xlu1 %11357  ;;  %v11290_v58 = vpop.xlane.xlu0 %11289 }
0x15c0   : > { %14215 = vpow2.f32 %v11311_v4  ;;  %v11298_v35 = vsub.f32 %v11266_v14, %v11290_v58  ;;  %13921 = vmatprep.subr.msk.mxu1 %vm5261_vm6, %v11358_v60  ;;  %v13214_v4 = vld [vmem:[%s18390_s6 + $0x20] sm:$0xff] }
0x15c1   : > { %14217 = vpow2.f32 %v11309_v10  ;;  %13922 = vmatpush3.msk.msra.mxu1 %vm5261_vm6, %v11358_v60 }
0x15c2   : > { %v11313_v38 = vmul.f32 1.442695, %v11298_v35 }
0x15c3   : > { %v11446_v53 = vpop.permute.xlu1 %11445  ;;  %v11356_v62 = vpop.permute.xlu0 %11355 }
0x15c4   : > { %14219 = vpow2.f32 %v11313_v38  ;;  %13923 = vmatprep.subr.mxu1 %v11356_v62  ;;  %13928 = vmatprep.subr.msk.mxu0 %vm5261_vm6, %v11446_v53 }
0x15c5   : > { %v14210_v18 = vpop.eup %14209  ;;  %13924 = vmatpush3.msra.mxu1 %v11356_v62  ;;  %13929 = vmatpush3.msk.msra.mxu0 %vm5261_vm6, %v11446_v53 }
0x15c6   : > { %v11321_v13 = vsel %vm5097_vm5, %v14210_v18, 0.0  ;;  %v14212_v0 = vpop.eup %14211 }
0x15c7   : > { %v11444_v26 = vpop.permute.xlu1 %11443  ;;  %11322 = vadd.xlane.f32.xlu1 %v11321_v13  ;;  %v11327_v44 = vsel %vm5097_vm5, %v14212_v0, 0.0  ;;  %v11532_v46 = vpop.permute.xlu0 %11531 }
0x15c8   : > { %13930 = vmatprep.subr.mxu0 %v11444_v26 }
0x15c9   : > { %v14214_v25 = vpop.eup %14213  ;;  %13931 = vmatpush3.msra.mxu0 %v11444_v26 }
0x15ca   : > { %v11324_v5 = vsel %vm5101_vm4, %v14214_v25, 0.0 }
0x15cb   : > { %v11534_v3 = vpop.permute.xlu1 %11533  ;;  %11328 = vadd.xlane.f32.xlu1 %v11327_v44  ;;  %11325 = vadd.xlane.f32.xlu0 %v11324_v5 }
0x15cc   : > { %13935 = vmatprep.subr.msk.mxu1 %vm5261_vm6, %v11534_v3 }
0x15cd   : > { %v14216_v57 = vpop.eup %14215 }
0x15ce   : > { %v14218_v15 = vpop.eup %14217  ;;  %v11333_v12 = vsel %vm5097_vm5, %v14216_v57, 0.0 }
0x15cf   : > { %11334 = vadd.xlane.f32.xlu1 %v11333_v12  ;;  %v11330_v51 = vsel %vm5101_vm4, %v14218_v15, 0.0 }
0x15d0   : > { %11331 = vadd.xlane.f32.xlu0 %v11330_v51 }
0x15d1   : > { %v14220_v37 = vpop.eup %14219 }
0x15d2   : > { %v11336_v9 = vsel %vm5101_vm4, %v14220_v37, 0.0 }
0x15d4   : > { %11337 = vadd.xlane.f32.xlu0 %v11336_v9 }
0x15e0   : > { %11621 = vrot.lane.b32.xlu1 %v17793_v31, %s18864_s25  ;;  %v18865_v31 = vmov 0.0  }
0x15ea   : > { %11619 = vrot.lane.b32.xlu0 %v18862_v24, %s18864_s25 }
0x161a   : > { %v11320_v36 = vpop.xlane.xlu0 %11319 }
0x161b   : > { %14221 = vrcp.f32 %v11320_v36 }
0x161c   : > { %v11317_v52 = vpop.xlane.xlu1 %11316 }
0x161d   : > { %14223 = vrcp.f32 %v11317_v52 }
0x1628   : > { %v14222_v27 = vpop.eup %14221 }
0x1629   : > { %v11342_v48 = vmul.f32 %v14222_v27, %v18027_v55 }
0x162a   : > { %v14224_v14 = vpop.eup %14223 }
0x162b   : > { %v11340_v33 = vmul.f32 %v14224_v14, %v18031_v39 }
0x162d   : > { %13925 = vmatprep.mubr.msk.f32.mxu1 %vm5097_vm5, %v11340_v33 }
0x162e   : > { %13926 = vmatmul.mubr.msk.f32.vlgmr.msra.gmra.mxu1 %vm5097_vm5, %v11342_v48 }
0x162f   : > { %13936 = vmatpush3.msk.msra.mxu1 %vm5261_vm6, %v11534_v3 }
0x1630   : > { %13937 = vmatprep.subr.mxu1 %v11532_v46 }
0x1631   : > { %13938 = vmatpush3.msra.mxu1 %v11532_v46 }
0x1632   : > { %13949 = vmatprep.subr.mxu1 %v18865_v31 }
0x1650   : > { %v11323_v24 = vpop.xlane.xlu1 %11322 }
0x1651   : > { %14225 = vrcp.f32 %v11323_v24 }
0x1654   : > { %v11329_v2 = vpop.xlane.xlu1 %11328  ;;  %v11326_v29 = vpop.xlane.xlu0 %11325 }
0x1655   : > { %14227 = vrcp.f32 %v11329_v2 }
0x1656   : > { %14229 = vrcp.f32 %v11326_v29 }
0x1658   : > { %v11335_v19 = vpop.xlane.xlu1 %11334 }
0x1659   : > { %14231 = vrcp.f32 %v11335_v19  ;;  %v11332_v1 = vpop.xlane.xlu0 %11331 }
0x165a   : > { %14233 = vrcp.f32 %v11332_v1 }
0x165c   : > { %v11622_v16 = vpop.permute.xlu1 %11621 }
0x165d   : > { %v11338_v17 = vpop.xlane.xlu0 %11337  ;;  %13942 = vmatprep.subr.msk.mxu0 %vm5261_vm6, %v11622_v16 }
0x165e   : > { %v14226_v22 = vpop.eup %14225  ;;  %14235 = vrcp.f32 %v11338_v17 }
0x165f   : > { %v11344_v55 = vmul.f32 %v14226_v22, %v14210_v18 }
0x1661   : > { %13932 = vmatprep.mubr.msk.f32.mxu0 %vm5097_vm5, %v11344_v55  ;;  %v11620_v8 = vpop.permute.xlu0 %11619 }
0x1662   : > { %v14228_v50 = vpop.eup %14227 }
0x1663   : > { %v14230_v39 = vpop.eup %14229  ;;  %v11348_v41 = vmul.f32 %v14228_v50, %v14212_v0 }
0x1664   : > { %v11346_v20 = vmul.f32 %v14230_v39, %v14214_v25 }
0x1665   : > { %13939 = vmatprep.mubr.msk.f32.mxu1 %vm5097_vm5, %v11348_v41 }
0x1666   : > { %v14232_v40 = vpop.eup %14231  ;;  %13933 = vmatmul.mubr.msk.f32.vlgmr.msra.gmra.mxu0 %vm5097_vm5, %v11346_v20 }
0x1667   : > { %v14234_v59 = vpop.eup %14233  ;;  %13943 = vmatpush3.msk.msra.mxu0 %vm5261_vm6, %v11622_v16  ;;  %v11352_v47 = vmul.f32 %v14232_v40, %v14216_v57 }
0x1668   : > { %13944 = vmatprep.subr.mxu0 %v11620_v8  ;;  %v11350_v28 = vmul.f32 %v14234_v59, %v14218_v15 }
0x1669   : > { %13945 = vmatpush3.msra.mxu0 %v11620_v8  ;;  %13946 = vmatprep.mubr.msk.f32.mxu0 %vm5097_vm5, %v11352_v47 }
0x166a   : > { %13940 = vmatmul.mubr.msk.f32.vlgmr.msra.gmra.mxu1 %vm5097_vm5, %v11350_v28  ;;  %13972 = vmatprep.subr.mxu0 %v18865_v31 }
0x166b   : > { %v14236_v63 = vpop.eup %14235  ;;  %13957 = vmatprep.mubr.msk.f32.mxu1 %vm14289_vm2, %v18865_v31  ;;  %13950 = vmatpush3.msra.mxu1 %v13217_v23 }
0x166c   : > { %v11354_v11 = vmul.f32 %v14236_v63, %v14220_v37  ;;  %13951 = vmatprep.subr.mxu1 %v18865_v31 }
0x166d   : > { %13952 = vmatpush3.msra.mxu1 %v13216_v45 }
0x166e   : > { %13947 = vmatmul.mubr.msk.f32.vlgmr.msra.gmra.mxu0 %vm5097_vm5, %v11354_v11  ;;  %13953 = vmatprep.subr.mxu1 %v18865_v31 }
0x166f   : > { %13980 = vmatprep.mubr.msk.f32.mxu0 %vm14289_vm2, %v18865_v31  ;;  %13954 = vmatpush3.msra.mxu1 %v13215_v21 }
0x1670   : > { %13955 = vmatprep.subr.mxu1 %v18865_v31 }
0x1671   : > { %13956 = vmatpush3.msra.mxu1 %v13214_v4 }
0x1672   : > { %13995 = vmatprep.subr.mxu1 %v18865_v31 }
0x16ee   : > { %v13927_v42 = vpop.f32.mrf.mxu1 }
0x16f0   : > { %v11434_v34 = vpop.f32.mrf.mxu1 }
0x16f1   : > { %11715 = vrot.lane.b32.xlu1 %v11434_v34, %s18866_s27 }
0x16f5   : > { %11717 = vrot.lane.b32.xlu1 %v13927_v42, %s18866_s27 }
0x1726   : > { %v13934_v10 = vpop.f32.mrf.mxu0 }
0x1727   : > { %11721 = vrot.lane.b32.xlu1 %v13934_v10, %s18866_s27 }
0x1728   : > { %v11522_v60 = vpop.f32.mrf.mxu0 }
0x1729   : > { %11719 = vrot.lane.b32.xlu0 %v11522_v60, %s18866_s27 }
0x172a   : > { %v13941_v58 = vpop.f32.mrf.mxu1 }
0x172b   : > { %11725 = vrot.lane.b32.xlu1 %v13941_v58, %s18866_s27 }
0x172c   : > { %v11610_v35 = vpop.f32.mrf.mxu1 }
0x172d   : > { %11723 = vrot.lane.b32.xlu0 %v11610_v35, %s18866_s27 }
0x172e   : > { %v13948_v38 = vpop.f32.mrf.mxu0 }
0x1730   : > { %v11698_v53 = vpop.f32.mrf.mxu0 }
0x1731   : > { %11727 = vrot.lane.b32.xlu0 %v11698_v53, %s18866_s27 }
0x1735   : > { %11729 = vrot.lane.b32.xlu0 %v13948_v38, %s18866_s27 }
0x1763   : > { %v11716_v62 = vpop.permute.xlu1 %11715 }
0x1764   : > { %v11739_v18 = vsel %vm4312_vm3, %v17993_v49, %v11716_v62 }
0x1765   : > { %v11755_v13 = vcombine.high %v11739_v18, %v11739_v18  ;;  %v11762_v0 = vrot.slane %v11739_v18, %v14415_v7 }
0x1767   : > { %v11769_v26 = vrot.slane %v11755_v13, %v14415_v7  ;;  %v11770_v25 = vcombine.high %v11762_v0, %v11762_v0  ;;  %v11778_v5 = vrot.slane %v11762_v0, %v14415_v7  ;;  %v11718_v2 = vpop.permute.xlu1 %11717 }
0x1768   : > { %v11740_v29 = vsel %vm4312_vm3, %v17991_v32, %v11718_v2 }
0x1769   : > { %v11771_v44 = vcombine.high %v11769_v26, %v11769_v26  ;;  %v11792_v3 = vrot.slane %v11770_v25, %v14415_v7  ;;  %v11785_v57 = vrot.slane %v11769_v26, %v14415_v7  ;;  %v11810_v17 = vrot.slane %v11740_v29, %v14415_v7 }
0x176b   : > { %v11799_v15 = vrot.slane %v11771_v44, %v14415_v7  ;;  %v12020_v12 = vcombine.low %v11778_v5, %v11792_v3  ;;  %v13220_v51 = vcombine.high %v11778_v5, %v11792_v3  ;;  %v11817_v8 = vrot.slane %v11810_v17, %v14415_v7 }
0x176d   : > { %v12022_v37 = vcombine.low %v11785_v57, %v11799_v15  ;;  %v13221_v9 = vcombine.high %v11785_v57, %v11799_v15  ;;  %v12030_v49 = vrot.slane %v12020_v12, %v14415_v7  ;;  %v12037_v46 = vrot.slane %v13220_v51, %v14415_v7 }
0x176f   : > { %v12044_v36 = vrot.slane %v12022_v37, %v14415_v7  ;;  %v12051_v52 = vrot.slane %v13221_v9, %v14415_v7  ;;  %v12052_v27 = vcombine.low %v12030_v49, %v12037_v46 }
0x1771   : > { %v12053_v14 = vcombine.low %v12044_v36, %v12051_v52  ;;  %v12060_v33 = vrot.slane %v12052_v27, %v14415_v7 }
0x1773   : > { %v12067_v48 = vrot.slane %v12053_v14, %v14415_v7 }
0x1775   : > { %v12068_v24 = vcombine.low %v12060_v33, %v12067_v48 }
0x1777   : > { %13958 = vmatmul.mubr.msk.f32.vlgmr.msra.gmra.mxu1 %vm1273_vm0, %v12068_v24 }
0x1778   : > { %13960 = vmatprep.mubr.msk.f32.mxu1 %vm14289_vm2, %v18865_v31 }
0x1799   : > { %v11722_v19 = vpop.permute.xlu1 %11721 }
0x179a   : > { %v11742_v1 = vsel %vm4312_vm3, %v18001_v56, %v11722_v19 }
0x179b   : > { %v11720_v16 = vpop.permute.xlu0 %11719  ;;  %v11873_v41 = vrot.slane %v11742_v1, %v14415_v7 }
0x179c   : > { %v11741_v22 = vsel %vm4312_vm3, %v18004_v43, %v11720_v16 }
0x179d   : > { %v11818_v55 = vcombine.high %v11741_v22, %v11741_v22  ;;  %v11825_v50 = vrot.slane %v11741_v22, %v14415_v7  ;;  %v11726_v39 = vpop.permute.xlu1 %11725 }
0x179e   : > { %v11744_v20 = vsel %vm4312_vm3, %v17995_v6, %v11726_v39  ;;  %v11880_v6 = vrot.slane %v11873_v41, %v14415_v7 }
0x179f   : > { %v11832_v32 = vrot.slane %v11818_v55, %v14415_v7  ;;  %v11833_v40 = vcombine.high %v11825_v50, %v11825_v50  ;;  %v11841_v56 = vrot.slane %v11825_v50, %v14415_v7  ;;  %v11724_v59 = vpop.permute.xlu0 %11723  ;;  %v11936_v47 = vrot.slane %v11744_v20, %v14415_v7 }
0x17a0   : > { %v11743_v43 = vsel %vm4312_vm3, %v17997_v61, %v11724_v59 }
0x17a1   : > { %v11834_v28 = vcombine.high %v11832_v32, %v11832_v32  ;;  %v11848_v63 = vrot.slane %v11832_v32, %v14415_v7  ;;  %v11855_v11 = vrot.slane %v11833_v40, %v14415_v7  ;;  %v11863_v42 = vcombine.high %v11841_v56, %v11841_v56 }
0x17a2   : > { %v12069_v34 = vcombine.low %v11817_v8, %v11841_v56  ;;  %v11881_v23 = vcombine.high %v11743_v43, %v11743_v43  ;;  %v11888_v45 = vrot.slane %v11743_v43, %v14415_v7  ;;  %v11943_v35 = vrot.slane %v11936_v47, %v14415_v7 }
0x17a3   : > { %v11862_v21 = vrot.slane %v11834_v28, %v14415_v7  ;;  %v11864_v4 = vcombine.high %v11848_v63, %v11848_v63  ;;  %v11865_v10 = vcombine.high %v11855_v11, %v11855_v11  ;;  %v12070_v60 = vcombine.low %v11855_v11, %v11863_v42  ;;  %v11728_v58 = vpop.permute.xlu0 %11727 }
0x17a4   : > { %v12079_v61 = vrot.slane %v12069_v34, %v14415_v7  ;;  %v11895_v38 = vrot.slane %v11881_v23, %v14415_v7  ;;  %v11896_v53 = vcombine.high %v11888_v45, %v11888_v45  ;;  %v11904_v25 = vrot.slane %v11888_v45, %v14415_v7 }
0x17a5   : > { %v11866_v62 = vcombine.high %v11862_v21, %v11862_v21  ;;  %v12071_v18 = vcombine.low %v11865_v10, %v11848_v63  ;;  %v12072_v13 = vcombine.low %v11862_v21, %v11864_v4  ;;  %v12086_v0 = vrot.slane %v12070_v60, %v14415_v7 }
0x17a6   : > { %v11897_v26 = vcombine.high %v11895_v38, %v11895_v38  ;;  %v11918_v44 = vrot.slane %v11896_v53, %v14415_v7  ;;  %v11745_v5 = vsel %vm4312_vm3, %v18008_v54, %v11728_v58  ;;  %v11911_v12 = vrot.slane %v11895_v38, %v14415_v7 }
0x17a7   : > { %v12093_v3 = vrot.slane %v12071_v18, %v14415_v7  ;;  %v12100_v57 = vrot.slane %v12072_v13, %v14415_v7  ;;  %v12118_v15 = vcombine.low %v11866_v62, %v11880_v6  ;;  %v11730_v51 = vpop.permute.xlu0 %11729  ;;  %v11944_v46 = vcombine.high %v11745_v5, %v11745_v5 }
0x17a8   : > { %v11925_v37 = vrot.slane %v11897_v26, %v14415_v7  ;;  %v12119_v9 = vcombine.low %v11904_v25, %v11918_v44  ;;  %v13222_v49 = vcombine.high %v11904_v25, %v11918_v44  ;;  %v12101_v36 = vcombine.low %v12079_v61, %v12086_v0  ;;  %v13219_v26 = vld [vmem:[%s18391_s7 + $0x1] ss:$0 sm:$0xff] }
0x17a9   : > { %v12128_v52 = vrot.slane %v12118_v15, %v14415_v7  ;;  %v11951_v27 = vrot.slane %v11745_v5, %v14415_v7  ;;  %v11746_v54 = vsel %vm4312_vm3, %v18006_v30, %v11730_v51  ;;  %v12102_v24 = vcombine.low %v12093_v3, %v12100_v57  ;;  %v18867_v3 = vld [vmem:[#allocation20_spill] sm:$0xff] }
0x17aa   : > { %v12121_v14 = vcombine.low %v11911_v12, %v11925_v37  ;;  %v12135_v33 = vrot.slane %v12119_v9, %v14415_v7  ;;  %v13223_v48 = vcombine.high %v11911_v12, %v11925_v37  ;;  %v12142_v2 = vrot.slane %v13222_v49, %v14415_v7  ;;  %v18868_v9 = vld [vmem:[#allocation21_spill] sm:$0xff] }
0x17ab   : > { %v11958_v29 = vrot.slane %v11944_v46, %v14415_v7  ;;  %v11959_v19 = vcombine.high %v11951_v27, %v11951_v27  ;;  %v11967_v1 = vrot.slane %v11951_v27, %v14415_v7  ;;  %v11999_v55 = vrot.slane %v11746_v54, %v14415_v7  ;;  %v18869_v54 = vld [vmem:[#allocation22_spill] sm:$0xff] }
0x17ac   : > { %v12149_v16 = vrot.slane %v12121_v14, %v14415_v7  ;;  %v12150_v17 = vcombine.low %v12128_v52, %v12135_v33  ;;  %v12177_v22 = vrot.slane %v13223_v48, %v14415_v7  ;;  %v12109_v40 = vrot.slane %v12101_v36, %v14415_v7 }
0x17ad   : > { %v11960_v30 = vcombine.high %v11958_v29, %v11958_v29  ;;  %v11974_v50 = vrot.slane %v11958_v29, %v14415_v7  ;;  %v11981_v39 = vrot.slane %v11959_v19, %v14415_v7  ;;  %v11989_v41 = vcombine.high %v11967_v1, %v11967_v1  ;;  %v18870_v29 = vld [vmem:[#allocation11_spill] sm:$0xff] }
0x17ae   : > { %v12151_v20 = vcombine.low %v12142_v2, %v12149_v16  ;;  %v12168_v32 = vcombine.low %v11943_v35, %v11967_v1  ;;  %v12116_v56 = vrot.slane %v12102_v24, %v14415_v7  ;;  %v12158_v11 = vrot.slane %v12150_v17, %v14415_v7 }
0x17af   : > { %v11988_v59 = vrot.slane %v11960_v30, %v14415_v7  ;;  %v11990_v8 = vcombine.high %v11974_v50, %v11974_v50  ;;  %v11991_v47 = vcombine.high %v11981_v39, %v11981_v39  ;;  %v12169_v43 = vcombine.low %v11981_v39, %v11989_v41  ;;  %v13236_v41 = vld [vmem:[%s18394_s10 + $0x38] sm:$0xff] }
0x17b0   : > { %v12184_v28 = vrot.slane %v12168_v32, %v14415_v7  ;;  %v12117_v63 = vcombine.low %v12109_v40, %v12116_v56  ;;  %v12165_v42 = vrot.slane %v12151_v20, %v14415_v7  ;;  %v12006_v23 = vrot.slane %v11999_v55, %v14415_v7  ;;  %v13235_v20 = vld [vmem:[%s18394_s10 + $0x30] sm:$0xff]  ;;  %13973 = vmatpush3.msra.mxu0 %v13236_v41  ;;  %v13234_v32 = vld [vmem:[%s18394_s10 + $0x28] sm:$0xff]  ;;  %v13233_v40 = vld [vmem:[%s18394_s10 + $0x20] sm:$0xff] }
0x17b1   : > { %v12170_v6 = vcombine.low %v11991_v47, %v11974_v50  ;;  %v11992_v34 = vcombine.high %v11988_v59, %v11988_v59  ;;  %v12191_v45 = vrot.slane %v12169_v43, %v14415_v7  ;;  %v12216_v60 = vcombine.low %v11988_v59, %v11990_v8  ;;  %13974 = vmatprep.subr.mxu0 %v18865_v31  ;;  %v13247_v41 = vld [vmem:[%s18396_s12 + $0x58] sm:$0xff] }
0x17b2   : > { %13961 = vmatmul.mubr.msk.f32.gmra.mxu1 %vm1273_vm0, %v12117_v63  ;;  %v12166_v21 = vcombine.low %v12158_v11, %v12165_v42  ;;  %v12199_v10 = vcombine.low %v12177_v22, %v12184_v28  ;;  %13975 = vmatpush3.msra.mxu0 %v13235_v20  ;;  %v13246_v20 = vld [vmem:[%s18396_s12 + $0x50] sm:$0xff] }
0x17b3   : > { %v12198_v4 = vrot.slane %v12170_v6, %v14415_v7  ;;  %v12217_v58 = vcombine.low %v11992_v34, %v12006_v23  ;;  %13963 = vmatprep.mubr.msk.f32.mxu1 %vm14289_vm2, %v18865_v31  ;;  %v12224_v62 = vrot.slane %v12216_v60, %v14415_v7  ;;  %13976 = vmatprep.subr.mxu0 %v18865_v31 }
0x17b4   : > { %v12207_v38 = vrot.slane %v12199_v10, %v14415_v7  ;;  %13977 = vmatpush3.msra.mxu0 %v13234_v32  ;;  %v13245_v32 = vld [vmem:[%s18396_s12 + $0x48] sm:$0xff] }
0x17b5   : > { %v12231_v61 = vrot.slane %v12217_v58, %v14415_v7  ;;  %v12200_v35 = vcombine.low %v12191_v45, %v12198_v4  ;;  %13978 = vmatprep.subr.mxu0 %v18865_v31  ;;  %v18871_v45 = vld [vmem:[#allocation23_spill] sm:$0xff] }
0x17b6   : > { %13964 = vmatmul.mubr.msk.f32.gmra.mxu1 %vm1273_vm0, %v12166_v21  ;;  %13979 = vmatpush3.msra.mxu0 %v13233_v40  ;;  %v13244_v40 = vld [vmem:[%s18396_s12 + $0x40] sm:$0xff] }
0x17b7   : > { %13966 = vmatprep.mubr.msk.f32.mxu1 %vm14289_vm2, %v18865_v31  ;;  %v12214_v53 = vrot.slane %v12200_v35, %v14415_v7  ;;  %v12232_v13 = vcombine.low %v12224_v62, %v12231_v61 }
0x17b9   : > { %v12215_v18 = vcombine.low %v12207_v38, %v12214_v53  ;;  %v12239_v0 = vrot.slane %v12232_v13, %v14415_v7 }
0x17bb   : > { %13967 = vmatmul.mubr.msk.f32.gmra.mxu1 %vm1273_vm0, %v12215_v18  ;;  %v18218_v18 = vld [vmem:[%s18392_s8 + $0x1] ss:$0 sm:$0xff] }
0x17bc   : > { %13969 = vmatprep.mubr.msk.f32.mxu1 %vm14289_vm2, %v18865_v31 }
0x17bf   : > { %13970 = vmatmul.mubr.msk.f32.gmra.mxu1 %vm1273_vm0, %v12239_v0  ;;  %v18223_v0 = vld [vmem:[%s18393_s9 + $0x1] ss:$0 sm:$0xff] }
0x17c0   : > { %14011 = vmatprep.mubr.msk.f32.mxu1 %vm14289_vm2, %v18865_v31 }
0x1837   : > { %v12316_v25 = vpop.f32.mrf.mxu1 }
0x1838   : > { %v12317_v44 = vadd.f32 %v13219_v26, %v12316_v25 }
0x1839   : > { %v13959_v5 = vpop.f32.mrf.mxu1 }
0x183a   : > { %v12340_v57 = vadd.f32 %v12317_v44, %v18867_v3 }
0x183c   : > { %v12349_v15 = vsel %vm1273_vm0, %v12340_v57, 0.0 }
0x183d   : > { %12350 = vadd.xlane.f32.xlu1 %v12349_v15 }
0x1872   : > { %v12321_v12 = vpop.f32.mrf.mxu1 }
0x1873   : > { %v12322_v51 = vadd.f32 %v13219_v26, %v12321_v12 }
0x1874   : > { %v13962_v37 = vpop.f32.mrf.mxu1 }
0x1875   : > { %v12341_v49 = vadd.f32 %v12322_v51, %v18868_v9 }
0x1876   : > { %v12326_v46 = vpop.f32.mrf.mxu1 }
0x1877   : > { %v12327_v36 = vadd.f32 %v13219_v26, %v12326_v46  ;;  %v12352_v52 = vsel %vm1273_vm0, %v12341_v49, 0.0 }
0x1878   : > { %12353 = vadd.xlane.f32.xlu0 %v12352_v52  ;;  %v13965_v27 = vpop.f32.mrf.mxu1 }
0x1879   : > { %v12342_v14 = vadd.f32 %v12327_v36, %v18869_v54 }
0x187b   : > { %v12331_v33 = vpop.f32.mrf.mxu1  ;;  %v12355_v48 = vsel %vm1273_vm0, %v12342_v14, 0.0 }
0x187c   : > { %v12332_v24 = vadd.f32 %v13219_v26, %v12331_v33  ;;  %12356 = vadd.xlane.f32.xlu0 %v12355_v48 }
0x187d   : > { %v13968_v2 = vpop.f32.mrf.mxu1 }
0x187e   : > { %v12343_v19 = vadd.f32 %v12332_v24, %v18870_v29 }
0x187f   : > { %v12336_v1 = vpop.f32.mrf.mxu1 }
0x1880   : > { %v12358_v16 = vsel %vm1273_vm0, %v12343_v19, 0.0  ;;  %v12337_v63 = vadd.f32 %v13219_v26, %v12336_v1 }
0x1881   : > { %12359 = vadd.xlane.f32.xlu0 %v12358_v16  ;;  %v13971_v17 = vpop.f32.mrf.mxu1 }
0x1882   : > { %v12344_v21 = vadd.f32 %v12337_v63, %v18871_v45 }
0x1884   : > { %v12361_v58 = vsel %vm1286_vm1, %v12344_v21, 0.0 }
0x18c6   : > { %v12351_v22 = vpop.xlane.xlu1 %12350 }
0x18c7   : > { %v12364_v55 = vmul.f32 0.03125, %v12351_v22 }
0x18c9   : > { %v12369_v30 = vsub.f32 %v12340_v57, %v12364_v55  ;;  %v13251_v55 = vld [vmem:[%s18396_s12 + $0x78] sm:$0xff] }
0x18ca   : > { %13996 = vmatpush3.msra.mxu1 %v13251_v55 }
0x18cb   : > { %v12374_v50 = vmul.f32 %v12369_v30, %v12369_v30  ;;  %13997 = vmatprep.subr.mxu1 %v18865_v31 }
0x18cd   : > { %v12379_v39 = vsel %vm1273_vm0, %v12374_v50, 0.0  ;;  %v13249_v50 = vld [vmem:[%s18396_s12 + $0x68] sm:$0xff] }
0x18ce   : > { %12380 = vadd.xlane.f32.xlu1 %v12379_v39  ;;  %v13248_v39 = vld [vmem:[%s18396_s12 + $0x60] sm:$0xff] }
0x1901   : > { %v12354_v56 = vpop.xlane.xlu0 %12353 }
0x1902   : > { %v12365_v59 = vmul.f32 0.03125, %v12354_v56 }
0x1904   : > { %v12370_v8 = vsub.f32 %v12341_v49, %v12365_v59 }
0x1905   : > { %v12357_v47 = vpop.xlane.xlu0 %12356 }
0x1906   : > { %v12366_v43 = vmul.f32 0.03125, %v12357_v47  ;;  %v12375_v28 = vmul.f32 %v12370_v8, %v12370_v8  ;;  %v18292_v47 = vld [vmem:[%s18395_s11 + $0x1] ss:$0 sm:$0xff] }
0x1908   : > { %v12371_v11 = vsub.f32 %v12342_v14, %v12366_v43  ;;  %v12382_v42 = vsel %vm1273_vm0, %v12375_v28, 0.0 }
0x1909   : > { %12383 = vadd.xlane.f32.xlu0 %v12382_v42 }
0x190a   : > { %v12360_v6 = vpop.xlane.xlu0 %12359  ;;  %v12376_v34 = vmul.f32 %v12371_v11, %v12371_v11 }
0x190b   : > { %v12367_v23 = vmul.f32 0.03125, %v12360_v6 }
0x190c   : > { %v12385_v4 = vsel %vm1273_vm0, %v12376_v34, 0.0 }
0x190d   : > { %v12372_v10 = vsub.f32 %v12343_v19, %v12367_v23  ;;  %12386 = vadd.xlane.f32.xlu1 %v12385_v4 }
0x190f   : > { %v12377_v60 = vmul.f32 %v12372_v10, %v12372_v10 }
0x1911   : > { %12362 = vadd.xlane.f32.xlu1 %v12361_v58  ;;  %v12388_v61 = vsel %vm1273_vm0, %v12377_v60, 0.0 }
0x1912   : > { %12389 = vadd.xlane.f32.xlu0 %v12388_v61 }
0x1957   : > { %v12381_v35 = vpop.xlane.xlu1 %12380 }
0x1958   : > { %v12394_v38 = vmul.f32 0.03125, %v12381_v35 }
0x195a   : > { %v12399_v53 = vadd.f32 1e-12, %v12394_v38 }
0x195c   : > { %14237 = vrsqrt.f32 %v12399_v53 }
0x1969   : > { %v14238_v62 = vpop.eup %14237 }
0x196a   : > { %v12409_v13 = vmul.f32 %v14238_v62, %v12369_v30  ;;  %v13250_v30 = vld [vmem:[%s18396_s12 + $0x70] sm:$0xff] }
0x196b   : > { %13998 = vmatpush3.msra.mxu1 %v13250_v30 }
0x196c   : > { %v12420_v26 = vmul.f32 %v18218_v18, %v12409_v13  ;;  %13999 = vmatprep.subr.mxu1 %v18865_v31 }
0x196d   : > { %14000 = vmatpush3.msra.mxu1 %v13249_v50 }
0x196e   : > { %v18227_v25 = vadd.f32 %v18223_v0, %v12420_v26  ;;  %14001 = vmatprep.subr.mxu1 %v18865_v31 }
0x196f   : > { %14002 = vmatpush3.msra.mxu1 %v13248_v39 }
0x1970   : > { %13981 = vmatmul.mubr.msk.f32.vlgmr.msra.gmra.mxu0 %vm1273_vm0, %v18227_v25  ;;  %14003 = vmatprep.subr.mxu1 %v18865_v31 }
0x1971   : > { %13983 = vmatprep.mubr.msk.f32.mxu0 %vm14289_vm2, %v18865_v31  ;;  %14004 = vmatpush3.msra.mxu1 %v13247_v41 }
0x1972   : > { %14005 = vmatprep.subr.mxu1 %v18865_v31 }
0x1973   : > { %14006 = vmatpush3.msra.mxu1 %v13246_v20 }
0x1974   : > { %14007 = vmatprep.subr.mxu1 %v18865_v31 }
0x1975   : > { %14008 = vmatpush3.msra.mxu1 %v13245_v32 }
0x1976   : > { %14009 = vmatprep.subr.mxu1 %v18865_v31 }
0x1977   : > { %14010 = vmatpush3.msra.mxu1 %v13244_v40 }
0x1992   : > { %v12384_v44 = vpop.xlane.xlu0 %12383 }
0x1993   : > { %v12395_v5 = vmul.f32 0.03125, %v12384_v44 }
0x1995   : > { %v12400_v3 = vadd.f32 1e-12, %v12395_v5 }
0x1996   : > { %v12387_v57 = vpop.xlane.xlu1 %12386 }
0x1997   : > { %14239 = vrsqrt.f32 %v12400_v3  ;;  %v12396_v15 = vmul.f32 0.03125, %v12387_v57 }
0x1999   : > { %v12401_v12 = vadd.f32 1e-12, %v12396_v15 }
0x199a   : > { %v12363_v51 = vpop.xlane.xlu1 %12362 }
0x199b   : > { %14241 = vrsqrt.f32 %v12401_v12  ;;  %v12368_v37 = vmul.f32 0.03125, %v12363_v51  ;;  %v12390_v9 = vpop.xlane.xlu0 %12389 }
0x199c   : > { %v12397_v49 = vmul.f32 0.03125, %v12390_v9 }
0x199d   : > { %v12373_v46 = vsub.f32 %v12344_v21, %v12368_v37 }
0x199e   : > { %v12402_v36 = vadd.f32 1e-12, %v12397_v49 }
0x199f   : > { %v12378_v52 = vmul.f32 %v12373_v46, %v12373_v46 }
0x19a0   : > { %14243 = vrsqrt.f32 %v12402_v36 }
0x19a1   : > { %v12391_v27 = vsel %vm1286_vm1, %v12378_v52, 0.0 }
0x19a2   : > { %12392 = vadd.xlane.f32.xlu0 %v12391_v27 }
0x19a4   : > { %v14240_v54 = vpop.eup %14239 }
0x19a5   : > { %v12410_v14 = vmul.f32 %v14240_v54, %v12370_v8 }
0x19a7   : > { %v12421_v33 = vmul.f32 %v18218_v18, %v12410_v14 }
0x19a8   : > { %v14242_v48 = vpop.eup %14241 }
0x19a9   : > { %v18236_v24 = vadd.f32 %v18223_v0, %v12421_v33  ;;  %v12411_v2 = vmul.f32 %v14242_v48, %v12371_v11 }
0x19ab   : > { %13984 = vmatmul.mubr.msk.f32.gmra.mxu0 %vm1273_vm0, %v18236_v24  ;;  %v12422_v29 = vmul.f32 %v18218_v18, %v12411_v2 }
0x19ac   : > { %13986 = vmatprep.mubr.msk.f32.mxu0 %vm14289_vm2, %v18865_v31 }
0x19ad   : > { %v14244_v19 = vpop.eup %14243  ;;  %v18244_v1 = vadd.f32 %v18223_v0, %v12422_v29 }
0x19ae   : > { %v12412_v16 = vmul.f32 %v14244_v19, %v12372_v10 }
0x19af   : > { %13987 = vmatmul.mubr.msk.f32.gmra.mxu0 %vm1273_vm0, %v18244_v1 }
0x19b0   : > { %13989 = vmatprep.mubr.msk.f32.mxu0 %vm14289_vm2, %v18865_v31  ;;  %v12423_v17 = vmul.f32 %v18218_v18, %v12412_v16 }
0x19b2   : > { %v18252_v22 = vadd.f32 %v18223_v0, %v12423_v17 }
0x19b4   : > { %13990 = vmatmul.mubr.msk.f32.gmra.mxu0 %vm1273_vm0, %v18252_v22 }
0x19b5   : > { %13992 = vmatprep.mubr.msk.f32.mxu0 %vm14289_vm2, %v18865_v31 }
0x1a2b   : > { %v12393_v56 = vpop.xlane.xlu0 %12392 }
0x1a2c   : > { %v12398_v59 = vmul.f32 0.03125, %v12393_v56 }
0x1a2e   : > { %v12403_v8 = vadd.f32 1e-12, %v12398_v59 }
0x1a30   : > { %14245 = vrsqrt.f32 %v12403_v8  ;;  %v12530_v43 = vpop.f32.mrf.mxu0 }
0x1a31   : > { %v12531_v28 = vadd.f32 %v18292_v47, %v12530_v43 }
0x1a32   : > { %v13982_v63 = vpop.f32.mrf.mxu0 }
0x1a33   : > { %v12559_v11 = vmul.f32 0.70710677, %v12531_v28  ;;  %v12554_v37 = vmul.f32 0.5, %v12531_v28 }
0x1a35   : > { %v12574_v42 = vand.u32 2147483647, %v12559_v11  ;;  %vm12564_vm13 = vcmp.ge.f32.partialorder %v12559_v11, 0.0 }
0x1a37   : > { %v12579_v6 = vmul.f32 0.3275911, %v12574_v42  ;;  %v12644_v4 = vsub.f32 0.0, %v12574_v42 }
0x1a39   : > { %v12584_v34 = vadd.f32 1.0, %v12579_v6  ;;  %v12649_v60 = vmul.f32 %v12644_v4, %v12574_v42 }
0x1a3b   : > { %14247 = vrcp.f32 %v12584_v34  ;;  %v12654_v35 = vmul.f32 1.442695, %v12649_v60 }
0x1a3d   : > { %v14246_v23 = vpop.eup %14245  ;;  %14249 = vpow2.f32 %v12654_v35 }
0x1a3e   : > { %v12413_v45 = vmul.f32 %v14246_v23, %v12373_v46 }
0x1a40   : > { %v12424_v21 = vmul.f32 %v18218_v18, %v12413_v45 }
0x1a42   : > { %v12435_v10 = vadd.f32 %v18223_v0, %v12424_v21  ;;  %v18872_v0 = vmov -1.0  }
0x1a43   : > { %v12569_v12 = vsel %vm12564_vm13, 1.0, %v18872_v0 }
0x1a44   : > { %13993 = vmatmul.mubr.msk.f32.gmra.mxu0 %vm1273_vm0, %v12435_v10 }
0x1a48   : > { %v14248_v58 = vpop.eup %14247 }
0x1a49   : > { %v12599_v61 = vmul.f32 1.0614054, %v14248_v58 }
0x1a4a   : > { %v14250_v57 = vpop.eup %14249 }
0x1a4b   : > { %v12604_v38 = vadd.f32 -1.4531521, %v12599_v61 }
0x1a4d   : > { %v12609_v53 = vmul.f32 %v14248_v58, %v12604_v38 }
0x1a4f   : > { %v12614_v62 = vadd.f32 1.4214138, %v12609_v53 }
0x1a51   : > { %v12619_v13 = vmul.f32 %v14248_v58, %v12614_v62 }
0x1a53   : > { %v12624_v26 = vadd.f32 -0.28449672, %v12619_v13 }
0x1a55   : > { %v12629_v44 = vmul.f32 %v14248_v58, %v12624_v26 }
0x1a57   : > { %v12634_v5 = vadd.f32 0.2548296, %v12629_v44 }
0x1a59   : > { %v12639_v3 = vmul.f32 %v14248_v58, %v12634_v5 }
0x1a5b   : > { %v12664_v18 = vmul.f32 %v14250_v57, %v12639_v3 }
0x1a5d   : > { %v12669_v15 = vsub.f32 1.0, %v12664_v18 }
0x1a5f   : > { %v12674_v51 = vmul.f32 %v12669_v15, %v12569_v12 }
0x1a61   : > { %v12679_v9 = vadd.f32 1.0, %v12674_v51 }
0x1a63   : > { %v12684_v49 = vmul.f32 %v12679_v9, %v12554_v37 }
0x1a65   : > { %14012 = vmatmul.mubr.msk.f32.vlgmr.msra.gmra.mxu1 %vm7600_vm9, %v12684_v49 }
0x1a66   : > { %14014 = vmatprep.mubr.msk.f32.mxu1 %vm14289_vm2, %v18865_v31 }
0x1a6b   : > { %v12535_v46 = vpop.f32.mrf.mxu0 }
0x1a6c   : > { %v18303_v36 = vadd.f32 %v18292_v47, %v12535_v46 }
0x1a6d   : > { %v13985_v52 = vpop.f32.mrf.mxu0 }
0x1a6e   : > { %v18306_v27 = vmul.f32 0.70710677, %v18303_v36 }
0x1a6f   : > { %v12540_v54 = vpop.f32.mrf.mxu0 }
0x1a70   : > { %v12575_v14 = vand.u32 2147483647, %v18306_v27  ;;  %v18310_v33 = vadd.f32 %v18292_v47, %v12540_v54  ;;  %vm12565_vm14 = vcmp.ge.f32.partialorder %v18306_v27, 0.0 }
0x1a71   : > { %v13988_v48 = vpop.f32.mrf.mxu0 }
0x1a72   : > { %v12580_v2 = vmul.f32 0.3275911, %v12575_v14  ;;  %v18313_v29 = vmul.f32 0.70710677, %v18310_v33  ;;  %v12645_v40 = vsub.f32 0.0, %v12575_v14 }
0x1a74   : > { %v12585_v19 = vadd.f32 1.0, %v12580_v2  ;;  %v12576_v16 = vand.u32 2147483647, %v18313_v29  ;;  %v12545_v17 = vpop.f32.mrf.mxu0  ;;  %v12650_v59 = vmul.f32 %v12645_v40, %v12575_v14  ;;  %v12570_v2 = vsel %vm12565_vm14, 1.0, %v18872_v0 }
0x1a75   : > { %v18317_v55 = vadd.f32 %v18292_v47, %v12545_v17  ;;  %vm12566_vm15 = vcmp.ge.f32.partialorder %v18313_v29, 0.0 }
0x1a76   : > { %14251 = vrcp.f32 %v12585_v19  ;;  %v12581_v30 = vmul.f32 0.3275911, %v12576_v16  ;;  %v13991_v50 = vpop.f32.mrf.mxu0  ;;  %v12646_v8 = vsub.f32 0.0, %v12576_v16  ;;  %v12656_v63 = vmul.f32 1.442695, %v12650_v59 }
0x1a77   : > { %v18320_v39 = vmul.f32 0.70710677, %v18317_v55  ;;  %v12555_v50 = vmul.f32 0.5, %v18303_v36  ;;  %v12571_v27 = vsel %vm12566_vm15, 1.0, %v18872_v0 }
0x1a78   : > { %v12586_v41 = vadd.f32 1.0, %v12581_v30  ;;  %v12651_v11 = vmul.f32 %v12646_v8, %v12576_v16 }
0x1a79   : > { %v12577_v20 = vand.u32 2147483647, %v18320_v39  ;;  %vm12567_vm1 = vcmp.ge.f32.partialorder %v18320_v39, 0.0 }
0x1a7a   : > { %14253 = vrcp.f32 %v12586_v41  ;;  %v12658_v21 = vmul.f32 1.442695, %v12651_v11 }
0x1a7b   : > { %v12582_v32 = vmul.f32 0.3275911, %v12577_v20  ;;  %v12647_v42 = vsub.f32 0.0, %v12577_v20 }
0x1a7d   : > { %v12587_v56 = vadd.f32 1.0, %v12582_v32  ;;  %v12652_v4 = vmul.f32 %v12647_v42, %v12577_v20  ;;  %v12557_v42 = vmul.f32 0.5, %v18317_v55 }
0x1a7f   : > { %14255 = vrcp.f32 %v12587_v56  ;;  %v12660_v53 = vmul.f32 1.442695, %v12652_v4 }
0x1a80   : > { %14257 = vpow2.f32 %v12656_v63  ;;  %v12572_v63 = vsel %vm12567_vm1, 1.0, %v18872_v0 }
0x1a81   : > { %14259 = vpow2.f32 %v12658_v21 }
0x1a82   : > { %14261 = vpow2.f32 %v12660_v53 }
0x1a83   : > { %v14252_v43 = vpop.eup %14251 }
0x1a84   : > { %v12600_v28 = vmul.f32 1.0614054, %v14252_v43 }
0x1a86   : > { %v12605_v6 = vadd.f32 -1.4531521, %v12600_v28 }
0x1a87   : > { %v14254_v34 = vpop.eup %14253 }
0x1a88   : > { %v12610_v23 = vmul.f32 %v14252_v43, %v12605_v6  ;;  %v12601_v45 = vmul.f32 1.0614054, %v14254_v34 }
0x1a8a   : > { %v12615_v10 = vadd.f32 1.4214138, %v12610_v23  ;;  %v12606_v60 = vadd.f32 -1.4531521, %v12601_v45 }
0x1a8c   : > { %v14256_v58 = vpop.eup %14255  ;;  %v12620_v61 = vmul.f32 %v14252_v43, %v12615_v10  ;;  %v12611_v35 = vmul.f32 %v14254_v34, %v12606_v60 }
0x1a8d   : > { %v12602_v38 = vmul.f32 1.0614054, %v14256_v58  ;;  %v14258_v37 = vpop.eup %14257 }
0x1a8e   : > { %v12625_v62 = vadd.f32 -0.28449672, %v12620_v61  ;;  %v12616_v13 = vadd.f32 1.4214138, %v12611_v35  ;;  %v14260_v48 = vpop.eup %14259 }
0x1a8f   : > { %v12607_v26 = vadd.f32 -1.4531521, %v12602_v38  ;;  %v14262_v40 = vpop.eup %14261 }
0x1a90   : > { %v12630_v44 = vmul.f32 %v14252_v43, %v12625_v62  ;;  %v12621_v5 = vmul.f32 %v14254_v34, %v12616_v13 }
0x1a91   : > { %v12612_v3 = vmul.f32 %v14256_v58, %v12607_v26 }
0x1a92   : > { %v12635_v57 = vadd.f32 0.2548296, %v12630_v44  ;;  %v12626_v18 = vadd.f32 -0.28449672, %v12621_v5 }
0x1a93   : > { %v12617_v15 = vadd.f32 1.4214138, %v12612_v3 }
0x1a94   : > { %v12640_v12 = vmul.f32 %v14252_v43, %v12635_v57  ;;  %v12631_v51 = vmul.f32 %v14254_v34, %v12626_v18  ;;  %v12556_v43 = vmul.f32 0.5, %v18310_v33 }
0x1a95   : > { %v12622_v9 = vmul.f32 %v14256_v58, %v12617_v15 }
0x1a96   : > { %v12665_v49 = vmul.f32 %v14258_v37, %v12640_v12  ;;  %v12636_v46 = vadd.f32 0.2548296, %v12631_v51 }
0x1a97   : > { %v12627_v52 = vadd.f32 -0.28449672, %v12622_v9 }
0x1a98   : > { %v12670_v54 = vsub.f32 1.0, %v12665_v49  ;;  %v12641_v14 = vmul.f32 %v14254_v34, %v12636_v46  ;;  %v13253_v46 = vld [vmem:[%s18397_s13 + $0x1] ss:$0 sm:$0xff] }
0x1a99   : > { %v12632_v19 = vmul.f32 %v14256_v58, %v12627_v52 }
0x1a9a   : > { %v12675_v16 = vmul.f32 %v12670_v54, %v12570_v2  ;;  %v12666_v17 = vmul.f32 %v14260_v48, %v12641_v14 }
0x1a9b   : > { %v12637_v30 = vadd.f32 0.2548296, %v12632_v19 }
0x1a9c   : > { %v12680_v41 = vadd.f32 1.0, %v12675_v16  ;;  %v12671_v20 = vsub.f32 1.0, %v12666_v17 }
0x1a9d   : > { %v12642_v32 = vmul.f32 %v14256_v58, %v12637_v30 }
0x1a9e   : > { %v12685_v56 = vmul.f32 %v12680_v41, %v12555_v50  ;;  %v12676_v59 = vmul.f32 %v12671_v20, %v12571_v27 }
0x1a9f   : > { %v12667_v8 = vmul.f32 %v14262_v40, %v12642_v32 }
0x1aa0   : > { %v12681_v28 = vadd.f32 1.0, %v12676_v59  ;;  %14015 = vmatmul.mubr.msk.f32.gmra.mxu1 %vm7600_vm9, %v12685_v56 }
0x1aa1   : > { %v12672_v29 = vsub.f32 1.0, %v12667_v8  ;;  %14017 = vmatprep.mubr.msk.f32.mxu1 %vm14289_vm2, %v18865_v31 }
0x1aa2   : > { %v12686_v36 = vmul.f32 %v12681_v28, %v12556_v43 }
0x1aa3   : > { %v12677_v11 = vmul.f32 %v12672_v29, %v12572_v63 }
0x1aa4   : > { %14018 = vmatmul.mubr.msk.f32.gmra.mxu1 %vm7600_vm9, %v12686_v36 }
0x1aa5   : > { %v12682_v6 = vadd.f32 1.0, %v12677_v11  ;;  %14020 = vmatprep.mubr.msk.f32.mxu1 %vm14289_vm2, %v18865_v31 }
0x1aa7   : > { %v12687_v33 = vmul.f32 %v12682_v6, %v12557_v42 }
0x1aa9   : > { %14021 = vmatmul.mubr.msk.f32.gmra.mxu1 %vm7600_vm9, %v12687_v33 }
0x1aaa   : > { %14023 = vmatprep.mubr.msk.f32.mxu1 %vm14289_vm2, %v18865_v31 }
0x1b04   : > { %v12550_v39 = vpop.f32.mrf.mxu0 }
0x1b05   : > { %v12551_v34 = vadd.f32 %v18292_v47, %v12550_v39 }
0x1b06   : > { %v13994_v23 = vpop.f32.mrf.mxu0 }
0x1b07   : > { %v12563_v45 = vmul.f32 0.70710677, %v12551_v34  ;;  %v12558_v37 = vmul.f32 0.5, %v12551_v34 }
0x1b09   : > { %v12578_v21 = vand.u32 2147483647, %v12563_v45  ;;  %vm12568_vm2 = vcmp.ge.f32.partialorder %v12563_v45, 0.0 }
0x1b0a   : > { %v12573_v12 = vsel %vm12568_vm2, 1.0, %v18872_v0 }
0x1b0b   : > { %v12583_v4 = vmul.f32 0.3275911, %v12578_v21  ;;  %v12648_v55 = vsub.f32 0.0, %v12578_v21 }
0x1b0d   : > { %v12588_v10 = vadd.f32 1.0, %v12583_v4  ;;  %v12653_v60 = vmul.f32 %v12648_v55, %v12578_v21 }
0x1b0f   : > { %14263 = vrcp.f32 %v12588_v10  ;;  %v12662_v35 = vmul.f32 1.442695, %v12653_v60 }
0x1b11   : > { %14265 = vpow2.f32 %v12662_v35 }
0x1b1c   : > { %v14264_v58 = vpop.eup %14263 }
0x1b1d   : > { %v12603_v61 = vmul.f32 1.0614054, %v14264_v58 }
0x1b1e   : > { %v14266_v57 = vpop.eup %14265 }
0x1b1f   : > { %v12608_v38 = vadd.f32 -1.4531521, %v12603_v61 }
0x1b21   : > { %v12613_v53 = vmul.f32 %v14264_v58, %v12608_v38 }
0x1b23   : > { %v12618_v62 = vadd.f32 1.4214138, %v12613_v53 }
0x1b25   : > { %v12623_v13 = vmul.f32 %v14264_v58, %v12618_v62  ;;  %v12787_v31 = vpop.f32.mrf.mxu1 }
0x1b26   : > { %v12788_v54 = vadd.f32 %v13253_v46, %v12787_v31 }
0x1b27   : > { %v12628_v26 = vadd.f32 -0.28449672, %v12623_v13  ;;  %v14013_v44 = vpop.f32.mrf.mxu1 }
0x1b28   : > { %v12810_v16 = vadd.f32 %v12788_v54, %v18227_v25 }
0x1b29   : > { %v12633_v47 = vmul.f32 %v14264_v58, %v12628_v26 }
0x1b2a   : > { %v12818_v50 = vsel %vm1273_vm0, %v12810_v16, 0.0 }
0x1b2b   : > { %v12638_v5 = vadd.f32 0.2548296, %v12633_v47 }
0x1b2d   : > { %v12643_v3 = vmul.f32 %v14264_v58, %v12638_v5 }
0x1b2f   : > { %v12668_v18 = vmul.f32 %v14266_v57, %v12643_v3  ;;  %v13261_v3 = vld [vmem:[%s18398_s14 + $0x1] ss:$0 sm:$0xff] }
0x1b31   : > { %v12673_v15 = vsub.f32 1.0, %v12668_v18  ;;  %v13262_v18 = vld [vmem:[%s18399_s15 + $0x1] ss:$0 sm:$0xff] }
0x1b33   : > { %v12678_v51 = vmul.f32 %v12673_v15, %v12573_v12 }
0x1b35   : > { %v12683_v9 = vadd.f32 1.0, %v12678_v51 }
0x1b37   : > { %v12688_v49 = vmul.f32 %v12683_v9, %v12558_v37 }
0x1b39   : > { %14024 = vmatmul.mubr.msk.f32.gmra.mxu1 %vm7600_vm9, %v12688_v49 }
0x1b60   : > { %v12792_v52 = vpop.f32.mrf.mxu1 }
0x1b61   : > { %v12793_v14 = vadd.f32 %v13253_v46, %v12792_v52 }
0x1b62   : > { %v14016_v48 = vpop.f32.mrf.mxu1 }
0x1b63   : > { %v12811_v2 = vadd.f32 %v12793_v14, %v18236_v24 }
0x1b64   : > { %v12797_v19 = vpop.f32.mrf.mxu1 }
0x1b65   : > { %v12821_v0 = vsel %vm1273_vm0, %v12811_v2, 0.0  ;;  %v12798_v41 = vadd.f32 %v13253_v46, %v12797_v19 }
0x1b66   : > { %12822 = vadd.xlane.f32.xlu1 %v12821_v0  ;;  %v14019_v17 = vpop.f32.mrf.mxu1 }
0x1b67   : > { %v12812_v40 = vadd.f32 %v12798_v41, %v18244_v1 }
0x1b69   : > { %v12802_v30 = vpop.f32.mrf.mxu1  ;;  %v12824_v25 = vsel %vm1273_vm0, %v12812_v40, 0.0 }
0x1b6a   : > { %v12803_v20 = vadd.f32 %v13253_v46, %v12802_v30  ;;  %12819 = vadd.xlane.f32.xlu1 %v12818_v50 }
0x1b6b   : > { %v14022_v27 = vpop.f32.mrf.mxu1 }
0x1b6c   : > { %v12813_v32 = vadd.f32 %v12803_v20, %v18252_v22 }
0x1b6e   : > { %v12827_v24 = vsel %vm1273_vm0, %v12813_v32, 0.0 }
0x1b6f   : > { %12828 = vadd.xlane.f32.xlu0 %v12827_v24 }
0x1b73   : > { %12825 = vadd.xlane.f32.xlu0 %v12824_v25 }
0x1bef   : > { %v12823_v56 = vpop.xlane.xlu1 %12822 }
0x1bf0   : > { %v12831_v59 = vmul.f32 0.03125, %v12823_v56 }
0x1bf2   : > { %v12835_v8 = vsub.f32 %v12811_v2, %v12831_v59 }
0x1bf3   : > { %v12820_v43 = vpop.xlane.xlu1 %12819 }
0x1bf4   : > { %v12830_v28 = vmul.f32 0.03125, %v12820_v43  ;;  %v12839_v29 = vmul.f32 %v12835_v8, %v12835_v8 }
0x1bf6   : > { %v12834_v36 = vsub.f32 %v12810_v16, %v12830_v28  ;;  %v12845_v63 = vsel %vm1273_vm0, %v12839_v29, 0.0 }
0x1bf7   : > { %12846 = vadd.xlane.f32.xlu1 %v12845_v63 }
0x1bf8   : > { %v12829_v11 = vpop.xlane.xlu0 %12828  ;;  %v12838_v22 = vmul.f32 %v12834_v36, %v12834_v36 }
0x1bf9   : > { %v12833_v42 = vmul.f32 0.03125, %v12829_v11  ;;  %v12807_v1 = vpop.f32.mrf.mxu1 }
0x1bfa   : > { %v12842_v6 = vsel %vm1273_vm0, %v12838_v22, 0.0 }
0x1bfb   : > { %v12837_v33 = vsub.f32 %v12813_v32, %v12833_v42  ;;  %12843 = vadd.xlane.f32.xlu1 %v12842_v6  ;;  %v14025_v39 = vpop.f32.mrf.mxu1 }
0x1bfc   : > { %v12826_v34 = vpop.xlane.xlu0 %12825 }
0x1bfd   : > { %v12832_v23 = vmul.f32 0.03125, %v12826_v34  ;;  %v12841_v45 = vmul.f32 %v12837_v33, %v12837_v33 }
0x1bff   : > { %v12836_v21 = vsub.f32 %v12812_v40, %v12832_v23  ;;  %v12851_v4 = vsel %vm1273_vm0, %v12841_v45, 0.0 }
0x1c00   : > { %12852 = vadd.xlane.f32.xlu0 %v12851_v4 }
0x1c01   : > { %v12840_v10 = vmul.f32 %v12836_v21, %v12836_v21 }
0x1c03   : > { %v12848_v55 = vsel %vm1273_vm0, %v12840_v10, 0.0  ;;  %vm12958_vm0 = vcmask 253952  }
0x1c04   : > { %12849 = vadd.xlane.f32.xlu0 %v12848_v55 }
0x1c80   : > { %v12847_v60 = vpop.xlane.xlu1 %12846 }
0x1c81   : > { %v12855_v58 = vmul.f32 0.03125, %v12847_v60 }
0x1c83   : > { %v12859_v61 = vadd.f32 1e-12, %v12855_v58 }
0x1c84   : > { %v12844_v35 = vpop.xlane.xlu1 %12843 }
0x1c85   : > { %14267 = vrsqrt.f32 %v12859_v61  ;;  %v12854_v38 = vmul.f32 0.03125, %v12844_v35 }
0x1c87   : > { %v12858_v53 = vadd.f32 1e-12, %v12854_v38 }
0x1c89   : > { %14269 = vrsqrt.f32 %v12858_v53  ;;  %v12853_v62 = vpop.xlane.xlu0 %12852 }
0x1c8a   : > { %v12857_v13 = vmul.f32 0.03125, %v12853_v62 }
0x1c8c   : > { %v12861_v31 = vadd.f32 1e-12, %v12857_v13 }
0x1c8d   : > { %v12850_v26 = vpop.xlane.xlu0 %12849 }
0x1c8e   : > { %14271 = vrsqrt.f32 %v12861_v31  ;;  %v12856_v44 = vmul.f32 0.03125, %v12850_v26 }
0x1c90   : > { %v12860_v47 = vadd.f32 1e-12, %v12856_v44 }
0x1c92   : > { %v14268_v5 = vpop.eup %14267  ;;  %14273 = vrsqrt.f32 %v12860_v47 }
0x1c93   : > { %v12867_v57 = vmul.f32 %v14268_v5, %v12835_v8 }
0x1c95   : > { %v12877_v15 = vmul.f32 %v13261_v3, %v12867_v57 }
0x1c96   : > { %v14270_v12 = vpop.eup %14269 }
0x1c97   : > { %v12887_v51 = vadd.f32 %v13262_v18, %v12877_v15  ;;  %v12866_v37 = vmul.f32 %v14270_v12, %v12834_v36 }
0x1c99   : > { %v12914_v9 = vrot.slane %v12887_v51, %v14415_v7  ;;  %v12876_v49 = vmul.f32 %v13261_v3, %v12866_v37 }
0x1c9b   : > { %v14272_v46 = vpop.eup %14271  ;;  %v12886_v52 = vadd.f32 %v13262_v18, %v12876_v49  ;;  %v12915_v54 = vcombine.high %v12914_v9, %v12914_v9 }
0x1c9c   : > { %v12869_v14 = vmul.f32 %v14272_v46, %v12837_v33 }
0x1c9d   : > { %v12900_v48 = vrot.slane %v12886_v52, %v14415_v7  ;;  %v12922_v0 = vrot.slane %v12915_v54, %v14415_v7 }
0x1c9e   : > { %v12879_v2 = vmul.f32 %v13261_v3, %v12869_v14 }
0x1c9f   : > { %v14274_v19 = vpop.eup %14273  ;;  %v12907_v16 = vrot.slane %v12900_v48, %v14415_v7  ;;  %12960 = vst.msk [vmem:[%s605_s28 + $0x1] sm:$0x1] %vm12958_vm0, %v12922_v0 }
0x1ca0   : > { %v12889_v17 = vadd.f32 %v13262_v18, %v12879_v2  ;;  %v12868_v30 = vmul.f32 %v14274_v19, %v12836_v21 }
0x1ca1   : > { %12959 = vst.msk [vmem:[%s605_s28] sm:$0x1] %vm12958_vm0, %v12907_v16 }
0x1ca2   : > { %v12944_v50 = vrot.slane %v12889_v17, %v14415_v7  ;;  %v12878_v41 = vmul.f32 %v13261_v3, %v12868_v30 }
0x1ca4   : > { %v12945_v20 = vcombine.high %v12944_v50, %v12944_v50  ;;  %v12888_v27 = vadd.f32 %v13262_v18, %v12878_v41 }
0x1ca6   : > { %v12929_v32 = vrot.slane %v12888_v27, %v14415_v7  ;;  %v12952_v40 = vrot.slane %v12945_v20, %v14415_v7 }
0x1ca8   : > { %v12936_v24 = vrot.slane %v12929_v32, %v14415_v7  ;;  %v12953_v56 = vcombine.high %v12952_v40, %v12952_v40 }
0x1caa   : > { %v12937_v25 = vcombine.high %v12936_v24, %v12936_v24  ;;  %12962 = vst.msk [vmem:[%s605_s28 + $0x3] sm:$0x1] %vm12958_vm0, %v12953_v56 }
0x1cac   : > { %12961 = vst.msk [vmem:[%s605_s28 + $0x2] sm:$0x1] %vm12958_vm0, %v12937_v25 }
0x1cad PF: > { %s29_s0 = sadd.s32 1, %s14285_s0  }
0x1cae   : > { %p26_p4 = scmp.ge.s32.totalorder %s29_s0, 4  }
0x1cb0   :  { %28 = sbr.rel (!%p26_p4) target bundleno = 5 (0x5), region = 138 }

</bundles_post_ra>
